<compile_context>
chip_gen: v6e
topology: v6e:2x2x1
jax: 0.10.0
libtpu: 0.0.40
codegen_flags: <defaults>
</compile_context>

<pallas_src>
import jax
import jax.numpy as jnp
import numpy as np
from jax.experimental import pallas as pl
from jax.experimental.pallas import tpu as pltpu

_EPS = 1e-5
_C = 128  # lane-padded channel width


# ----------------------------------------------------------------------------
# Fused Pallas kernel: entire MnistCNN forward for one batch-tile of nb images.
# ----------------------------------------------------------------------------
def _mnist_fused_kernel(x_ref, w1_ref, w2_ref, w3_ref, w4_ref,
                        wf1_ref, wf2_ref, wf3_ref, b_ref,
                        sp1_ref, sc2_ref, sp2_ref, sc4_ref, o_ref):
    f32 = jnp.float32
    bf16 = jnp.bfloat16
    n = o_ref.shape[0]                                # images in this batch-tile
    B = b_ref[...]                                    # (8, 128) packed f32 biases

    def sel(s_ref, a):
        # Row selection / compaction as a tiny 0/1 matmul (keeps everything 2-D,
        # avoids strided sublane loads).  Both operands bf16 -> single MXU pass;
        # exact because the selector is 0/1 and `a` is re-cast to bf16 for the
        # following matmul anyway.
        return jnp.dot(s_ref[...], a.astype(bf16), preferred_element_type=f32)

    def conv(a, w_ref, bias, shifts):
        # Shifted-matmul conv: sum_t a[shift_t : shift_t + r, :] @ w[t]
        # bf16 MXU operands, f32 accumulation, f32 bias+ReLU epilogue.
        r = a.shape[0] - shifts[-1]
        acc = jnp.zeros((r, _C), f32)
        for t, s in enumerate(shifts):
            acc = acc + jnp.dot(a[s:s + r, :].astype(bf16), w_ref[t],
                                preferred_element_type=f32)
        return jnp.maximum(acc + bias, 0.0)

    def pool_max(a, w_flat):
        # 2x2 max pool, part 1: elementwise max of the 4 window taps
        # (taken as shifted row-slices of the flattened spatial layout).
        r = a.shape[0] - (w_flat + 1)
        return jnp.maximum(
            jnp.maximum(a[0:r, :], a[1:1 + r, :]),
            jnp.maximum(a[w_flat:w_flat + r, :], a[w_flat + 1:w_flat + 1 + r, :]))

    # ---- conv1 (1->96, 3x3) + ReLU : Cin=1 -> 9 VPU broadcast-FMAs (no MXU) ----
    x = x_ref[...]                                    # (n*196, 1) f32
    w1 = w1_ref[...]                                  # (9, 128)  f32
    r1 = n * 196 - (2 * 14 + 2)                       # valid shifted-row count
    z = x[0:r1, :] * w1[0:1, :]
    for t in range(1, 9):
        dy, dx = divmod(t, 3)
        s = dy * 14 + dx
        z = z + x[s:s + r1, :] * w1[t:t + 1, :]
    a = jnp.maximum(z + B[0:1, :], 0.0)

    # ---- maxpool 2x2 + compact (BN1 folded into conv2 weights) ----
    a = sel(sp1_ref, pool_max(a, 14))                 # (n*36, 128) : 6x6 x 96ch

    # ---- conv2 (96->48, 2x2) + ReLU (BN2 folded into conv3) ----
    a = conv(a, w2_ref, B[1:2, :], (0, 1, 6, 7))
    a = sel(sc2_ref, a)                               # (n*25, 128) : 5x5 x 48ch

    # ---- conv3 (48->32, 2x2) + ReLU ----
    a = conv(a, w3_ref, B[2:3, :], (0, 1, 5, 6))
    # ---- maxpool 2x2 + compact (BN3 folded into conv4) ----
    a = sel(sp2_ref, pool_max(a, 5))                  # (n*4, 128) : 2x2 x 32ch

    # ---- conv4 (32->64, 2x2) + ReLU (BN4 folded into fc1) ----
    a = conv(a, w4_ref, B[3:4, :], (0, 1, 2, 3))
    a = sel(sc4_ref, a)                               # (n, 128) : flatten -> 64ch

    # ---- fc1+ReLU (BN5 folded into fc2), fc2+ReLU (BN6 folded into fc3), fc3 ----
    a = jnp.maximum(jnp.dot(a.astype(bf16), wf1_ref[...],
                            preferred_element_type=f32) + B[4:5, :], 0.0)
    a = jnp.maximum(jnp.dot(a.astype(bf16), wf2_ref[...],
                            preferred_element_type=f32) + B[5:6, :], 0.0)
    o_ref[...] = jnp.dot(a.astype(bf16), wf3_ref[...],
                         preferred_element_type=f32) + B[6:7, :]


# ----------------------------------------------------------------------------
# One-time parameter packing: fold eval-mode BN + bias into the next linear layer,
# pad all channel dims to 128 lanes, pre-transpose, cast matmul weights to bf16.
# ----------------------------------------------------------------------------
def _bn_affine(g, b, m, v):
    s = g / jnp.sqrt(v + _EPS)
    return s, b - m * s


def _conv1_pack(wc, bc):
    cout, cin, kh, kw = wc.shape                       # (96,1,3,3)
    w = jnp.transpose(wc, (2, 3, 1, 0)).reshape(kh * kw, cout)
    w = jnp.pad(w, ((0, 0), (0, _C - cout))).astype(jnp.float32)
    b = jnp.pad(bc, (0, _C - cout)).reshape(1, _C).astype(jnp.float32)
    return w, b


def _conv_fold(wc, bc, s_in, t_in):
    """PyTorch conv weight (Cout,Cin,kh,kw)+bias with the preceding eval-BN folded."""
    cout, cin, kh, kw = wc.shape
    w = jnp.transpose(wc, (2, 3, 1, 0))                # (kh,kw,cin,cout)
    b_eff = bc + jnp.einsum('hwio,i->o', w, t_in)
    w_eff = w * s_in[None, None, :, None]
    taps = w_eff.reshape(kh * kw, cin, cout)
    taps = jnp.pad(taps, ((0, 0), (0, _C - cin), (0, _C - cout))).astype(jnp.bfloat16)
    bias = jnp.pad(b_eff, (0, _C - cout)).reshape(1, _C).astype(jnp.float32)
    return taps, bias


def _fc_fold(wf, bf, s_in, t_in):
    """PyTorch linear weight (out,in)+bias with the preceding eval-BN folded."""
    out, inn = wf.shape
    b_eff = bf + wf @ t_in
    w_eff = (wf * s_in[None, :]).T                     # (in, out)
    w_eff = jnp.pad(w_eff, ((0, _C - inn), (0, _C - out))).astype(jnp.bfloat16)
    bias = jnp.pad(b_eff, (0, _C - out)).reshape(1, _C).astype(jnp.float32)
    return w_eff, bias


def pack_params(P):
    s1, t1 = _bn_affine(*P["bn1"]); s2, t2 = _bn_affine(*P["bn2"])
    s3, t3 = _bn_affine(*P["bn3"]); s4, t4 = _bn_affine(*P["bn4"])
    s5, t5 = _bn_affine(*P["bn5"]); s6, t6 = _bn_affine(*P["bn6"])
    w1, b1 = _conv1_pack(P["cw1"], P["cb1"])
    w2, b2 = _conv_fold(P["cw2"], P["cb2"], s1, t1)
    w3, b3 = _conv_fold(P["cw3"], P["cb3"], s2, t2)
    w4, b4 = _conv_fold(P["cw4"], P["cb4"], s3, t3)
    wf1, bf1 = _fc_fold(P["fw1"], P["fb1"], s4, t4)
    wf2, bf2 = _fc_fold(P["fw2"], P["fb2"], s5, t5)
    wf3, bf3 = _fc_fold(P["fw3"], P["fb3"], s6, t6)
    biases = jnp.concatenate(
        [b1, b2, b3, b4, bf1, bf2, bf3, jnp.zeros((1, _C), jnp.float32)], axis=0)
    return {"w1": w1, "w2": w2, "w3": w3, "w4": w4,
            "wf1": wf1, "wf2": wf2, "wf3": wf3, "b": biases}


# ----------------------------------------------------------------------------
# Constant 0/1 selection matrices (pool stride-2 pick + row compaction), built
# per batch-tile of nb images (block-diagonal across images).  bf16 is exact for
# 0/1 values and keeps the selection matmuls single-pass on the MXU.
# ----------------------------------------------------------------------------
def _selector(idx, r_in):
    s = np.zeros((len(idx), r_in), np.float32)
    s[np.arange(len(idx)), np.asarray(idx)] = 1.0
    return jnp.asarray(s, dtype=jnp.bfloat16)


def _build_selectors(nb):
    sp1 = _selector([b * 196 + 2 * i * 14 + 2 * j
                     for b in range(nb) for i in range(6) for j in range(6)],
                    nb * 196 - 30 - 15)                # pool1 pick: 12x12 -> 6x6
    sc2 = _selector([b * 36 + h * 6 + w
                     for b in range(nb) for h in range(5) for w in range(5)],
                    nb * 36 - 7)                       # conv2 compact: 6-wide -> 5x5
    sp2 = _selector([b * 25 + 2 * i * 5 + 2 * j
                     for b in range(nb) for i in range(2) for j in range(2)],
                    nb * 25 - 6 - 6)                   # pool2 pick: 4x4 -> 2x2
    sc4 = _selector([b * 4 for b in range(nb)], nb * 4 - 3)  # conv4 compact / flatten
    return sp1, sc2, sp2, sc4


def _pick_block_n(n):
    # One grid point for tiny batches; 8-image tiles otherwise (keeps the
    # block-diagonal selectors ~1 MiB and gives "parallel" grid points for
    # megacore / the 2nd TensorCore on v7x).
    if n <= 8:
        return n
    if n % 8 == 0:
        return 8
    # TODO(synk): ragged batches >8 fall back to a single block; pad the batch
    #             to a multiple of 8 upstream for best performance.
    return n


# ----------------------------------------------------------------------------
# Forward pass (matches MnistCNN.forward in eval mode)
# ----------------------------------------------------------------------------
_VMEM = pl.BlockSpec(memory_space=pltpu.MemorySpace.VMEM)


@jax.jit
def mnist_cnn_forward(x_nchw, W):
    n = x_nchw.shape[0]
    nb = _pick_block_n(n)
    # NCHW with C=1: flatten to rows r = b*196 + h*14 + w, single lane of pixels.
    x_rows = x_nchw.reshape(n * 14 * 14, 1).astype(jnp.float32)
    sp1, sc2, sp2, sc4 = _build_selectors(nb)
    out = pl.pallas_call(
        _mnist_fused_kernel,
        out_shape=jax.ShapeDtypeStruct((n, _C), jnp.float32),
        grid=(n // nb,),
        in_specs=[pl.BlockSpec((nb * 196, 1), lambda i: (i, 0))]   # batch-tiled rows
                 + [_VMEM] * 12,                                   # weights/selectors
        out_specs=pl.BlockSpec((nb, _C), lambda i: (i, 0)),
        compiler_params=pltpu.CompilerParams(
            dimension_semantics=("parallel",)),
    )(x_rows, W["w1"], W["w2"], W["w3"], W["w4"],
      W["wf1"], W["wf2"], W["wf3"], W["b"], sp1, sc2, sp2, sc4)
    return out[:, :10]                                 # drop lane padding


# ----------------------------------------------------------------------------
# Independent pure-JAX reference (lax.conv, unfolded BN) for correctness checking
# ----------------------------------------------------------------------------
def ref_forward(x_nchw, P):
    x = jnp.transpose(x_nchw, (0, 2, 3, 1)).astype(jnp.float32)

    def conv(h, w, b):
        wh = jnp.transpose(w, (2, 3, 1, 0))            # HWIO
        y = jax.lax.conv_general_dilated(h, wh, (1, 1), "VALID",
                                         dimension_numbers=("NHWC", "HWIO", "NHWC"))
        return y + b

    def bn(h, g, bb, m, v):
        return (h - m) / jnp.sqrt(v + _EPS) * g + bb

    def pool(h):
        N, H, Wd, C = h.shape
        return jnp.max(h.reshape(N, H // 2, 2, Wd // 2, 2, C), axis=(2, 4))

    relu = lambda z: jnp.maximum(z, 0.0)
    h = relu(conv(x, P["cw1"], P["cb1"])); h = pool(h); h = bn(h, *P["bn1"])
    h = relu(conv(h, P["cw2"], P["cb2"])); h = bn(h, *P["bn2"])
    h = relu(conv(h, P["cw3"], P["cb3"])); h = pool(h); h = bn(h, *P["bn3"])
    h = relu(conv(h, P["cw4"], P["cb4"])); h = bn(h, *P["bn4"])
    h = h.reshape(h.shape[0], -1)
    h = relu(h @ P["fw1"].T + P["fb1"]); h = bn(h, *P["bn5"])
    h = relu(h @ P["fw2"].T + P["fb2"]); h = bn(h, *P["bn6"])
    return h @ P["fw3"].T + P["fb3"]


# ----------------------------------------------------------------------------
# Deterministic parameter init (PyTorch layouts: conv (Cout,Cin,kh,kw), linear (out,in))
# ----------------------------------------------------------------------------
def init_params(key):
    ks = iter(jax.random.split(key, 64))               # 38 keys consumed; headroom

    def conv_w(cout, cin, kh, kw):
        return jax.random.normal(next(ks), (cout, cin, kh, kw), jnp.float32) / np.sqrt(cin * kh * kw)

    def lin_w(out, inn):
        return jax.random.normal(next(ks), (out, inn), jnp.float32) / np.sqrt(inn)

    def bias(n):
        return 0.1 * jax.random.normal(next(ks), (n,), jnp.float32)

    def bn(c):
        g = 1.0 + 0.1 * jax.random.normal(next(ks), (c,), jnp.float32)
        b = 0.1 * jax.random.normal(next(ks), (c,), jnp.float32)
        m = 0.1 * jax.random.normal(next(ks), (c,), jnp.float32)
        v = jnp.abs(jax.random.normal(next(ks), (c,), jnp.float32)) + 0.5
        return (g, b, m, v)

    return {
        "cw1": conv_w(96, 1, 3, 3), "cb1": bias(96), "bn1": bn(96),
        "cw2": conv_w(48, 96, 2, 2), "cb2": bias(48), "bn2": bn(48),
        "cw3": conv_w(32, 48, 2, 2), "cb3": bias(32), "bn3": bn(32),
        "cw4": conv_w(64, 32, 2, 2), "cb4": bias(64), "bn4": bn(64),
        "fw1": lin_w(128, 64), "fb1": bias(128), "bn5": bn(128),
        "fw2": lin_w(64, 128), "fb2": bias(64), "bn6": bn(64),
        "fw3": lin_w(10, 64), "fb3": bias(10),
    }


if __name__ == "__main__":
    key = jax.random.PRNGKey(0)
    kx, kp = jax.random.split(key)
    x = jax.random.normal(kx, (2, 1, 14, 14), jnp.float32)   # N x 1 x 14 x 14 (NCHW)
    params = init_params(kp)
    packed = pack_params(params)     # one-time weight prep (BN/bias fold, pad, bf16)

    out = mnist_cnn_forward(x, packed)
    out = jax.block_until_ready(out)
    assert out.shape == (2, 10), out.shape

    ref = ref_forward(x, params)
    # Kernel uses bf16 MXU operands (f32 accumulation) vs. an all-f32 reference,
    # so allow a few percent; structural errors would be orders of magnitude larger.
    np.testing.assert_allclose(np.asarray(out), np.asarray(ref), rtol=5e-2, atol=5e-2)

    print("KERNEL_OK")
</pallas_src>

<mosaic_0001>
module attributes {stable_mosaic.version = 11 : i64} {
  func.func @_mnist_fused_kernel(%arg0: i32, %arg1: memref<392x1xf32, #tpu.memory_space<vmem>>, %arg2: memref<9x128xf32, #tpu.memory_space<vmem>>, %arg3: memref<4x128x128xbf16, #tpu.memory_space<vmem>>, %arg4: memref<4x128x128xbf16, #tpu.memory_space<vmem>>, %arg5: memref<4x128x128xbf16, #tpu.memory_space<vmem>>, %arg6: memref<128x128xbf16, #tpu.memory_space<vmem>>, %arg7: memref<128x128xbf16, #tpu.memory_space<vmem>>, %arg8: memref<128x128xbf16, #tpu.memory_space<vmem>>, %arg9: memref<8x128xf32, #tpu.memory_space<vmem>>, %arg10: memref<72x347xbf16, #tpu.memory_space<vmem>>, %arg11: memref<50x65xbf16, #tpu.memory_space<vmem>>, %arg12: memref<8x38xbf16, #tpu.memory_space<vmem>>, %arg13: memref<2x5xbf16, #tpu.memory_space<vmem>>, %arg14: memref<2x128xf32, #tpu.memory_space<vmem>>) attributes {dimension_semantics = [#tpu.dimension_semantics<parallel>], iteration_bounds = array<i64: 1>, scalar_prefetch = 0 : i64, scratch_operands = 0 : i64, tpu.core_type = #tpu.core_type<tc>, window_params = [{transform_indices = @transform_0, window_bounds = array<i64: 392, 1>}, {pipeline_mode = #tpu.pipeline_mode<synchronous>, transform_indices = @transform_1, window_bounds = array<i64: 9, 128>}, {pipeline_mode = #tpu.pipeline_mode<synchronous>, transform_indices = @transform_2, window_bounds = array<i64: 4, 128, 128>}, {pipeline_mode = #tpu.pipeline_mode<synchronous>, transform_indices = @transform_3, window_bounds = array<i64: 4, 128, 128>}, {pipeline_mode = #tpu.pipeline_mode<synchronous>, transform_indices = @transform_4, window_bounds = array<i64: 4, 128, 128>}, {pipeline_mode = #tpu.pipeline_mode<synchronous>, transform_indices = @transform_5, window_bounds = array<i64: 128, 128>}, {pipeline_mode = #tpu.pipeline_mode<synchronous>, transform_indices = @transform_6, window_bounds = array<i64: 128, 128>}, {pipeline_mode = #tpu.pipeline_mode<synchronous>, transform_indices = @transform_7, window_bounds = array<i64: 128, 128>}, {pipeline_mode = #tpu.pipeline_mode<synchronous>, transform_indices = @transform_8, window_bounds = array<i64: 8, 128>}, {pipeline_mode = #tpu.pipeline_mode<synchronous>, transform_indices = @transform_9, window_bounds = array<i64: 72, 347>}, {pipeline_mode = #tpu.pipeline_mode<synchronous>, transform_indices = @transform_10, window_bounds = array<i64: 50, 65>}, {pipeline_mode = #tpu.pipeline_mode<synchronous>, transform_indices = @transform_11, window_bounds = array<i64: 8, 38>}, {pipeline_mode = #tpu.pipeline_mode<synchronous>, transform_indices = @transform_12, window_bounds = array<i64: 2, 5>}, {transform_indices = @transform_13, window_bounds = array<i64: 2, 128>}]} {
    %c0 = arith.constant 0 : index
    %c0_0 = arith.constant 0 : index
    %0 = vector.load %arg9[%c0, %c0_0] : memref<8x128xf32, #tpu.memory_space<vmem>>, vector<8x128xf32>
    %c0_1 = arith.constant 0 : index
    %c0_2 = arith.constant 0 : index
    %1 = vector.load %arg1[%c0_1, %c0_2] : memref<392x1xf32, #tpu.memory_space<vmem>>, vector<392x1xf32>
    %c0_3 = arith.constant 0 : index
    %c0_4 = arith.constant 0 : index
    %2 = vector.load %arg2[%c0_3, %c0_4] : memref<9x128xf32, #tpu.memory_space<vmem>>, vector<9x128xf32>
    %3 = vector.extract_strided_slice %1 {offsets = [0, 0], sizes = [362, 1], strides = [1, 1]} : vector<392x1xf32> to vector<362x1xf32>
    %4 = vector.extract_strided_slice %2 {offsets = [0, 0], sizes = [1, 128], strides = [1, 1]} : vector<9x128xf32> to vector<1x128xf32>
    %5 = vector.broadcast %3 : vector<362x1xf32> to vector<362x128xf32>
    %6 = vector.broadcast %4 : vector<1x128xf32> to vector<362x128xf32>
    %7 = arith.mulf %5, %6 : vector<362x128xf32>
    %8 = vector.extract_strided_slice %1 {offsets = [1, 0], sizes = [362, 1], strides = [1, 1]} : vector<392x1xf32> to vector<362x1xf32>
    %9 = vector.extract_strided_slice %2 {offsets = [1, 0], sizes = [1, 128], strides = [1, 1]} : vector<9x128xf32> to vector<1x128xf32>
    %10 = vector.broadcast %8 : vector<362x1xf32> to vector<362x128xf32>
    %11 = vector.broadcast %9 : vector<1x128xf32> to vector<362x128xf32>
    %12 = arith.mulf %10, %11 : vector<362x128xf32>
    %13 = arith.addf %7, %12 : vector<362x128xf32>
    %14 = vector.extract_strided_slice %1 {offsets = [2, 0], sizes = [362, 1], strides = [1, 1]} : vector<392x1xf32> to vector<362x1xf32>
    %15 = vector.extract_strided_slice %2 {offsets = [2, 0], sizes = [1, 128], strides = [1, 1]} : vector<9x128xf32> to vector<1x128xf32>
    %16 = vector.broadcast %14 : vector<362x1xf32> to vector<362x128xf32>
    %17 = vector.broadcast %15 : vector<1x128xf32> to vector<362x128xf32>
    %18 = arith.mulf %16, %17 : vector<362x128xf32>
    %19 = arith.addf %13, %18 : vector<362x128xf32>
    %20 = vector.extract_strided_slice %1 {offsets = [14, 0], sizes = [362, 1], strides = [1, 1]} : vector<392x1xf32> to vector<362x1xf32>
    %21 = vector.extract_strided_slice %2 {offsets = [3, 0], sizes = [1, 128], strides = [1, 1]} : vector<9x128xf32> to vector<1x128xf32>
    %22 = vector.broadcast %20 : vector<362x1xf32> to vector<362x128xf32>
    %23 = vector.broadcast %21 : vector<1x128xf32> to vector<362x128xf32>
    %24 = arith.mulf %22, %23 : vector<362x128xf32>
    %25 = arith.addf %19, %24 : vector<362x128xf32>
    %26 = vector.extract_strided_slice %1 {offsets = [15, 0], sizes = [362, 1], strides = [1, 1]} : vector<392x1xf32> to vector<362x1xf32>
    %27 = vector.extract_strided_slice %2 {offsets = [4, 0], sizes = [1, 128], strides = [1, 1]} : vector<9x128xf32> to vector<1x128xf32>
    %28 = vector.broadcast %26 : vector<362x1xf32> to vector<362x128xf32>
    %29 = vector.broadcast %27 : vector<1x128xf32> to vector<362x128xf32>
    %30 = arith.mulf %28, %29 : vector<362x128xf32>
    %31 = arith.addf %25, %30 : vector<362x128xf32>
    %32 = vector.extract_strided_slice %1 {offsets = [16, 0], sizes = [362, 1], strides = [1, 1]} : vector<392x1xf32> to vector<362x1xf32>
    %33 = vector.extract_strided_slice %2 {offsets = [5, 0], sizes = [1, 128], strides = [1, 1]} : vector<9x128xf32> to vector<1x128xf32>
    %34 = vector.broadcast %32 : vector<362x1xf32> to vector<362x128xf32>
    %35 = vector.broadcast %33 : vector<1x128xf32> to vector<362x128xf32>
    %36 = arith.mulf %34, %35 : vector<362x128xf32>
    %37 = arith.addf %31, %36 : vector<362x128xf32>
    %38 = vector.extract_strided_slice %1 {offsets = [28, 0], sizes = [362, 1], strides = [1, 1]} : vector<392x1xf32> to vector<362x1xf32>
    %39 = vector.extract_strided_slice %2 {offsets = [6, 0], sizes = [1, 128], strides = [1, 1]} : vector<9x128xf32> to vector<1x128xf32>
    %40 = vector.broadcast %38 : vector<362x1xf32> to vector<362x128xf32>
    %41 = vector.broadcast %39 : vector<1x128xf32> to vector<362x128xf32>
    %42 = arith.mulf %40, %41 : vector<362x128xf32>
    %43 = arith.addf %37, %42 : vector<362x128xf32>
    %44 = vector.extract_strided_slice %1 {offsets = [29, 0], sizes = [362, 1], strides = [1, 1]} : vector<392x1xf32> to vector<362x1xf32>
    %45 = vector.extract_strided_slice %2 {offsets = [7, 0], sizes = [1, 128], strides = [1, 1]} : vector<9x128xf32> to vector<1x128xf32>
    %46 = vector.broadcast %44 : vector<362x1xf32> to vector<362x128xf32>
    %47 = vector.broadcast %45 : vector<1x128xf32> to vector<362x128xf32>
    %48 = arith.mulf %46, %47 : vector<362x128xf32>
    %49 = arith.addf %43, %48 : vector<362x128xf32>
    %50 = vector.extract_strided_slice %1 {offsets = [30, 0], sizes = [362, 1], strides = [1, 1]} : vector<392x1xf32> to vector<362x1xf32>
    %51 = vector.extract_strided_slice %2 {offsets = [8, 0], sizes = [1, 128], strides = [1, 1]} : vector<9x128xf32> to vector<1x128xf32>
    %52 = vector.broadcast %50 : vector<362x1xf32> to vector<362x128xf32>
    %53 = vector.broadcast %51 : vector<1x128xf32> to vector<362x128xf32>
    %54 = arith.mulf %52, %53 : vector<362x128xf32>
    %55 = arith.addf %49, %54 : vector<362x128xf32>
    %56 = vector.extract_strided_slice %0 {offsets = [0, 0], sizes = [1, 128], strides = [1, 1]} : vector<8x128xf32> to vector<1x128xf32>
    %57 = vector.broadcast %56 : vector<1x128xf32> to vector<362x128xf32>
    %58 = arith.addf %55, %57 : vector<362x128xf32>
    %cst = arith.constant 0.000000e+00 : f32
    %59 = vector.broadcast %cst : f32 to vector<362x128xf32>
    %60 = arith.maximumf %58, %59 : vector<362x128xf32>
    %61 = vector.extract_strided_slice %60 {offsets = [0, 0], sizes = [347, 128], strides = [1, 1]} : vector<362x128xf32> to vector<347x128xf32>
    %62 = vector.extract_strided_slice %60 {offsets = [1, 0], sizes = [347, 128], strides = [1, 1]} : vector<362x128xf32> to vector<347x128xf32>
    %63 = arith.maximumf %61, %62 : vector<347x128xf32>
    %64 = vector.extract_strided_slice %60 {offsets = [14, 0], sizes = [347, 128], strides = [1, 1]} : vector<362x128xf32> to vector<347x128xf32>
    %65 = vector.extract_strided_slice %60 {offsets = [15, 0], sizes = [347, 128], strides = [1, 1]} : vector<362x128xf32> to vector<347x128xf32>
    %66 = arith.maximumf %64, %65 : vector<347x128xf32>
    %67 = arith.maximumf %63, %66 : vector<347x128xf32>
    %c0_5 = arith.constant 0 : index
    %c0_6 = arith.constant 0 : index
    %68 = vector.load %arg10[%c0_5, %c0_6] : memref<72x347xbf16, #tpu.memory_space<vmem>>, vector<72x347xbf16>
    %69 = arith.truncf %67 : vector<347x128xf32> to vector<347x128xbf16>
    %cst_7 = arith.constant dense<0.000000e+00> : vector<72x128xf32>
    %70 = tpu.matmul %68, %69, %cst_7 {dimension_numbers = #tpu.dot_dimension_numbers<[1], [0], [0], [1], [0, 0, 1, 1], [], []>} : vector<72x347xbf16>, vector<347x128xbf16>, vector<72x128xf32> -> vector<72x128xf32>
    %71 = vector.extract_strided_slice %0 {offsets = [1, 0], sizes = [1, 128], strides = [1, 1]} : vector<8x128xf32> to vector<1x128xf32>
    %cst_8 = arith.constant 0.000000e+00 : f32
    %72 = vector.broadcast %cst_8 : f32 to vector<65x128xf32>
    %73 = vector.extract_strided_slice %70 {offsets = [0, 0], sizes = [65, 128], strides = [1, 1]} : vector<72x128xf32> to vector<65x128xf32>
    %74 = arith.truncf %73 : vector<65x128xf32> to vector<65x128xbf16>
    %c0_9 = arith.constant 0 : index
    %c0_10 = arith.constant 0 : index
    %c0_11 = arith.constant 0 : index
    %75 = vector.load %arg3[%c0_9, %c0_10, %c0_11] : memref<4x128x128xbf16, #tpu.memory_space<vmem>>, vector<1x128x128xbf16>
    %76 = vector.shape_cast %75 : vector<1x128x128xbf16> to vector<128x128xbf16>
    %cst_12 = arith.constant dense<0.000000e+00> : vector<65x128xf32>
    %77 = tpu.matmul %74, %76, %cst_12 {dimension_numbers = #tpu.dot_dimension_numbers<[1], [0], [0], [1], [0, 0, 1, 1], [], []>} : vector<65x128xbf16>, vector<128x128xbf16>, vector<65x128xf32> -> vector<65x128xf32>
    %78 = arith.addf %72, %77 : vector<65x128xf32>
    %79 = vector.extract_strided_slice %70 {offsets = [1, 0], sizes = [65, 128], strides = [1, 1]} : vector<72x128xf32> to vector<65x128xf32>
    %80 = arith.truncf %79 : vector<65x128xf32> to vector<65x128xbf16>
    %c1 = arith.constant 1 : index
    %c0_13 = arith.constant 0 : index
    %c0_14 = arith.constant 0 : index
    %81 = vector.load %arg3[%c1, %c0_13, %c0_14] : memref<4x128x128xbf16, #tpu.memory_space<vmem>>, vector<1x128x128xbf16>
    %82 = vector.shape_cast %81 : vector<1x128x128xbf16> to vector<128x128xbf16>
    %cst_15 = arith.constant dense<0.000000e+00> : vector<65x128xf32>
    %83 = tpu.matmul %80, %82, %cst_15 {dimension_numbers = #tpu.dot_dimension_numbers<[1], [0], [0], [1], [0, 0, 1, 1], [], []>} : vector<65x128xbf16>, vector<128x128xbf16>, vector<65x128xf32> -> vector<65x128xf32>
    %84 = arith.addf %78, %83 : vector<65x128xf32>
    %85 = vector.extract_strided_slice %70 {offsets = [6, 0], sizes = [65, 128], strides = [1, 1]} : vector<72x128xf32> to vector<65x128xf32>
    %86 = arith.truncf %85 : vector<65x128xf32> to vector<65x128xbf16>
    %c2 = arith.constant 2 : index
    %c0_16 = arith.constant 0 : index
    %c0_17 = arith.constant 0 : index
    %87 = vector.load %arg3[%c2, %c0_16, %c0_17] : memref<4x128x128xbf16, #tpu.memory_space<vmem>>, vector<1x128x128xbf16>
    %88 = vector.shape_cast %87 : vector<1x128x128xbf16> to vector<128x128xbf16>
    %cst_18 = arith.constant dense<0.000000e+00> : vector<65x128xf32>
    %89 = tpu.matmul %86, %88, %cst_18 {dimension_numbers = #tpu.dot_dimension_numbers<[1], [0], [0], [1], [0, 0, 1, 1], [], []>} : vector<65x128xbf16>, vector<128x128xbf16>, vector<65x128xf32> -> vector<65x128xf32>
    %90 = arith.addf %84, %89 : vector<65x128xf32>
    %91 = vector.extract_strided_slice %70 {offsets = [7, 0], sizes = [65, 128], strides = [1, 1]} : vector<72x128xf32> to vector<65x128xf32>
    %92 = arith.truncf %91 : vector<65x128xf32> to vector<65x128xbf16>
    %c3 = arith.constant 3 : index
    %c0_19 = arith.constant 0 : index
    %c0_20 = arith.constant 0 : index
    %93 = vector.load %arg3[%c3, %c0_19, %c0_20] : memref<4x128x128xbf16, #tpu.memory_space<vmem>>, vector<1x128x128xbf16>
    %94 = vector.shape_cast %93 : vector<1x128x128xbf16> to vector<128x128xbf16>
    %cst_21 = arith.constant dense<0.000000e+00> : vector<65x128xf32>
    %95 = tpu.matmul %92, %94, %cst_21 {dimension_numbers = #tpu.dot_dimension_numbers<[1], [0], [0], [1], [0, 0, 1, 1], [], []>} : vector<65x128xbf16>, vector<128x128xbf16>, vector<65x128xf32> -> vector<65x128xf32>
    %96 = arith.addf %90, %95 : vector<65x128xf32>
    %97 = vector.broadcast %71 : vector<1x128xf32> to vector<65x128xf32>
    %98 = arith.addf %96, %97 : vector<65x128xf32>
    %cst_22 = arith.constant 0.000000e+00 : f32
    %99 = vector.broadcast %cst_22 : f32 to vector<65x128xf32>
    %100 = arith.maximumf %98, %99 : vector<65x128xf32>
    %c0_23 = arith.constant 0 : index
    %c0_24 = arith.constant 0 : index
    %101 = vector.load %arg11[%c0_23, %c0_24] : memref<50x65xbf16, #tpu.memory_space<vmem>>, vector<50x65xbf16>
    %102 = arith.truncf %100 : vector<65x128xf32> to vector<65x128xbf16>
    %cst_25 = arith.constant dense<0.000000e+00> : vector<50x128xf32>
    %103 = tpu.matmul %101, %102, %cst_25 {dimension_numbers = #tpu.dot_dimension_numbers<[1], [0], [0], [1], [0, 0, 1, 1], [], []>} : vector<50x65xbf16>, vector<65x128xbf16>, vector<50x128xf32> -> vector<50x128xf32>
    %104 = vector.extract_strided_slice %0 {offsets = [2, 0], sizes = [1, 128], strides = [1, 1]} : vector<8x128xf32> to vector<1x128xf32>
    %cst_26 = arith.constant 0.000000e+00 : f32
    %105 = vector.broadcast %cst_26 : f32 to vector<44x128xf32>
    %106 = vector.extract_strided_slice %103 {offsets = [0, 0], sizes = [44, 128], strides = [1, 1]} : vector<50x128xf32> to vector<44x128xf32>
    %107 = arith.truncf %106 : vector<44x128xf32> to vector<44x128xbf16>
    %c0_27 = arith.constant 0 : index
    %c0_28 = arith.constant 0 : index
    %c0_29 = arith.constant 0 : index
    %108 = vector.load %arg4[%c0_27, %c0_28, %c0_29] : memref<4x128x128xbf16, #tpu.memory_space<vmem>>, vector<1x128x128xbf16>
    %109 = vector.shape_cast %108 : vector<1x128x128xbf16> to vector<128x128xbf16>
    %cst_30 = arith.constant dense<0.000000e+00> : vector<44x128xf32>
    %110 = tpu.matmul %107, %109, %cst_30 {dimension_numbers = #tpu.dot_dimension_numbers<[1], [0], [0], [1], [0, 0, 1, 1], [], []>} : vector<44x128xbf16>, vector<128x128xbf16>, vector<44x128xf32> -> vector<44x128xf32>
    %111 = arith.addf %105, %110 : vector<44x128xf32>
    %112 = vector.extract_strided_slice %103 {offsets = [1, 0], sizes = [44, 128], strides = [1, 1]} : vector<50x128xf32> to vector<44x128xf32>
    %113 = arith.truncf %112 : vector<44x128xf32> to vector<44x128xbf16>
    %c1_31 = arith.constant 1 : index
    %c0_32 = arith.constant 0 : index
    %c0_33 = arith.constant 0 : index
    %114 = vector.load %arg4[%c1_31, %c0_32, %c0_33] : memref<4x128x128xbf16, #tpu.memory_space<vmem>>, vector<1x128x128xbf16>
    %115 = vector.shape_cast %114 : vector<1x128x128xbf16> to vector<128x128xbf16>
    %cst_34 = arith.constant dense<0.000000e+00> : vector<44x128xf32>
    %116 = tpu.matmul %113, %115, %cst_34 {dimension_numbers = #tpu.dot_dimension_numbers<[1], [0], [0], [1], [0, 0, 1, 1], [], []>} : vector<44x128xbf16>, vector<128x128xbf16>, vector<44x128xf32> -> vector<44x128xf32>
    %117 = arith.addf %111, %116 : vector<44x128xf32>
    %118 = vector.extract_strided_slice %103 {offsets = [5, 0], sizes = [44, 128], strides = [1, 1]} : vector<50x128xf32> to vector<44x128xf32>
    %119 = arith.truncf %118 : vector<44x128xf32> to vector<44x128xbf16>
    %c2_35 = arith.constant 2 : index
    %c0_36 = arith.constant 0 : index
    %c0_37 = arith.constant 0 : index
    %120 = vector.load %arg4[%c2_35, %c0_36, %c0_37] : memref<4x128x128xbf16, #tpu.memory_space<vmem>>, vector<1x128x128xbf16>
    %121 = vector.shape_cast %120 : vector<1x128x128xbf16> to vector<128x128xbf16>
    %cst_38 = arith.constant dense<0.000000e+00> : vector<44x128xf32>
    %122 = tpu.matmul %119, %121, %cst_38 {dimension_numbers = #tpu.dot_dimension_numbers<[1], [0], [0], [1], [0, 0, 1, 1], [], []>} : vector<44x128xbf16>, vector<128x128xbf16>, vector<44x128xf32> -> vector<44x128xf32>
    %123 = arith.addf %117, %122 : vector<44x128xf32>
    %124 = vector.extract_strided_slice %103 {offsets = [6, 0], sizes = [44, 128], strides = [1, 1]} : vector<50x128xf32> to vector<44x128xf32>
    %125 = arith.truncf %124 : vector<44x128xf32> to vector<44x128xbf16>
    %c3_39 = arith.constant 3 : index
    %c0_40 = arith.constant 0 : index
    %c0_41 = arith.constant 0 : index
    %126 = vector.load %arg4[%c3_39, %c0_40, %c0_41] : memref<4x128x128xbf16, #tpu.memory_space<vmem>>, vector<1x128x128xbf16>
    %127 = vector.shape_cast %126 : vector<1x128x128xbf16> to vector<128x128xbf16>
    %cst_42 = arith.constant dense<0.000000e+00> : vector<44x128xf32>
    %128 = tpu.matmul %125, %127, %cst_42 {dimension_numbers = #tpu.dot_dimension_numbers<[1], [0], [0], [1], [0, 0, 1, 1], [], []>} : vector<44x128xbf16>, vector<128x128xbf16>, vector<44x128xf32> -> vector<44x128xf32>
    %129 = arith.addf %123, %128 : vector<44x128xf32>
    %130 = vector.broadcast %104 : vector<1x128xf32> to vector<44x128xf32>
    %131 = arith.addf %129, %130 : vector<44x128xf32>
    %cst_43 = arith.constant 0.000000e+00 : f32
    %132 = vector.broadcast %cst_43 : f32 to vector<44x128xf32>
    %133 = arith.maximumf %131, %132 : vector<44x128xf32>
    %134 = vector.extract_strided_slice %133 {offsets = [0, 0], sizes = [38, 128], strides = [1, 1]} : vector<44x128xf32> to vector<38x128xf32>
    %135 = vector.extract_strided_slice %133 {offsets = [1, 0], sizes = [38, 128], strides = [1, 1]} : vector<44x128xf32> to vector<38x128xf32>
    %136 = arith.maximumf %134, %135 : vector<38x128xf32>
    %137 = vector.extract_strided_slice %133 {offsets = [5, 0], sizes = [38, 128], strides = [1, 1]} : vector<44x128xf32> to vector<38x128xf32>
    %138 = vector.extract_strided_slice %133 {offsets = [6, 0], sizes = [38, 128], strides = [1, 1]} : vector<44x128xf32> to vector<38x128xf32>
    %139 = arith.maximumf %137, %138 : vector<38x128xf32>
    %140 = arith.maximumf %136, %139 : vector<38x128xf32>
    %c0_44 = arith.constant 0 : index
    %c0_45 = arith.constant 0 : index
    %141 = vector.load %arg12[%c0_44, %c0_45] : memref<8x38xbf16, #tpu.memory_space<vmem>>, vector<8x38xbf16>
    %142 = arith.truncf %140 : vector<38x128xf32> to vector<38x128xbf16>
    %cst_46 = arith.constant dense<0.000000e+00> : vector<8x128xf32>
    %143 = tpu.matmul %141, %142, %cst_46 {dimension_numbers = #tpu.dot_dimension_numbers<[1], [0], [0], [1], [0, 0, 1, 1], [], []>} : vector<8x38xbf16>, vector<38x128xbf16>, vector<8x128xf32> -> vector<8x128xf32>
    %144 = vector.extract_strided_slice %0 {offsets = [3, 0], sizes = [1, 128], strides = [1, 1]} : vector<8x128xf32> to vector<1x128xf32>
    %cst_47 = arith.constant 0.000000e+00 : f32
    %145 = vector.broadcast %cst_47 : f32 to vector<5x128xf32>
    %146 = vector.extract_strided_slice %143 {offsets = [0, 0], sizes = [5, 128], strides = [1, 1]} : vector<8x128xf32> to vector<5x128xf32>
    %147 = arith.truncf %146 : vector<5x128xf32> to vector<5x128xbf16>
    %c0_48 = arith.constant 0 : index
    %c0_49 = arith.constant 0 : index
    %c0_50 = arith.constant 0 : index
    %148 = vector.load %arg5[%c0_48, %c0_49, %c0_50] : memref<4x128x128xbf16, #tpu.memory_space<vmem>>, vector<1x128x128xbf16>
    %149 = vector.shape_cast %148 : vector<1x128x128xbf16> to vector<128x128xbf16>
    %cst_51 = arith.constant dense<0.000000e+00> : vector<5x128xf32>
    %150 = tpu.matmul %147, %149, %cst_51 {dimension_numbers = #tpu.dot_dimension_numbers<[1], [0], [0], [1], [0, 0, 1, 1], [], []>} : vector<5x128xbf16>, vector<128x128xbf16>, vector<5x128xf32> -> vector<5x128xf32>
    %151 = arith.addf %145, %150 : vector<5x128xf32>
    %152 = vector.extract_strided_slice %143 {offsets = [1, 0], sizes = [5, 128], strides = [1, 1]} : vector<8x128xf32> to vector<5x128xf32>
    %153 = arith.truncf %152 : vector<5x128xf32> to vector<5x128xbf16>
    %c1_52 = arith.constant 1 : index
    %c0_53 = arith.constant 0 : index
    %c0_54 = arith.constant 0 : index
    %154 = vector.load %arg5[%c1_52, %c0_53, %c0_54] : memref<4x128x128xbf16, #tpu.memory_space<vmem>>, vector<1x128x128xbf16>
    %155 = vector.shape_cast %154 : vector<1x128x128xbf16> to vector<128x128xbf16>
    %cst_55 = arith.constant dense<0.000000e+00> : vector<5x128xf32>
    %156 = tpu.matmul %153, %155, %cst_55 {dimension_numbers = #tpu.dot_dimension_numbers<[1], [0], [0], [1], [0, 0, 1, 1], [], []>} : vector<5x128xbf16>, vector<128x128xbf16>, vector<5x128xf32> -> vector<5x128xf32>
    %157 = arith.addf %151, %156 : vector<5x128xf32>
    %158 = vector.extract_strided_slice %143 {offsets = [2, 0], sizes = [5, 128], strides = [1, 1]} : vector<8x128xf32> to vector<5x128xf32>
    %159 = arith.truncf %158 : vector<5x128xf32> to vector<5x128xbf16>
    %c2_56 = arith.constant 2 : index
    %c0_57 = arith.constant 0 : index
    %c0_58 = arith.constant 0 : index
    %160 = vector.load %arg5[%c2_56, %c0_57, %c0_58] : memref<4x128x128xbf16, #tpu.memory_space<vmem>>, vector<1x128x128xbf16>
    %161 = vector.shape_cast %160 : vector<1x128x128xbf16> to vector<128x128xbf16>
    %cst_59 = arith.constant dense<0.000000e+00> : vector<5x128xf32>
    %162 = tpu.matmul %159, %161, %cst_59 {dimension_numbers = #tpu.dot_dimension_numbers<[1], [0], [0], [1], [0, 0, 1, 1], [], []>} : vector<5x128xbf16>, vector<128x128xbf16>, vector<5x128xf32> -> vector<5x128xf32>
    %163 = arith.addf %157, %162 : vector<5x128xf32>
    %164 = vector.extract_strided_slice %143 {offsets = [3, 0], sizes = [5, 128], strides = [1, 1]} : vector<8x128xf32> to vector<5x128xf32>
    %165 = arith.truncf %164 : vector<5x128xf32> to vector<5x128xbf16>
    %c3_60 = arith.constant 3 : index
    %c0_61 = arith.constant 0 : index
    %c0_62 = arith.constant 0 : index
    %166 = vector.load %arg5[%c3_60, %c0_61, %c0_62] : memref<4x128x128xbf16, #tpu.memory_space<vmem>>, vector<1x128x128xbf16>
    %167 = vector.shape_cast %166 : vector<1x128x128xbf16> to vector<128x128xbf16>
    %cst_63 = arith.constant dense<0.000000e+00> : vector<5x128xf32>
    %168 = tpu.matmul %165, %167, %cst_63 {dimension_numbers = #tpu.dot_dimension_numbers<[1], [0], [0], [1], [0, 0, 1, 1], [], []>} : vector<5x128xbf16>, vector<128x128xbf16>, vector<5x128xf32> -> vector<5x128xf32>
    %169 = arith.addf %163, %168 : vector<5x128xf32>
    %170 = vector.broadcast %144 : vector<1x128xf32> to vector<5x128xf32>
    %171 = arith.addf %169, %170 : vector<5x128xf32>
    %cst_64 = arith.constant 0.000000e+00 : f32
    %172 = vector.broadcast %cst_64 : f32 to vector<5x128xf32>
    %173 = arith.maximumf %171, %172 : vector<5x128xf32>
    %c0_65 = arith.constant 0 : index
    %c0_66 = arith.constant 0 : index
    %174 = vector.load %arg13[%c0_65, %c0_66] : memref<2x5xbf16, #tpu.memory_space<vmem>>, vector<2x5xbf16>
    %175 = arith.truncf %173 : vector<5x128xf32> to vector<5x128xbf16>
    %cst_67 = arith.constant dense<0.000000e+00> : vector<2x128xf32>
    %176 = tpu.matmul %174, %175, %cst_67 {dimension_numbers = #tpu.dot_dimension_numbers<[1], [0], [0], [1], [0, 0, 1, 1], [], []>} : vector<2x5xbf16>, vector<5x128xbf16>, vector<2x128xf32> -> vector<2x128xf32>
    %177 = arith.truncf %176 : vector<2x128xf32> to vector<2x128xbf16>
    %c0_68 = arith.constant 0 : index
    %c0_69 = arith.constant 0 : index
    %178 = vector.load %arg6[%c0_68, %c0_69] : memref<128x128xbf16, #tpu.memory_space<vmem>>, vector<128x128xbf16>
    %cst_70 = arith.constant dense<0.000000e+00> : vector<2x128xf32>
    %179 = tpu.matmul %177, %178, %cst_70 {dimension_numbers = #tpu.dot_dimension_numbers<[1], [0], [0], [1], [0, 0, 1, 1], [], []>} : vector<2x128xbf16>, vector<128x128xbf16>, vector<2x128xf32> -> vector<2x128xf32>
    %180 = vector.extract_strided_slice %0 {offsets = [4, 0], sizes = [1, 128], strides = [1, 1]} : vector<8x128xf32> to vector<1x128xf32>
    %181 = vector.broadcast %180 : vector<1x128xf32> to vector<2x128xf32>
    %182 = arith.addf %179, %181 : vector<2x128xf32>
    %cst_71 = arith.constant 0.000000e+00 : f32
    %183 = vector.broadcast %cst_71 : f32 to vector<2x128xf32>
    %184 = arith.maximumf %182, %183 : vector<2x128xf32>
    %185 = arith.truncf %184 : vector<2x128xf32> to vector<2x128xbf16>
    %c0_72 = arith.constant 0 : index
    %c0_73 = arith.constant 0 : index
    %186 = vector.load %arg7[%c0_72, %c0_73] : memref<128x128xbf16, #tpu.memory_space<vmem>>, vector<128x128xbf16>
    %cst_74 = arith.constant dense<0.000000e+00> : vector<2x128xf32>
    %187 = tpu.matmul %185, %186, %cst_74 {dimension_numbers = #tpu.dot_dimension_numbers<[1], [0], [0], [1], [0, 0, 1, 1], [], []>} : vector<2x128xbf16>, vector<128x128xbf16>, vector<2x128xf32> -> vector<2x128xf32>
    %188 = vector.extract_strided_slice %0 {offsets = [5, 0], sizes = [1, 128], strides = [1, 1]} : vector<8x128xf32> to vector<1x128xf32>
    %189 = vector.broadcast %188 : vector<1x128xf32> to vector<2x128xf32>
    %190 = arith.addf %187, %189 : vector<2x128xf32>
    %cst_75 = arith.constant 0.000000e+00 : f32
    %191 = vector.broadcast %cst_75 : f32 to vector<2x128xf32>
    %192 = arith.maximumf %190, %191 : vector<2x128xf32>
    %193 = arith.truncf %192 : vector<2x128xf32> to vector<2x128xbf16>
    %c0_76 = arith.constant 0 : index
    %c0_77 = arith.constant 0 : index
    %194 = vector.load %arg8[%c0_76, %c0_77] : memref<128x128xbf16, #tpu.memory_space<vmem>>, vector<128x128xbf16>
    %cst_78 = arith.constant dense<0.000000e+00> : vector<2x128xf32>
    %195 = tpu.matmul %193, %194, %cst_78 {dimension_numbers = #tpu.dot_dimension_numbers<[1], [0], [0], [1], [0, 0, 1, 1], [], []>} : vector<2x128xbf16>, vector<128x128xbf16>, vector<2x128xf32> -> vector<2x128xf32>
    %196 = vector.extract_strided_slice %0 {offsets = [6, 0], sizes = [1, 128], strides = [1, 1]} : vector<8x128xf32> to vector<1x128xf32>
    %197 = vector.broadcast %196 : vector<1x128xf32> to vector<2x128xf32>
    %198 = arith.addf %195, %197 : vector<2x128xf32>
    %c0_79 = arith.constant 0 : index
    %c0_80 = arith.constant 0 : index
    %199 = vector.load %arg14[%c0_79, %c0_80] : memref<2x128xf32, #tpu.memory_space<vmem>>, vector<2x128xf32>
    tpu.vector_store %arg14[%c0_79, %c0_80], %198 {strides = array<i32>} : memref<2x128xf32, #tpu.memory_space<vmem>>, vector<2x128xf32>,
    return
  }
  func.func @transform_0(%arg0: i32) -> (i32, i32) {
    %c0_i32 = arith.constant 0 : i32
    %c0_i32_0 = arith.constant 0 : i32
    return %arg0, %c0_i32 : i32, i32
  }
  func.func @transform_1(%arg0: i32) -> (i32, i32) {
    %c0_i32 = arith.constant 0 : i32
    %c0_i32_0 = arith.constant 0 : i32
    %c0_i32_1 = arith.constant 0 : i32
    return %c0_i32, %c0_i32_0 : i32, i32
  }
  func.func @transform_2(%arg0: i32) -> (i32, i32, i32) {
    %c0_i32 = arith.constant 0 : i32
    %c0_i32_0 = arith.constant 0 : i32
    %c0_i32_1 = arith.constant 0 : i32
    %c0_i32_2 = arith.constant 0 : i32
    return %c0_i32, %c0_i32_0, %c0_i32_1 : i32, i32, i32
  }
  func.func @transform_3(%arg0: i32) -> (i32, i32, i32) {
    %c0_i32 = arith.constant 0 : i32
    %c0_i32_0 = arith.constant 0 : i32
    %c0_i32_1 = arith.constant 0 : i32
    %c0_i32_2 = arith.constant 0 : i32
    return %c0_i32, %c0_i32_0, %c0_i32_1 : i32, i32, i32
  }
  func.func @transform_4(%arg0: i32) -> (i32, i32, i32) {
    %c0_i32 = arith.constant 0 : i32
    %c0_i32_0 = arith.constant 0 : i32
    %c0_i32_1 = arith.constant 0 : i32
    %c0_i32_2 = arith.constant 0 : i32
    return %c0_i32, %c0_i32_0, %c0_i32_1 : i32, i32, i32
  }
  func.func @transform_5(%arg0: i32) -> (i32, i32) {
    %c0_i32 = arith.constant 0 : i32
    %c0_i32_0 = arith.constant 0 : i32
    %c0_i32_1 = arith.constant 0 : i32
    return %c0_i32, %c0_i32_0 : i32, i32
  }
  func.func @transform_6(%arg0: i32) -> (i32, i32) {
    %c0_i32 = arith.constant 0 : i32
    %c0_i32_0 = arith.constant 0 : i32
    %c0_i32_1 = arith.constant 0 : i32
    return %c0_i32, %c0_i32_0 : i32, i32
  }
  func.func @transform_7(%arg0: i32) -> (i32, i32) {
    %c0_i32 = arith.constant 0 : i32
    %c0_i32_0 = arith.constant 0 : i32
    %c0_i32_1 = arith.constant 0 : i32
    return %c0_i32, %c0_i32_0 : i32, i32
  }
  func.func @transform_8(%arg0: i32) -> (i32, i32) {
    %c0_i32 = arith.constant 0 : i32
    %c0_i32_0 = arith.constant 0 : i32
    %c0_i32_1 = arith.constant 0 : i32
    return %c0_i32, %c0_i32_0 : i32, i32
  }
  func.func @transform_9(%arg0: i32) -> (i32, i32) {
    %c0_i32 = arith.constant 0 : i32
    %c0_i32_0 = arith.constant 0 : i32
    %c0_i32_1 = arith.constant 0 : i32
    return %c0_i32, %c0_i32_0 : i32, i32
  }
  func.func @transform_10(%arg0: i32) -> (i32, i32) {
    %c0_i32 = arith.constant 0 : i32
    %c0_i32_0 = arith.constant 0 : i32
    %c0_i32_1 = arith.constant 0 : i32
    return %c0_i32, %c0_i32_0 : i32, i32
  }
  func.func @transform_11(%arg0: i32) -> (i32, i32) {
    %c0_i32 = arith.constant 0 : i32
    %c0_i32_0 = arith.constant 0 : i32
    %c0_i32_1 = arith.constant 0 : i32
    return %c0_i32, %c0_i32_0 : i32, i32
  }
  func.func @transform_12(%arg0: i32) -> (i32, i32) {
    %c0_i32 = arith.constant 0 : i32
    %c0_i32_0 = arith.constant 0 : i32
    %c0_i32_1 = arith.constant 0 : i32
    return %c0_i32, %c0_i32_0 : i32, i32
  }
  func.func @transform_13(%arg0: i32) -> (i32, i32) {
    %c0_i32 = arith.constant 0 : i32
    %c0_i32_0 = arith.constant 0 : i32
    return %arg0, %c0_i32 : i32, i32
  }
}

</mosaic_0001>

<bundles_post_ra>
// kernel: mnist_cnn_forward.1
= control target key start
LH: loop header
LB: loop body
LE: loop exit
PB: predicated region body
PF: predicated region fallthrough
CT: control target
= control target key end

     0   :  { %18 = vsyncpa [#allocation3], 0  ;;  %s11342_s0 = inlined_call_operand.vmem [shape: f32[392,1], index: 0, kind: input, shape index: {}]   ;;  %s11343_s1 = inlined_call_operand.hbm [shape: f32[9,128], index: 1, kind: input, shape index: {}]   ;;  %s11344_s2 = inlined_call_operand.vmem [shape: bf16[4,128,128], index: 2, kind: input, shape index: {}]   ;;  %s11345_s3 = inlined_call_operand.hbm [shape: bf16[4,128,128], index: 3, kind: input, shape index: {}]   ;;  %s11346_s4 = inlined_call_operand.hbm [shape: bf16[4,128,128], index: 4, kind: input, shape index: {}]   ;;  %s11347_s5 = inlined_call_operand.vmem [shape: bf16[128,128], index: 5, kind: input, shape index: {}]   ;;  %s11348_s6 = inlined_call_operand.vmem [shape: bf16[128,128], index: 6, kind: input, shape index: {}]   ;;  %s11349_s7 = inlined_call_operand.hbm [shape: bf16[128,128], index: 7, kind: input, shape index: {}]   ;;  %s11350_s8 = inlined_call_operand.hbm [shape: f32[8,128], index: 8, kind: input, shape index: {}]   ;;  %s11351_s9 = inlined_call_operand.vmem [shape: bf16[72,347], index: 9, kind: input, shape index: {}]   ;;  %s11352_s10 = inlined_call_operand.hbm [shape: bf16[50,65], index: 10, kind: input, shape index: {}]   ;;  %s11353_s11 = inlined_call_operand.vmem [shape: bf16[8,38], index: 11, kind: input, shape index: {}]   ;;  %s11354_s12 = inlined_call_operand.vmem [shape: bf16[2,5], index: 12, kind: input, shape index: {}]   ;;  %s11355_s13 = inlined_call_operand.hbm [shape: f32[2,128], index: 13, kind: output, shape index: {}]  }
   0x1   :  { %19 = vsyncpa [#allocation6], 0 }
   0x2   :  { %20 = vsyncpa [#allocation9], 0 }
   0x3   :  { %21 = vsyncpa [#allocation12], 0 }
   0x4   :  { %22 = vsyncpa [#allocation4], 0  ;;  %s6887_s25 = smov [#allocation5]  }
   0x5   :  { %s44_s26 = sshll.u32 %s6887_s25, 4  ;;  %s45_s26 = int_to_ptr.vmem [resolvable:$true] %s44_s26 }
   0x6   :  { %s6745_s27 = scalar_lea.vmem %s45_s26, 4096  ;;  %p6750_p1 = scmp.lt.s32.totalorder %s45_s26, %s45_s26 }
   0x7   :  { %p6746_p0 = scmp.ne.s32.totalorder %s45_s26, %s6745_s27  ;;  %p6751_p2 = scmp.lt.s32.totalorder %s6745_s27, %s6745_s27 }
   0x9   :  { %p6752_p3 = por %p6751_p2, %p6750_p1 }
   0xb   :  { %p6753_p4 = pnand %p6752_p3, %p6746_p0 }
   0xd   :  { %6756 = shalt.err (!%p6753_p4)
}
   0xe   :  { %s6888_s28 = smov 64   ;;  %s6889_s29 = smov 4  }
   0xf   :  { %50 = dma.hbm_to_vmem [thread:$0]  %s11345_s3, 4096, %s45_s26, [#allocation6], %s6888_s28, %s6888_s28, %s6889_s29  }
  0x10   :  { %s6890_s15 = smov [#allocation8]   ;;  %s6891_s17 = smov [#allocation2]  }
  0x11   :  { %s72_s16 = sshll.u32 %s6890_s15, 4  ;;  %s30_s18 = sshll.u32 %s6891_s17, 4  ;;  %s73_s16 = int_to_ptr.vmem [resolvable:$true] %s72_s16  ;;  %s31_s18 = int_to_ptr.vmem [resolvable:$true] %s30_s18 }
  0x12   :  { %s6765_s19 = scalar_lea.vmem %s73_s16, 1024  ;;  %p6770_p6 = scmp.lt.s32.totalorder %s73_s16, %s73_s16 }
  0x13   :  { %p6766_p5 = scmp.ne.s32.totalorder %s73_s16, %s6765_s19  ;;  %p6771_p7 = scmp.lt.s32.totalorder %s6765_s19, %s6765_s19 }
  0x15   :  { %p6772_p8 = por %p6771_p7, %p6770_p6 }
  0x17   :  { %p6773_p9 = pnand %p6772_p8, %p6766_p5 }
  0x19   :  { %6776 = shalt.err (!%p6773_p9)
}
  0x1a   :  { %78 = dma.hbm_to_vmem [thread:$0]  %s11349_s7, 1024, %s73_s16, [#allocation9], %s6888_s28, %s6888_s28, %s6889_s29  }
  0x1b   :  { %s6785_s3 = scalar_lea.vmem %s31_s18, 256  ;;  %p6790_p11 = scmp.lt.s32.totalorder %s31_s18, %s31_s18 }
  0x1c   :  { %p6786_p10 = scmp.ne.s32.totalorder %s31_s18, %s6785_s3  ;;  %p6791_p12 = scmp.lt.s32.totalorder %s6785_s3, %s6785_s3 }
  0x1e   :  { %p6792_p13 = por %p6791_p12, %p6790_p11 }
  0x20   :  { %p6793_p0 = pnand %p6792_p13, %p6786_p10 }
  0x22   :  { %6796 = shalt.err (!%p6793_p0)
}
  0x23   :  { %s6892_s22 = smov 128   ;;  %s6893_s23 = smov 8  }
  0x24   :  { %36 = dma.hbm_to_vmem [thread:$0]  %s11343_s1, 256, %s31_s18, [#allocation3], %s6892_s22, %s6892_s22, %s6893_s23  }
  0x25   :  { %s6894_s26 = smov [#allocation7]   ;;  %s6895_s30 = smov [#allocation10]  }
  0x26   :  { %s56_s27 = sshll.u32 %s6894_s26, 4  ;;  %s85_s14 = sshll.u32 %s6895_s30, 4  ;;  %s57_s27 = int_to_ptr.vmem [resolvable:$true] %s56_s27  ;;  %s86_s14 = int_to_ptr.vmem [resolvable:$true] %s85_s14 }
  0x27   :  { %s6805_s7 = scalar_lea.vmem %s57_s27, 4096  ;;  %p6810_p2 = scmp.lt.s32.totalorder %s57_s27, %s57_s27 }
  0x28   :  { %p6806_p1 = scmp.ne.s32.totalorder %s57_s27, %s6805_s7  ;;  %p6811_p3 = scmp.lt.s32.totalorder %s6805_s7, %s6805_s7 }
  0x2a   :  { %p6812_p4 = por %p6811_p3, %p6810_p2 }
  0x2c   :  { %p6813_p5 = pnand %p6812_p4, %p6806_p1 }
  0x2e   :  { %6816 = shalt.err (!%p6813_p5)
}
  0x2f   :  { %62 = dma.hbm_to_vmem [thread:$0]  %s11346_s4, 4096, %s57_s27, [#allocation6], %s6888_s28, %s6888_s28, %s6889_s29  }
  0x30   :  { %s6825_s1 = scalar_lea.vmem %s86_s14, 128  ;;  %p6830_p7 = scmp.lt.s32.totalorder %s86_s14, %s86_s14 }
  0x31   :  { %p6826_p6 = scmp.ne.s32.totalorder %s86_s14, %s6825_s1  ;;  %p6831_p8 = scmp.lt.s32.totalorder %s6825_s1, %s6825_s1 }
  0x33   :  { %p6832_p9 = por %p6831_p8, %p6830_p7 }
  0x35   :  { %p6833_p10 = pnand %p6832_p9, %p6826_p6 }
  0x37   :  { %6836 = shalt.err (!%p6833_p10)
}
  0x38   :  { %88 = dma.hbm_to_vmem [thread:$0]  %s11350_s8, 128, %s86_s14, [#allocation9]  }
  0x39   :  { %s6896_s19 = smov [#allocation11]  }
  0x3a   :  { %s96_s20 = sshll.u32 %s6896_s19, 4  ;;  %s97_s20 = int_to_ptr.vmem [resolvable:$true] %s96_s20 }
  0x3b   :  { %s6845_s21 = scalar_lea.vmem %s97_s20, 448  ;;  %p6850_p12 = scmp.lt.s32.totalorder %s97_s20, %s97_s20 }
  0x3c   :  { %p6846_p11 = scmp.ne.s32.totalorder %s97_s20, %s6845_s21  ;;  %p6851_p13 = scmp.lt.s32.totalorder %s6845_s21, %s6845_s21 }
  0x3e   :  { %p6852_p0 = por %p6851_p13, %p6850_p12 }
  0x40   :  { %p6853_p1 = pnand %p6852_p0, %p6846_p11 }
  0x42   :  { %6856 = shalt.err (!%p6853_p1)
}
  0x43   :  { %102 = dma.hbm_to_vmem [thread:$0]  %s11352_s10, 448, %s97_s20, [#allocation12], %s6888_s28, %s6888_s28, %s6889_s29  }
  0x44   :  { %6877 = dma.done.wait [#allocation3], 256  }
  0x45   :  { %6878 = vsyncadd [#allocation3], 4294967040 }
  0x46   :  { %6879 = dma.done.wait [#allocation6], 8192  }
  0x47   :  { %6880 = vsyncadd [#allocation6], 4294959104 }
  0x48   :  { %6881 = dma.done.wait [#allocation9], 1152  }
  0x49   :  { %6882 = vsyncadd [#allocation9], 4294966144 }
  0x4a   :  { %6883 = dma.done.wait [#allocation12], 448  }
  0x4b   :  { %6884 = vsyncadd [#allocation12], 4294966848  ;;  %v11361_v0 = vmov 0   ;;  %v160_v1 = vld [vmem:[%s11342_s0 + $0x108] sm:$0xff]  ;;  %v158_v2 = vld [vmem:[%s11342_s0 + $0xf8] sm:$0xff]  ;;  %v408_v50 = vlaneseq  ;;  %vm554_vm0 = vcmask 1046528  }
  0x4c   :  { %6588 = vset.pattern.permute.xlu1 %v11361_v0  ;;  %6587 = vset.pattern.permute.xlu0 %v11361_v0  ;;  %v161_v3 = vld [vmem:[%s11342_s0 + $0x110] sm:$0xff]  ;;  %v159_v4 = vld [vmem:[%s11342_s0 + $0x100] sm:$0xff]  ;;  %v162_v5 = vld [vmem:[%s11342_s0 + $0x118] sm:$0xff]  ;;  %vm834_vm1 = vcmask 1045504   ;;  %vm1119_vm2 = vcmask 1041408   ;;  %vm1406_vm3 = vcmask 1040384  }
  0x4d   :  { %345 = vperm.xlu1 %6588, %v160_v1   ;;  %335 = vperm.xlu0 %6587, %v158_v2   ;;  %v142_v6 = vld [vmem:[%s11342_s0 + $0x78] sm:$0xff]  ;;  %v143_v7 = vld [vmem:[%s11342_s0 + $0x80] sm:$0xff]  ;;  %v144_v8 = vld [vmem:[%s11342_s0 + $0x88] sm:$0xff]  ;;  %v7151_v51 = vshrl.u32 %v408_v50, 7  ;;  %vm1789_vm4 = vcmask 1043456   ;;  %vm2069_vm5 = vcmask 1042432  }
  0x4e   :  { %v145_v9 = vld [vmem:[%s11342_s0 + $0x90] sm:$0xff]  ;;  %v146_v10 = vld [vmem:[%s11342_s0 + $0x98] sm:$0xff]  ;;  %v156_v13 = vld [vmem:[%s11342_s0 + $0xe8] sm:$0xff]  ;;  %vm3207_vm6 = vcmask 1044480   ;;  %vm6900_vm7 = vmmov 0   ;;  %vm3191_vm8 = vcmask 744448  }
  0x4f   :  { %v157_v11 = vld [vmem:[%s11342_s0 + $0xf0] sm:$0xff]  ;;  %v163_v14 = vld [vmem:[%s11342_s0 + $0x120] sm:$0xff]  ;;  %v140_v16 = vld [vmem:[%s11342_s0 + $0x68] sm:$0xff]  ;;  %11817 = vst [vmem:[#allocation19_spill] sm:$0xff] %v7151_v51  ;;  %v11362_v52 = vsub.s32 1, %v7151_v51  ;;  %v11360_v53 = vsub.s32 2, %v7151_v51 }
  0x50   :  { %v141_v12 = vld [vmem:[%s11342_s0 + $0x70] sm:$0xff]  ;;  %v147_v15 = vld [vmem:[%s11342_s0 + $0xa0] sm:$0xff]  ;;  %v154_v19 = vld [vmem:[%s11342_s0 + $0xd8] sm:$0xff]  ;;  %v11359_v55 = vsub.s32 3, %v7151_v51  ;;  %v410_v56 = vsub.s32 0, %v7151_v51  ;;  %v11358_v59 = vsub.s32 4, %v7151_v51 }
  0x51   :  { %350 = vperm.xlu1 %6588, %v161_v3   ;;  %340 = vperm.xlu0 %6587, %v159_v4   ;;  %v155_v17 = vld [vmem:[%s11342_s0 + $0xe0] sm:$0xff]  ;;  %v138_v20 = vld [vmem:[%s11342_s0 + $0x58] sm:$0xff]  ;;  %v164_v21 = vld [vmem:[%s11342_s0 + $0x128] sm:$0xff]  ;;  %v11357_v61 = vsub.s32 5, %v7151_v51  ;;  %v11356_v62 = vsub.s32 6, %v7151_v51  ;;  %v1975_v3 = vsub.s32 7, %v7151_v51 }
  0x52   :  { %v139_v18 = vld [vmem:[%s11342_s0 + $0x60] sm:$0xff]  ;;  %v165_v22 = vld [vmem:[%s11342_s0 + $0x130] sm:$0xff]  ;;  %v148_v23 = vld [vmem:[%s11342_s0 + $0xa8] sm:$0xff]  ;;  %vm3395_vm9 = vsmask.f32 7424  ;;  %vm4068_vm11 = vcmask 531456  }
  0x53   :  { %v149_v24 = vld [vmem:[%s11342_s0 + $0xb0] sm:$0xff]  ;;  %v170_v26 = vld [vmem:[%s11342_s0 + $0x158] sm:$0xff]  ;;  %v171_v27 = vld [vmem:[%s11342_s0 + $0x160] sm:$0xff]  ;;  %vm3862_vm10 = vsmask.f32 4352  ;;  %vm4791_vm13 = vcmask 310272  }
  0x54   :  { %v153_v25 = vld [vmem:[%s11342_s0 + $0xd0] sm:$0xff]  ;;  %v172_v28 = vld [vmem:[%s11342_s0 + $0x168] sm:$0xff]  ;;  %v151_v34 = vld [vmem:[%s11342_s0 + $0xc0] sm:$0xff]  ;;  %vm4440_vm12 = vsmask.f32 5376  ;;  %vm5283_vm14 = vcmask 39936  }
  0x55   :  { %355 = vperm.xlu0 %6587, %v162_v5   ;;  %255 = vperm.xlu1 %6588, %v142_v6   ;;  %v152_v29 = vld [vmem:[%s11342_s0 + $0xc8] sm:$0xff]  ;;  %v137_v30 = vld [vmem:[%s11342_s0 + $0x50] sm:$0xff]  ;;  %v150_v35 = vld [vmem:[%s11342_s0 + $0xb8] sm:$0xff] }
  0x56   :  { %v169_v31 = vld [vmem:[%s11342_s0 + $0x150] sm:$0xff]  ;;  %v136_v32 = vld [vmem:[%s11342_s0 + $0x48] sm:$0xff]  ;;  %v135_v36 = vld [vmem:[%s11342_s0 + $0x40] sm:$0xff] }
  0x57   :  { %v173_v33 = vld [vmem:[%s11342_s0 + $0x170] sm:$0xff]  ;;  %v168_v37 = vld [vmem:[%s11342_s0 + $0x148] sm:$0xff]  ;;  %v134_v38 = vld [vmem:[%s11342_s0 + $0x38] sm:$0xff] }
  0x58   :  { %v174_v39 = vld [vmem:[%s11342_s0 + $0x178] sm:$0xff]  ;;  %v133_v40 = vld [vmem:[%s11342_s0 + $0x30] sm:$0xff]  ;;  %v167_v41 = vld [vmem:[%s11342_s0 + $0x140] sm:$0xff] }
  0x59   :  { %260 = vperm.xlu0 %6587, %v143_v7   ;;  %265 = vperm.xlu1 %6588, %v144_v8   ;;  %v132_v42 = vld [vmem:[%s11342_s0 + $0x28] sm:$0xff]  ;;  %v166_v43 = vld [vmem:[%s11342_s0 + $0x138] sm:$0xff]  ;;  %v175_v44 = vld [vmem:[%s11342_s0 + $0x180] sm:$0xff] }
  0x5a   :  { %v131_v45 = vld [vmem:[%s11342_s0 + $0x20] sm:$0xff]  ;;  %v130_v46 = vld [vmem:[%s11342_s0 + $0x18] sm:$0xff]  ;;  %v129_v47 = vld [vmem:[%s11342_s0 + $0x10] sm:$0xff] }
  0x5b   :  { %v128_v48 = vld [vmem:[%s11342_s0 + $0x8] sm:$0xff]  ;;  %v127_v49 = vld [vmem:[%s11342_s0] sm:$0xff]  ;;  %v126_v7 = vld [vmem:[#allocation10] sm:$0xff] }
  0x5c   :  { %v176_v54 = vld [vmem:[#allocation2] sm:$0xff] }
  0x5d   :  { %270 = vperm.xlu0 %6587, %v145_v9   ;;  %275 = vperm.xlu1 %6588, %v146_v10   ;;  %v7159_v57 = vrot.slane %v176_v54, %v11362_v52  ;;  %v7163_v58 = vrot.slane %v176_v54, %v11360_v53  ;;  %v7168_v60 = vrot.slane %v176_v54, %v11359_v55 }
  0x5e   :  { %v7172_v63 = vrot.slane %v176_v54, %v410_v56  ;;  %v7193_v8 = vrot.slane %v176_v54, %v11358_v59  ;;  %v7201_v10 = vrot.slane %v176_v54, %v11357_v61 }
  0x60   :  { %11818 = vst [vmem:[#allocation20_spill] sm:$0xff] %v7172_v63 }
  0x61   :  { %330 = vperm.xlu0 %6587, %v157_v11   ;;  %250 = vperm.xlu1 %6588, %v141_v12   ;;  %v7205_v11 = vrot.slane %v176_v54, %v11356_v62 }
  0x65   :  { %325 = vperm.xlu0 %6587, %v156_v13   ;;  %360 = vperm.xlu1 %6588, %v163_v14  }
  0x69   :  { %280 = vperm.xlu1 %6588, %v147_v15   ;;  %245 = vperm.xlu0 %6587, %v140_v16   ;;  %v7219_v16 = vrot.slane %v176_v54, %v1975_v3 }
  0x6d   :  { %320 = vperm.xlu0 %6587, %v155_v17   ;;  %240 = vperm.xlu1 %6588, %v139_v18   ;;  %v7225_v18 = vrot.slane %v126_v7, %v410_v56 }
  0x6f   :  { %11820 = vst [vmem:[#allocation22_spill] sm:$0xff] %v7225_v18 }
  0x71   :  { %315 = vperm.xlu0 %6587, %v154_v19   ;;  %235 = vperm.xlu1 %6588, %v138_v20  }
  0x75   :  { %365 = vperm.xlu0 %6587, %v164_v21   ;;  %370 = vperm.xlu1 %6588, %v165_v22  }
  0x79   :  { %285 = vperm.xlu0 %6587, %v148_v23   ;;  %290 = vperm.xlu1 %6588, %v149_v24  }
  0x7d   :  { %310 = vperm.xlu0 %6587, %v153_v25   ;;  %395 = vperm.xlu1 %6588, %v170_v26  }
  0x81   :  { %400 = vperm.xlu0 %6587, %v171_v27   ;;  %405 = vperm.xlu1 %6588, %v172_v28  }
  0x85   :  { %305 = vperm.xlu1 %6588, %v152_v29   ;;  %230 = vperm.xlu0 %6587, %v137_v30  }
  0x89   :  { %390 = vperm.xlu1 %6588, %v169_v31   ;;  %225 = vperm.xlu0 %6587, %v136_v32  }
  0x8d   :  { %1020 = vperm.xlu1 %6588, %v173_v33   ;;  %300 = vperm.xlu0 %6587, %v151_v34  }
  0x91   :  { %295 = vperm.xlu1 %6588, %v150_v35   ;;  %220 = vperm.xlu0 %6587, %v135_v36  }
  0x95   :  { %385 = vperm.xlu1 %6588, %v168_v37   ;;  %215 = vperm.xlu0 %6587, %v134_v38  }
  0x99   :  { %1305 = vperm.xlu0 %6587, %v174_v39   ;;  %210 = vperm.xlu1 %6588, %v133_v40  }
  0x9d   :  { %380 = vperm.xlu0 %6587, %v167_v41   ;;  %205 = vperm.xlu1 %6588, %v132_v42  }
  0xa1   :  { %375 = vperm.xlu0 %6587, %v166_v43   ;;  %1690 = vperm.xlu1 %6588, %v175_v44  }
  0xa5   :  { %200 = vperm.xlu0 %6587, %v131_v45   ;;  %195 = vperm.xlu1 %6588, %v130_v46  }
  0xa9   :  { %190 = vperm.xlu0 %6587, %v129_v47   ;;  %185 = vperm.xlu1 %6588, %v128_v48  }
  0xad   :  { %180 = vperm.xlu0 %6587, %v127_v49  }
  0xc8   :  { %v7174_v1 = vpop.permute.xlu1 %345  ;;  %v7176_v2 = vpop.permute.xlu0 %335 }
  0xc9   :  { %11819 = vst [vmem:[#allocation21_spill] sm:$0xff] %v7176_v2  ;;  %v7181_v4 = vmul.f32 %v7159_v57, %v7174_v1  ;;  %v7185_v5 = vmul.f32 %v7163_v58, %v7174_v1  ;;  %v7189_v6 = vmul.f32 %v7159_v57, %v7176_v2  ;;  %v7197_v9 = vmul.f32 %v7163_v58, %v7176_v2 }
  0xca   :  { %v7209_v12 = vmul.f32 %v7168_v60, %v7176_v2  ;;  %v7213_v13 = vmul.f32 %v7172_v63, %v7174_v1  ;;  %v7223_v17 = vmul.f32 %v7168_v60, %v7174_v1  ;;  %v7232_v22 = vmul.f32 %v7172_v63, %v7176_v2 }
  0xcb   :  { %v11364_v19 = vrot.slane %v7181_v4, 1  ;;  %v7258_v30 = vmul.f32 %v7193_v8, %v7176_v2  ;;  %v7272_v36 = vmul.f32 %v7193_v8, %v7174_v1 }
  0xcc   :  { %v7215_v14 = vpop.permute.xlu1 %350  ;;  %v7217_v15 = vpop.permute.xlu0 %340 }
  0xcd   :  { %v7236_v23 = vmul.f32 %v7159_v57, %v7215_v14  ;;  %v7240_v24 = vmul.f32 %v7163_v58, %v7215_v14  ;;  %v7244_v25 = vmul.f32 %v7168_v60, %v7215_v14  ;;  %v7248_v26 = vmul.f32 %v7159_v57, %v7217_v15 }
  0xce   :  { %v7253_v28 = vmul.f32 %v7193_v8, %v7215_v14  ;;  %v7263_v32 = vmul.f32 %v7163_v58, %v7217_v15  ;;  %v446_v37 = vmul.f32 %v7172_v63, %v7215_v14  ;;  %v444_v38 = vmul.f32 %v7172_v63, %v7217_v15 }
  0xcf   :  { %v11368_v31 = vrot.slane %v7248_v26, 1  ;;  %v11365_v41 = vrot.slane %v7236_v23, 1  ;;  %v11367_v42 = vrot.slane %v7240_v24, 2  ;;  %v7291_v44 = vmul.f32 %v7168_v60, %v7217_v15 }
  0xd0   :  { %v7265_v33 = vpop.permute.xlu0 %355  ;;  %v7267_v34 = vpop.permute.xlu1 %255  ;;  %v7333_v55 = vmul.f32 %v7193_v8, %v7217_v15 }
  0xd1   :  { %11821 = vst [vmem:[#allocation23_spill] sm:$0xff] %v7265_v33  ;;  %11822 = vst [vmem:[#allocation24_spill] sm:$0xff] %v7267_v34  ;;  %v7280_v39 = vmul.f32 %v7159_v57, %v7265_v33  ;;  %v7284_v40 = vmul.f32 %v7163_v58, %v7265_v33  ;;  %v621_v46 = vsel %vm554_vm0, %v11368_v31, %v11364_v19 }
  0xd2   :  { %v7302_v48 = vmul.f32 %v7168_v60, %v7265_v33  ;;  %v7308_v54 = vmul.f32 %v7193_v8, %v7265_v33  ;;  %v7312_v56 = vmul.f32 %v7159_v57, %v7267_v34  ;;  %v7325_v61 = vmul.f32 %v7163_v58, %v7267_v34 }
  0xd3   :  { %11823 = vst [vmem:[#allocation25_spill] sm:$0xff] %v7280_v39  ;;  %11824 = vst [vmem:[#allocation26_spill] sm:$0xff] %v7284_v40  ;;  %v11363_v47 = vrot.slane %v7280_v39, 1  ;;  %v11366_v50 = vrot.slane %v7284_v40, 2  ;;  %v7329_v59 = vmul.f32 %v7168_v60, %v7267_v34  ;;  %v7335_v53 = vadd.f32 %v621_v46, %v444_v38 }
  0xd4   :  { %11825 = vst [vmem:[#allocation27_spill] sm:$0xff] %v7312_v56  ;;  %v7314_v3 = vpop.permute.xlu0 %260  ;;  %v7316_v7 = vpop.permute.xlu1 %265  ;;  %11828 = vst [vmem:[#allocation30_spill] sm:$0xff] %v7325_v61  ;;  %v7339_v52 = vmul.f32 %v7172_v63, %v7267_v34 }
  0xd5   :  { %11826 = vst [vmem:[#allocation28_spill] sm:$0xff] %v7314_v3  ;;  %11827 = vst [vmem:[#allocation29_spill] sm:$0xff] %v7316_v7  ;;  %v625_v62 = vsel %vm554_vm0, %v11365_v41, %v11363_v47  ;;  %v7343_v47 = vmul.f32 %v7159_v57, %v7314_v3  ;;  %v7348_v29 = vmul.f32 %v7163_v58, %v7314_v3 }
  0xd6   :  { %11829 = vst [vmem:[#allocation31_spill] sm:$0xff] %v7329_v59  ;;  %v726_v0 = vadd.f32 %v625_v62, %v446_v37  ;;  %11830 = vst [vmem:[#allocation32_spill] sm:$0xff] %v7339_v52  ;;  %v7352_v35 = vmul.f32 %v7168_v60, %v7314_v3  ;;  %v479_v62 = vmul.f32 %v7159_v57, %v7316_v7 }
  0xd7   :  { %11831 = vst [vmem:[#allocation33_spill] sm:$0xff] %v7343_v47  ;;  %11832 = vst [vmem:[#allocation34_spill] sm:$0xff] %v7348_v29  ;;  %v905_v37 = vsel %vm834_vm1, %v11367_v42, %v11366_v50  ;;  %v7365_v43 = vmul.f32 %v7172_v63, %v7314_v3  ;;  %v7375_v41 = vmul.f32 %v7163_v58, %v7316_v7  ;;  %v11848_v40 = vrot.slane %v7343_v47, 1 }
  0xd8   :  { %11833 = vst [vmem:[#allocation35_spill] sm:$0xff] %v7352_v35  ;;  %v7367_v20 = vpop.permute.xlu0 %270  ;;  %v7369_v49 = vpop.permute.xlu1 %275  ;;  %v7379_v46 = vadd.f32 %v905_v37, %v726_v0  ;;  %v7384_v42 = vmul.f32 %v7172_v63, %v7316_v7  ;;  %v588_v21 = vrot.slane %v479_v62, 1  ;;  %v7394_v45 = vmul.f32 %v7168_v60, %v7316_v7 }
  0xd9   :  { %11834 = vst [vmem:[#allocation36_spill] sm:$0xff] %v7365_v43  ;;  %11835 = vst [vmem:[#allocation37_spill] sm:$0xff] %v7367_v20  ;;  %v480_v50 = vmul.f32 %v7159_v57, %v7367_v20  ;;  %v7388_v27 = vmul.f32 %v7163_v58, %v7367_v20  ;;  %v430_v0 = vmul.f32 %v7172_v63, %v7367_v20 }
  0xda   :  { %11836 = vst [vmem:[#allocation38_spill] sm:$0xff] %v7369_v49  ;;  %11837 = vst [vmem:[#allocation39_spill] sm:$0xff] %v7375_v41  ;;  %v7400_v38 = vmul.f32 %v7159_v57, %v7369_v49  ;;  %v7404_v51 = vmul.f32 %v7163_v58, %v7369_v49  ;;  %v7414_v39 = vmul.f32 %v7168_v60, %v7367_v20 }
  0xdb   :  { %11838 = vst [vmem:[#allocation40_spill] sm:$0xff] %v7384_v42  ;;  %11839 = vst [vmem:[#allocation41_spill] sm:$0xff] %v7388_v27  ;;  %v590_v37 = vrot.slane %v480_v50, 1  ;;  %v7418_v50 = vmul.f32 %v7193_v8, %v7367_v20  ;;  %v7424_v3 = vmul.f32 %v7168_v60, %v7369_v49  ;;  %v7428_v62 = vmul.f32 %v7193_v8, %v7369_v49 }
  0xdc   :  { %11840 = vst [vmem:[#allocation42_spill] sm:$0xff] %v7394_v45  ;;  %11841 = vst [vmem:[#allocation43_spill] sm:$0xff] %v7400_v38  ;;  %v7406_v19 = vpop.permute.xlu0 %330  ;;  %v7408_v31 = vpop.permute.xlu1 %250  ;;  %v7433_v34 = vsel %vm554_vm0, %v11848_v40, %v588_v21  ;;  %v7446_v59 = vmul.f32 %v7172_v63, %v7369_v49  ;;  %v11851_v35 = vrot.slane %v7400_v38, 1  ;;  %v11857_v49 = vrot.slane %v7404_v51, 2 }
  0xdd   :  { %11842 = vst [vmem:[#allocation44_spill] sm:$0xff] %v7404_v51  ;;  %11843 = vst [vmem:[#allocation45_spill] sm:$0xff] %v7408_v31  ;;  %v7438_v2 = vmul.f32 %v7159_v57, %v7406_v19  ;;  %v7442_v7 = vmul.f32 %v7163_v58, %v7406_v19  ;;  %v7453_v40 = vmul.f32 %v7168_v60, %v7406_v19  ;;  %v11858_v42 = vrot.slane %v7388_v27, 2 }
  0xde   :  { %11844 = vst [vmem:[#allocation46_spill] sm:$0xff] %v7414_v39  ;;  %11845 = vst [vmem:[#allocation47_spill] sm:$0xff] %v7418_v50  ;;  %v593_v41 = vsel %vm554_vm0, %v590_v37, %v11851_v35  ;;  %v7457_v20 = vmul.f32 %v7193_v8, %v7406_v19  ;;  %v7464_v61 = vsel %vm554_vm0, %v588_v21, %v590_v37 }
  0xdf   :  { %11846 = vst [vmem:[#allocation48_spill] sm:$0xff] %v7424_v3  ;;  %11847 = vst [vmem:[#allocation49_spill] sm:$0xff] %v7428_v62  ;;  %v710_v35 = vadd.f32 %v593_v41, %v430_v0  ;;  %v873_v52 = vsel %vm834_vm1, %v11858_v42, %v11857_v49  ;;  %v7477_v47 = vmul.f32 %v7159_v57, %v7408_v31 }
  0xe0   :  { %11849 = vst [vmem:[#allocation50_spill] sm:$0xff] %v7433_v34  ;;  %11850 = vst [vmem:[#allocation51_spill] sm:$0xff] %v7446_v59  ;;  %v7459_v45 = vpop.permute.xlu0 %325  ;;  %v7461_v29 = vpop.permute.xlu1 %360  ;;  %v7483_v41 = vmul.f32 %v7163_v58, %v7408_v31  ;;  %v7487_v0 = vmul.f32 %v7168_v60, %v7408_v31  ;;  %v7493_v38 = vmul.f32 %v7193_v8, %v7408_v31 }
  0xe1   :  { %11852 = vst [vmem:[#allocation52_spill] sm:$0xff] %v7453_v40  ;;  %11853 = vst [vmem:[#allocation53_spill] sm:$0xff] %v7457_v20  ;;  %v7497_v59 = vmul.f32 %v7159_v57, %v7459_v45  ;;  %v990_v43 = vadd.f32 %v873_v52, %v710_v35  ;;  %v7505_v34 = vmul.f32 %v7172_v63, %v7408_v31 }
  0xe2   :  { %11854 = vst [vmem:[#allocation54_spill] sm:$0xff] %v7459_v45  ;;  %11855 = vst [vmem:[#allocation55_spill] sm:$0xff] %v7461_v29  ;;  %v7509_v49 = vmul.f32 %v7163_v58, %v7459_v45  ;;  %v7513_v42 = vmul.f32 %v7168_v60, %v7459_v45  ;;  %v7518_v20 = vmul.f32 %v7172_v63, %v7459_v45 }
  0xe3   :  { %11856 = vst [vmem:[#allocation56_spill] sm:$0xff] %v7464_v61  ;;  %11859 = vst [vmem:[#allocation57_spill] sm:$0xff] %v7477_v47  ;;  %v7522_v52 = vmul.f32 %v7193_v8, %v7459_v45  ;;  %v7526_v35 = vmul.f32 %v7168_v60, %v7461_v29  ;;  %v7532_v50 = vmul.f32 %v7159_v57, %v7461_v29 }
  0xe4   :  { %11860 = vst [vmem:[#allocation58_spill] sm:$0xff] %v7483_v41  ;;  %11861 = vst [vmem:[#allocation59_spill] sm:$0xff] %v7487_v0  ;;  %v7499_v37 = vpop.permute.xlu1 %280  ;;  %v7501_v21 = vpop.permute.xlu0 %245  ;;  %v7536_v51 = vmul.f32 %v7163_v58, %v7461_v29  ;;  %v7543_v27 = vmul.f32 %v7193_v8, %v7461_v29  ;;  %v7553_v61 = vmul.f32 %v7172_v63, %v7461_v29 }
  0xe5   :  { %11862 = vst [vmem:[#allocation60_spill] sm:$0xff] %v7493_v38  ;;  %11863 = vst [vmem:[#allocation61_spill] sm:$0xff] %v7497_v59  ;;  %v7562_v39 = vmul.f32 %v7201_v10, %v7461_v29  ;;  %v7566_v38 = vmul.f32 %v7159_v57, %v7499_v37  ;;  %v7570_v41 = vmul.f32 %v7193_v8, %v7499_v37 }
  0xe6   :  { %11864 = vst [vmem:[#allocation62_spill] sm:$0xff] %v7499_v37  ;;  %11865 = vst [vmem:[#allocation63_spill] sm:$0xff] %v7501_v21  ;;  %v7589_v0 = vmul.f32 %v7172_v63, %v7499_v37 }
  0xe7   :  { %11866 = vst [vmem:[#allocation64_spill] sm:$0xff] %v7505_v34  ;;  %11867 = vst [vmem:[#allocation65_spill] sm:$0xff] %v7509_v49  ;;  %v11884_v49 = vrot.slane %v7302_v48, 6  ;;  %v7609_v34 = vmul.f32 %v7159_v57, %v7501_v21 }
  0xe8   :  { %11868 = vst [vmem:[#allocation66_spill] sm:$0xff] %v7513_v42  ;;  %11869 = vst [vmem:[#allocation67_spill] sm:$0xff] %v7518_v20  ;;  %v7545_v31 = vpop.permute.xlu0 %320  ;;  %v7547_v40 = vpop.permute.xlu1 %240  ;;  %v7557_v20 = vmul.f32 %v7168_v60, %v7499_v37  ;;  %v7576_v42 = vmul.f32 %v7163_v58, %v7499_v37 }
  0xe9   :  { %11870 = vst [vmem:[#allocation68_spill] sm:$0xff] %v7522_v52  ;;  %11871 = vst [vmem:[#allocation69_spill] sm:$0xff] %v7526_v35  ;;  %v11883_v52 = vrot.slane %v7526_v35, 6  ;;  %v11888_v35 = vrot.slane %v7424_v3, 6  ;;  %v7677_v56 = vmul.f32 %v7172_v63, %v7547_v40 }
  0xea   :  { %11872 = vst [vmem:[#allocation70_spill] sm:$0xff] %v7532_v50  ;;  %11873 = vst [vmem:[#allocation71_spill] sm:$0xff] %v7536_v51  ;;  %v11435_v45 = vrot.slane %v7557_v20, 6 }
  0xeb   :  { %11874 = vst [vmem:[#allocation72_spill] sm:$0xff] %v7543_v27  ;;  %11875 = vst [vmem:[#allocation73_spill] sm:$0xff] %v7545_v31  ;;  %v7584_v59 = vsel %vm1119_vm2, %v11884_v49, %v11883_v52  ;;  %v1614_v49 = vmul.f32 %v7201_v10, %v7499_v37  ;;  %v7605_v52 = vmul.f32 %v7205_v11, %v7499_v37  ;;  %v11893_v37 = vrot.slane %v7570_v41, 7 }
  0xec   :  { %11876 = vst [vmem:[#allocation74_spill] sm:$0xff] %v7547_v40  ;;  %11877 = vst [vmem:[#allocation75_spill] sm:$0xff] %v7553_v61  ;;  %v7592_v51 = vpop.permute.xlu0 %315  ;;  %v7594_v50 = vpop.permute.xlu1 %235  ;;  %v1158_v47 = vsel %vm1119_vm2, %v11888_v35, %v11435_v45  ;;  %v7618_v35 = vmul.f32 %v7168_v60, %v7501_v21  ;;  %v7628_v61 = vmul.f32 %v7193_v8, %v7501_v21 }
  0xed   :  { %11878 = vst [vmem:[#allocation76_spill] sm:$0xff] %v7557_v20  ;;  %11879 = vst [vmem:[#allocation77_spill] sm:$0xff] %v7562_v39  ;;  %v7614_v20 = vmul.f32 %v7163_v58, %v7501_v21  ;;  %v7640_v45 = vmul.f32 %v7172_v63, %v7545_v31 }
  0xee   :  { %11880 = vst [vmem:[#allocation78_spill] sm:$0xff] %v7566_v38  ;;  %11881 = vst [vmem:[#allocation79_spill] sm:$0xff] %v7570_v41  ;;  %v7636_v38 = vmul.f32 %v7172_v63, %v7501_v21  ;;  %v7661_v21 = vmul.f32 %v7159_v57, %v7547_v40 }
  0xef   :  { %11882 = vst [vmem:[#allocation80_spill] sm:$0xff] %v7576_v42  ;;  %11885 = vst [vmem:[#allocation81_spill] sm:$0xff] %v7589_v0  ;;  %v1275_v0 = vadd.f32 %v1158_v47, %v990_v43  ;;  %v7632_v43 = vmul.f32 %v7159_v57, %v7545_v31  ;;  %v7671_v42 = vmul.f32 %v7168_v60, %v7547_v40 }
  0xf0   :  { %11886 = vst [vmem:[#allocation82_spill] sm:$0xff] %v7592_v51  ;;  %11887 = vst [vmem:[#allocation83_spill] sm:$0xff] %v7594_v50  ;;  %v7648_v41 = vpop.permute.xlu1 %370 }
  0xf1   :  { %11889 = vst [vmem:[#allocation84_spill] sm:$0xff] %v7605_v52  ;;  %11890 = vst [vmem:[#allocation85_spill] sm:$0xff] %v7609_v34  ;;  %v11894_v52 = vrot.slane %v7428_v62, 7  ;;  %v7667_v62 = vmul.f32 %v7163_v58, %v7547_v40  ;;  %v7692_v34 = vmul.f32 %v7163_v58, %v7592_v51  ;;  %v7782_v18 = vmul.f32 %v7172_v63, %v7648_v41 }
  0xf2   :  { %11891 = vst [vmem:[#allocation86_spill] sm:$0xff] %v7614_v20  ;;  %11892 = vst [vmem:[#allocation87_spill] sm:$0xff] %v7618_v35  ;;  %v7688_v20 = vmul.f32 %v7159_v57, %v7592_v51 }
  0xf3   :  { %v1445_v3 = vsel %vm1406_vm3, %v11894_v52, %v11893_v37  ;;  %11895 = vst [vmem:[#allocation88_spill] sm:$0xff] %v7628_v61  ;;  %11896 = vst [vmem:[#allocation89_spill] sm:$0xff] %v7632_v43  ;;  %v7644_v37 = vmul.f32 %v7163_v58, %v7545_v31  ;;  %v7646_v52 = vpop.permute.xlu0 %365  ;;  %v7709_v43 = vmul.f32 %v7172_v63, %v7592_v51 }
  0xf4   :  { %v1564_v47 = vadd.f32 %v1445_v3, %v1275_v0  ;;  %11897 = vst [vmem:[#allocation90_spill] sm:$0xff] %v7636_v38  ;;  %11898 = vst [vmem:[#allocation91_spill] sm:$0xff] %v7640_v45  ;;  %v7653_v3 = vmul.f32 %v7168_v60, %v7545_v31  ;;  %v7657_v0 = vmul.f32 %v7193_v8, %v7545_v31  ;;  %v7694_v31 = vpop.permute.xlu1 %290 }
  0xf5   :  { %11899 = vst [vmem:[#allocation92_spill] sm:$0xff] %v7644_v37  ;;  %11900 = vst [vmem:[#allocation93_spill] sm:$0xff] %v7646_v52  ;;  %v7681_v38 = vmul.f32 %v7193_v8, %v7547_v40  ;;  %v7713_v61 = vmul.f32 %v7193_v8, %v7592_v51  ;;  %v7718_v40 = vmul.f32 %v7159_v57, %v7594_v50 }
  0xf6   :  { %11901 = vst [vmem:[#allocation94_spill] sm:$0xff] %v7648_v41  ;;  %11902 = vst [vmem:[#allocation95_spill] sm:$0xff] %v7653_v3  ;;  %v7683_v45 = vadd.f32 %v1614_v49, %v1564_v47  ;;  %v7701_v49 = vmul.f32 %v7168_v60, %v7592_v51  ;;  %v7726_v37 = vmul.f32 %v7168_v60, %v7594_v50 }
  0xf7   :  { %11903 = vst [vmem:[#allocation96_spill] sm:$0xff] %v7657_v0  ;;  %11904 = vst [vmem:[#allocation97_spill] sm:$0xff] %v7661_v21  ;;  %v7703_v47 = vpop.permute.xlu0 %285  ;;  %v7722_v0 = vmul.f32 %v7163_v58, %v7594_v50  ;;  %v7732_v51 = vmul.f32 %v7172_v63, %v7594_v50  ;;  %v7747_v35 = vmul.f32 %v7163_v58, %v7646_v52 }
  0xf8   :  { %11905 = vst [vmem:[#allocation98_spill] sm:$0xff] %v7667_v62  ;;  %11906 = vst [vmem:[#allocation99_spill] sm:$0xff] %v7671_v42  ;;  %v7751_v42 = vmul.f32 %v7168_v60, %v7646_v52  ;;  %v7760_v3 = vmul.f32 %v7159_v57, %v7648_v41  ;;  %v7793_v21 = vmul.f32 %v7205_v11, %v7648_v41 }
  0xf9   :  { %11907 = vst [vmem:[#allocation100_spill] sm:$0xff] %v7677_v56  ;;  %11908 = vst [vmem:[#allocation101_spill] sm:$0xff] %v7681_v38  ;;  %v7736_v56 = vmul.f32 %v7193_v8, %v7594_v50  ;;  %v7738_v38 = vpop.permute.xlu1 %395  ;;  %v7756_v50 = vmul.f32 %v7193_v8, %v7646_v52  ;;  %v7811_v62 = vmul.f32 %v7163_v58, %v7703_v47 }
  0xfa   :  { %11909 = vst [vmem:[#allocation102_spill] sm:$0xff] %v7683_v45  ;;  %11910 = vst [vmem:[#allocation103_spill] sm:$0xff] %v7688_v20  ;;  %v7778_v45 = vmul.f32 %v7172_v63, %v7646_v52  ;;  %v7786_v20 = vmul.f32 %v7193_v8, %v7648_v41 }
  0xfb   :  { %11911 = vst [vmem:[#allocation104_spill] sm:$0xff] %v7692_v34  ;;  %11912 = vst [vmem:[#allocation105_spill] sm:$0xff] %v7694_v31  ;;  %v7826_v34 = vmul.f32 %v7159_v57, %v7694_v31 }
  0xfc   :  { %11913 = vst [vmem:[#allocation106_spill] sm:$0xff] %v7701_v49  ;;  %11914 = vst [vmem:[#allocation107_spill] sm:$0xff] %v7703_v47  ;;  %v7764_v49 = vmul.f32 %v7163_v58, %v7648_v41 }
  0xfd   :  { %11915 = vst [vmem:[#allocation108_spill] sm:$0xff] %v7709_v43  ;;  %11916 = vst [vmem:[#allocation109_spill] sm:$0xff] %v7713_v61  ;;  %v7743_v43 = vmul.f32 %v7159_v57, %v7646_v52  ;;  %v7773_v61 = vpop.permute.xlu0 %310 }
  0xfe   :  { %11917 = vst [vmem:[#allocation110_spill] sm:$0xff] %v7718_v40  ;;  %11918 = vst [vmem:[#allocation111_spill] sm:$0xff] %v7722_v0  ;;  %v7800_v0 = vmul.f32 %v7219_v16, %v7648_v41  ;;  %v7802_v40 = vpop.permute.xlu1 %405 }
  0xff   :  { %11919 = vst [vmem:[#allocation112_spill] sm:$0xff] %v7726_v37  ;;  %11920 = vst [vmem:[#allocation113_spill] sm:$0xff] %v7732_v51  ;;  %v7771_v51 = vmul.f32 %v7168_v60, %v7648_v41  ;;  %v7807_v37 = vmul.f32 %v7159_v57, %v7703_v47 }
 0x100   :  { %11921 = vst [vmem:[#allocation114_spill] sm:$0xff] %v7736_v56  ;;  %11922 = vst [vmem:[#allocation115_spill] sm:$0xff] %v7738_v38  ;;  %v7839_v56 = vmul.f32 %v7172_v63, %v7703_v47 }
 0x101   :  { %11923 = vst [vmem:[#allocation116_spill] sm:$0xff] %v7743_v43  ;;  %11924 = vst [vmem:[#allocation117_spill] sm:$0xff] %v7747_v35  ;;  %v7845_v43 = vpop.permute.xlu0 %400 }
 0x102   :  { %11925 = vst [vmem:[#allocation118_spill] sm:$0xff] %v7751_v42  ;;  %11926 = vst [vmem:[#allocation119_spill] sm:$0xff] %v7756_v50  ;;  %v7822_v50 = vmul.f32 %v7193_v8, %v7703_v47  ;;  %v7830_v42 = vmul.f32 %v7163_v58, %v7694_v31  ;;  %v7874_v52 = vpop.permute.xlu1 %305  ;;  %v7942_v39 = vmul.f32 %v7168_v60, %v7845_v43 }
 0x103   :  { %11927 = vst [vmem:[#allocation120_spill] sm:$0xff] %v7760_v3  ;;  %11928 = vst [vmem:[#allocation121_spill] sm:$0xff] %v7764_v49  ;;  %v7850_v3 = vmul.f32 %v7205_v11, %v7703_v47  ;;  %v7865_v49 = vmul.f32 %v7205_v11, %v7694_v31 }
 0x104   :  { %11929 = vst [vmem:[#allocation122_spill] sm:$0xff] %v7771_v51  ;;  %11930 = vst [vmem:[#allocation123_spill] sm:$0xff] %v7773_v61  ;;  %v7854_v51 = vmul.f32 %v7172_v63, %v7694_v31 }
 0x105   :  { %11931 = vst [vmem:[#allocation124_spill] sm:$0xff] %v7778_v45  ;;  %11932 = vst [vmem:[#allocation125_spill] sm:$0xff] %v7782_v18  ;;  %v7815_v45 = vmul.f32 %v7168_v60, %v7703_v47  ;;  %v7817_v18 = vld [vmem:[#allocation2 + $0x8] ss:$0 sm:$0xff]  ;;  %v7887_v47 = vmul.f32 %v7163_v58, %v7773_v61 }
 0x106   :  { %11933 = vst [vmem:[#allocation126_spill] sm:$0xff] %v7786_v20  ;;  %11934 = vst [vmem:[#allocation127_spill] sm:$0xff] %v7793_v21  ;;  %v7835_v35 = vmul.f32 %v7817_v18, %v7648_v41  ;;  %v7843_v20 = vmul.f32 %v7168_v60, %v7694_v31  ;;  %v7858_v41 = vmul.f32 %v7193_v8, %v7694_v31  ;;  %v7944_v33 = vpop.permute.xlu1 %390 }
 0x107   :  { %11935 = vst [vmem:[#allocation128_spill] sm:$0xff] %v7800_v0  ;;  %11936 = vst [vmem:[#allocation129_spill] sm:$0xff] %v7807_v37  ;;  %v7872_v0 = vmul.f32 %v7219_v16, %v7694_v31  ;;  %v7879_v21 = vmul.f32 %v7817_v18, %v7694_v31  ;;  %v7900_v31 = vmul.f32 %v7159_v57, %v7738_v38 }
 0x108   :  { %11937 = vst [vmem:[#allocation130_spill] sm:$0xff] %v7811_v62  ;;  %11938 = vst [vmem:[#allocation131_spill] sm:$0xff] %v7815_v45  ;;  %v7905_v45 = vmul.f32 %v7172_v63, %v7773_v61  ;;  %v7920_v37 = vmul.f32 %v7193_v8, %v7738_v38  ;;  %v7935_v62 = vmul.f32 %v7172_v63, %v7738_v38 }
 0x109   :  { %11939 = vst [vmem:[#allocation132_spill] sm:$0xff] %v7822_v50  ;;  %11940 = vst [vmem:[#allocation133_spill] sm:$0xff] %v7826_v34  ;;  %v7924_v50 = vmul.f32 %v7159_v57, %v7845_v43  ;;  %v7950_v34 = vmul.f32 %v7168_v60, %v7802_v40  ;;  %v8002_v29 = vmul.f32 %v7159_v57, %v7944_v33 }
 0x10a   :  { %11941 = vst [vmem:[#allocation134_spill] sm:$0xff] %v7830_v42  ;;  %11942 = vst [vmem:[#allocation135_spill] sm:$0xff] %v7835_v35  ;;  %v7896_v35 = vmul.f32 %v7193_v8, %v7773_v61  ;;  %v7928_v42 = vmul.f32 %v7163_v58, %v7845_v43 }
 0x10b   :  { %11943 = vst [vmem:[#allocation136_spill] sm:$0xff] %v7839_v56  ;;  %11944 = vst [vmem:[#allocation137_spill] sm:$0xff] %v7843_v20  ;;  %v7883_v56 = vmul.f32 %v7159_v57, %v7773_v61  ;;  %v7915_v20 = vpop.permute.xlu0 %230 }
 0x10c   :  { %11945 = vst [vmem:[#allocation138_spill] sm:$0xff] %v7845_v43  ;;  %11946 = vst [vmem:[#allocation139_spill] sm:$0xff] %v7850_v3  ;;  %v7892_v3 = vmul.f32 %v7168_v60, %v7773_v61  ;;  %v7969_v61 = vmul.f32 %v7168_v60, %v7874_v52  ;;  %v8007_v43 = vmul.f32 %v7163_v58, %v7944_v33 }
 0x10d   :  { %11947 = vst [vmem:[#allocation140_spill] sm:$0xff] %v7854_v51  ;;  %11948 = vst [vmem:[#allocation141_spill] sm:$0xff] %v7858_v41  ;;  %v7909_v51 = vmul.f32 %v7163_v58, %v7738_v38  ;;  %v7913_v41 = vmul.f32 %v7168_v60, %v7738_v38 }
 0x10e   :  { %11949 = vst [vmem:[#allocation142_spill] sm:$0xff] %v7865_v49  ;;  %11950 = vst [vmem:[#allocation143_spill] sm:$0xff] %v7872_v0  ;;  %v7954_v0 = vmul.f32 %v7159_v57, %v7874_v52  ;;  %v7977_v49 = vmul.f32 %v7159_v57, %v7915_v20 }
 0x10f   :  { %11951 = vst [vmem:[#allocation144_spill] sm:$0xff] %v7874_v52  ;;  %11952 = vst [vmem:[#allocation145_spill] sm:$0xff] %v7879_v21  ;;  %v7979_v38 = vpop.permute.xlu0 %225 }
 0x110   :  { %11953 = vst [vmem:[#allocation146_spill] sm:$0xff] %v7883_v56  ;;  %11954 = vst [vmem:[#allocation147_spill] sm:$0xff] %v7887_v47  ;;  %v7998_v56 = vmul.f32 %v7172_v63, %v7915_v20  ;;  %v8015_v47 = vmul.f32 %v7193_v8, %v7944_v33 }
 0x111   :  { %11955 = vst [vmem:[#allocation148_spill] sm:$0xff] %v7892_v3  ;;  %11956 = vst [vmem:[#allocation149_spill] sm:$0xff] %v7896_v35  ;;  %v7961_v35 = vmul.f32 %v7163_v58, %v7874_v52  ;;  %v7988_v3 = vmul.f32 %v7168_v60, %v7915_v20 }
 0x112   :  { %11957 = vst [vmem:[#allocation150_spill] sm:$0xff] %v7900_v31  ;;  %11958 = vst [vmem:[#allocation151_spill] sm:$0xff] %v7905_v45  ;;  %v7965_v45 = vmul.f32 %v7172_v63, %v7874_v52 }
 0x113   :  { %11959 = vst [vmem:[#allocation152_spill] sm:$0xff] %v7909_v51  ;;  %11960 = vst [vmem:[#allocation153_spill] sm:$0xff] %v7913_v41  ;;  %v7973_v41 = vmul.f32 %v7193_v8, %v7874_v52  ;;  %v7992_v52 = vmul.f32 %v7193_v8, %v7915_v20  ;;  %v8011_v51 = vmul.f32 %v7168_v60, %v7944_v33 }
 0x114   :  { %11961 = vst [vmem:[#allocation154_spill] sm:$0xff] %v7915_v20  ;;  %11962 = vst [vmem:[#allocation155_spill] sm:$0xff] %v7920_v37  ;;  %v7984_v37 = vmul.f32 %v7163_v58, %v7915_v20 }
 0x115   :  { %11963 = vst [vmem:[#allocation156_spill] sm:$0xff] %v7928_v42  ;;  %11964 = vst [vmem:[#allocation157_spill] sm:$0xff] %v7935_v62  ;;  %v8029_v62 = vmul.f32 %v7159_v57, %v7979_v38  ;;  %v8044_v42 = vpop.permute.xlu0 %300 }
 0x116   :  { %11965 = vst [vmem:[#allocation158_spill] sm:$0xff] %v7942_v39  ;;  %11966 = vst [vmem:[#allocation159_spill] sm:$0xff] %v7944_v33  ;;  %v8022_v39 = vmul.f32 %v7172_v63, %v7944_v33  ;;  %v8084_v33 = vmul.f32 %v7163_v58, %v8044_v42 }
 0x117   :  { %11967 = vst [vmem:[#allocation160_spill] sm:$0xff] %v7950_v34  ;;  %11968 = vst [vmem:[#allocation161_spill] sm:$0xff] %v7954_v0  ;;  %v8034_v0 = vmul.f32 %v7172_v63, %v7979_v38  ;;  %v8042_v34 = vmul.f32 %v7168_v60, %v7979_v38 }
 0x118   :  { %11969 = vst [vmem:[#allocation162_spill] sm:$0xff] %v7961_v35  ;;  %11970 = vst [vmem:[#allocation163_spill] sm:$0xff] %v7965_v45  ;;  %v1021_v45 = vpop.permute.xlu1 %1020 }
 0x119   :  { %11971 = vst [vmem:[#allocation164_spill] sm:$0xff] %v7969_v61  ;;  %11972 = vst [vmem:[#allocation165_spill] sm:$0xff] %v7973_v41  ;;  %v8064_v35 = vmul.f32 %v7205_v11, %v1021_v45  ;;  %v8068_v20 = vmul.f32 %v7219_v16, %v1021_v45  ;;  %v8088_v61 = vmul.f32 %v7201_v10, %v1021_v45 }
 0x11a   :  { %11973 = vst [vmem:[#allocation166_spill] sm:$0xff] %v7977_v49  ;;  %11974 = vst [vmem:[#allocation167_spill] sm:$0xff] %v7979_v38 }
 0x11b   :  { %11975 = vst [vmem:[#allocation168_spill] sm:$0xff] %v7984_v37  ;;  %11976 = vst [vmem:[#allocation169_spill] sm:$0xff] %v7988_v3  ;;  %v8061_v3 = vmul.f32 %v7193_v8, %v1021_v45  ;;  %v8092_v37 = vmul.f32 %v7168_v60, %v8044_v42  ;;  %v12004_v41 = vrot.slane %v8064_v35, 4 }
 0x11c   :  { %11977 = vst [vmem:[#allocation170_spill] sm:$0xff] %v7992_v52  ;;  %11978 = vst [vmem:[#allocation171_spill] sm:$0xff] %v7998_v56  ;;  %v8038_v56 = vmul.f32 %v7163_v58, %v7979_v38  ;;  %v8058_v52 = vmul.f32 %v7168_v60, %v1021_v45 }
 0x11d   :  { %11979 = vst [vmem:[#allocation172_spill] sm:$0xff] %v8002_v29  ;;  %11980 = vst [vmem:[#allocation173_spill] sm:$0xff] %v8007_v43  ;;  %v8055_v29 = vmul.f32 %v7205_v11, %v7802_v40  ;;  %v8077_v43 = vpop.permute.xlu1 %295 }
 0x11e   :  { %11981 = vst [vmem:[#allocation174_spill] sm:$0xff] %v8011_v51  ;;  %11982 = vst [vmem:[#allocation175_spill] sm:$0xff] %v8015_v47  ;;  %v8071_v47 = vmul.f32 %v7817_v18, %v1021_v45  ;;  %v8075_v51 = vmul.f32 %v7159_v57, %v8044_v42  ;;  %v8128_v45 = vmul.f32 %v7163_v58, %v8077_v43 }
 0x11f   :  { %11983 = vst [vmem:[#allocation176_spill] sm:$0xff] %v8022_v39  ;;  %11984 = vst [vmem:[#allocation177_spill] sm:$0xff] %v8029_v62  ;;  %v8051_v39 = vmul.f32 %v7193_v8, %v7979_v38  ;;  %v8096_v38 = vmul.f32 %v7193_v8, %v8044_v42  ;;  %v8103_v62 = vmul.f32 %v7159_v57, %v8077_v43 }
 0x120   :  { %11985 = vst [vmem:[#allocation178_spill] sm:$0xff] %v8034_v0  ;;  %11986 = vst [vmem:[#allocation179_spill] sm:$0xff] %v8038_v56  ;;  %v11620_v0 = vrot.slane %v8055_v29, 4  ;;  %v8109_v56 = vmul.f32 %v7172_v63, %v8044_v42 }
 0x121   :  { %11987 = vst [vmem:[#allocation180_spill] sm:$0xff] %v8042_v34  ;;  %11988 = vst [vmem:[#allocation181_spill] sm:$0xff] %v8044_v42  ;;  %v442_v42 = vmul.f32 %v7172_v63, %v7406_v19 }
 0x122   :  { %11989 = vst [vmem:[#allocation182_spill] sm:$0xff] %v8051_v39  ;;  %11990 = vst [vmem:[#allocation183_spill] sm:$0xff] %v8055_v29  ;;  %v8119_v34 = vsel %vm1789_vm4, %v11620_v0, %v12004_v41  ;;  %v8124_v39 = vmul.f32 %v7172_v63, %v8077_v43  ;;  %v8134_v29 = vmul.f32 %v7168_v60, %v8077_v43 }
 0x123   :  { %11991 = vst [vmem:[#allocation184_spill] sm:$0xff] %v8058_v52  ;;  %11992 = vst [vmem:[#allocation185_spill] sm:$0xff] %v8061_v3  ;;  %v8138_v41 = vmul.f32 %v7193_v8, %v8077_v43 }
 0x124   :  { %11993 = vst [vmem:[#allocation186_spill] sm:$0xff] %v8068_v20  ;;  %11994 = vst [vmem:[#allocation187_spill] sm:$0xff] %v8071_v47 }
 0x125   :  { %11995 = vst [vmem:[#allocation188_spill] sm:$0xff] %v8075_v51  ;;  %11996 = vst [vmem:[#allocation189_spill] sm:$0xff] %v8077_v43  ;;  %v12013_v43 = vrot.slane %v7189_v6, 1 }
 0x126   :  { %11997 = vst [vmem:[#allocation190_spill] sm:$0xff] %v8084_v33  ;;  %11998 = vst [vmem:[#allocation191_spill] sm:$0xff] %v8088_v61  ;;  %v8112_v61 = vpop.permute.xlu0 %220  ;;  %v12018_v33 = vrot.slane %v7181_v4, 1 }
 0x127   :  { %11999 = vst [vmem:[#allocation192_spill] sm:$0xff] %v8092_v37  ;;  %12000 = vst [vmem:[#allocation193_spill] sm:$0xff] %v8096_v38  ;;  %v8143_v3 = vmul.f32 %v7172_v63, %v8112_v61  ;;  %v8153_v49 = vmul.f32 %v7163_v58, %v8112_v61  ;;  %v12014_v38 = vrot.slane %v7438_v2, 1  ;;  %v12015_v37 = vrot.slane %v7248_v26, 1 }
 0x128   :  { %12001 = vst [vmem:[#allocation194_spill] sm:$0xff] %v8103_v62  ;;  %12002 = vst [vmem:[#allocation195_spill] sm:$0xff] %v8109_v56  ;;  %v12020_v26 = vrot.slane %v7442_v7, 2 }
 0x129   :  { %12003 = vst [vmem:[#allocation196_spill] sm:$0xff] %v8112_v61  ;;  %12005 = vst [vmem:[#allocation197_spill] sm:$0xff] %v8119_v34  ;;  %v8147_v34 = vmul.f32 %v7159_v57, %v8112_v61  ;;  %v617_v0 = vsel %vm554_vm0, %v12014_v38, %v12013_v43  ;;  %v12019_v38 = vrot.slane %v7197_v9, 2  ;;  %v1181_v9 = vrot.slane %v7291_v44, 6 }
 0x12a   :  { %12006 = vst [vmem:[#allocation198_spill] sm:$0xff] %v8124_v39  ;;  %12007 = vst [vmem:[#allocation199_spill] sm:$0xff] %v8128_v45  ;;  %v12016_v39 = vmov %v12013_v43  ;;  %v722_v52 = vadd.f32 %v617_v0, %v442_v42  ;;  %v1468_v44 = vrot.slane %v7333_v55, 7  ;;  %v12034_v55 = vrot.slane %v7308_v54, 7 }
 0x12b   :  { %12008 = vst [vmem:[#allocation200_spill] sm:$0xff] %v8134_v29  ;;  %12009 = vst [vmem:[#allocation201_spill] sm:$0xff] %v8138_v41  ;;  %v619_v62 = vsel %vm554_vm0, %v12016_v39, %v12015_v37  ;;  %v897_v6 = vsel %vm834_vm1, %v12020_v26, %v12019_v38  ;;  %v12021_v39 = vrot.slane %v7263_v32, 2  ;;  %v12028_v26 = vrot.slane %v7223_v17, 6 }
 0x12c   :  { %12010 = vst [vmem:[#allocation202_spill] sm:$0xff] %v8143_v3  ;;  %12011 = vst [vmem:[#allocation203_spill] sm:$0xff] %v8147_v34  ;;  %v12017_v3 = vrot.slane %v7236_v23, 1  ;;  %v723_v47 = vadd.f32 %v619_v62, %v7232_v22  ;;  %v12022_v23 = vmov %v12019_v38  ;;  %v1002_v43 = vadd.f32 %v897_v6, %v722_v52 }
 0x12d   :  { %12012 = vst [vmem:[#allocation204_spill] sm:$0xff] %v8153_v49  ;;  %v899_v4 = vsel %vm834_vm1, %v12022_v23, %v12021_v39  ;;  %v12024_v42 = vmov %v12021_v39  ;;  %v12027_v38 = vrot.slane %v7244_v25, 6  ;;  %v12029_v39 = vrot.slane %v7302_v48, 6 }
 0x12e   :  { %v623_v56 = vsel %vm554_vm0, %v12018_v33, %v12017_v3  ;;  %v12023_v33 = vrot.slane %v7185_v5, 2  ;;  %v1003_v37 = vadd.f32 %v899_v4, %v723_v47  ;;  %v1291_v52 = vadd.f32 %v7584_v59, %v7379_v46 }
 0x12f   :  { %v725_v20 = vadd.f32 %v623_v56, %v7213_v13  ;;  %v12025_v13 = vrot.slane %v7240_v24, 2  ;;  %v1186_v32 = vsel %vm1119_vm2, %v12028_v26, %v12027_v38  ;;  %v12030_v24 = vmov %v12027_v38 }
 0x130   :  { %v901_v22 = vsel %vm834_vm1, %v12024_v42, %v12023_v33  ;;  %v12026_v56 = vmov %v12023_v33  ;;  %v1188_v5 = vsel %vm1119_vm2, %v12030_v24, %v12029_v39  ;;  %v12031_v6 = vrot.slane %v7209_v12, 6 }
 0x131   :  { %v903_v62 = vsel %vm834_vm1, %v12026_v56, %v12025_v13  ;;  %v1004_v3 = vadd.f32 %v901_v22, %v7335_v53  ;;  %v12032_v4 = vmov %v12028_v26  ;;  %v11643_v25 = vrot.slane %v7258_v30, 7 }
 0x132   :  { %v1005_v0 = vadd.f32 %v903_v62, %v725_v20  ;;  %v1182_v23 = vsel %vm1119_vm2, %v12031_v6, %v1181_v9  ;;  %v1184_v48 = vsel %vm1119_vm2, %v1181_v9, %v12032_v4  ;;  %v1470_v33 = vrot.slane %v7272_v36, 7 }
 0x133   :  { %v1289_v20 = vadd.f32 %v1186_v32, %v1004_v3  ;;  %v1287_v46 = vadd.f32 %v1182_v23, %v1002_v43  ;;  %v1288_v42 = vadd.f32 %v1184_v48, %v1003_v37  ;;  %v12033_v22 = vrot.slane %v7543_v27, 7  ;;  %v12039_v23 = vld [vmem:[#allocation77_spill] sm:$0xff]  ;;  %v12040_v48 = vld [vmem:[#allocation55_spill] sm:$0xff] }
 0x134   :  { %v1290_v47 = vadd.f32 %v1188_v5, %v1005_v0  ;;  %v1469_v17 = vsel %vm1406_vm3, %v11643_v25, %v1468_v44  ;;  %v1471_v56 = vsel %vm1406_vm3, %v1468_v44, %v1470_v33  ;;  %v12035_v62 = vmov %v12034_v55  ;;  %v12038_v5 = vld [vmem:[#allocation23_spill] sm:$0xff] }
 0x135   :  { %v1477_v13 = vsel %vm1406_vm3, %v12034_v55, %v12033_v22  ;;  %v12036_v36 = vrot.slane %v7253_v28, 7  ;;  %v1576_v9 = vadd.f32 %v1469_v17, %v1287_v46  ;;  %v1577_v38 = vadd.f32 %v1471_v56, %v1288_v42  ;;  %v12041_v46 = vld [vmem:[#allocation93_spill] sm:$0xff] }
 0x136   :  { %v1580_v43 = vadd.f32 %v1477_v13, %v1291_v52  ;;  %v1626_v39 = vmul.f32 %v7201_v10, %v7217_v15  ;;  %v1627_v24 = vmul.f32 %v7201_v10, %v7174_v1  ;;  %v1628_v54 = vmul.f32 %v7201_v10, %v7215_v14 }
 0x137   :  { %v1475_v3 = vsel %vm1406_vm3, %v12036_v36, %v12035_v62  ;;  %v12037_v37 = vmov %v12036_v36  ;;  %v1629_v52 = vmul.f32 %v7201_v10, %v12038_v5  ;;  %v8245_v28 = vmul.f32 %v7205_v11, %v7174_v1 }
 0x138   :  { %v1473_v0 = vsel %vm1406_vm3, %v1470_v33, %v12037_v37  ;;  %v1579_v26 = vadd.f32 %v1475_v3, %v1290_v47  ;;  %v1729_v47 = vmul.f32 %v7205_v11, %v12038_v5  ;;  %v1672_v44 = vadd.f32 %v1626_v39, %v1576_v9 }
 0x139   :  { %v1578_v32 = vadd.f32 %v1473_v0, %v1289_v20  ;;  %v1728_v20 = vmul.f32 %v7205_v11, %v7215_v14  ;;  %v1673_v6 = vadd.f32 %v1627_v24, %v1577_v38  ;;  %v1676_v4 = vadd.f32 %v12039_v23, %v1580_v43 }
 0x13a   :  { %v1730_v33 = vmul.f32 %v7205_v11, %v12040_v48  ;;  %v1731_v42 = vmul.f32 %v7205_v11, %v12041_v46  ;;  %v11639_v22 = vrot.slane %v8245_v28, 4  ;;  %v1853_v13 = vrot.slane %v1729_v47, 4  ;;  %v12042_v47 = vld [vmem:[#allocation127_spill] sm:$0xff] }
 0x13b   :  { %v1851_v55 = vrot.slane %v1728_v20, 4  ;;  %v8259_v56 = vmul.f32 %v7219_v16, %v7174_v1  ;;  %v2008_v62 = vmul.f32 %v7219_v16, %v7215_v14  ;;  %v2009_v36 = vmul.f32 %v7219_v16, %v12038_v5 }
 0x13c   :  { %v1855_v17 = vrot.slane %v1730_v33, 4  ;;  %v1674_v3 = vadd.f32 %v1628_v54, %v1578_v32  ;;  %v1675_v43 = vadd.f32 %v1629_v52, %v1579_v26  ;;  %v1857_v37 = vrot.slane %v1731_v42, 4 }
 0x13d   :  { %v2010_v0 = vmul.f32 %v7219_v16, %v12040_v48  ;;  %v1852_v9 = vsel %vm1789_vm4, %v11639_v22, %v1851_v55  ;;  %v1854_v38 = vsel %vm1789_vm4, %v1851_v55, %v1853_v13  ;;  %v2011_v24 = vmul.f32 %v7219_v16, %v12041_v46 }
 0x13e   :  { %v1856_v39 = vsel %vm1789_vm4, %v1853_v13, %v1855_v17  ;;  %v1858_v20 = vsel %vm1789_vm4, %v1855_v17, %v1857_v37  ;;  %v12043_v32 = vrot.slane %v12042_v47, 4  ;;  %v1957_v54 = vadd.f32 %v1852_v9, %v1672_v44 }
 0x13f   :  { %v1958_v52 = vadd.f32 %v1854_v38, %v1673_v6  ;;  %v1959_v23 = vadd.f32 %v1856_v39, %v1674_v3  ;;  %v11642_v33 = vrot.slane %v8259_v56, 5  ;;  %v2131_v42 = vrot.slane %v2008_v62, 5 }
 0x140   :  { %v1860_v26 = vsel %vm1789_vm4, %v1857_v37, %v12043_v32  ;;  %v2133_v59 = vrot.slane %v2009_v36, 5  ;;  %v2135_v53 = vrot.slane %v2010_v0, 5  ;;  %v2137_v55 = vrot.slane %v2011_v24, 5  ;;  %v12044_v37 = vld [vmem:[#allocation128_spill] sm:$0xff] }
 0x141   :  { %v8281_v13 = vmul.f32 %v7817_v18, %v7174_v1  ;;  %v2288_v17 = vmul.f32 %v7817_v18, %v7215_v14  ;;  %v1960_v51 = vadd.f32 %v1858_v20, %v1675_v43  ;;  %v1961_v22 = vadd.f32 %v1860_v26, %v1676_v4 }
 0x142   :  { %v2289_v44 = vmul.f32 %v7817_v18, %v12038_v5  ;;  %v2290_v6 = vmul.f32 %v7817_v18, %v12040_v48  ;;  %v2132_v62 = vsel %vm2069_vm5, %v11642_v33, %v2131_v42  ;;  %v2134_v36 = vsel %vm2069_vm5, %v2131_v42, %v2133_v59  ;;  %v12073_v5 = vld [vmem:[#allocation32_spill] sm:$0xff] }
 0x143   :  { %v2136_v1 = vsel %vm2069_vm5, %v2133_v59, %v2135_v53  ;;  %v2138_v3 = vsel %vm2069_vm5, %v2135_v53, %v2137_v55  ;;  %v12045_v14 = vrot.slane %v12044_v37, 5  ;;  %v2237_v43 = vadd.f32 %v2132_v62, %v1957_v54  ;;  %v12046_v59 = vld [vmem:[#allocation135_spill] sm:$0xff]  ;;  %v12065_v37 = vld [vmem:[#allocation57_spill] sm:$0xff] }
 0x144   :  { %v2238_v0 = vadd.f32 %v2134_v36, %v1958_v52  ;;  %v2239_v9 = vadd.f32 %v2136_v1, %v1959_v23  ;;  %v2291_v48 = vmul.f32 %v7817_v18, %v12041_v46  ;;  %v11641_v38 = vrot.slane %v8281_v13, 6 }
 0x145   :  { %v2140_v4 = vsel %vm2069_vm5, %v2137_v55, %v12045_v14  ;;  %v2410_v39 = vrot.slane %v2288_v17, 6  ;;  %v2412_v24 = vrot.slane %v2289_v44, 6  ;;  %v2240_v20 = vadd.f32 %v2138_v3, %v1960_v51  ;;  %v8312_v44 = vpop.permute.xlu1 %385 }
 0x146   :  { %v2241_v32 = vadd.f32 %v2140_v4, %v1961_v22  ;;  %v2414_v26 = vrot.slane %v2290_v6, 6  ;;  %v11640_v42 = vrot.slane %v12046_v59, 6  ;;  %v8304_v53 = vmul.f32 %v7168_v60, %v8112_v61  ;;  %12048 = vst [vmem:[#allocation55_spill] sm:$0xff] %v8312_v44  ;;  %v12049_v4 = vld [vmem:[#allocation22_spill] sm:$0xff]  ;;  %v12063_v6 = vld [vmem:[#allocation27_spill] sm:$0xff] }
 0x147   :  { %v2411_v54 = vsel %vm1119_vm2, %v11641_v38, %v2410_v39  ;;  %v2413_v52 = vsel %vm1119_vm2, %v2410_v39, %v2412_v24  ;;  %v2416_v23 = vrot.slane %v2291_v48, 6  ;;  %v12064_v59 = vrot.slane %v12063_v6, 1 }
 0x148   :  { %12047 = vst [vmem:[#allocation77_spill] sm:$0xff] %v8304_v53  ;;  %v2415_v17 = vsel %vm1119_vm2, %v2412_v24, %v2414_v26  ;;  %v2516_v51 = vadd.f32 %v2411_v54, %v2237_v43  ;;  %v2517_v22 = vadd.f32 %v2413_v52, %v2238_v0  ;;  %v8323_v43 = vmul.f32 %v7193_v8, %v8112_v61  ;;  %v12093_v61 = vld [vmem:[#allocation31_spill] sm:$0xff]  ;;  %v12107_v53 = vld [vmem:[#allocation29_spill] sm:$0xff] }
 0x149   :  { %v2417_v62 = vsel %vm1119_vm2, %v2414_v26, %v2416_v23  ;;  %v2419_v36 = vsel %vm1119_vm2, %v2416_v23, %v11640_v42  ;;  %v2518_v1 = vadd.f32 %v2415_v17, %v2239_v9  ;;  %v8328_v24 = vmul.f32 %v7159_v57, %v8312_v44 }
 0x14a   :  { %v2519_v3 = vadd.f32 %v2417_v62, %v2240_v20  ;;  %v2520_v14 = vadd.f32 %v2419_v36, %v2241_v32  ;;  %v2566_v48 = vadd.f32 %v12049_v4, %v2516_v51  ;;  %v2567_v39 = vadd.f32 %v12049_v4, %v2517_v22  ;;  %12050 = vst [vmem:[#allocation22_spill] sm:$0xff] %v8323_v43  ;;  %v12095_v43 = vld [vmem:[#allocation42_spill] sm:$0xff] }
 0x14b   :  { %v2568_v0 = vadd.f32 %v12049_v4, %v2518_v1  ;;  %12051 = vst [vmem:[#allocation205_spill] sm:$0xff] %v8328_v24  ;;  %v8332_v26 = vmul.f32 %v7163_v58, %v8312_v44  ;;  %v8341_v17 = vmul.f32 %v7168_v60, %v8312_v44  ;;  %v8345_v51 = vmul.f32 %v7193_v8, %v8312_v44  ;;  %v12091_v24 = vld [vmem:[#allocation35_spill] sm:$0xff] }
 0x14c   :  { %v2569_v9 = vadd.f32 %v12049_v4, %v2519_v3  ;;  %v8336_v20 = vadd.f32 %v12049_v4, %v2520_v14  ;;  %v2612_v32 = vmax.f32 %v2566_v48, 0.0  ;;  %v2613_v54 = vmax.f32 %v2567_v39, 0.0  ;;  %v8350_v3 = vpop.permute.xlu0 %215 }
 0x14d   :  { %12052 = vst [vmem:[#allocation206_spill] sm:$0xff] %v8332_v26  ;;  %v2614_v23 = vmax.f32 %v2568_v0, 0.0  ;;  %12054 = vst [vmem:[#allocation208_spill] sm:$0xff] %v8341_v17  ;;  %v8355_v39 = vmul.f32 %v7172_v63, %v8312_v44  ;;  %v8370_v33 = vmul.f32 %v7172_v63, %v8350_v3  ;;  %v12066_v47 = vrot.slane %v12065_v37, 1  ;;  %v12078_v17 = vld [vmem:[#allocation58_spill] sm:$0xff] }
 0x14e   :  { %12053 = vst [vmem:[#allocation207_spill] sm:$0xff] %v8336_v20  ;;  %12055 = vst [vmem:[#allocation209_spill] sm:$0xff] %v8345_v51  ;;  %v2615_v22 = vmax.f32 %v2569_v9, 0.0  ;;  %v11645_v62 = vmax.f32 %v8336_v20, 0.0  ;;  %v8348_v36 = vrot.slane %v2612_v32, 1  ;;  %v2733_v1 = vrot.slane %v2613_v54, 1 }
 0x14f   :  { %12056 = vst [vmem:[#allocation210_spill] sm:$0xff] %v8350_v3  ;;  %v2735_v48 = vrot.slane %v2614_v23, 1  ;;  %12057 = vst [vmem:[#allocation211_spill] sm:$0xff] %v8355_v39  ;;  %v12076_v51 = vld [vmem:[#allocation30_spill] sm:$0xff]  ;;  %v12079_v6 = vrot.slane %v12078_v17, 2 }
 0x150   :  { %v2734_v42 = vsel %vm554_vm0, %v8348_v36, %v2733_v1  ;;  %v2737_v9 = vrot.slane %v2615_v22, 1  ;;  %v8362_v52 = vrot.slane %v11645_v62, 1  ;;  %12059 = vst [vmem:[#allocation213_spill] sm:$0xff] %v8370_v33  ;;  %v8379_v62 = vmul.f32 %v7159_v57, %v8350_v3 }
 0x151   :  { %v2736_v55 = vsel %vm554_vm0, %v2733_v1, %v2735_v48  ;;  %v8381_v1 = vmax.f32 %v2612_v32, %v2734_v42  ;;  %v12070_v42 = vld [vmem:[#allocation64_spill] sm:$0xff] }
 0x152   :  { %12058 = vst [vmem:[#allocation212_spill] sm:$0xff] %v8362_v52  ;;  %v2738_v0 = vsel %vm554_vm0, %v2735_v48, %v2737_v9  ;;  %v2740_v25 = vsel %vm554_vm0, %v2737_v9, %v8362_v52  ;;  %v8375_v20 = vmax.f32 %v2613_v54, %v2736_v55  ;;  %12060 = vst [vmem:[#allocation214_spill] sm:$0xff] %v8379_v62  ;;  %v12067_v55 = vld [vmem:[#allocation33_spill] sm:$0xff]  ;;  %v12069_v52 = vmov %v12064_v59 }
 0x153   :  { %v8383_v14 = vmax.f32 %v2614_v23, %v2738_v0  ;;  %v8385_v38 = vmax.f32 %v2615_v22, %v2740_v25  ;;  %v585_v48 = vsel %vm554_vm0, %v12066_v47, %v12064_v59  ;;  %v12068_v54 = vrot.slane %v12067_v55, 1  ;;  %v12071_v23 = vld [vmem:[#allocation36_spill] sm:$0xff]  ;;  %v12072_v0 = vld [vmem:[#allocation50_spill] sm:$0xff] }
 0x154   :  { %v706_v32 = vadd.f32 %v585_v48, %v12070_v42  ;;  %v708_v25 = vadd.f32 %v12072_v0, %v12071_v23  ;;  %v12074_v47 = vld [vmem:[#allocation40_spill] sm:$0xff]  ;;  %v12077_v55 = vrot.slane %v12076_v51, 2  ;;  %v12083_v0 = vld [vmem:[#allocation39_spill] sm:$0xff] }
 0x155   :  { %12061 = vst [vmem:[#allocation215_spill] sm:$0xff] %v8383_v14  ;;  %12062 = vst [vmem:[#allocation216_spill] sm:$0xff] %v8385_v38  ;;  %v587_v46 = vsel %vm554_vm0, %v12069_v52, %v12068_v54  ;;  %v2965_v22 = vrot.slane %v8383_v14, 6  ;;  %v12075_v59 = vld [vmem:[#allocation56_spill] sm:$0xff]  ;;  %v12080_v54 = vld [vmem:[#allocation34_spill] sm:$0xff]  ;;  %v12084_v14 = vrot.slane %v12083_v0, 2 }
 0x156   :  { %v707_v44 = vadd.f32 %v587_v46, %v12073_v5  ;;  %v709_v9 = vadd.f32 %v12075_v59, %v12074_v47  ;;  %v865_v52 = vsel %vm834_vm1, %v12079_v6, %v12077_v55  ;;  %v12081_v48 = vrot.slane %v12080_v54, 2  ;;  %v12086_v46 = vld [vmem:[#allocation41_spill] sm:$0xff] }
 0x157   :  { %v12082_v42 = vmov %v12077_v55  ;;  %v12087_v47 = vrot.slane %v12086_v46, 2  ;;  %v12088_v59 = vmov %v12084_v14  ;;  %v12089_v55 = vrot.slane %v8375_v20, 6 }
 0x158   :  { %v867_v23 = vsel %vm834_vm1, %v12082_v42, %v12081_v48  ;;  %v12085_v27 = vmov %v12081_v48  ;;  %v12090_v51 = vrot.slane %v8385_v38, 6  ;;  %v986_v42 = vadd.f32 %v865_v52, %v706_v32  ;;  %v12098_v32 = vld [vmem:[#allocation46_spill] sm:$0xff] }
 0x159   :  { %v869_v5 = vsel %vm834_vm1, %v12085_v27, %v12084_v14  ;;  %v871_v26 = vsel %vm834_vm1, %v12088_v59, %v12087_v47  ;;  %v2966_v6 = vsel %vm1119_vm2, %v12089_v55, %v2965_v22  ;;  %v987_v39 = vadd.f32 %v867_v23, %v707_v44 }
 0x15a   :  { %v2968_v48 = vsel %vm1119_vm2, %v2965_v22, %v12090_v51  ;;  %v3067_v54 = vmax.f32 %v8381_v1, %v2966_v6  ;;  %v988_v14 = vadd.f32 %v869_v5, %v708_v25  ;;  %v989_v46 = vadd.f32 %v871_v26, %v709_v9  ;;  %v12101_v25 = vld [vmem:[#allocation48_spill] sm:$0xff] }
 0x15b   :  { %v3068_v27 = vmax.f32 %v8375_v20, %v2968_v48  ;;  %v12092_v0 = vrot.slane %v12091_v24, 6  ;;  %v12094_v47 = vrot.slane %v12093_v61, 6  ;;  %v12096_v55 = vrot.slane %v12095_v43, 6  ;;  %v12104_v24 = vld [vmem:[#allocation24_spill] sm:$0xff]  ;;  %v12116_v61 = vld [vmem:[#allocation139_spill] sm:$0xff] }
 0x15c   :  { %v12099_v44 = vrot.slane %v12098_v32, 6  ;;  %v12102_v26 = vrot.slane %v12101_v25, 6  ;;  %v12110_v25 = vld [vmem:[#allocation47_spill] sm:$0xff] }
 0x15d   :  { %v1150_v59 = vsel %vm1119_vm2, %v12094_v47, %v12092_v0  ;;  %v12097_v38 = vmov %v12092_v0  ;;  %v12100_v52 = vmov %v12096_v55  ;;  %v3114_v6 = vpack.c.bf16 %v3068_v27, %v3067_v54  ;;  %v12112_v27 = vld [vmem:[#allocation37_spill] sm:$0xff] }
 0x15e   :  { %v1152_v22 = vsel %vm1119_vm2, %v12097_v38, %v12096_v55  ;;  %v1154_v23 = vsel %vm1119_vm2, %v12100_v52, %v12099_v44  ;;  %v12103_v9 = vmov %v12099_v44  ;;  %v1271_v51 = vadd.f32 %v1150_v59, %v986_v42  ;;  %v12106_v55 = vld [vmem:[#allocation28_spill] sm:$0xff]  ;;  %v12108_v52 = vld [vmem:[#allocation49_spill] sm:$0xff] }
 0x15f   :  { %v1156_v5 = vsel %vm1119_vm2, %v12103_v9, %v12102_v26  ;;  %v1272_v48 = vadd.f32 %v1152_v22, %v987_v39  ;;  %v1273_v0 = vadd.f32 %v1154_v23, %v988_v14  ;;  %v8456_v38 = vmul.f32 %v7193_v8, %v12104_v24  ;;  %5879 = vmatprep.subr.bf16.mxu0 %v3114_v6  ;;  %v12113_v9 = vld [vmem:[#allocation38_spill] sm:$0xff] }
 0x160   :  { %v1274_v47 = vadd.f32 %v1156_v5, %v989_v46  ;;  %v1327_v43 = vmul.f32 %v7193_v8, %v12106_v55  ;;  %v1328_v44 = vmul.f32 %v7193_v8, %v12107_v53  ;;  %v12109_v32 = vrot.slane %v12108_v52, 7 }
 0x161   :  { %12105 = vst [vmem:[#allocation27_spill] sm:$0xff] %v8456_v38  ;;  %v12111_v26 = vrot.slane %v12110_v25, 7  ;;  %v1610_v39 = vmul.f32 %v7201_v10, %v12106_v55  ;;  %v1611_v54 = vmul.f32 %v7201_v10, %v12107_v53  ;;  %v1612_v14 = vmul.f32 %v7201_v10, %v12112_v27 }
 0x162   :  { %v11682_v46 = vrot.slane %v8456_v38, 7  ;;  %v1436_v59 = vrot.slane %v1327_v43, 7  ;;  %v1438_v22 = vrot.slane %v1328_v44, 7  ;;  %v1613_v5 = vmul.f32 %v7201_v10, %v12113_v9 }
 0x163   :  { %v1443_v42 = vsel %vm1406_vm3, %v12111_v26, %v12109_v32  ;;  %v8478_v6 = vmul.f32 %v7205_v11, %v12107_v53  ;;  %v1712_v52 = vmul.f32 %v7205_v11, %v12112_v27  ;;  %v1713_v32 = vmul.f32 %v7205_v11, %v12113_v9 }
 0x164   :  { %v1563_v23 = vadd.f32 %v1443_v42, %v1274_v47  ;;  %v1437_v26 = vsel %vm1406_vm3, %v11682_v46, %v1436_v59  ;;  %v1439_v43 = vsel %vm1406_vm3, %v1436_v59, %v1438_v22  ;;  %v12114_v47 = vrot.slane %v12110_v25, 7  ;;  %v12115_v42 = vld [vmem:[#allocation84_spill] sm:$0xff] }
 0x165   :  { %v1823_v33 = vrot.slane %v12115_v42, 4  ;;  %v1560_v41 = vadd.f32 %v1437_v26, %v1271_v51  ;;  %v1561_v29 = vadd.f32 %v1439_v43, %v1272_v48  ;;  %v11684_v34 = vrot.slane %v8478_v6, 4 }
 0x166   :  { %v1441_v44 = vsel %vm1406_vm3, %v1438_v22, %v12114_v47  ;;  %v1659_v49 = vadd.f32 %v1613_v5, %v1563_v23  ;;  %v1819_v55 = vrot.slane %v1712_v52, 4  ;;  %v1821_v24 = vrot.slane %v1713_v32, 4  ;;  %v12117_v22 = vld [vmem:[#allocation142_spill] sm:$0xff] }
 0x167   :  { %v1562_v45 = vadd.f32 %v1441_v44, %v1273_v0  ;;  %v1825_v38 = vrot.slane %v12116_v61, 4  ;;  %v1656_v17 = vadd.f32 %v1610_v39, %v1560_v41  ;;  %v1657_v46 = vadd.f32 %v1611_v54, %v1561_v29  ;;  %v12119_v54 = vld [vmem:[#allocation102_spill] sm:$0xff] }
 0x168   :  { %v8496_v25 = vmul.f32 %v7219_v16, %v12107_v53  ;;  %v1820_v51 = vsel %vm1789_vm4, %v11684_v34, %v1819_v55  ;;  %v1822_v48 = vsel %vm1789_vm4, %v1819_v55, %v1821_v24  ;;  %v1824_v0 = vsel %vm1789_vm4, %v1821_v24, %v1823_v33  ;;  %v12120_v52 = vld [vmem:[#allocation62_spill] sm:$0xff] }
 0x169   :  { %v1658_v37 = vadd.f32 %v1612_v14, %v1562_v45  ;;  %v1826_v59 = vsel %vm1789_vm4, %v1823_v33, %v1825_v38  ;;  %v12118_v23 = vrot.slane %v12117_v22, 4  ;;  %v1941_v29 = vadd.f32 %v1820_v51, %v1656_v17  ;;  %v12121_v33 = vld [vmem:[#allocation107_spill] sm:$0xff] }
 0x16a   :  { %v1942_v45 = vadd.f32 %v1822_v48, %v1657_v46  ;;  %v1944_v39 = vadd.f32 %v1826_v59, %v1659_v49  ;;  %v1992_v5 = vmul.f32 %v7219_v16, %v12112_v27  ;;  %v1993_v55 = vmul.f32 %v7219_v16, %v12113_v9  ;;  %v12122_v59 = vld [vmem:[#allocation143_spill] sm:$0xff] }
 0x16b   :  { %v1828_v61 = vsel %vm1789_vm4, %v1825_v38, %v12118_v23  ;;  %v1943_v41 = vadd.f32 %v1824_v0, %v1658_v37  ;;  %v1994_v24 = vmul.f32 %v7219_v16, %v12120_v52  ;;  %v1995_v32 = vmul.f32 %v7219_v16, %v12121_v33 }
 0x16c   :  { %v1945_v14 = vadd.f32 %v1828_v61, %v12119_v54  ;;  %v11683_v38 = vrot.slane %v8496_v25, 5  ;;  %v8519_v37 = vmul.f32 %v7817_v18, %v12107_v53  ;;  %v2099_v49 = vrot.slane %v1992_v5, 5 }
 0x16d   :  { %v2101_v17 = vrot.slane %v1993_v55, 5  ;;  %v2272_v46 = vmul.f32 %v7817_v18, %v12112_v27  ;;  %v2273_v26 = vmul.f32 %v7817_v18, %v12113_v9  ;;  %v2103_v43 = vrot.slane %v1994_v24, 5 }
 0x16e   :  { %v2105_v47 = vrot.slane %v1995_v32, 5  ;;  %v2274_v44 = vmul.f32 %v7817_v18, %v12120_v52  ;;  %v2275_v42 = vmul.f32 %v7817_v18, %v12121_v33  ;;  %v2100_v53 = vsel %vm2069_vm5, %v11683_v38, %v2099_v49 }
 0x16f   :  { %v2102_v51 = vsel %vm2069_vm5, %v2099_v49, %v2101_v17  ;;  %v11689_v48 = vrot.slane %v8519_v37, 6  ;;  %v2378_v27 = vrot.slane %v2272_v46, 6  ;;  %v2104_v0 = vsel %vm2069_vm5, %v2101_v17, %v2103_v43  ;;  %v12124_v17 = vld [vmem:[#allocation61_spill] sm:$0xff] }
 0x170   :  { %v2106_v9 = vsel %vm2069_vm5, %v2103_v43, %v2105_v47  ;;  %v12123_v23 = vrot.slane %v12122_v59, 5  ;;  %v2221_v54 = vadd.f32 %v2100_v53, %v1941_v29  ;;  %v2222_v5 = vadd.f32 %v2102_v51, %v1942_v45  ;;  %v12126_v43 = vld [vmem:[#allocation89_spill] sm:$0xff] }
 0x171   :  { %v2223_v55 = vadd.f32 %v2104_v0, %v1943_v41  ;;  %v2224_v52 = vadd.f32 %v2106_v9, %v1944_v39  ;;  %v2379_v32 = vsel %vm1119_vm2, %v11689_v48, %v2378_v27  ;;  %v2380_v49 = vrot.slane %v2273_v26, 6  ;;  %v12130_v39 = vld [vmem:[#allocation65_spill] sm:$0xff]  ;;  %v12163_v48 = vld [vmem:[#allocation156_spill] sm:$0xff] }
 0x172   :  { %v2108_v61 = vsel %vm2069_vm5, %v2105_v47, %v12123_v23  ;;  %v2382_v38 = vrot.slane %v2274_v44, 6  ;;  %v2384_v46 = vrot.slane %v2275_v42, 6  ;;  %v2500_v34 = vadd.f32 %v2379_v32, %v2221_v54  ;;  %v12132_v47 = vld [vmem:[#allocation92_spill] sm:$0xff]  ;;  %v12135_v54 = vld [vmem:[#allocation91_spill] sm:$0xff] }
 0x173   :  { %v2225_v24 = vadd.f32 %v2108_v61, %v1945_v14  ;;  %v12125_v22 = vrot.slane %v12124_v17, 1  ;;  %v12127_v33 = vrot.slane %v12126_v43, 1  ;;  %v12128_v29 = vrot.slane %v7438_v2, 1  ;;  %v12136_v17 = vld [vmem:[#allocation67_spill] sm:$0xff] }
 0x174   :  { %v12131_v14 = vrot.slane %v12130_v39, 2  ;;  %v12133_v53 = vrot.slane %v12132_v47, 2  ;;  %v2381_v44 = vsel %vm1119_vm2, %v2378_v27, %v2380_v49  ;;  %v2383_v42 = vsel %vm1119_vm2, %v2380_v49, %v2382_v38 }
 0x175   :  { %v613_v59 = vsel %vm554_vm0, %v12127_v33, %v12125_v22  ;;  %v12129_v45 = vmov %v12125_v22  ;;  %v2385_v51 = vsel %vm1119_vm2, %v2382_v38, %v2384_v46  ;;  %v12134_v22 = vrot.slane %v7879_v21, 6 }
 0x176   :  { %v615_v41 = vsel %vm554_vm0, %v12129_v45, %v12128_v29  ;;  %v893_v26 = vsel %vm834_vm1, %v12133_v53, %v12131_v14  ;;  %v2501_v33 = vadd.f32 %v2381_v44, %v2222_v5  ;;  %v2502_v0 = vadd.f32 %v2383_v42, %v2223_v55 }
 0x177   :  { %v2387_v2 = vsel %vm1119_vm2, %v2384_v46, %v12134_v22  ;;  %v2503_v9 = vadd.f32 %v2385_v51, %v2224_v52  ;;  %v2550_v61 = vadd.f32 %v12049_v4, %v2500_v34  ;;  %v720_v32 = vadd.f32 %v613_v59, %v12135_v54 }
 0x178   :  { %v2504_v23 = vadd.f32 %v2387_v2, %v2225_v24  ;;  %v721_v29 = vadd.f32 %v615_v41, %v12136_v17  ;;  %v12137_v27 = vrot.slane %v7442_v7, 2  ;;  %v12138_v49 = vmov %v12131_v14  ;;  %v12140_v24 = vld [vmem:[#allocation52_spill] sm:$0xff]  ;;  %v12142_v14 = vld [vmem:[#allocation66_spill] sm:$0xff] }
 0x179   :  { %v2551_v45 = vadd.f32 %v12049_v4, %v2501_v33  ;;  %v2552_v46 = vadd.f32 %v12049_v4, %v2502_v0  ;;  %v2553_v5 = vadd.f32 %v12049_v4, %v2503_v9  ;;  %v2596_v34 = vmax.f32 %v2550_v61, 0.0  ;;  %v12146_v9 = vld [vmem:[#allocation53_spill] sm:$0xff]  ;;  %v12148_v61 = vld [vmem:[#allocation68_spill] sm:$0xff] }
 0x17a   :  { %v895_v38 = vsel %vm834_vm1, %v12138_v49, %v12137_v27  ;;  %v8575_v55 = vadd.f32 %v12049_v4, %v2504_v23  ;;  %v1000_v52 = vadd.f32 %v893_v26, %v720_v32  ;;  %v12141_v41 = vrot.slane %v12140_v24, 6 }
 0x17b   :  { %v1001_v59 = vadd.f32 %v895_v38, %v721_v29  ;;  %v12143_v7 = vrot.slane %v12142_v14, 6  ;;  %v2597_v53 = vmax.f32 %v2551_v45, 0.0  ;;  %v2598_v44 = vmax.f32 %v2552_v46, 0.0 }
 0x17c   :  { %12139 = vst [vmem:[#allocation33_spill] sm:$0xff] %v8575_v55  ;;  %v2599_v42 = vmax.f32 %v2553_v5, 0.0  ;;  %v11687_v51 = vmax.f32 %v8575_v55, 0.0  ;;  %v8583_v22 = vrot.slane %v2596_v34, 1  ;;  %v12144_v2 = vrot.slane %v7209_v12, 6  ;;  %v8734_v55 = vpop.permute.xlu1 %210 }
 0x17d   :  { %v1178_v39 = vsel %vm1119_vm2, %v12143_v7, %v12141_v41  ;;  %v12145_v33 = vmov %v12141_v41  ;;  %v12147_v23 = vrot.slane %v12146_v9, 7  ;;  %v12149_v54 = vrot.slane %v12148_v61, 7  ;;  %12175 = vst [vmem:[#allocation34_spill] sm:$0xff] %v8734_v55 }
 0x17e   :  { %v1180_v26 = vsel %vm1119_vm2, %v12145_v33, %v12144_v2  ;;  %v1285_v0 = vadd.f32 %v1178_v39, %v1000_v52  ;;  %v2701_v17 = vrot.slane %v2597_v53, 1  ;;  %v2703_v29 = vrot.slane %v2598_v44, 1 }
 0x17f   :  { %v1465_v32 = vsel %vm1406_vm3, %v12149_v54, %v12147_v23  ;;  %v2705_v27 = vrot.slane %v2599_v42, 1  ;;  %v8597_v49 = vrot.slane %v11687_v51, 1  ;;  %v8602_v38 = vmul.f32 %v7163_v58, %v8350_v3  ;;  %v12156_v54 = vld [vmem:[#allocation21_spill] sm:$0xff] }
 0x180   :  { %v1286_v45 = vadd.f32 %v1180_v26, %v1001_v59  ;;  %v1574_v46 = vadd.f32 %v1465_v32, %v1285_v0  ;;  %v2702_v5 = vsel %vm554_vm0, %v8583_v22, %v2701_v17  ;;  %v2704_v52 = vsel %vm554_vm0, %v2701_v17, %v2703_v29 }
 0x181   :  { %12150 = vst [vmem:[#allocation64_spill] sm:$0xff] %v8597_v49  ;;  %12151 = vst [vmem:[#allocation36_spill] sm:$0xff] %v8602_v38  ;;  %v2706_v24 = vsel %vm554_vm0, %v2703_v29, %v2705_v27  ;;  %v2708_v41 = vsel %vm554_vm0, %v2705_v27, %v8597_v49  ;;  %v8610_v7 = vmax.f32 %v2597_v53, %v2704_v52  ;;  %v12154_v33 = vrot.slane %v7258_v30, 7 }
 0x182   :  { %v8612_v39 = vmax.f32 %v2598_v44, %v2706_v24  ;;  %v8614_v2 = vmax.f32 %v2599_v42, %v2708_v41  ;;  %v12155_v59 = vmov %v12147_v23  ;;  %v1624_v23 = vmul.f32 %v7201_v10, %v7406_v19 }
 0x183   :  { %v1467_v26 = vsel %vm1406_vm3, %v12155_v59, %v12154_v33  ;;  %v1625_v32 = vmul.f32 %v7201_v10, %v12156_v54  ;;  %v8627_v53 = vmul.f32 %v7205_v11, %v12156_v54  ;;  %v8629_v44 = vmax.f32 %v2596_v34, %v2702_v5 }
 0x184   :  { %12152 = vst [vmem:[#allocation50_spill] sm:$0xff] %v8612_v39  ;;  %12153 = vst [vmem:[#allocation32_spill] sm:$0xff] %v8614_v2  ;;  %v1575_v0 = vadd.f32 %v1467_v26, %v1286_v45  ;;  %v11690_v42 = vrot.slane %v8610_v7, 6  ;;  %v2933_v30 = vrot.slane %v8612_v39, 6  ;;  %v11686_v9 = vrot.slane %v8614_v2, 6  ;;  %v12165_v39 = vld [vmem:[#allocation152_spill] sm:$0xff] }
 0x185   :  { %v1670_v17 = vadd.f32 %v1624_v23, %v1574_v46  ;;  %v1726_v27 = vmul.f32 %v7205_v11, %v7217_v15  ;;  %v8638_v45 = vmul.f32 %v7219_v16, %v12156_v54  ;;  %v2006_v52 = vmul.f32 %v7219_v16, %v7217_v15 }
 0x186   :  { %v1671_v29 = vadd.f32 %v1625_v32, %v1575_v0  ;;  %v2934_v34 = vsel %vm1119_vm2, %v11690_v42, %v2933_v30  ;;  %v2936_v5 = vsel %vm1119_vm2, %v2933_v30, %v11686_v9  ;;  %v8650_v46 = vmul.f32 %v7817_v18, %v12156_v54 }
 0x187   :  { %v3051_v24 = vmax.f32 %v8629_v44, %v2934_v34  ;;  %v3052_v41 = vmax.f32 %v8610_v7, %v2936_v5  ;;  %v11688_v33 = vrot.slane %v8627_v53, 4  ;;  %v1847_v59 = vrot.slane %v1726_v27, 4 }
 0x188   :  { %v8657_v26 = vmul.f32 %v7168_v60, %v8350_v3  ;;  %v11692_v0 = vrot.slane %v8638_v45, 5  ;;  %v2127_v23 = vrot.slane %v2006_v52, 5  ;;  %v2286_v32 = vmul.f32 %v7817_v18, %v7217_v15 }
 0x189   :  { %v3106_v30 = vpack.c.bf16 %v3052_v41, %v3051_v24  ;;  %v1848_v54 = vsel %vm1789_vm4, %v11688_v33, %v1847_v59  ;;  %v12158_v34 = vrot.slane %v8245_v28, 4  ;;  %v12159_v27 = vrot.slane %v7924_v50, 1 }
 0x18a   :  { %12157 = vst [vmem:[#allocation40_spill] sm:$0xff] %v8657_v26  ;;  %v12160_v9 = vrot.slane %v7900_v31, 1  ;;  %v1955_v12 = vadd.f32 %v1848_v54, %v1670_v17  ;;  %v2128_v15 = vsel %vm2069_vm5, %v11692_v0, %v2127_v23  ;;  %v11698_v24 = vrot.slane %v8650_v46, 6  ;;  %v12201_v26 = vld [vmem:[#allocation98_spill] sm:$0xff] }
 0x18b   :  { %v1850_v5 = vsel %vm1789_vm4, %v1847_v59, %v12158_v34  ;;  %5880 = vmatpush3.bf16.msra.mxu0 %v3106_v30  ;;  %v12161_v41 = vrot.slane %v8259_v56, 5  ;;  %v2406_v59 = vrot.slane %v2286_v32, 6  ;;  %v12162_v34 = vld [vmem:[#allocation157_spill] sm:$0xff]  ;;  %v12164_v42 = vrot.slane %v12163_v48, 2 }
 0x18c   :  { %v643_v51 = vsel %vm554_vm0, %v12160_v9, %v12159_v27  ;;  %v1956_v52 = vadd.f32 %v1850_v5, %v1671_v29  ;;  %v12166_v9 = vrot.slane %v12165_v39, 2  ;;  %v2235_v29 = vadd.f32 %v2128_v15, %v1955_v12  ;;  %v12167_v5 = vld [vmem:[#allocation138_spill] sm:$0xff]  ;;  %v12170_v12 = vld [vmem:[#allocation160_spill] sm:$0xff] }
 0x18d   :  { %v2130_v28 = vsel %vm2069_vm5, %v2127_v23, %v12161_v41  ;;  %v735_v33 = vadd.f32 %v643_v51, %v12162_v34  ;;  %v8688_v27 = vmul.f32 %v7193_v8, %v12167_v5  ;;  %v8692_v56 = vmul.f32 %v7193_v8, %v7802_v40  ;;  %v1306_v23 = vpop.permute.xlu0 %1305  ;;  %v12172_v15 = vld [vmem:[#allocation158_spill] sm:$0xff] }
 0x18e   :  { %v923_v17 = vsel %vm834_vm1, %v12166_v9, %v12164_v42  ;;  %v2236_v54 = vadd.f32 %v2130_v28, %v1956_v52  ;;  %v2407_v51 = vsel %vm1119_vm2, %v11698_v24, %v2406_v59  ;;  %v12169_v32 = vrot.slane %v8281_v13, 6 }
 0x18f   :  { %12168 = vst [vmem:[#allocation56_spill] sm:$0xff] %v8688_v27  ;;  %v1015_v42 = vadd.f32 %v923_v17, %v735_v33  ;;  %v12171_v52 = vrot.slane %v12170_v12, 6  ;;  %v12173_v41 = vrot.slane %v12172_v15, 6  ;;  %v2514_v34 = vadd.f32 %v2407_v51, %v2235_v29 }
 0x190   :  { %v2409_v30 = vsel %vm1119_vm2, %v2406_v59, %v12169_v32  ;;  %v11696_v0 = vrot.slane %v8688_v27, 7  ;;  %v11697_v2 = vrot.slane %v8692_v56, 7  ;;  %v8710_v13 = vmul.f32 %v7193_v8, %v8350_v3 }
 0x191   :  { %v1208_v28 = vsel %vm1119_vm2, %v12173_v41, %v12171_v52  ;;  %v2515_v9 = vadd.f32 %v2409_v30, %v2236_v54  ;;  %v8713_v33 = vmul.f32 %v7205_v11, %v1306_v23  ;;  %v2564_v17 = vadd.f32 %v12049_v4, %v2514_v34 }
 0x192   :  { %12174 = vst [vmem:[#allocation30_spill] sm:$0xff] %v8710_v13  ;;  %v1300_v59 = vadd.f32 %v1208_v28, %v1015_v42  ;;  %v1495_v29 = vsel %vm1406_vm3, %v11696_v0, %v11697_v2  ;;  %v8723_v54 = vmul.f32 %v7219_v16, %v1306_v23  ;;  %v2961_v51 = vrot.slane %v8381_v1, 6  ;;  %v12198_v13 = vld [vmem:[#allocation90_spill] sm:$0xff] }
 0x193   :  { %v2565_v32 = vadd.f32 %v12049_v4, %v2515_v9  ;;  %v11701_v42 = vrot.slane %v8713_v33, 4  ;;  %v8728_v52 = vmul.f32 %v7817_v18, %v1306_v23  ;;  %v2610_v28 = vmax.f32 %v2564_v17, 0.0 }
 0x194   :  { %v1589_v30 = vadd.f32 %v1495_v29, %v1300_v59  ;;  %v8732_v9 = vmul.f32 %v7193_v8, %v1306_v23  ;;  %v1639_v1 = vmul.f32 %v7201_v10, %v7802_v40  ;;  %v12176_v17 = vrot.slane %v8064_v35, 4 }
 0x195   :  { %v2611_v34 = vmax.f32 %v2565_v32, 0.0  ;;  %v8741_v18 = vrot.slane %v2610_v28, 1  ;;  %v12177_v0 = vrot.slane %v8375_v20, 6  ;;  %v8753_v49 = vmul.f32 %v7201_v10, %v1306_v23 }
 0x196   :  { %v1878_v32 = vsel %vm1789_vm4, %v12176_v17, %v11701_v42  ;;  %v1685_v2 = vadd.f32 %v1639_v1, %v1589_v30  ;;  %v8757_v59 = vmul.f32 %v7159_v57, %v8734_v55  ;;  %v8766_v20 = vmul.f32 %v7172_v63, %v8734_v55  ;;  %v12182_v1 = vld [vmem:[#allocation186_spill] sm:$0xff]  ;;  %v12186_v17 = vld [vmem:[#allocation187_spill] sm:$0xff] }
 0x197   :  { %v2729_v29 = vrot.slane %v2611_v34, 1  ;;  %v2964_v24 = vsel %vm1119_vm2, %v2961_v51, %v12177_v0  ;;  %12178 = vst [vmem:[#allocation39_spill] sm:$0xff] %v8753_v49  ;;  %v12181_v30 = vrot.slane %v8723_v54, 5  ;;  %v12183_v42 = vrot.slane %v12182_v1, 5  ;;  %v12216_v49 = vld [vmem:[#allocation88_spill] sm:$0xff] }
 0x198   :  { %12179 = vst [vmem:[#allocation41_spill] sm:$0xff] %v8757_v59  ;;  %12180 = vst [vmem:[#allocation35_spill] sm:$0xff] %v8766_v20  ;;  %v1970_v23 = vadd.f32 %v1878_v32, %v1685_v2  ;;  %v8777_v3 = vmul.f32 %v7163_v58, %v8734_v55  ;;  %v12187_v27 = vrot.slane %v12186_v17, 6  ;;  %v12189_v2 = vld [vmem:[#allocation85_spill] sm:$0xff] }
 0x199   :  { %v2730_v21 = vsel %vm554_vm0, %v8741_v18, %v2729_v29  ;;  %v2732_v35 = vsel %vm554_vm0, %v2729_v29, %v8348_v36  ;;  %v2158_v41 = vsel %vm2069_vm5, %v12183_v42, %v12181_v30  ;;  %v12185_v29 = vrot.slane %v8728_v52, 6  ;;  %v12193_v42 = vld [vmem:[#allocation57_spill] sm:$0xff] }
 0x19a   :  { %v8768_v0 = vmax.f32 %v2611_v34, %v2732_v35  ;;  %12184 = vst [vmem:[#allocation42_spill] sm:$0xff] %v8777_v3  ;;  %v8779_v36 = vmax.f32 %v2610_v28, %v2730_v21  ;;  %v12190_v32 = vrot.slane %v12189_v2, 1  ;;  %v12191_v35 = vld [vmem:[#allocation97_spill] sm:$0xff]  ;;  %v12194_v30 = vrot.slane %v12193_v42, 1 }
 0x19b   :  { %v8786_v34 = vsel %vm1119_vm2, %v12187_v27, %v12185_v29  ;;  %v12192_v15 = vrot.slane %v12191_v35, 1  ;;  %v8802_v27 = vmul.f32 %v7168_v60, %v8734_v55  ;;  %v12197_v29 = vld [vmem:[#allocation100_spill] sm:$0xff]  ;;  %v12202_v2 = vrot.slane %v12201_v26, 2  ;;  %v12211_v26 = vld [vmem:[#allocation31_spill] sm:$0xff] }
 0x19c   :  { %12188 = vst [vmem:[#allocation46_spill] sm:$0xff] %v8786_v34  ;;  %v12195_v39 = vmov %v12190_v32  ;;  %v3066_v34 = vmax.f32 %v8768_v0, %v2964_v24  ;;  %v12206_v20 = vrot.slane %v8768_v0, 6  ;;  %v12207_v24 = vld [vmem:[#allocation59_spill] sm:$0xff]  ;;  %v12212_v35 = vrot.slane %v12211_v26, 6 }
 0x19d   :  { %v581_v1 = vsel %vm554_vm0, %v12192_v15, %v12190_v32  ;;  %v583_v21 = vsel %vm554_vm0, %v12195_v39, %v12194_v30  ;;  %12196 = vst [vmem:[#allocation48_spill] sm:$0xff] %v8802_v27  ;;  %v12199_v32 = vld [vmem:[#allocation86_spill] sm:$0xff]  ;;  %v12208_v59 = vrot.slane %v12207_v24, 6  ;;  %v12265_v3 = vrot.slane %v12148_v61, 7 }
 0x19e   :  { %v704_v17 = vadd.f32 %v581_v1, %v12197_v29  ;;  %v705_v15 = vadd.f32 %v583_v21, %v12198_v13  ;;  %v12200_v42 = vrot.slane %v12199_v32, 2  ;;  %v12203_v30 = vld [vmem:[#allocation58_spill] sm:$0xff]  ;;  %v2962_v1 = vsel %vm1119_vm2, %v12206_v20, %v2961_v51  ;;  %v12209_v13 = vld [vmem:[#allocation87_spill] sm:$0xff] }
 0x19f   :  { %v12204_v28 = vrot.slane %v12203_v30, 2  ;;  %v12210_v21 = vrot.slane %v12209_v13, 6  ;;  %v3065_v32 = vmax.f32 %v8779_v36, %v2962_v1  ;;  %v12217_v51 = vrot.slane %v12216_v49, 7  ;;  %v12218_v20 = vld [vmem:[#allocation27_spill] sm:$0xff] }
 0x1a0   :  { %v861_v39 = vsel %vm834_vm1, %v12202_v2, %v12200_v42  ;;  %v12205_v31 = vmov %v12200_v42  ;;  %v12213_v42 = vmov %v12208_v59  ;;  %v1724_v61 = vmul.f32 %v7205_v11, %v7406_v19 }
 0x1a1   :  { %v863_v38 = vsel %vm834_vm1, %v12205_v31, %v12204_v28  ;;  %v984_v29 = vadd.f32 %v861_v39, %v704_v17  ;;  %v1146_v62 = vsel %vm1119_vm2, %v12210_v21, %v12208_v59  ;;  %v1148_v2 = vsel %vm1119_vm2, %v12213_v42, %v12212_v35  ;;  %v12214_v28 = vld [vmem:[#allocation60_spill] sm:$0xff]  ;;  %v12221_v21 = vld [vmem:[#allocation45_spill] sm:$0xff] }
 0x1a2   :  { %v985_v31 = vadd.f32 %v863_v38, %v705_v15  ;;  %v12215_v30 = vrot.slane %v12214_v28, 7  ;;  %v12219_v39 = vrot.slane %v12218_v20, 7  ;;  %v1608_v24 = vmul.f32 %v7201_v10, %v12221_v21  ;;  %v12222_v35 = vld [vmem:[#allocation24_spill] sm:$0xff] }
 0x1a3   :  { %v1269_v26 = vadd.f32 %v1146_v62, %v984_v29  ;;  %v8845_v1 = vmul.f32 %v7205_v11, %v12222_v35  ;;  %v12223_v38 = vld [vmem:[#allocation28_spill] sm:$0xff]  ;;  %v3113_v42 = vpack.c.bf16 %v3066_v34, %v3065_v32  ;;  %v1609_v29 = vmul.f32 %v7201_v10, %v12222_v35 }
 0x1a4   :  { %v1433_v17 = vsel %vm1406_vm3, %v12217_v51, %v12215_v30  ;;  %v12220_v13 = vmov %v12215_v30  ;;  %v1710_v15 = vmul.f32 %v7205_v11, %v12223_v38  ;;  %v1270_v49 = vadd.f32 %v1148_v2, %v985_v31  ;;  %v8857_v51 = vld [vmem:[#allocation2 + $0x8] ss:$0 sm:$0xff] }
 0x1a5   :  { %v1435_v59 = vsel %vm1406_vm3, %v12220_v13, %v12219_v39  ;;  %v8851_v30 = vmul.f32 %v7219_v16, %v12222_v35  ;;  %v1990_v13 = vmul.f32 %v7219_v16, %v12223_v38  ;;  %v1558_v62 = vadd.f32 %v1433_v17, %v1269_v26  ;;  %5881 = vmatprep.subr.bf16.mxu0 %v3113_v42  ;;  %v8866_v39 = vpop.permute.xlu0 %380 }
 0x1a6   :  { %v1815_v28 = vrot.slane %v1710_v15, 4  ;;  %v8861_v20 = vmul.f32 %v8857_v51, %v12222_v35  ;;  %v1559_v34 = vadd.f32 %v1435_v59, %v1270_v49  ;;  %v11718_v2 = vrot.slane %v8845_v1, 4  ;;  %12224 = vst [vmem:[#allocation29_spill] sm:$0xff] %v8866_v39 }
 0x1a7   :  { %v2095_v32 = vrot.slane %v1990_v13, 5  ;;  %v2270_v31 = vmul.f32 %v8857_v51, %v12223_v38  ;;  %v8868_v17 = vadd.f32 %v2158_v41, %v1970_v23  ;;  %v8873_v15 = vmul.f32 %v7193_v8, %v8734_v55 }
 0x1a8   :  { %v1654_v35 = vadd.f32 %v1608_v24, %v1558_v62  ;;  %v1655_v21 = vadd.f32 %v1609_v29, %v1559_v34  ;;  %v1816_v49 = vsel %vm1789_vm4, %v11718_v2, %v1815_v28  ;;  %v11717_v59 = vrot.slane %v8851_v30, 5  ;;  %v12240_v2 = vld [vmem:[#allocation146_spill] sm:$0xff] }
 0x1a9   :  { %12225 = vst [vmem:[#allocation49_spill] sm:$0xff] %v8868_v17  ;;  %12226 = vst [vmem:[#allocation47_spill] sm:$0xff] %v8873_v15  ;;  %v2374_v42 = vrot.slane %v2270_v31, 6  ;;  %v12227_v41 = vrot.slane %v8478_v6, 4  ;;  %v8885_v26 = vmul.f32 %v7159_v57, %v8866_v39  ;;  %v11716_v29 = vrot.slane %v8861_v20, 6  ;;  %v12248_v15 = vld [vmem:[#allocation104_spill] sm:$0xff] }
 0x1aa   :  { %v1939_v13 = vadd.f32 %v1816_v49, %v1654_v35  ;;  %v2096_v62 = vsel %vm2069_vm5, %v11717_v59, %v2095_v32  ;;  %v8893_v34 = vmul.f32 %v7163_v58, %v8866_v39  ;;  %v12232_v38 = vrot.slane %v8610_v7, 6 }
 0x1ab   :  { %v1818_v23 = vsel %vm1789_vm4, %v1815_v28, %v12227_v41  ;;  %12228 = vst [vmem:[#allocation37_spill] sm:$0xff] %v8885_v26  ;;  %v12230_v28 = vrot.slane %v8496_v25, 5  ;;  %v12233_v6 = vrot.slane %v8629_v44, 6  ;;  %v12249_v27 = vrot.slane %v12248_v15, 2 }
 0x1ac   :  { %v1940_v24 = vadd.f32 %v1818_v23, %v1655_v21  ;;  %12229 = vst [vmem:[#allocation38_spill] sm:$0xff] %v8893_v34  ;;  %v2219_v35 = vadd.f32 %v2096_v62, %v1939_v13  ;;  %v8901_v21 = vmul.f32 %v7168_v60, %v8866_v39  ;;  %v2375_v23 = vsel %vm1119_vm2, %v11716_v29, %v2374_v42  ;;  %v12256_v34 = vld [vmem:[#allocation106_spill] sm:$0xff] }
 0x1ad   :  { %v2098_v31 = vsel %vm2069_vm5, %v2095_v32, %v12230_v28  ;;  %v8912_v25 = vsel %vm1119_vm2, %v12233_v6, %v12232_v38  ;;  %v8914_v32 = vpop.permute.xlu1 %205  ;;  %v12235_v13 = vrot.slane %v8519_v37, 6  ;;  %v8927_v38 = vmul.f32 %v7193_v8, %v8866_v39  ;;  %v12238_v6 = vld [vmem:[#allocation103_spill] sm:$0xff] }
 0x1ae   :  { %12231 = vst [vmem:[#allocation84_spill] sm:$0xff] %v8901_v21  ;;  %v2220_v41 = vadd.f32 %v2098_v31, %v1940_v24  ;;  %12234 = vst [vmem:[#allocation139_spill] sm:$0xff] %v8914_v32  ;;  %v2498_v28 = vadd.f32 %v2375_v23, %v2219_v35  ;;  %v8921_v24 = vmul.f32 %v7172_v63, %v8866_v39  ;;  %v12239_v59 = vrot.slane %v12238_v6, 1 }
 0x1af   :  { %v2377_v62 = vsel %vm1119_vm2, %v2374_v42, %v12235_v13  ;;  %12237 = vst [vmem:[#allocation62_spill] sm:$0xff] %v8927_v38  ;;  %v12241_v37 = vrot.slane %v12240_v2, 1  ;;  %v8938_v13 = vmul.f32 %v7172_v63, %v8914_v32  ;;  %v8948_v49 = vmul.f32 %v7159_v57, %v8914_v32 }
 0x1b0   :  { %12236 = vst [vmem:[#allocation102_spill] sm:$0xff] %v8921_v24  ;;  %v2499_v29 = vadd.f32 %v2377_v62, %v2220_v41  ;;  %v2548_v35 = vadd.f32 %v12049_v4, %v2498_v28  ;;  %v12243_v41 = vrot.slane %v12126_v43, 1  ;;  %v12244_v62 = vmov %v12239_v59 }
 0x1b1   :  { %v609_v42 = vsel %vm554_vm0, %v12241_v37, %v12239_v59  ;;  %12242 = vst [vmem:[#allocation61_spill] sm:$0xff] %v8938_v13  ;;  %12245 = vst [vmem:[#allocation89_spill] sm:$0xff] %v8948_v49  ;;  %v12246_v59 = vld [vmem:[#allocation151_spill] sm:$0xff]  ;;  %v12247_v37 = vld [vmem:[#allocation108_spill] sm:$0xff]  ;;  %v12252_v6 = vrot.slane %v12132_v47, 2  ;;  %v12257_v24 = vrot.slane %v12256_v34, 6 }
 0x1b2   :  { %v611_v7 = vsel %vm554_vm0, %v12244_v62, %v12243_v41  ;;  %v2549_v31 = vadd.f32 %v12049_v4, %v2499_v29  ;;  %v718_v28 = vadd.f32 %v609_v42, %v12246_v59  ;;  %v2594_v55 = vmax.f32 %v2548_v35, 0.0  ;;  %v12250_v13 = vld [vmem:[#allocation147_spill] sm:$0xff] }
 0x1b3   :  { %v719_v23 = vadd.f32 %v611_v7, %v12247_v37  ;;  %v12251_v39 = vrot.slane %v12250_v13, 2  ;;  %v12253_v41 = vmov %v12249_v27  ;;  %v12254_v62 = vld [vmem:[#allocation95_spill] sm:$0xff]  ;;  %v12258_v37 = vrot.slane %v12142_v14, 6 }
 0x1b4   :  { %v891_v29 = vsel %vm834_vm1, %v12253_v41, %v12252_v6  ;;  %v12255_v21 = vrot.slane %v12254_v62, 6  ;;  %v2595_v7 = vmax.f32 %v2549_v31, 0.0  ;;  %v8972_v47 = vrot.slane %v2594_v55, 1  ;;  %v12263_v6 = vld [vmem:[#allocation109_spill] sm:$0xff] }
 0x1b5   :  { %v889_v43 = vsel %vm834_vm1, %v12251_v39, %v12249_v27  ;;  %v999_v59 = vadd.f32 %v891_v29, %v719_v23  ;;  %v12261_v39 = vld [vmem:[#allocation96_spill] sm:$0xff]  ;;  %v12264_v41 = vrot.slane %v12263_v6, 7  ;;  %v12267_v31 = vld [vmem:[#allocation73_spill] sm:$0xff] }
 0x1b6   :  { %v1174_v42 = vsel %vm1119_vm2, %v12257_v24, %v12255_v21  ;;  %v998_v35 = vadd.f32 %v889_v43, %v718_v28  ;;  %v12259_v26 = vmov %v12255_v21  ;;  %12260 = vst [vmem:[#allocation65_spill] sm:$0xff] %v8972_v47  ;;  %v12262_v15 = vrot.slane %v12261_v39, 7  ;;  %v12268_v43 = vld [vmem:[#allocation54_spill] sm:$0xff] }
 0x1b7   :  { %v1176_v27 = vsel %vm1119_vm2, %v12259_v26, %v12258_v37  ;;  %v1622_v14 = vmul.f32 %v7201_v10, %v12267_v31  ;;  %v2697_v23 = vrot.slane %v2595_v7, 1  ;;  %v1623_v29 = vmul.f32 %v7201_v10, %v12268_v43 }
 0x1b8   :  { %v1461_v17 = vsel %vm1406_vm3, %v12264_v41, %v12262_v15  ;;  %v12266_v21 = vmov %v12262_v15  ;;  %v1283_v28 = vadd.f32 %v1174_v42, %v998_v35  ;;  %v1284_v26 = vadd.f32 %v1176_v27, %v999_v59 }
 0x1b9   :  { %v1463_v24 = vsel %vm1406_vm3, %v12266_v21, %v12265_v3  ;;  %v8990_v62 = vmul.f32 %v7205_v11, %v12268_v43  ;;  %v8996_v37 = vmul.f32 %v7219_v16, %v12268_v43  ;;  %v2004_v3 = vmul.f32 %v7219_v16, %v7406_v19 }
 0x1ba   :  { %v2698_v42 = vsel %vm554_vm0, %v8972_v47, %v2697_v23  ;;  %v2700_v35 = vsel %vm554_vm0, %v2697_v23, %v8583_v22  ;;  %v1572_v59 = vadd.f32 %v1461_v17, %v1283_v28  ;;  %v1573_v27 = vadd.f32 %v1463_v24, %v1284_v26 }
 0x1bb   :  { %v9004_v39 = vmax.f32 %v2594_v55, %v2698_v42  ;;  %v9006_v15 = vmax.f32 %v2595_v7, %v2700_v35  ;;  %v11738_v41 = vrot.slane %v8990_v62, 4  ;;  %v1843_v21 = vrot.slane %v1724_v61, 4 }
 0x1bc   :  { %v1668_v31 = vadd.f32 %v1622_v14, %v1572_v59  ;;  %v1669_v6 = vadd.f32 %v1623_v29, %v1573_v27  ;;  %v11737_v34 = vrot.slane %v8996_v37, 5  ;;  %v2123_v13 = vrot.slane %v2004_v3, 5 }
 0x1bd   :  { %v11739_v2 = vrot.slane %v9006_v15, 6  ;;  %v9013_v47 = vmul.f32 %v7163_v58, %v8914_v32  ;;  %v9017_v55 = vmul.f32 %v7168_v60, %v8914_v32  ;;  %v1844_v22 = vsel %vm1789_vm4, %v11738_v41, %v1843_v21 }
 0x1be   :  { %v9024_v17 = vmul.f32 %v7193_v8, %v8914_v32  ;;  %v12272_v7 = vrot.slane %v8627_v53, 4  ;;  %v1953_v14 = vadd.f32 %v1844_v22, %v1668_v31  ;;  %v2124_v23 = vsel %vm2069_vm5, %v11737_v34, %v2123_v13  ;;  %v12285_v34 = vld [vmem:[#allocation184_spill] sm:$0xff] }
 0x1bf   :  { %12269 = vst [vmem:[#allocation92_spill] sm:$0xff] %v9013_v47  ;;  %12270 = vst [vmem:[#allocation91_spill] sm:$0xff] %v9017_v55  ;;  %v12273_v28 = vrot.slane %v8629_v44, 6  ;;  %v9039_v61 = vmul.f32 %v8857_v51, %v12268_v43  ;;  %v2284_v53 = vmul.f32 %v8857_v51, %v7406_v19  ;;  %v3050_v3 = vmax.f32 %v9006_v15, %v8912_v25 }
 0x1c0   :  { %12271 = vst [vmem:[#allocation67_spill] sm:$0xff] %v9024_v17  ;;  %v1846_v24 = vsel %vm1789_vm4, %v1843_v21, %v12272_v7  ;;  %v12274_v42 = vrot.slane %v8638_v45, 5  ;;  %v2233_v35 = vadd.f32 %v2124_v23, %v1953_v14  ;;  %v9051_v21 = vpop.permute.xlu0 %375  ;;  %v12276_v14 = vrot.slane %v8650_v46, 6 }
 0x1c1   :  { %v2930_v26 = vsel %vm1119_vm2, %v11739_v2, %v12273_v28  ;;  %v1954_v29 = vadd.f32 %v1846_v24, %v1669_v6  ;;  %v11736_v27 = vrot.slane %v9039_v61, 6  ;;  %v2402_v43 = vrot.slane %v2284_v53, 6  ;;  %12275 = vst [vmem:[#allocation52_spill] sm:$0xff] %v9051_v21  ;;  %v12289_v2 = vld [vmem:[#allocation185_spill] sm:$0xff] }
 0x1c2   :  { %v3049_v31 = vmax.f32 %v9004_v39, %v2930_v26  ;;  %v2126_v44 = vsel %vm2069_vm5, %v2123_v13, %v12274_v42  ;;  %v12278_v53 = vrot.slane %v8779_v36, 6  ;;  %v1691_v42 = vpop.permute.xlu1 %1690  ;;  %v9077_v46 = vmul.f32 %v7159_v57, %v9051_v21 }
 0x1c3   :  { %v2234_v6 = vadd.f32 %v2126_v44, %v1954_v29  ;;  %v2403_v24 = vsel %vm1119_vm2, %v11736_v27, %v2402_v43  ;;  %v2405_v23 = vsel %vm1119_vm2, %v2402_v43, %v12276_v14  ;;  %v12277_v29 = vrot.slane %v8768_v0, 6 }
 0x1c4   :  { %v3105_v22 = vpack.c.bf16 %v3050_v3, %v3049_v31  ;;  %v2512_v28 = vadd.f32 %v2403_v24, %v2233_v35  ;;  %v9073_v3 = vmul.f32 %v7172_v63, %v9051_v21  ;;  %12280 = vst [vmem:[#allocation53_spill] sm:$0xff] %v9077_v46  ;;  %v9081_v44 = vmul.f32 %v7163_v58, %v9051_v21 }
 0x1c5   :  { %v2513_v26 = vadd.f32 %v2405_v23, %v2234_v6  ;;  %v9069_v31 = vsel %vm1119_vm2, %v12278_v53, %v12277_v29  ;;  %v507_v0 = vmul.f32 %v7159_v57, %v7802_v40  ;;  %v787_v35 = vmul.f32 %v7163_v58, %v7802_v40 }
 0x1c6   :  { %5882 = vmatpush3.bf16.msra.mxu0 %v3105_v22  ;;  %12279 = vst [vmem:[#allocation66_spill] sm:$0xff] %v9073_v3  ;;  %12281 = vst [vmem:[#allocation68_spill] sm:$0xff] %v9081_v44  ;;  %v2562_v6 = vadd.f32 %v12049_v4, %v2512_v28  ;;  %v9091_v22 = vmul.f32 %v7168_v60, %v9051_v21  ;;  %v456_v24 = vmul.f32 %v7172_v63, %v12167_v5 }
 0x1c7   :  { %v2563_v43 = vadd.f32 %v12049_v4, %v2513_v26  ;;  %v457_v14 = vmul.f32 %v7172_v63, %v7802_v40  ;;  %v644_v23 = vrot.slane %v507_v0, 1  ;;  %v924_v29 = vrot.slane %v787_v35, 2 }
 0x1c8   :  { %12282 = vst [vmem:[#allocation21_spill] sm:$0xff] %v9091_v22  ;;  %v1742_v53 = vmul.f32 %v7205_v11, %v1691_v42  ;;  %v2608_v13 = vmax.f32 %v2562_v6, 0.0  ;;  %v2022_v28 = vmul.f32 %v7219_v16, %v1691_v42  ;;  %v2302_v26 = vmul.f32 %v8857_v51, %v1691_v42 }
 0x1c9   :  { %v2609_v25 = vmax.f32 %v2563_v43, 0.0  ;;  %v9102_v7 = vmul.f32 %v7193_v8, %v9051_v21  ;;  %v12284_v19 = vrot.slane %v7924_v50, 1  ;;  %v737_v27 = vadd.f32 %v644_v23, %v457_v14 }
 0x1ca   :  { %v12286_v0 = vrot.slane %v12285_v34, 6  ;;  %v12287_v35 = vrot.slane %v12170_v12, 6  ;;  %v9112_v43 = vrot.slane %v2608_v13, 1  ;;  %v12288_v42 = vrot.slane %v8732_v9, 7 }
 0x1cb   :  { %12283 = vst [vmem:[#allocation157_spill] sm:$0xff] %v9102_v7  ;;  %v645_v59 = vsel %vm554_vm0, %v12284_v19, %v644_v23  ;;  %v2725_v41 = vrot.slane %v2609_v25, 1  ;;  %v12290_v32 = vrot.slane %v12289_v2, 7  ;;  %v12291_v50 = vrot.slane %v12163_v48, 2 }
 0x1cc   :  { %v1210_v6 = vsel %vm1119_vm2, %v12287_v35, %v12286_v0  ;;  %v736_v45 = vadd.f32 %v645_v59, %v456_v24  ;;  %v1017_v14 = vadd.f32 %v924_v29, %v737_v27  ;;  %v1879_v23 = vrot.slane %v1742_v53, 4  ;;  %v9132_v27 = vpop.permute.xlu0 %200  ;;  %v12314_v35 = vld [vmem:[#allocation111_spill] sm:$0xff] }
 0x1cd   :  { %v1499_v21 = vsel %vm1406_vm3, %v12290_v32, %v12288_v42  ;;  %v925_v19 = vsel %vm834_vm1, %v12291_v50, %v924_v29  ;;  %v2159_v17 = vrot.slane %v2022_v28, 5  ;;  %v2726_v12 = vsel %vm554_vm0, %v9112_v43, %v2725_v41  ;;  %12293 = vst [vmem:[#allocation156_spill] sm:$0xff] %v9132_v27 }
 0x1ce   :  { %v2728_v0 = vsel %vm554_vm0, %v2725_v41, %v8741_v18  ;;  %v1016_v59 = vadd.f32 %v925_v19, %v736_v45  ;;  %v2438_v24 = vrot.slane %v2302_v26, 6  ;;  %v12292_v48 = vrot.slane %v12285_v34, 6 }
 0x1cf   :  { %v9126_v9 = vmax.f32 %v2609_v25, %v2728_v0  ;;  %v9134_v29 = vmax.f32 %v2608_v13, %v2726_v12  ;;  %v12294_v25 = vmov %v12290_v32  ;;  %v12295_v45 = vrot.slane %v8692_v56, 7 }
 0x1d0   :  { %v1302_v42 = vadd.f32 %v12292_v48, %v1017_v14  ;;  %v1301_v18 = vadd.f32 %v1210_v6, %v1016_v59  ;;  %v12296_v34 = vrot.slane %v8713_v33, 4  ;;  %v12297_v14 = vrot.slane %v8723_v54, 5  ;;  %v12301_v54 = vld [vmem:[#allocation39_spill] sm:$0xff] }
 0x1d1   :  { %v11746_v41 = vrot.slane %v9126_v9, 6  ;;  %v1497_v26 = vsel %vm1406_vm3, %v12295_v45, %v12294_v25  ;;  %v12298_v6 = vrot.slane %v8728_v52, 6  ;;  %v9155_v2 = vmul.f32 %v7172_v63, %v9132_v27  ;;  %v12304_v25 = vld [vmem:[#allocation110_spill] sm:$0xff] }
 0x1d2   :  { %v1591_v50 = vadd.f32 %v1499_v21, %v1302_v42  ;;  %v1880_v19 = vsel %vm1789_vm4, %v12296_v34, %v1879_v23  ;;  %v1590_v13 = vadd.f32 %v1497_v26, %v1301_v18  ;;  %v2160_v12 = vsel %vm2069_vm5, %v12297_v14, %v2159_v17  ;;  %v12303_v42 = vld [vmem:[#allocation191_spill] sm:$0xff]  ;;  %v12308_v14 = vld [vmem:[#allocation97_spill] sm:$0xff] }
 0x1d3   :  { %v2439_v0 = vsel %vm1119_vm2, %v12298_v6, %v2438_v24  ;;  %12299 = vst [vmem:[#allocation138_spill] sm:$0xff] %v9155_v2  ;;  %v12300_v56 = vrot.slane %v8779_v36, 6  ;;  %v3064_v21 = vmax.f32 %v9126_v9, %v9069_v31  ;;  %v9167_v52 = vmul.f32 %v7159_v57, %v9132_v27  ;;  %v12306_v36 = vld [vmem:[#allocation166_spill] sm:$0xff] }
 0x1d4   :  { %v1687_v59 = vadd.f32 %v12301_v54, %v1591_v50  ;;  %v1686_v18 = vadd.f32 %v12303_v42, %v1590_v13  ;;  %v12305_v45 = vrot.slane %v12304_v25, 1  ;;  %v12307_v26 = vrot.slane %v12306_v36, 1  ;;  %v12313_v13 = vld [vmem:[#allocation113_spill] sm:$0xff]  ;;  %v12318_v25 = vld [vmem:[#allocation98_spill] sm:$0xff] }
 0x1d5   :  { %v2958_v33 = vsel %vm1119_vm2, %v11746_v41, %v12300_v56  ;;  %12302 = vst [vmem:[#allocation160_spill] sm:$0xff] %v9167_v52  ;;  %v12309_v6 = vrot.slane %v12308_v14, 1  ;;  %v9183_v54 = vmul.f32 %v7163_v58, %v9132_v27  ;;  %v12315_v41 = vrot.slane %v12314_v35, 2  ;;  %v12328_v35 = vld [vmem:[#allocation101_spill] sm:$0xff] }
 0x1d6   :  { %v3063_v48 = vmax.f32 %v9134_v29, %v2958_v33  ;;  %v577_v34 = vsel %vm554_vm0, %v12307_v26, %v12305_v45  ;;  %v12310_v31 = vmov %v12305_v45  ;;  %v1972_v56 = vadd.f32 %v1879_v23, %v1687_v59  ;;  %v12312_v33 = vld [vmem:[#allocation171_spill] sm:$0xff]  ;;  %v12316_v45 = vld [vmem:[#allocation168_spill] sm:$0xff] }
 0x1d7   :  { %v579_v50 = vsel %vm554_vm0, %v12310_v31, %v12309_v6  ;;  %12311 = vst [vmem:[#allocation85_spill] sm:$0xff] %v9183_v54  ;;  %v702_v28 = vadd.f32 %v577_v34, %v12312_v33  ;;  %v1971_v32 = vadd.f32 %v1880_v19, %v1686_v18  ;;  %v12317_v26 = vrot.slane %v12316_v45, 2  ;;  %v12321_v34 = vld [vmem:[#allocation99_spill] sm:$0xff] }
 0x1d8   :  { %v703_v42 = vadd.f32 %v579_v50, %v12313_v13  ;;  %v3112_v53 = vpack.c.bf16 %v3064_v21, %v3063_v48  ;;  %v12319_v55 = vrot.slane %v12318_v25, 2  ;;  %v12320_v23 = vmov %v12315_v41  ;;  %v12323_v50 = vld [vmem:[#allocation112_spill] sm:$0xff]  ;;  %v12325_v18 = vld [vmem:[#allocation87_spill] sm:$0xff] }
 0x1d9   :  { %v857_v14 = vsel %vm834_vm1, %v12317_v26, %v12315_v41  ;;  %v2252_v6 = vadd.f32 %v2159_v17, %v1972_v56  ;;  %v12322_v33 = vrot.slane %v12321_v34, 6  ;;  %v12324_v21 = vrot.slane %v12323_v50, 6  ;;  %v12332_v56 = vld [vmem:[#allocation88_spill] sm:$0xff] }
 0x1da   :  { %v859_v59 = vsel %vm834_vm1, %v12320_v23, %v12319_v55  ;;  %v982_v31 = vadd.f32 %v857_v14, %v702_v28  ;;  %5883 = vmatprep.subr.bf16.mxu0 %v3112_v53  ;;  %v2251_v48 = vadd.f32 %v2160_v12, %v1971_v32  ;;  %v12326_v13 = vrot.slane %v12325_v18, 6  ;;  %v12330_v55 = vld [vmem:[#allocation114_spill] sm:$0xff] }
 0x1db   :  { %v983_v47 = vadd.f32 %v859_v59, %v703_v42  ;;  %v1142_v19 = vsel %vm1119_vm2, %v12324_v21, %v12322_v33  ;;  %v12327_v41 = vmov %v12322_v33  ;;  %v12329_v25 = vrot.slane %v12328_v35, 7  ;;  %v12335_v59 = vld [vmem:[#allocation74_spill] sm:$0xff]  ;;  %v12336_v21 = vld [vmem:[#allocation63_spill] sm:$0xff] }
 0x1dc   :  { %v1144_v26 = vsel %vm1119_vm2, %v12327_v41, %v12326_v13  ;;  %v12331_v17 = vrot.slane %v12330_v55, 7  ;;  %v12333_v42 = vrot.slane %v12332_v56, 7  ;;  %v2531_v53 = vadd.f32 %v2438_v24, %v2252_v6  ;;  %v12337_v41 = vld [vmem:[#allocation45_spill] sm:$0xff] }
 0x1dd   :  { %v12334_v14 = vmov %v12329_v25  ;;  %v1267_v32 = vadd.f32 %v1142_v19, %v982_v31  ;;  %v1268_v12 = vadd.f32 %v1144_v26, %v983_v47  ;;  %v1606_v34 = vmul.f32 %v7201_v10, %v12335_v59 }
 0x1de   :  { %v1429_v28 = vsel %vm1406_vm3, %v12331_v17, %v12329_v25  ;;  %v1431_v23 = vsel %vm1406_vm3, %v12334_v14, %v12333_v42  ;;  %v2530_v33 = vadd.f32 %v2439_v0, %v2251_v48  ;;  %v1607_v18 = vmul.f32 %v7201_v10, %v12336_v21 }
 0x1df   :  { %v9223_v13 = vmul.f32 %v7205_v11, %v12336_v21  ;;  %v1708_v25 = vmul.f32 %v7205_v11, %v12337_v41  ;;  %v2581_v35 = vadd.f32 %v12049_v4, %v2531_v53  ;;  %v1556_v17 = vadd.f32 %v1429_v28, %v1267_v32 }
 0x1e0   :  { %v1557_v24 = vadd.f32 %v1431_v23, %v1268_v12  ;;  %v9230_v47 = vmul.f32 %v7219_v16, %v12336_v21  ;;  %v9234_v0 = vmul.f32 %v7168_v60, %v9132_v27  ;;  %v1988_v19 = vmul.f32 %v7219_v16, %v12337_v41 }
 0x1e1   :  { %v11752_v6 = vrot.slane %v9223_v13, 4  ;;  %v1811_v31 = vrot.slane %v1708_v25, 4  ;;  %v9240_v48 = vadd.f32 %v12049_v4, %v2530_v33  ;;  %v1652_v26 = vadd.f32 %v1606_v34, %v1556_v17  ;;  %v9250_v25 = vpop.permute.xlu1 %195 }
 0x1e2   :  { %12338 = vst [vmem:[#allocation57_spill] sm:$0xff] %v9234_v0  ;;  %v1653_v28 = vadd.f32 %v1607_v18, %v1557_v24  ;;  %v11751_v56 = vrot.slane %v9230_v47, 5  ;;  %v2627_v42 = vmax.f32 %v2581_v35, 0.0  ;;  %v12340_v23 = vrot.slane %v8845_v1, 4  ;;  %12341 = vst [vmem:[#allocation90_spill] sm:$0xff] %v9250_v25 }
 0x1e3   :  { %12339 = vst [vmem:[#allocation100_spill] sm:$0xff] %v9240_v48  ;;  %v1812_v14 = vsel %vm1789_vm4, %v11752_v6, %v1811_v31  ;;  %v2091_v32 = vrot.slane %v1988_v19, 5  ;;  %v9254_v34 = vmul.f32 %v8857_v51, %v12336_v21  ;;  %v12342_v1 = vrot.slane %v8851_v30, 5 }
 0x1e4   :  { %v1814_v53 = vsel %vm1789_vm4, %v1811_v31, %v12340_v23  ;;  %v1937_v33 = vadd.f32 %v1812_v14, %v1652_v26  ;;  %v2268_v24 = vmul.f32 %v8857_v51, %v12337_v41  ;;  %v191_v31 = vpop.permute.xlu0 %190  ;;  %v9267_v19 = vmul.f32 %v7193_v8, %v9132_v27 }
 0x1e5   :  { %v1938_v2 = vadd.f32 %v1814_v53, %v1653_v28  ;;  %v2092_v35 = vsel %vm2069_vm5, %v11751_v56, %v2091_v32  ;;  %v2094_v17 = vsel %vm2069_vm5, %v2091_v32, %v12342_v1  ;;  %v11753_v28 = vrot.slane %v9254_v34, 6 }
 0x1e6   :  { %12343 = vst [vmem:[#allocation86_spill] sm:$0xff] %v9267_v19  ;;  %v2217_v21 = vadd.f32 %v2092_v35, %v1937_v33  ;;  %v11756_v14 = vmax.f32 %v9240_v48, 0.0  ;;  %v9271_v23 = vrot.slane %v2627_v42, 1  ;;  %v2370_v53 = vrot.slane %v2268_v24, 6 }
 0x1e7   :  { %v2218_v26 = vadd.f32 %v2094_v17, %v1938_v2  ;;  %v465_v30 = vmul.f32 %v7159_v57, %v9250_v25  ;;  %v415_v1 = vmul.f32 %v7172_v63, %v9250_v25  ;;  %v464_v33 = vmul.f32 %v7159_v57, %v191_v31 }
 0x1e8   :  { %v2371_v2 = vsel %vm1119_vm2, %v11753_v28, %v2370_v53  ;;  %v12344_v35 = vrot.slane %v8861_v20, 6  ;;  %v9288_v24 = vmul.f32 %v7163_v58, %v9250_v25  ;;  %v744_v32 = vmul.f32 %v7163_v58, %v191_v31 }
 0x1e9   :  { %v2496_v56 = vadd.f32 %v2371_v2, %v2217_v21  ;;  %v560_v12 = vrot.slane %v465_v30, 1  ;;  %v558_v41 = vrot.slane %v464_v33, 1  ;;  %v9293_v18 = vrot.slane %v11756_v14, 1  ;;  %v186_v2 = vpop.permute.xlu1 %185 }
 0x1ea   :  { %v2373_v17 = vsel %vm1119_vm2, %v2370_v53, %v12344_v35  ;;  %12345 = vst [vmem:[#allocation58_spill] sm:$0xff] %v9288_v24  ;;  %v9296_v28 = vmax.f32 %v2627_v42, %v9271_v23  ;;  %v1028_v53 = vmul.f32 %v7168_v60, %v191_v31  ;;  %v12347_v21 = vrot.slane %v9006_v15, 6 }
 0x1eb   :  { %v2497_v6 = vadd.f32 %v2373_v17, %v2218_v26  ;;  %v2546_v35 = vadd.f32 %v12049_v4, %v2496_v56  ;;  %v12348_v26 = vrot.slane %v9004_v39, 6  ;;  %v561_v33 = vsel %vm554_vm0, %v558_v41, %v560_v12 }
 0x1ec   :  { %12346 = vst [vmem:[#allocation59_spill] sm:$0xff] %v9296_v28  ;;  %v414_v17 = vmul.f32 %v7172_v63, %v191_v31  ;;  %v9311_v20 = vmul.f32 %v7193_v8, %v191_v31  ;;  %v1029_v56 = vmul.f32 %v7168_v60, %v9250_v25  ;;  %v12349_v15 = vrot.slane %v9167_v52, 1 }
 0x1ed   :  { %v2547_v54 = vadd.f32 %v12049_v4, %v2497_v6  ;;  %v2928_v30 = vsel %vm1119_vm2, %v12348_v26, %v12347_v21  ;;  %v2592_v6 = vmax.f32 %v2546_v35, 0.0  ;;  %v838_v21 = vrot.slane %v744_v32, 2 }
 0x1ee   :  { %v563_v19 = vsel %vm554_vm0, %v560_v12, %v12349_v15  ;;  %v694_v26 = vadd.f32 %v561_v33, %v414_v17  ;;  %v1121_v49 = vrot.slane %v1028_v53, 6  ;;  %v9319_v7 = vmul.f32 %v7201_v10, %v191_v31  ;;  %v12352_v33 = vld [vmem:[#allocation65_spill] sm:$0xff] }
 0x1ef   :  { %v2593_v14 = vmax.f32 %v2547_v54, 0.0  ;;  %v463_v42 = vmul.f32 %v7159_v57, %v186_v2  ;;  %v9322_v38 = vrot.slane %v2592_v6, 1  ;;  %v9326_v44 = vmul.f32 %v7193_v8, %v9250_v25 }
 0x1f0   :  { %12350 = vst [vmem:[#allocation31_spill] sm:$0xff] %v9319_v7  ;;  %v9329_v54 = vmul.f32 %v7163_v58, %v186_v2  ;;  %v1408_v12 = vrot.slane %v9311_v20, 7  ;;  %v1123_v32 = vrot.slane %v1029_v56, 6  ;;  %v413_v53 = vmul.f32 %v7172_v63, %v186_v2 }
 0x1f1   :  { %v2693_v22 = vrot.slane %v2593_v14, 1  ;;  %12351 = vst [vmem:[#allocation60_spill] sm:$0xff] %v9326_v44  ;;  %v556_v35 = vrot.slane %v463_v42, 1  ;;  %v1027_v7 = vmul.f32 %v7168_v60, %v186_v2  ;;  %v9343_v46 = vadd.f32 %v563_v19, %v415_v1 }
 0x1f2   :  { %v11774_v15 = vrot.slane %v9329_v54, 2  ;;  %v12354_v42 = vrot.slane %v9288_v24, 2  ;;  %v11773_v28 = vrot.slane %v9326_v44, 7  ;;  %v9357_v19 = vmul.f32 %v7201_v10, %v9250_v25 }
 0x1f3   :  { %v2694_v31 = vsel %vm554_vm0, %v9322_v38, %v2693_v22  ;;  %v2696_v17 = vsel %vm554_vm0, %v2693_v22, %v12352_v33  ;;  %12353 = vst [vmem:[#allocation27_spill] sm:$0xff] %v9343_v46  ;;  %v559_v20 = vsel %vm554_vm0, %v556_v35, %v558_v41  ;;  %v1312_v22 = vmul.f32 %v7193_v8, %v186_v2  ;;  %v181_v33 = vpop.permute.xlu0 %180 }
 0x1f4   :  { %v9339_v52 = vmax.f32 %v2592_v6, %v2694_v31  ;;  %v9341_v3 = vmax.f32 %v2593_v14, %v2696_v17  ;;  %v841_v56 = vsel %vm834_vm1, %v838_v21, %v12354_v42  ;;  %v693_v48 = vadd.f32 %v559_v20, %v413_v53  ;;  %12356 = vst [vmem:[#allocation28_spill] sm:$0xff] %v9357_v19 }
 0x1f5   :  { %v9352_v6 = vadd.f32 %v841_v56, %v694_v26  ;;  %v1124_v14 = vsel %vm1119_vm2, %v1121_v49, %v1123_v32  ;;  %v12357_v41 = vrot.slane %v9234_v0, 6  ;;  %v1411_v8 = vsel %vm1406_vm3, %v1408_v12, %v11773_v28 }
 0x1f6   :  { %v11775_v60 = vrot.slane %v9341_v3, 6  ;;  %v839_v2 = vsel %vm834_vm1, %v11774_v15, %v838_v21  ;;  %v1120_v26 = vrot.slane %v1027_v7, 6  ;;  %v12359_v31 = vrot.slane %v9004_v39, 6  ;;  %v12361_v39 = vld [vmem:[#allocation161_spill] sm:$0xff]  ;;  %v12363_v15 = vld [vmem:[#allocation188_spill] sm:$0xff] }
 0x1f7   :  { %12355 = vst [vmem:[#allocation24_spill] sm:$0xff] %v9352_v6  ;;  %v9362_v1 = vsel %vm1119_vm2, %v1123_v32, %v12357_v41  ;;  %v9378_v32 = vmul.f32 %v7205_v11, %v9250_v25  ;;  %v462_v20 = vmul.f32 %v7159_v57, %v181_v33  ;;  %v3048_v56 = vmax.f32 %v9341_v3, %v2928_v30 }
 0x1f8   :  { %12358 = vst [vmem:[#allocation103_spill] sm:$0xff] %v9362_v1  ;;  %v2926_v17 = vsel %vm1119_vm2, %v11775_v60, %v12359_v31  ;;  %v973_v21 = vadd.f32 %v839_v2, %v693_v48  ;;  %v1407_v7 = vrot.slane %v1312_v22, 7  ;;  %v742_v28 = vmul.f32 %v7163_v58, %v181_v33  ;;  %v12365_v60 = vld [vmem:[#allocation146_spill] sm:$0xff]  ;;  %v12369_v58 = vld [vmem:[#allocation195_spill] sm:$0xff] }
 0x1f9   :  { %12360 = vst [vmem:[#allocation151_spill] sm:$0xff] %v9378_v32  ;;  %v3047_v42 = vmax.f32 %v9339_v52, %v2926_v17  ;;  %v555_v41 = vrot.slane %v462_v20, 1  ;;  %v12362_v53 = vrot.slane %v12361_v39, 1  ;;  %v12364_v19 = vrot.slane %v12363_v15, 1  ;;  %v12371_v20 = vld [vmem:[#allocation162_spill] sm:$0xff]  ;;  %v12378_v32 = vld [vmem:[#allocation148_spill] sm:$0xff] }
 0x1fa   :  { %v12366_v25 = vrot.slane %v12365_v60, 1  ;;  %v9395_v30 = vsel %vm1119_vm2, %v1120_v26, %v1121_v49  ;;  %v9399_v48 = vmul.f32 %v7205_v11, %v9132_v27  ;;  %v12372_v39 = vrot.slane %v12371_v20, 2  ;;  %v12373_v1 = vld [vmem:[#allocation190_spill] sm:$0xff]  ;;  %v12380_v27 = vld [vmem:[#allocation164_spill] sm:$0xff] }
 0x1fb   :  { %v605_v31 = vsel %vm554_vm0, %v12364_v19, %v12362_v53  ;;  %v12367_v44 = vmov %v12362_v53  ;;  %v3104_v17 = vpack.c.bf16 %v3048_v56, %v3047_v42  ;;  %v412_v19 = vmul.f32 %v7172_v63, %v181_v33  ;;  %v12370_v53 = vld [vmem:[#allocation163_spill] sm:$0xff] }
 0x1fc   :  { %v607_v57 = vsel %vm554_vm0, %v12367_v44, %v12366_v25  ;;  %12368 = vst [vmem:[#allocation108_spill] sm:$0xff] %v9399_v48  ;;  %v716_v22 = vadd.f32 %v605_v31, %v12369_v58  ;;  %v12374_v44 = vrot.slane %v12373_v1, 2  ;;  %v1258_v49 = vadd.f32 %v1124_v14, %v973_v21  ;;  %v12375_v42 = vld [vmem:[#allocation147_spill] sm:$0xff]  ;;  %v12382_v21 = vld [vmem:[#allocation106_spill] sm:$0xff] }
 0x1fd   :  { %v717_v60 = vadd.f32 %v607_v57, %v12370_v53  ;;  %5884 = vmatpush3.bf16.msra.mxu0 %v3104_v17  ;;  %v9411_v26 = vsel %vm1406_vm3, %v1407_v7, %v1408_v12  ;;  %v12376_v56 = vrot.slane %v12375_v42, 2  ;;  %v12377_v31 = vmov %v12372_v39 }
 0x1fe   :  { %v885_v25 = vsel %vm834_vm1, %v12374_v44, %v12372_v39  ;;  %v557_v57 = vsel %vm554_vm0, %v555_v41, %v556_v35  ;;  %v835_v53 = vrot.slane %v742_v28, 2  ;;  %v12379_v63 = vrot.slane %v12378_v32, 6  ;;  %v12385_v44 = vld [vmem:[#allocation149_spill] sm:$0xff]  ;;  %v12393_v32 = vld [vmem:[#allocation82_spill] sm:$0xff] }
 0x1ff   :  { %v887_v58 = vsel %vm834_vm1, %v12377_v31, %v12376_v56  ;;  %v996_v33 = vadd.f32 %v885_v25, %v716_v22  ;;  %v12381_v39 = vrot.slane %v12380_v27, 6  ;;  %v12383_v12 = vrot.slane %v12382_v21, 6  ;;  %v12387_v22 = vld [vmem:[#allocation165_spill] sm:$0xff]  ;;  %v12392_v31 = vld [vmem:[#allocation123_spill] sm:$0xff] }
 0x200   :  { %v997_v2 = vadd.f32 %v887_v58, %v717_v60  ;;  %v12384_v7 = vmov %v12379_v63  ;;  %v12386_v42 = vrot.slane %v12385_v44, 7  ;;  %v12388_v25 = vrot.slane %v12387_v22, 7  ;;  %v12389_v35 = vld [vmem:[#allocation109_spill] sm:$0xff] }
 0x201   :  { %v1170_v14 = vsel %vm1119_vm2, %v12381_v39, %v12379_v63  ;;  %v1172_v17 = vsel %vm1119_vm2, %v12384_v7, %v12383_v12  ;;  %v12390_v41 = vrot.slane %v12389_v35, 7  ;;  %v1620_v58 = vmul.f32 %v7201_v10, %v12392_v31 }
 0x202   :  { %v1281_v20 = vadd.f32 %v1170_v14, %v996_v33  ;;  %v1457_v28 = vsel %vm1406_vm3, %v12388_v25, %v12386_v42  ;;  %v12391_v60 = vmov %v12386_v42  ;;  %v1282_v63 = vadd.f32 %v1172_v17, %v997_v2  ;;  %v12394_v33 = vld [vmem:[#allocation73_spill] sm:$0xff] }
 0x203   :  { %v1459_v56 = vsel %vm1406_vm3, %v12391_v60, %v12390_v41  ;;  %v9443_v39 = vmul.f32 %v7205_v11, %v12393_v32  ;;  %v1722_v14 = vmul.f32 %v7205_v11, %v12394_v33  ;;  %v1621_v12 = vmul.f32 %v7201_v10, %v12393_v32 }
 0x204   :  { %v1570_v21 = vadd.f32 %v1457_v28, %v1281_v20  ;;  %v9451_v7 = vmul.f32 %v7219_v16, %v12393_v32  ;;  %v2002_v2 = vmul.f32 %v7219_v16, %v12394_v33  ;;  %v1571_v17 = vadd.f32 %v1459_v56, %v1282_v63 }
 0x205   :  { %v11785_v44 = vrot.slane %v9443_v39, 4  ;;  %v1839_v42 = vrot.slane %v1722_v14, 4  ;;  %v9458_v25 = vmul.f32 %v8857_v51, %v12393_v32  ;;  %v9462_v60 = vadd.f32 %v1411_v8, %v1258_v49 }
 0x206   :  { %v1666_v28 = vadd.f32 %v1620_v58, %v1570_v21  ;;  %v11783_v35 = vrot.slane %v9451_v7, 5  ;;  %v2119_v41 = vrot.slane %v2002_v2, 5  ;;  %v1667_v6 = vadd.f32 %v1621_v12, %v1571_v17 }
 0x207   :  { %12395 = vst [vmem:[#allocation104_spill] sm:$0xff] %v9462_v60  ;;  %v1840_v56 = vsel %vm1789_vm4, %v11785_v44, %v1839_v42  ;;  %v2282_v63 = vmul.f32 %v8857_v51, %v12394_v33  ;;  %v9469_v14 = vadd.f32 %v557_v57, %v412_v19  ;;  %v12396_v32 = vrot.slane %v9329_v54, 2 }
 0x208   :  { %v12397_v58 = vrot.slane %v8990_v62, 4  ;;  %v1951_v49 = vadd.f32 %v1840_v56, %v1666_v28  ;;  %v2120_v12 = vsel %vm2069_vm5, %v11783_v35, %v2119_v41  ;;  %v11784_v2 = vrot.slane %v9458_v25, 6  ;;  %v12410_v35 = vld [vmem:[#allocation204_spill] sm:$0xff] }
 0x209   :  { %v9474_v20 = vsel %vm834_vm1, %v835_v53, %v12396_v32  ;;  %v2398_v33 = vrot.slane %v2282_v63, 6  ;;  %v12398_v19 = vrot.slane %v8996_v37, 5  ;;  %v12399_v53 = vld [vmem:[#allocation177_spill] sm:$0xff]  ;;  %v12401_v32 = vld [vmem:[#allocation203_spill] sm:$0xff]  ;;  %v12460_v24 = vrot.slane %v12387_v22, 7 }
 0x20a   :  { %v1842_v8 = vsel %vm1789_vm4, %v1839_v42, %v12397_v58  ;;  %v2231_v57 = vadd.f32 %v2120_v12, %v1951_v49  ;;  %v12400_v17 = vrot.slane %v12399_v53, 1  ;;  %v12402_v62 = vrot.slane %v12401_v32, 1 }
 0x20b   :  { %v1952_v21 = vadd.f32 %v1842_v8, %v1667_v6  ;;  %v2122_v54 = vsel %vm2069_vm5, %v2119_v41, %v12398_v19  ;;  %v12403_v6 = vrot.slane %v12306_v36, 1  ;;  %v2399_v37 = vsel %vm1119_vm2, %v11784_v2, %v2398_v33  ;;  %v12406_v8 = vld [vmem:[#allocation202_spill] sm:$0xff] }
 0x20c   :  { %v573_v42 = vsel %vm554_vm0, %v12402_v62, %v12400_v17  ;;  %v12404_v28 = vmov %v12400_v17  ;;  %v12405_v41 = vrot.slane %v9039_v61, 6  ;;  %v2510_v12 = vadd.f32 %v2399_v37, %v2231_v57  ;;  %v12407_v19 = vld [vmem:[#allocation178_spill] sm:$0xff]  ;;  %v12408_v62 = vld [vmem:[#allocation179_spill] sm:$0xff] }
 0x20d   :  { %v575_v56 = vsel %vm554_vm0, %v12404_v28, %v12403_v6  ;;  %v2232_v58 = vadd.f32 %v2122_v54, %v1952_v21  ;;  %v700_v49 = vadd.f32 %v573_v42, %v12406_v8  ;;  %v12409_v36 = vrot.slane %v12408_v62, 2  ;;  %v12416_v42 = vld [vmem:[#allocation180_spill] sm:$0xff]  ;;  %v12420_v62 = vld [vmem:[#allocation170_spill] sm:$0xff] }
 0x20e   :  { %v2401_v63 = vsel %vm1119_vm2, %v2398_v33, %v12405_v41  ;;  %v701_v17 = vadd.f32 %v575_v56, %v12407_v19  ;;  %v12411_v53 = vrot.slane %v12410_v35, 2  ;;  %v12412_v21 = vrot.slane %v12316_v45, 2  ;;  %v12414_v33 = vld [vmem:[#allocation169_spill] sm:$0xff] }
 0x20f   :  { %v12413_v54 = vmov %v12409_v36  ;;  %v2511_v61 = vadd.f32 %v2401_v63, %v2232_v58  ;;  %v12415_v41 = vrot.slane %v12414_v33, 6  ;;  %v12417_v57 = vrot.slane %v12416_v42, 6 }
 0x210   :  { %v853_v6 = vsel %vm834_vm1, %v12411_v53, %v12409_v36  ;;  %v855_v28 = vsel %vm834_vm1, %v12413_v54, %v12412_v21  ;;  %v12418_v37 = vrot.slane %v12323_v50, 6  ;;  %v2560_v45 = vadd.f32 %v12049_v4, %v2510_v12  ;;  %v12422_v21 = vld [vmem:[#allocation182_spill] sm:$0xff]  ;;  %v12427_v12 = vld [vmem:[#allocation83_spill] sm:$0xff] }
 0x211   :  { %v980_v2 = vadd.f32 %v853_v6, %v700_v49  ;;  %v1138_v56 = vsel %vm1119_vm2, %v12417_v57, %v12415_v41  ;;  %v12419_v8 = vmov %v12415_v41  ;;  %v981_v36 = vadd.f32 %v855_v28, %v701_v17  ;;  %v12426_v41 = vld [vmem:[#allocation154_spill] sm:$0xff] }
 0x212   :  { %v1140_v19 = vsel %vm1119_vm2, %v12419_v8, %v12418_v37  ;;  %v12421_v53 = vrot.slane %v12420_v62, 7  ;;  %v12423_v58 = vrot.slane %v12422_v21, 7  ;;  %v12424_v49 = vrot.slane %v12330_v55, 7 }
 0x213   :  { %v2561_v50 = vadd.f32 %v12049_v4, %v2511_v61  ;;  %v1265_v33 = vadd.f32 %v1138_v56, %v980_v2  ;;  %v1604_v57 = vmul.f32 %v7201_v10, %v12426_v41  ;;  %v1605_v17 = vmul.f32 %v7201_v10, %v12427_v12 }
 0x214   :  { %v1425_v63 = vsel %vm1406_vm3, %v12423_v58, %v12421_v53  ;;  %v12425_v6 = vmov %v12421_v53  ;;  %v2606_v28 = vmax.f32 %v2560_v45, 0.0  ;;  %v1266_v37 = vadd.f32 %v1140_v19, %v981_v36 }
 0x215   :  { %v1427_v54 = vsel %vm1406_vm3, %v12425_v6, %v12424_v49  ;;  %v9542_v8 = vmul.f32 %v7205_v11, %v12427_v12  ;;  %v1706_v55 = vmul.f32 %v7205_v11, %v12335_v59  ;;  %v2607_v62 = vmax.f32 %v2561_v50, 0.0 }
 0x216   :  { %v1554_v53 = vadd.f32 %v1425_v63, %v1265_v33  ;;  %v9548_v2 = vmul.f32 %v7219_v16, %v12427_v12  ;;  %v1986_v61 = vmul.f32 %v7219_v16, %v12335_v59  ;;  %v9552_v56 = vrot.slane %v2606_v28, 1 }
 0x217   :  { %v1555_v45 = vadd.f32 %v1427_v54, %v1266_v37  ;;  %v11788_v19 = vrot.slane %v9542_v8, 4  ;;  %v1807_v36 = vrot.slane %v1706_v55, 4  ;;  %v2721_v58 = vrot.slane %v2607_v62, 1 }
 0x218   :  { %v1650_v49 = vadd.f32 %v1604_v57, %v1554_v53  ;;  %v11789_v6 = vrot.slane %v9548_v2, 5  ;;  %v2087_v44 = vrot.slane %v1986_v61, 5  ;;  %v12428_v63 = vrot.slane %v9126_v9, 6 }
 0x219   :  { %v12429_v50 = vrot.slane %v9134_v29, 6  ;;  %v1651_v48 = vadd.f32 %v1605_v17, %v1555_v45  ;;  %v1808_v60 = vsel %vm1789_vm4, %v11788_v19, %v1807_v36  ;;  %v9566_v54 = vmul.f32 %v8857_v51, %v12427_v12 }
 0x21a   :  { %v2722_v57 = vsel %vm554_vm0, %v9552_v56, %v2721_v58  ;;  %v2724_v37 = vsel %vm554_vm0, %v2721_v58, %v9112_v43  ;;  %v12430_v9 = vrot.slane %v9223_v13, 4  ;;  %v1935_v53 = vadd.f32 %v1808_v60, %v1650_v49 }
 0x21b   :  { %v2956_v33 = vsel %vm1119_vm2, %v12429_v50, %v12428_v63  ;;  %v9575_v17 = vmax.f32 %v2606_v28, %v2722_v57  ;;  %v9577_v61 = vmax.f32 %v2607_v62, %v2724_v37  ;;  %v2088_v12 = vsel %vm2069_vm5, %v11789_v6, %v2087_v44  ;;  %v12436_v57 = vld [vmem:[#allocation133_spill] sm:$0xff] }
 0x21c   :  { %v1810_v55 = vsel %vm1789_vm4, %v1807_v36, %v12430_v9  ;;  %v12431_v63 = vrot.slane %v9230_v47, 5  ;;  %v2215_v19 = vadd.f32 %v2088_v12, %v1935_v53  ;;  %v2266_v43 = vmul.f32 %v8857_v51, %v12335_v59  ;;  %v12440_v53 = vld [vmem:[#allocation199_spill] sm:$0xff] }
 0x21d   :  { %v1936_v45 = vadd.f32 %v1810_v55, %v1651_v48  ;;  %v11791_v13 = vrot.slane %v9566_v54, 6  ;;  %v11790_v60 = vrot.slane %v9577_v61, 6  ;;  %v3062_v28 = vmax.f32 %v9577_v61, %v2956_v33 }
 0x21e   :  { %v2090_v50 = vsel %vm2069_vm5, %v2087_v44, %v12431_v63  ;;  %v12432_v48 = vrot.slane %v9341_v3, 6  ;;  %v12433_v36 = vrot.slane %v9339_v52, 6  ;;  %v2366_v47 = vrot.slane %v2266_v43, 6  ;;  %v12434_v44 = vld [vmem:[#allocation194_spill] sm:$0xff] }
 0x21f   :  { %v2216_v62 = vadd.f32 %v2090_v50, %v1936_v45  ;;  %v12435_v49 = vrot.slane %v12434_v44, 1  ;;  %v12437_v37 = vrot.slane %v12436_v57, 1  ;;  %v12438_v9 = vrot.slane %v12363_v15, 1  ;;  %v12442_v45 = vld [vmem:[#allocation134_spill] sm:$0xff] }
 0x220   :  { %v9595_v58 = vsel %vm1119_vm2, %v12433_v36, %v12432_v48  ;;  %v12441_v3 = vrot.slane %v12440_v53, 2  ;;  %v12443_v12 = vrot.slane %v12442_v45, 2  ;;  %v12444_v50 = vrot.slane %v9134_v29, 6  ;;  %v12445_v48 = vld [vmem:[#allocation140_spill] sm:$0xff] }
 0x221   :  { %v601_v59 = vsel %vm554_vm0, %v12437_v37, %v12435_v49  ;;  %v12439_v55 = vmov %v12435_v49  ;;  %v12446_v49 = vld [vmem:[#allocation198_spill] sm:$0xff]  ;;  %v12447_v44 = vrot.slane %v12373_v1, 2  ;;  %v2367_v29 = vsel %vm1119_vm2, %v11791_v13, %v2366_v47 }
 0x222   :  { %v603_v33 = vsel %vm554_vm0, %v12439_v55, %v12438_v9  ;;  %v881_v63 = vsel %vm834_vm1, %v12443_v12, %v12441_v3  ;;  %v2954_v43 = vsel %vm1119_vm2, %v11790_v60, %v12444_v50  ;;  %v714_v36 = vadd.f32 %v601_v59, %v12445_v48  ;;  %v12450_v50 = vld [vmem:[#allocation192_spill] sm:$0xff] }
 0x223   :  { %v715_v15 = vadd.f32 %v603_v33, %v12446_v49  ;;  %v12448_v37 = vmov %v12441_v3  ;;  %v3061_v55 = vmax.f32 %v9575_v17, %v2954_v43  ;;  %v12449_v3 = vrot.slane %v9254_v34, 6  ;;  %v12452_v48 = vld [vmem:[#allocation200_spill] sm:$0xff]  ;;  %v12456_v34 = vld [vmem:[#allocation193_spill] sm:$0xff] }
 0x224   :  { %v883_v9 = vsel %vm834_vm1, %v12448_v37, %v12447_v44  ;;  %v12451_v59 = vrot.slane %v12450_v50, 6  ;;  %v12453_v33 = vrot.slane %v12452_v48, 6  ;;  %v2494_v49 = vadd.f32 %v2367_v29, %v2215_v19 }
 0x225   :  { %v2369_v12 = vsel %vm1119_vm2, %v2366_v47, %v12449_v3  ;;  %v994_v6 = vadd.f32 %v881_v63, %v714_v36  ;;  %v995_v44 = vadd.f32 %v883_v9, %v715_v15  ;;  %v3111_v37 = vpack.c.bf16 %v3062_v28, %v3061_v55  ;;  %v12458_v47 = vld [vmem:[#allocation201_spill] sm:$0xff]  ;;  %v12463_v9 = vld [vmem:[#allocation144_spill] sm:$0xff] }
 0x226   :  { %v1166_v1 = vsel %vm1119_vm2, %v12453_v33, %v12451_v59  ;;  %v2495_v53 = vadd.f32 %v2369_v12, %v2216_v62  ;;  %v12454_v43 = vrot.slane %v12380_v27, 6  ;;  %v12455_v60 = vmov %v12451_v59 }
 0x227   :  { %v12457_v46 = vrot.slane %v12456_v34, 7  ;;  %v12459_v3 = vrot.slane %v12458_v47, 7  ;;  %v2544_v28 = vadd.f32 %v12049_v4, %v2494_v49  ;;  %v1279_v63 = vadd.f32 %v1166_v1, %v994_v6  ;;  %5885 = vmatprep.subr.bf16.mxu0 %v3111_v37 }
 0x228   :  { %v1168_v13 = vsel %vm1119_vm2, %v12455_v60, %v12454_v43  ;;  %v2545_v27 = vadd.f32 %v12049_v4, %v2495_v53  ;;  %v12462_v60 = vld [vmem:[#allocation181_spill] sm:$0xff]  ;;  %v1619_v55 = vmul.f32 %v7201_v10, %v12463_v9  ;;  %v9666_v59 = vmul.f32 %v7219_v16, %v12463_v9 }
 0x229   :  { %v1453_v0 = vsel %vm1406_vm3, %v12459_v3, %v12457_v46  ;;  %v12461_v19 = vmov %v12457_v46  ;;  %v1280_v36 = vadd.f32 %v1168_v13, %v995_v44  ;;  %v1618_v15 = vmul.f32 %v7201_v10, %v12462_v60 }
 0x22a   :  { %v1455_v62 = vsel %vm1406_vm3, %v12461_v19, %v12460_v24  ;;  %v9659_v46 = vmul.f32 %v7205_v11, %v12463_v9  ;;  %v1720_v24 = vmul.f32 %v7205_v11, %v12392_v31  ;;  %v2590_v22 = vmax.f32 %v2544_v28, 0.0 }
 0x22b   :  { %v2591_v29 = vmax.f32 %v2545_v27, 0.0  ;;  %v1568_v12 = vadd.f32 %v1453_v0, %v1279_v63  ;;  %v1569_v50 = vadd.f32 %v1455_v62, %v1280_v36  ;;  %v2000_v33 = vmul.f32 %v7219_v16, %v12392_v31 }
 0x22c   :  { %v1833_v6 = vrot.slane %v9659_v46, 4  ;;  %v1835_v13 = vrot.slane %v1720_v24, 4  ;;  %v9670_v1 = vrot.slane %v2590_v22, 1  ;;  %v12464_v37 = vrot.slane %v9443_v39, 4 }
 0x22d   :  { %v2689_v49 = vrot.slane %v2591_v29, 1  ;;  %v1664_v53 = vadd.f32 %v1618_v15, %v1568_v12  ;;  %v1665_v44 = vadd.f32 %v1619_v55, %v1569_v50  ;;  %v11798_v34 = vrot.slane %v9666_v59, 5 }
 0x22e   :  { %v1836_v0 = vsel %vm1789_vm4, %v1833_v6, %v1835_v13  ;;  %v1838_v43 = vsel %vm1789_vm4, %v1835_v13, %v12464_v37  ;;  %v2115_v3 = vrot.slane %v2000_v33, 5  ;;  %v9685_v63 = vadd.f32 %v9474_v20, %v9469_v14 }
 0x22f   :  { %v2690_v19 = vsel %vm554_vm0, %v9670_v1, %v2689_v49  ;;  %v2692_v62 = vsel %vm554_vm0, %v2689_v49, %v9322_v38  ;;  %v1949_v28 = vadd.f32 %v1836_v0, %v1664_v53  ;;  %v1950_v27 = vadd.f32 %v1838_v43, %v1665_v44  ;;  %v12468_v53 = vld [vmem:[#allocation41_spill] sm:$0xff]  ;;  %v12473_v43 = vld [vmem:[#allocation35_spill] sm:$0xff] }
 0x230   :  { %v2949_v36 = vrot.slane %v9575_v17, 6  ;;  %v9688_v39 = vmax.f32 %v2590_v22, %v2690_v19  ;;  %v9690_v15 = vmax.f32 %v2591_v29, %v2692_v62  ;;  %v2116_v55 = vsel %vm2069_vm5, %v11798_v34, %v2115_v3  ;;  %v12474_v19 = vld [vmem:[#allocation213_spill] sm:$0xff] }
 0x231   :  { %v12465_v24 = vrot.slane %v9451_v7, 5  ;;  %v9700_v12 = vmul.f32 %v8857_v51, %v12463_v9  ;;  %v2280_v20 = vmul.f32 %v8857_v51, %v12392_v31  ;;  %v2229_v29 = vadd.f32 %v2116_v55, %v1949_v28  ;;  %v12466_v7 = vld [vmem:[#allocation214_spill] sm:$0xff]  ;;  %v12475_v28 = vld [vmem:[#allocation36_spill] sm:$0xff] }
 0x232   :  { %v2919_v14 = vrot.slane %v9690_v15, 6  ;;  %v3046_v22 = vmax.f32 %v9690_v15, %v9595_v58  ;;  %v12467_v49 = vrot.slane %v12466_v7, 1  ;;  %v12469_v44 = vrot.slane %v12468_v53, 1  ;;  %v12477_v55 = vld [vmem:[#allocation42_spill] sm:$0xff] }
 0x233   :  { %v2118_v38 = vsel %vm2069_vm5, %v2115_v3, %v12465_v24  ;;  %v11794_v13 = vrot.slane %v9700_v12, 6  ;;  %v2394_v33 = vrot.slane %v2280_v20, 6  ;;  %v12470_v0 = vrot.slane %v12401_v32, 1 }
 0x234   :  { %v2230_v50 = vadd.f32 %v2118_v38, %v1950_v27  ;;  %v569_v9 = vsel %vm554_vm0, %v12469_v44, %v12467_v49  ;;  %v12471_v51 = vmov %v12467_v49  ;;  %v12472_v37 = vrot.slane %v9339_v52, 6 }
 0x235   :  { %v571_v31 = vsel %vm554_vm0, %v12471_v51, %v12470_v0  ;;  %v698_v3 = vadd.f32 %v569_v9, %v12473_v43  ;;  %v12476_v27 = vrot.slane %v12475_v28, 2  ;;  %v12478_v24 = vrot.slane %v12477_v55, 2  ;;  %v12488_v28 = vld [vmem:[#allocation22_spill] sm:$0xff] }
 0x236   :  { %v2922_v58 = vsel %vm1119_vm2, %v2919_v14, %v12472_v37  ;;  %v699_v62 = vadd.f32 %v571_v31, %v12474_v19  ;;  %v2395_v52 = vsel %vm1119_vm2, %v11794_v13, %v2394_v33  ;;  %v12479_v20 = vrot.slane %v9458_v25, 6 }
 0x237   :  { %v849_v32 = vsel %vm834_vm1, %v12478_v24, %v12476_v27  ;;  %v3045_v38 = vmax.f32 %v9688_v39, %v2922_v58  ;;  %v12480_v49 = vrot.slane %v12410_v35, 2  ;;  %v12481_v44 = vmov %v12476_v27  ;;  %v12482_v58 = vld [vmem:[#allocation77_spill] sm:$0xff]  ;;  %v12484_v27 = vld [vmem:[#allocation40_spill] sm:$0xff] }
 0x238   :  { %v2397_v7 = vsel %vm1119_vm2, %v2394_v33, %v12479_v20  ;;  %v2508_v0 = vadd.f32 %v2395_v52, %v2229_v29  ;;  %v978_v31 = vadd.f32 %v849_v32, %v698_v3  ;;  %v12483_v19 = vrot.slane %v12482_v58, 6 }
 0x239   :  { %v851_v9 = vsel %vm834_vm1, %v12481_v44, %v12480_v49  ;;  %v2509_v51 = vadd.f32 %v2397_v7, %v2230_v50  ;;  %v3103_v43 = vpack.c.bf16 %v3046_v22, %v3045_v38  ;;  %v12485_v24 = vrot.slane %v12484_v27, 6  ;;  %v12490_v49 = vld [vmem:[#allocation30_spill] sm:$0xff]  ;;  %v12494_v7 = vld [vmem:[#allocation196_spill] sm:$0xff] }
 0x23a   :  { %v979_v37 = vadd.f32 %v851_v9, %v699_v62  ;;  %v12486_v25 = vrot.slane %v12416_v42, 6  ;;  %v12487_v33 = vmov %v12483_v19  ;;  %v12489_v20 = vrot.slane %v12488_v28, 7  ;;  %v12495_v9 = vld [vmem:[#allocation167_spill] sm:$0xff] }
 0x23b   :  { %v1134_v13 = vsel %vm1119_vm2, %v12485_v24, %v12483_v19  ;;  %v12491_v29 = vrot.slane %v12490_v49, 7  ;;  %v2558_v22 = vadd.f32 %v12049_v4, %v2508_v0  ;;  %v2559_v3 = vadd.f32 %v12049_v4, %v2509_v51  ;;  %5886 = vmatpush3.bf16.msra.mxu0 %v3103_v43 }
 0x23c   :  { %v1136_v35 = vsel %vm1119_vm2, %v12487_v33, %v12486_v25  ;;  %v1263_v62 = vadd.f32 %v1134_v13, %v978_v31  ;;  %v12492_v38 = vrot.slane %v12422_v21, 7  ;;  %v12493_v42 = vmov %v12489_v20 }
 0x23d   :  { %v1421_v50 = vsel %vm1406_vm3, %v12491_v29, %v12489_v20  ;;  %v1264_v32 = vadd.f32 %v1136_v35, %v979_v37  ;;  %v1602_v44 = vmul.f32 %v7201_v10, %v12494_v7  ;;  %v1603_v58 = vmul.f32 %v7201_v10, %v12495_v9 }
 0x23e   :  { %v1423_v52 = vsel %vm1406_vm3, %v12493_v42, %v12492_v38  ;;  %v9770_v0 = vmul.f32 %v7205_v11, %v12495_v9  ;;  %v2604_v51 = vmax.f32 %v2558_v22, 0.0  ;;  %v2605_v13 = vmax.f32 %v2559_v3, 0.0  ;;  %v9784_v22 = vld [vmem:[#allocation2 + $0x8] ss:$0 sm:$0xff] }
 0x23f   :  { %v1552_v31 = vadd.f32 %v1421_v50, %v1263_v62  ;;  %v1553_v37 = vadd.f32 %v1423_v52, %v1264_v32  ;;  %v1704_v21 = vmul.f32 %v7205_v11, %v12426_v41  ;;  %v9777_v19 = vmul.f32 %v7219_v16, %v12495_v9 }
 0x240   :  { %v11796_v43 = vrot.slane %v9770_v0, 4  ;;  %v1984_v24 = vmul.f32 %v7219_v16, %v12426_v41  ;;  %v9781_v25 = vrot.slane %v2604_v51, 1  ;;  %v2717_v33 = vrot.slane %v2605_v13, 1 }
 0x241   :  { %v1648_v35 = vadd.f32 %v1602_v44, %v1552_v31  ;;  %v1649_v28 = vadd.f32 %v1603_v58, %v1553_v37  ;;  %v1803_v20 = vrot.slane %v1704_v21, 4  ;;  %v11795_v29 = vrot.slane %v9777_v19, 5 }
 0x242   :  { %v2083_v50 = vrot.slane %v1984_v24, 5  ;;  %v9788_v3 = vmul.f32 %v9784_v22, %v12495_v9  ;;  %v2718_v62 = vsel %vm554_vm0, %v9781_v25, %v2717_v33  ;;  %v2720_v32 = vsel %vm554_vm0, %v2717_v33, %v9552_v56 }
 0x243   :  { %v12496_v38 = vrot.slane %v9577_v61, 6  ;;  %v2264_v52 = vmul.f32 %v9784_v22, %v12426_v41  ;;  %v9802_v58 = vmax.f32 %v2605_v13, %v2720_v32  ;;  %v1804_v9 = vsel %vm1789_vm4, %v11796_v43, %v1803_v20 }
 0x244   :  { %v12497_v31 = vrot.slane %v9542_v8, 4  ;;  %v9810_v61 = vmax.f32 %v2604_v51, %v2718_v62  ;;  %v1933_v37 = vadd.f32 %v1804_v9, %v1648_v35  ;;  %v2084_v41 = vsel %vm2069_vm5, %v11795_v29, %v2083_v50  ;;  %v12499_v62 = vld [vmem:[#allocation129_spill] sm:$0xff] }
 0x245   :  { %v2952_v42 = vsel %vm1119_vm2, %v2949_v36, %v12496_v38  ;;  %v11797_v24 = vrot.slane %v9802_v58, 6  ;;  %v12498_v33 = vrot.slane %v9548_v2, 5  ;;  %v11799_v8 = vrot.slane %v9788_v3, 6 }
 0x246   :  { %v1806_v56 = vsel %vm1789_vm4, %v1803_v20, %v12497_v31  ;;  %v3060_v13 = vmax.f32 %v9802_v58, %v2952_v42  ;;  %v2213_v38 = vadd.f32 %v2084_v41, %v1933_v37  ;;  %v2362_v51 = vrot.slane %v2264_v52, 6  ;;  %v12505_v37 = vld [vmem:[#allocation81_spill] sm:$0xff] }
 0x247   :  { %v1934_v21 = vadd.f32 %v1806_v56, %v1649_v28  ;;  %v2086_v32 = vsel %vm2069_vm5, %v2083_v50, %v12498_v33  ;;  %v12500_v35 = vrot.slane %v12499_v62, 1  ;;  %v12501_v28 = vld [vmem:[#allocation78_spill] sm:$0xff]  ;;  %v2950_v42 = vsel %vm1119_vm2, %v11797_v24, %v2949_v36  ;;  %v12508_v33 = vld [vmem:[#allocation80_spill] sm:$0xff]  ;;  %v12514_v24 = vld [vmem:[#allocation137_spill] sm:$0xff] }
 0x248   :  { %v12502_v9 = vrot.slane %v12501_v28, 1  ;;  %v12503_v2 = vrot.slane %v12436_v57, 1  ;;  %v3059_v17 = vmax.f32 %v9810_v61, %v2950_v42  ;;  %v2363_v36 = vsel %vm1119_vm2, %v11799_v8, %v2362_v51  ;;  %v12516_v8 = vld [vmem:[#allocation131_spill] sm:$0xff] }
 0x249   :  { %v2214_v20 = vadd.f32 %v2086_v32, %v1934_v21  ;;  %v12504_v50 = vmov %v12500_v35  ;;  %v12506_v21 = vld [vmem:[#allocation130_spill] sm:$0xff]  ;;  %v12509_v32 = vrot.slane %v12508_v33, 2  ;;  %v12510_v57 = vrot.slane %v9566_v54, 6 }
 0x24a   :  { %v597_v31 = vsel %vm554_vm0, %v12502_v9, %v12500_v35  ;;  %v599_v56 = vsel %vm554_vm0, %v12504_v50, %v12503_v2  ;;  %v12507_v41 = vrot.slane %v12506_v21, 2  ;;  %v12511_v9 = vld [vmem:[#allocation136_spill] sm:$0xff]  ;;  %v2492_v50 = vadd.f32 %v2363_v36, %v2213_v38 }
 0x24b   :  { %v712_v52 = vadd.f32 %v597_v31, %v12505_v37  ;;  %v2365_v62 = vsel %vm1119_vm2, %v2362_v51, %v12510_v57  ;;  %v713_v2 = vadd.f32 %v599_v56, %v12511_v9  ;;  %v12512_v37 = vrot.slane %v12442_v45, 2  ;;  %v12522_v21 = vld [vmem:[#allocation132_spill] sm:$0xff] }
 0x24c   :  { %v877_v35 = vsel %vm834_vm1, %v12509_v32, %v12507_v41  ;;  %v2493_v31 = vadd.f32 %v2365_v62, %v2214_v20  ;;  %v12513_v29 = vmov %v12507_v41  ;;  %v3110_v42 = vpack.c.bf16 %v3060_v13, %v3059_v17  ;;  %v12527_v62 = vld [vmem:[#allocation189_spill] sm:$0xff] }
 0x24d   :  { %v879_v41 = vsel %vm834_vm1, %v12513_v29, %v12512_v37  ;;  %v992_v32 = vadd.f32 %v877_v35, %v712_v52  ;;  %v12515_v34 = vrot.slane %v12514_v24, 6  ;;  %v12517_v44 = vrot.slane %v12516_v8, 6  ;;  %v12520_v52 = vld [vmem:[#allocation141_spill] sm:$0xff] }
 0x24e   :  { %v993_v43 = vadd.f32 %v879_v41, %v713_v2  ;;  %v12518_v51 = vrot.slane %v12452_v48, 6  ;;  %v2542_v45 = vadd.f32 %v12049_v4, %v2492_v50  ;;  %v2543_v56 = vadd.f32 %v12049_v4, %v2493_v31  ;;  %5887 = vmatprep.subr.bf16.mxu0 %v3110_v42  ;;  %v12526_v24 = vld [vmem:[#allocation105_spill] sm:$0xff] }
 0x24f   :  { %v1162_v54 = vsel %vm1119_vm2, %v12517_v44, %v12515_v34  ;;  %v12519_v38 = vmov %v12515_v34  ;;  %v12521_v13 = vrot.slane %v12520_v52, 7  ;;  %v12523_v35 = vrot.slane %v12522_v21, 7 }
 0x250   :  { %v1164_v20 = vsel %vm1119_vm2, %v12519_v38, %v12518_v51  ;;  %v1277_v29 = vadd.f32 %v1162_v54, %v992_v32  ;;  %v12524_v34 = vrot.slane %v12458_v47, 7  ;;  %v1616_v57 = vmul.f32 %v7201_v10, %v12526_v24 }
 0x251   :  { %v1449_v17 = vsel %vm1406_vm3, %v12523_v35, %v12521_v13  ;;  %v1278_v36 = vadd.f32 %v1164_v20, %v993_v43  ;;  %v12525_v48 = vmov %v12521_v13  ;;  %v1617_v9 = vmul.f32 %v7201_v10, %v12527_v62 }
 0x252   :  { %v1451_v44 = vsel %vm1406_vm3, %v12525_v48, %v12524_v34  ;;  %v2588_v2 = vmax.f32 %v2542_v45, 0.0  ;;  %v2589_v50 = vmax.f32 %v2543_v56, 0.0  ;;  %v1566_v31 = vadd.f32 %v1449_v17, %v1277_v29 }
 0x253   :  { %v9883_v37 = vmul.f32 %v7205_v11, %v12527_v62  ;;  %v1567_v43 = vadd.f32 %v1451_v44, %v1278_v36  ;;  %v1718_v47 = vmul.f32 %v7205_v11, %v12462_v60  ;;  %v9889_v41 = vmul.f32 %v7219_v16, %v12527_v62 }
 0x254   :  { %v1998_v32 = vmul.f32 %v7219_v16, %v12462_v60  ;;  %v9893_v42 = vrot.slane %v2588_v2, 1  ;;  %v2685_v54 = vrot.slane %v2589_v50, 1  ;;  %v1662_v51 = vadd.f32 %v1616_v57, %v1566_v31 }
 0x255   :  { %v11802_v38 = vrot.slane %v9883_v37, 4  ;;  %v1663_v20 = vadd.f32 %v1617_v9, %v1567_v43  ;;  %v1831_v45 = vrot.slane %v1718_v47, 4  ;;  %v11801_v56 = vrot.slane %v9889_v41, 5 }
 0x256   :  { %v2111_v29 = vrot.slane %v1998_v32, 5  ;;  %v2686_v52 = vsel %vm554_vm0, %v9893_v42, %v2685_v54  ;;  %v2688_v13 = vsel %vm554_vm0, %v2685_v54, %v9670_v1  ;;  %v9903_v35 = vmul.f32 %v9784_v22, %v12527_v62  ;;  %v12531_v32 = vld [vmem:[#allocation150_spill] sm:$0xff] }
 0x257   :  { %v2278_v17 = vmul.f32 %v9784_v22, %v12462_v60  ;;  %v1257_v36 = vadd.f32 %v9395_v30, %v9685_v63  ;;  %v9909_v34 = vmax.f32 %v2589_v50, %v2688_v13  ;;  %v1832_v48 = vsel %vm1789_vm4, %v11802_v38, %v1831_v45 }
 0x258   :  { %v1834_v1 = vsel %vm1789_vm4, %v1831_v45, %v1833_v6  ;;  %v9917_v44 = vmax.f32 %v2588_v2, %v2686_v52  ;;  %v12528_v24 = vrot.slane %v9688_v39, 6  ;;  %v1947_v57 = vadd.f32 %v1832_v48, %v1662_v51 }
 0x259   :  { %v1948_v30 = vadd.f32 %v1834_v1, %v1663_v20  ;;  %v11803_v63 = vrot.slane %v9909_v34, 6  ;;  %v2112_v62 = vsel %vm2069_vm5, %v11801_v56, %v2111_v29  ;;  %v12529_v46 = vrot.slane %v9666_v59, 5  ;;  %v12533_v59 = vld [vmem:[#allocation172_spill] sm:$0xff] }
 0x25a   :  { %v2920_v60 = vsel %vm1119_vm2, %v12528_v24, %v2919_v14  ;;  %v11800_v9 = vrot.slane %v9903_v35, 6  ;;  %v2945_v15 = vrot.slane %v9810_v61, 6  ;;  %v2227_v2 = vadd.f32 %v2112_v62, %v1947_v57  ;;  %v12537_v57 = vld [vmem:[#allocation152_spill] sm:$0xff]  ;;  %v12539_v62 = vld [vmem:[#allocation173_spill] sm:$0xff] }
 0x25b   :  { %v2114_v6 = vsel %vm2069_vm5, %v2111_v29, %v12529_v46  ;;  %v2390_v31 = vrot.slane %v2278_v17, 6  ;;  %v12530_v14 = vmov %v12528_v24  ;;  %v3044_v47 = vmax.f32 %v9909_v34, %v2920_v60  ;;  %v12536_v17 = vld [vmem:[#allocation176_spill] sm:$0xff] }
 0x25c   :  { %v2228_v50 = vadd.f32 %v2114_v6, %v1948_v30  ;;  %v2918_v43 = vsel %vm1119_vm2, %v11803_v63, %v12530_v14  ;;  %v12532_v54 = vrot.slane %v12531_v32, 1  ;;  %v12534_v51 = vrot.slane %v12533_v59, 1 }
 0x25d   :  { %v3043_v45 = vmax.f32 %v9917_v44, %v2918_v43  ;;  %v2391_v29 = vsel %vm1119_vm2, %v11800_v9, %v2390_v31  ;;  %v12535_v39 = vrot.slane %v9700_v12, 6  ;;  %v11804_v13 = vmov 0.0   ;;  %v6591_v12 = vld [vmem:[%s11351_s9 + $0x4] ss:$12 sps:$4 sm:$0xff]  }
 0x25e   :  { %v641_v20 = vsel %vm554_vm0, %v12534_v51, %v12532_v54  ;;  %6110 = vmatprep.subr.bf16.mxu1 %v11804_v13  ;;  %v9954_v1 = vadd.f32 %v9411_v26, %v1257_v36  ;;  %v2506_v24 = vadd.f32 %v2391_v29, %v2227_v2  ;;  %v12538_v30 = vrot.slane %v12537_v57, 2  ;;  %v12543_v54 = vld [vmem:[#allocation153_spill] sm:$0xff]  ;;  %3245 = vmatprep.mubr.bf16.mxu0 %v6591_v12 }
 0x25f   :  { %v2393_v52 = vsel %vm1119_vm2, %v2390_v31, %v12535_v39  ;;  %v734_v48 = vadd.f32 %v641_v20, %v12536_v17  ;;  %v12540_v46 = vrot.slane %v12539_v62, 2  ;;  %v3102_v14 = vpack.c.bf16 %v3044_v47, %v3043_v45  ;;  %v12545_v29 = vld [vmem:[#allocation49_spill] sm:$0xff]  ;;  %v12546_v39 = vld [vmem:[#allocation46_spill] sm:$0xff] }
 0x260   :  { %v2507_v60 = vadd.f32 %v2393_v52, %v2228_v50  ;;  %v9967_v26 = vmul.f32 %v7219_v16, %v7802_v40  ;;  %v2556_v36 = vadd.f32 %v12049_v4, %v2506_v24  ;;  %v12541_v50 = vld [vmem:[#allocation158_spill] sm:$0xff]  ;;  %v12544_v51 = vrot.slane %v12543_v54, 6 }
 0x261   :  { %v921_v6 = vsel %vm834_vm1, %v12540_v46, %v12538_v30  ;;  %v12542_v32 = vrot.slane %v12541_v50, 6  ;;  %v2529_v52 = vadd.f32 %v12546_v39, %v12545_v29  ;;  %5888 = vmatpush3.bf16.msra.mxu0 %v3102_v14  ;;  %v12547_v47 = vrot.slane %v9802_v58, 6  ;;  %v12548_v30 = vld [vmem:[#allocation56_spill] sm:$0xff]  ;;  %v12555_v29 = vld [vmem:[#allocation59_spill] sm:$0xff] }
 0x262   :  { %v1014_v43 = vadd.f32 %v921_v6, %v734_v48  ;;  %v2557_v2 = vadd.f32 %v12049_v4, %v2507_v60  ;;  %v9985_v48 = vmul.f32 %v9784_v22, %v7802_v40  ;;  %v2852_v24 = vsel %vm554_vm0, %v9293_v18, %v9271_v23  ;;  %v12550_v6 = vld [vmem:[#allocation155_spill] sm:$0xff] }
 0x263   :  { %v1206_v20 = vsel %vm1119_vm2, %v12544_v51, %v12542_v32  ;;  %v2948_v45 = vsel %vm1119_vm2, %v2945_v15, %v12547_v47  ;;  %v2602_v60 = vmax.f32 %v2556_v36, 0.0  ;;  %v12549_v46 = vrot.slane %v12548_v30, 7  ;;  %v12552_v32 = vld [vmem:[#allocation100_spill] sm:$0xff] }
 0x264   :  { %v1299_v17 = vadd.f32 %v1206_v20, %v1014_v43  ;;  %v2603_v57 = vmax.f32 %v2557_v2, 0.0  ;;  %v12551_v12 = vrot.slane %v12550_v6, 7  ;;  %v2579_v14 = vadd.f32 %v12049_v4, %v2529_v52 }
 0x265   :  { %v1638_v43 = vmul.f32 %v7201_v10, %v12167_v5  ;;  %v11809_v40 = vrot.slane %v9967_v26, 5  ;;  %v12553_v51 = vmax.f32 %v12552_v32, 0.0  ;;  %v10001_v23 = vrot.slane %v2602_v60, 1 }
 0x266   :  { %v1493_v58 = vsel %vm1406_vm3, %v12551_v12, %v12549_v46  ;;  %v2713_v36 = vrot.slane %v2603_v57, 1  ;;  %v2625_v2 = vmax.f32 %v2579_v14, 0.0  ;;  %v2991_v39 = vrot.slane %v12555_v29, 6 }
 0x267   :  { %v1588_v50 = vadd.f32 %v1493_v58, %v1299_v17  ;;  %v2857_v20 = vmax.f32 %v12553_v51, %v2852_v24  ;;  %12554 = vst [vmem:[#allocation95_spill] sm:$0xff] %v10001_v23  ;;  %v11806_v30 = vrot.slane %v9985_v48, 6  ;;  %v12556_v24 = vld [vmem:[#allocation197_spill] sm:$0xff]  ;;  %v12557_v51 = vld [vmem:[#allocation186_spill] sm:$0xff]  ;;  %v12573_v61 = vrot.slane %v12539_v62, 2 }
 0x268   :  { %v2714_v52 = vsel %vm554_vm0, %v10001_v23, %v2713_v36  ;;  %v2716_v17 = vsel %vm554_vm0, %v2713_v36, %v9781_v25  ;;  %v2757_v12 = vrot.slane %v2625_v2, 1  ;;  %v12558_v14 = vrot.slane %v12557_v51, 5  ;;  %v12561_v36 = vld [vmem:[#allocation205_spill] sm:$0xff] }
 0x269   :  { %v1684_v47 = vadd.f32 %v1638_v43, %v1588_v50  ;;  %v2989_v46 = vrot.slane %v2857_v20, 6  ;;  %v10009_v58 = vmax.f32 %v2603_v57, %v2716_v17  ;;  %v12559_v20 = vld [vmem:[#allocation187_spill] sm:$0xff]  ;;  %v12563_v17 = vld [vmem:[#allocation37_spill] sm:$0xff]  ;;  %v10030_v56 = vmax.f32 %v2602_v60, %v2714_v52 }
 0x26a   :  { %v2156_v50 = vsel %vm2069_vm5, %v11809_v40, %v12558_v14  ;;  %v12560_v29 = vrot.slane %v12559_v20, 6  ;;  %v2846_v25 = vmax.f32 %v2625_v2, %v2757_v12  ;;  %v2850_v57 = vsel %vm554_vm0, %v2757_v12, %v9293_v18 }
 0x26b   :  { %v1969_v32 = vadd.f32 %v12556_v24, %v1684_v47  ;;  %v2992_v43 = vsel %vm1119_vm2, %v2989_v46, %v2991_v39  ;;  %v12562_v47 = vrot.slane %v12561_v36, 1  ;;  %v12564_v24 = vrot.slane %v12563_v17, 1 }
 0x26c   :  { %v2435_v9 = vsel %vm1119_vm2, %v11806_v30, %v12560_v29  ;;  %v11808_v39 = vrot.slane %v10009_v58, 6  ;;  %v11807_v20 = vmov 65535   ;;  %v3058_v29 = vmax.f32 %v10009_v58, %v2948_v45 }
 0x26d   :  { %v637_v51 = vsel %vm554_vm0, %v12564_v24, %v12562_v47  ;;  %v2249_v14 = vadd.f32 %v2156_v50, %v1969_v32  ;;  %v3208_v38 = vsel %vm3207_vm6, 4294967295, %v11807_v20  ;;  %v2856_v31 = vmax.f32 %v2625_v2, %v2850_v57  ;;  %v12567_v32 = vld [vmem:[#allocation102_spill] sm:$0xff] }
 0x26e   :  { %v3080_v63 = vmax.f32 %v2846_v25, %v2992_v43  ;;  %v12565_v18 = vrot.slane %v12533_v59, 1  ;;  %v12566_v13 = vmov %v12562_v47  ;;  %v2946_v60 = vsel %vm1119_vm2, %v11808_v39, %v2945_v15  ;;  %v12568_v47 = vld [vmem:[#allocation211_spill] sm:$0xff]  ;;  %v12569_v59 = vld [vmem:[#allocation206_spill] sm:$0xff] }
 0x26f   :  { %v2528_v52 = vadd.f32 %v2435_v9, %v2249_v14  ;;  %v732_v50 = vadd.f32 %v637_v51, %v12567_v32  ;;  %v3057_v45 = vmax.f32 %v10030_v56, %v2946_v60  ;;  %v10049_v2 = vrot.slane %v2856_v31, 6  ;;  %v12571_v25 = vld [vmem:[#allocation38_spill] sm:$0xff]  ;;  %v12577_v31 = vld [vmem:[#allocation208_spill] sm:$0xff] }
 0x270   :  { %v639_v30 = vsel %vm554_vm0, %v12566_v13, %v12565_v18  ;;  %v12570_v43 = vrot.slane %v12569_v59, 2  ;;  %v12572_v57 = vrot.slane %v12571_v25, 2  ;;  %v12575_v14 = vld [vmem:[#allocation174_spill] sm:$0xff]  ;;  %v12578_v60 = vrot.slane %v12577_v31, 6 }
 0x271   :  { %v733_v24 = vadd.f32 %v639_v30, %v12568_v47  ;;  %v2578_v15 = vadd.f32 %v12049_v4, %v2528_v52  ;;  %v12576_v18 = vrot.slane %v12575_v14, 6  ;;  %v3109_v47 = vpack.c.bf16 %v3058_v29, %v3057_v45 }
 0x272   :  { %v917_v13 = vsel %vm834_vm1, %v12572_v57, %v12570_v43  ;;  %v12574_v36 = vmov %v12570_v43  ;;  %v2990_v43 = vsel %vm1119_vm2, %v10049_v2, %v2989_v46  ;;  %v12579_v62 = vrot.slane %v12543_v54, 6  ;;  %v12587_v54 = vld [vmem:[#allocation159_spill] sm:$0xff] }
 0x273   :  { %v919_v9 = vsel %vm834_vm1, %v12574_v36, %v12573_v61  ;;  %v1012_v51 = vadd.f32 %v917_v13, %v732_v50  ;;  %v1202_v32 = vsel %vm1119_vm2, %v12578_v60, %v12576_v18  ;;  %v12580_v59 = vmov %v12576_v18  ;;  %v12581_v61 = vld [vmem:[#allocation175_spill] sm:$0xff]  ;;  %v12583_v50 = vld [vmem:[#allocation209_spill] sm:$0xff]  ;;  %5889 = vmatprep.subr.bf16.mxu0 %v3109_v47 }
 0x274   :  { %v1013_v30 = vadd.f32 %v919_v9, %v733_v24  ;;  %v1204_v57 = vsel %vm1119_vm2, %v12580_v59, %v12579_v62  ;;  %v12582_v52 = vrot.slane %v12581_v61, 7  ;;  %v12584_v24 = vrot.slane %v12583_v50, 7  ;;  %v12588_v18 = vld [vmem:[#allocation115_spill] sm:$0xff] }
 0x275   :  { %v2624_v36 = vmax.f32 %v2578_v15, 0.0  ;;  %v1297_v9 = vadd.f32 %v1202_v32, %v1012_v51  ;;  %v12585_v29 = vrot.slane %v12550_v6, 7  ;;  %v1636_v14 = vmul.f32 %v7201_v10, %v12587_v54 }
 0x276   :  { %v1489_v13 = vsel %vm1406_vm3, %v12584_v24, %v12582_v52  ;;  %v1298_v20 = vadd.f32 %v1204_v57, %v1013_v30  ;;  %v12586_v45 = vmov %v12582_v52  ;;  %v1637_v60 = vmul.f32 %v7201_v10, %v12588_v18 }
 0x277   :  { %v1491_v46 = vsel %vm1406_vm3, %v12586_v45, %v12585_v29  ;;  %v10090_v62 = vmul.f32 %v7205_v11, %v12588_v18  ;;  %v1738_v15 = vmul.f32 %v7205_v11, %v12167_v5  ;;  %v10094_v51 = vrot.slane %v2624_v36, 1  ;;  %v12589_v45 = vld [vmem:[#allocation183_spill] sm:$0xff] }
 0x278   :  { %v1586_v6 = vadd.f32 %v1489_v13, %v1297_v9  ;;  %v1587_v30 = vadd.f32 %v1491_v46, %v1298_v20  ;;  %v10098_v32 = vmul.f32 %v7219_v16, %v12588_v18  ;;  %v2018_v57 = vmul.f32 %v7219_v16, %v12167_v5 }
 0x279   :  { %v11813_v47 = vrot.slane %v10090_v62, 4  ;;  %v1871_v59 = vrot.slane %v1738_v15, 4  ;;  %v10105_v61 = vmul.f32 %v9784_v22, %v12588_v18  ;;  %v2758_v52 = vsel %vm554_vm0, %v10094_v51, %v2757_v12 }
 0x27a   :  { %v1682_v24 = vadd.f32 %v1636_v14, %v1586_v6  ;;  %v1683_v13 = vadd.f32 %v1637_v60, %v1587_v30  ;;  %v11812_v20 = vrot.slane %v10098_v32, 5  ;;  %v10110_v9 = vmax.f32 %v2624_v36, %v2758_v52  ;;  %v12592_v52 = vld [vmem:[#allocation53_spill] sm:$0xff] }
 0x27b   :  { %v1872_v29 = vsel %vm1789_vm4, %v11813_v47, %v1871_v59  ;;  %v12590_v46 = vrot.slane %v12589_v45, 4  ;;  %v2151_v39 = vrot.slane %v2018_v57, 5  ;;  %v3209_v18 = vsel %vm834_vm1, %v3208_v38, 0 }
 0x27c   :  { %v1967_v40 = vadd.f32 %v1872_v29, %v1682_v24  ;;  %v2298_v12 = vmul.f32 %v9784_v22, %v12167_v5  ;;  %v3079_v14 = vmax.f32 %v10110_v9, %v2990_v43  ;;  %v12591_v60 = vrot.slane %v9967_v26, 5 }
 0x27d   :  { %v1874_v15 = vsel %vm1789_vm4, %v1871_v59, %v12590_v46  ;;  %v2152_v36 = vsel %vm2069_vm5, %v11812_v20, %v2151_v39  ;;  %v11811_v30 = vrot.slane %v10105_v61, 6  ;;  %v12593_v24 = vrot.slane %v12592_v52, 1 }
 0x27e   :  { %v1968_v23 = vadd.f32 %v1874_v15, %v1683_v13  ;;  %v2154_v6 = vsel %vm2069_vm5, %v2151_v39, %v12591_v60  ;;  %v2247_v59 = vadd.f32 %v2152_v36, %v1967_v40  ;;  %v2430_v38 = vrot.slane %v2298_v12, 6  ;;  %v12594_v13 = vld [vmem:[#allocation120_spill] sm:$0xff]  ;;  %v12598_v15 = vld [vmem:[#allocation125_spill] sm:$0xff]  ;;  %v12600_v36 = vld [vmem:[#allocation66_spill] sm:$0xff] }
 0x27f   :  { %v12595_v29 = vrot.slane %v12594_v13, 1  ;;  %v3120_v45 = vpack.c.bf16 %v3080_v63, %v3079_v14  ;;  %v12596_v46 = vrot.slane %v12563_v17, 1  ;;  %v12597_v26 = vmov %v12593_v24  ;;  %v12603_v14 = vld [vmem:[#allocation121_spill] sm:$0xff] }
 0x280   :  { %v2248_v57 = vadd.f32 %v2154_v6, %v1968_v23  ;;  %v2431_v40 = vsel %vm1119_vm2, %v11811_v30, %v2430_v38  ;;  %v12599_v23 = vrot.slane %v9985_v48, 6  ;;  %v12604_v17 = vrot.slane %v12603_v14, 2 }
 0x281   :  { %v633_v5 = vsel %vm554_vm0, %v12595_v29, %v12593_v24  ;;  %v635_v39 = vsel %vm554_vm0, %v12597_v26, %v12596_v46  ;;  %v12601_v24 = vld [vmem:[#allocation68_spill] sm:$0xff]  ;;  %v3211_v29 = vand.u32 %v3209_v18, %v3120_v45  ;;  %v2526_v46 = vadd.f32 %v2431_v40, %v2247_v59  ;;  %v12613_v45 = vld [vmem:[#allocation62_spill] sm:$0xff] }
 0x282   :  { %v730_v60 = vadd.f32 %v633_v5, %v12598_v15  ;;  %v2433_v12 = vsel %vm1119_vm2, %v2430_v38, %v12599_v23  ;;  %v731_v6 = vadd.f32 %v635_v39, %v12600_v36  ;;  %v12602_v63 = vrot.slane %v12601_v24, 2  ;;  %v12607_v38 = vld [vmem:[#allocation84_spill] sm:$0xff]  ;;  %v12609_v39 = vld [vmem:[#allocation21_spill] sm:$0xff] }
 0x283   :  { %v2527_v26 = vadd.f32 %v2433_v12, %v2248_v57  ;;  %v12605_v5 = vrot.slane %v12571_v25, 2  ;;  %v12608_v23 = vrot.slane %v12607_v38, 6  ;;  %v12610_v36 = vrot.slane %v12609_v39, 6  ;;  %6111 = vmatpush3.bf16.msra.mxu1 %v3211_v29 }
 0x284   :  { %v913_v52 = vsel %vm834_vm1, %v12604_v17, %v12602_v63  ;;  %v12606_v15 = vmov %v12602_v63  ;;  %v12611_v47 = vrot.slane %v12577_v31, 6  ;;  %v2576_v25 = vadd.f32 %v12049_v4, %v2526_v46  ;;  %v12621_v46 = vld [vmem:[#allocation55_spill] sm:$0xff] }
 0x285   :  { %v915_v30 = vsel %vm834_vm1, %v12606_v15, %v12605_v5  ;;  %v1010_v48 = vadd.f32 %v913_v52, %v730_v60  ;;  %v1198_v43 = vsel %vm1119_vm2, %v12610_v36, %v12608_v23  ;;  %v12612_v18 = vmov %v12608_v23  ;;  %v12620_v52 = vld [vmem:[#allocation29_spill] sm:$0xff] }
 0x286   :  { %v1011_v20 = vadd.f32 %v915_v30, %v731_v6  ;;  %v1200_v59 = vsel %vm1119_vm2, %v12612_v18, %v12611_v47  ;;  %v2577_v57 = vadd.f32 %v12049_v4, %v2527_v26  ;;  %v12614_v60 = vrot.slane %v12613_v45, 7  ;;  %v12615_v30 = vld [vmem:[#allocation157_spill] sm:$0xff] }
 0x287   :  { %v12616_v40 = vrot.slane %v12615_v30, 7  ;;  %v12617_v6 = vrot.slane %v12583_v50, 7  ;;  %v12619_v63 = vmov 0.0   ;;  %v1295_v47 = vadd.f32 %v1198_v43, %v1010_v48 }
 0x288   :  { %v12618_v24 = vmov %v12614_v60  ;;  %6112 = vmatprep.subr.bf16.mxu1 %v12619_v63  ;;  %v1296_v17 = vadd.f32 %v1200_v59, %v1011_v20  ;;  %v1634_v29 = vmul.f32 %v7201_v10, %v12620_v52  ;;  %v1635_v26 = vmul.f32 %v7201_v10, %v12621_v46  ;;  %6122 = vmatprep.mubr.msk.bf16.mxu1 %vm6900_vm7, %v12619_v63 }
 0x289   :  { %v1485_v12 = vsel %vm1406_vm3, %v12616_v40, %v12614_v60  ;;  %v1487_v31 = vsel %vm1406_vm3, %v12618_v24, %v12617_v6  ;;  %v2622_v5 = vmax.f32 %v2576_v25, 0.0  ;;  %v2623_v15 = vmax.f32 %v2577_v57, 0.0 }
 0x28a   :  { %v10187_v38 = vmul.f32 %v7205_v11, %v12621_v46  ;;  %v1736_v50 = vmul.f32 %v7205_v11, %v12587_v54  ;;  %v1584_v23 = vadd.f32 %v1485_v12, %v1295_v47  ;;  %v1585_v36 = vadd.f32 %v1487_v31, %v1296_v17 }
 0x28b   :  { %v10193_v20 = vmul.f32 %v7219_v16, %v12621_v46  ;;  %v2016_v43 = vmul.f32 %v7219_v16, %v12587_v54  ;;  %v10197_v48 = vrot.slane %v2622_v5, 1  ;;  %v2753_v18 = vrot.slane %v2623_v15, 1 }
 0x28c   :  { %v1865_v59 = vrot.slane %v10187_v38, 4  ;;  %v1867_v25 = vrot.slane %v1736_v50, 4  ;;  %v1680_v57 = vadd.f32 %v1634_v29, %v1584_v23  ;;  %v1681_v45 = vadd.f32 %v1635_v26, %v1585_v36 }
 0x28d   :  { %v11814_v60 = vrot.slane %v10193_v20, 5  ;;  %v2147_v40 = vrot.slane %v2016_v43, 5  ;;  %v2754_v12 = vsel %vm554_vm0, %v10197_v48, %v2753_v18  ;;  %v2756_v6 = vsel %vm554_vm0, %v2753_v18, %v10094_v51 }
 0x28e   :  { %v1868_v24 = vsel %vm1789_vm4, %v1865_v59, %v1867_v25  ;;  %v12622_v31 = vrot.slane %v10090_v62, 4  ;;  %v10211_v17 = vmax.f32 %v2622_v5, %v2754_v12  ;;  %v10213_v29 = vmax.f32 %v2623_v15, %v2756_v6  ;;  %v12625_v6 = vld [vmem:[#allocation89_spill] sm:$0xff] }
 0x28f   :  { %v1965_v26 = vadd.f32 %v1868_v24, %v1680_v57  ;;  %v12623_v23 = vrot.slane %v10110_v9, 6  ;;  %v2148_v51 = vsel %vm2069_vm5, %v11814_v60, %v2147_v40  ;;  %v10224_v62 = vmul.f32 %v9784_v22, %v12621_v46  ;;  %v12627_v46 = vld [vmem:[#allocation160_spill] sm:$0xff] }
 0x290   :  { %v1870_v47 = vsel %vm1789_vm4, %v1867_v25, %v12622_v31  ;;  %v2296_v5 = vmul.f32 %v9784_v22, %v12587_v54  ;;  %v2981_v15 = vrot.slane %v10211_v17, 6  ;;  %v2983_v43 = vrot.slane %v10213_v29, 6 }
 0x291   :  { %v1966_v50 = vadd.f32 %v1870_v47, %v1681_v45  ;;  %v2988_v36 = vsel %vm1119_vm2, %v12623_v23, %v10049_v2  ;;  %v12624_v18 = vrot.slane %v10098_v32, 5  ;;  %v2245_v2 = vadd.f32 %v2148_v51, %v1965_v26 }
 0x292   :  { %v11815_v45 = vrot.slane %v10224_v62, 6  ;;  %v2426_v12 = vrot.slane %v2296_v5, 6  ;;  %v12626_v24 = vrot.slane %v12625_v6, 1  ;;  %v12628_v31 = vrot.slane %v12627_v46, 1  ;;  %v12635_v46 = vld [vmem:[#allocation92_spill] sm:$0xff] }
 0x293   :  { %v2150_v25 = vsel %vm2069_vm5, %v2147_v40, %v12624_v18  ;;  %v12629_v54 = vmov %v12623_v23  ;;  %v3078_v60 = vmax.f32 %v10213_v29, %v2988_v36  ;;  %v12630_v32 = vrot.slane %v12468_v53, 1 }
 0x294   :  { %v2246_v57 = vadd.f32 %v2150_v25, %v1966_v50  ;;  %v565_v47 = vsel %vm554_vm0, %v12628_v31, %v12626_v24  ;;  %v2986_v23 = vsel %vm1119_vm2, %v2983_v43, %v12629_v54  ;;  %v12631_v40 = vmov %v12626_v24  ;;  %v12632_v50 = vld [vmem:[#allocation138_spill] sm:$0xff]  ;;  %v12634_v24 = vld [vmem:[#allocation61_spill] sm:$0xff] }
 0x295   :  { %v567_v26 = vsel %vm554_vm0, %v12631_v40, %v12630_v32  ;;  %v696_v51 = vadd.f32 %v565_v47, %v12632_v50  ;;  %v3077_v5 = vmax.f32 %v10211_v17, %v2986_v23  ;;  %v2427_v18 = vsel %vm1119_vm2, %v11815_v45, %v2426_v12  ;;  %v12637_v31 = vld [vmem:[#allocation85_spill] sm:$0xff]  ;;  %v12664_v17 = vld [vmem:[#allocation44_spill] sm:$0xff] }
 0x296   :  { %v12633_v9 = vrot.slane %v10105_v61, 6  ;;  %v697_v29 = vadd.f32 %v567_v26, %v12634_v24  ;;  %v2524_v36 = vadd.f32 %v2427_v18, %v2245_v2  ;;  %v12636_v6 = vrot.slane %v12635_v46, 2  ;;  %v12643_v26 = vld [vmem:[#allocation91_spill] sm:$0xff] }
 0x297   :  { %v12638_v54 = vrot.slane %v12637_v31, 2  ;;  %v12639_v23 = vrot.slane %v12477_v55, 2  ;;  %v3119_v50 = vpack.c.bf16 %v3078_v60, %v3077_v5  ;;  %v12644_v2 = vrot.slane %v12643_v26, 6 }
 0x298   :  { %v2429_v25 = vsel %vm1119_vm2, %v2426_v12, %v12633_v9  ;;  %v12640_v32 = vmov %v12636_v6  ;;  %v12641_v12 = vld [vmem:[#allocation48_spill] sm:$0xff]  ;;  %v2574_v18 = vadd.f32 %v12049_v4, %v2524_v36  ;;  %v12645_v24 = vrot.slane %v12484_v27, 6  ;;  %v12653_v27 = vld [vmem:[#allocation34_spill] sm:$0xff] }
 0x299   :  { %v2525_v53 = vadd.f32 %v2429_v25, %v2246_v57  ;;  %v845_v47 = vsel %vm834_vm1, %v12638_v54, %v12636_v6  ;;  %v847_v40 = vsel %vm834_vm1, %v12640_v32, %v12639_v23  ;;  %v12642_v9 = vrot.slane %v12641_v12, 6  ;;  %v12647_v6 = vld [vmem:[#allocation47_spill] sm:$0xff]  ;;  %6113 = vmatpush3.bf16.msra.mxu1 %v3119_v50 }
 0x29a   :  { %v976_v61 = vadd.f32 %v845_v47, %v696_v51  ;;  %v977_v45 = vadd.f32 %v847_v40, %v697_v29  ;;  %v12648_v60 = vrot.slane %v12647_v6, 7  ;;  %v12649_v51 = vld [vmem:[#allocation67_spill] sm:$0xff]  ;;  %v12651_v23 = vrot.slane %v12490_v49, 7  ;;  %6114 = vmatprep.subr.bf16.mxu1 %v12619_v63 }
 0x29b   :  { %v1130_v57 = vsel %vm1119_vm2, %v12644_v2, %v12642_v9  ;;  %v2575_v25 = vadd.f32 %v12049_v4, %v2525_v53  ;;  %v12646_v55 = vmov %v12642_v9  ;;  %v12650_v5 = vrot.slane %v12649_v51, 7  ;;  %v12654_v9 = vld [vmem:[#allocation210_spill] sm:$0xff] }
 0x29c   :  { %v1132_v46 = vsel %vm1119_vm2, %v12646_v55, %v12645_v24  ;;  %v1261_v54 = vadd.f32 %v1130_v57, %v976_v61  ;;  %v12652_v36 = vmov %v12648_v60  ;;  %v1600_v32 = vmul.f32 %v7201_v10, %v12653_v27 }
 0x29d   :  { %v1417_v29 = vsel %vm1406_vm3, %v12650_v5, %v12648_v60  ;;  %v1262_v47 = vadd.f32 %v1132_v46, %v977_v45  ;;  %v1419_v53 = vsel %vm1406_vm3, %v12652_v36, %v12651_v23  ;;  %v2620_v40 = vmax.f32 %v2574_v18, 0.0 }
 0x29e   :  { %v2621_v12 = vmax.f32 %v2575_v25, 0.0  ;;  %v1601_v2 = vmul.f32 %v7201_v10, %v12654_v9  ;;  %v10296_v50 = vmul.f32 %v7205_v11, %v12654_v9  ;;  %v1550_v45 = vadd.f32 %v1417_v29, %v1261_v54 }
 0x29f   :  { %v1551_v49 = vadd.f32 %v1419_v53, %v1262_v47  ;;  %v1702_v61 = vmul.f32 %v7205_v11, %v12494_v7  ;;  %v10302_v57 = vmul.f32 %v7219_v16, %v12654_v9  ;;  %v10304_v24 = vrot.slane %v2620_v40, 1 }
 0x2a0   :  { %v2749_v18 = vrot.slane %v2621_v12, 1  ;;  %v1797_v25 = vrot.slane %v10296_v50, 4  ;;  %v1982_v55 = vmul.f32 %v7219_v16, %v12494_v7  ;;  %v1646_v46 = vadd.f32 %v1600_v32, %v1550_v45 }
 0x2a1   :  { %v1647_v6 = vadd.f32 %v1601_v2, %v1551_v49  ;;  %v1799_v60 = vrot.slane %v1702_v61, 4  ;;  %v2077_v5 = vrot.slane %v10302_v57, 5  ;;  %v10316_v23 = vmul.f32 %v9784_v22, %v12654_v9 }
 0x2a2   :  { %v2750_v29 = vsel %vm554_vm0, %v10304_v24, %v2749_v18  ;;  %v2752_v54 = vsel %vm554_vm0, %v2749_v18, %v10197_v48  ;;  %v2079_v47 = vrot.slane %v1982_v55, 5  ;;  %v2941_v36 = vrot.slane %v10030_v56, 6 }
 0x2a3   :  { %v10319_v53 = vmax.f32 %v2621_v12, %v2752_v54  ;;  %v1800_v32 = vsel %vm1789_vm4, %v1797_v25, %v1799_v60  ;;  %v12655_v2 = vrot.slane %v9770_v0, 4  ;;  %v10327_v49 = vmax.f32 %v2620_v40, %v2750_v29 }
 0x2a4   :  { %v2984_v48 = vsel %vm1119_vm2, %v2981_v15, %v2983_v43  ;;  %v1931_v9 = vadd.f32 %v1800_v32, %v1646_v46  ;;  %v2080_v12 = vsel %vm2069_vm5, %v2077_v5, %v2079_v47  ;;  %v12656_v55 = vrot.slane %v9777_v19, 5 }
 0x2a5   :  { %v1802_v45 = vsel %vm1789_vm4, %v1799_v60, %v12655_v2  ;;  %v2979_v18 = vrot.slane %v10319_v53, 6  ;;  %v2262_v40 = vmul.f32 %v9784_v22, %v12494_v7  ;;  %v11816_v54 = vrot.slane %v10316_v23, 6  ;;  %v12660_v2 = vld [vmem:[#allocation43_spill] sm:$0xff] }
 0x2a6   :  { %v1932_v61 = vadd.f32 %v1802_v45, %v1647_v6  ;;  %v2082_v0 = vsel %vm2069_vm5, %v2079_v47, %v12656_v55  ;;  %v2211_v60 = vadd.f32 %v2080_v12, %v1931_v9  ;;  %v12657_v43 = vrot.slane %v9909_v34, 6 }
 0x2a7   :  { %v12658_v46 = vrot.slane %v9917_v44, 6  ;;  %v2982_v19 = vsel %vm1119_vm2, %v2979_v18, %v2981_v15  ;;  %v3076_v47 = vmax.f32 %v10319_v53, %v2984_v48  ;;  %v2358_v7 = vrot.slane %v2262_v40, 6  ;;  %v12667_v48 = vld [vmem:[#allocation76_spill] sm:$0xff] }
 0x2a8   :  { %v2212_v29 = vadd.f32 %v2082_v0, %v1932_v61  ;;  %v12659_v32 = vrot.slane %v12501_v28, 1  ;;  %v12661_v45 = vrot.slane %v12660_v2, 1  ;;  %v3075_v9 = vmax.f32 %v10327_v49, %v2982_v19  ;;  %v12662_v61 = vld [vmem:[#allocation51_spill] sm:$0xff] }
 0x2a9   :  { %v10347_v6 = vsel %vm1119_vm2, %v12658_v46, %v12657_v43  ;;  %v12663_v55 = vrot.slane %v12508_v33, 2  ;;  %v12665_v0 = vrot.slane %v12664_v17, 2  ;;  %v12666_v15 = vrot.slane %v12516_v8, 6  ;;  %v12671_v2 = vld [vmem:[#allocation79_spill] sm:$0xff] }
 0x2aa   :  { %v595_v34 = vsel %vm554_vm0, %v12661_v45, %v12659_v32  ;;  %v12668_v40 = vrot.slane %v12667_v48, 6  ;;  %v2359_v46 = vsel %vm1119_vm2, %v11816_v54, %v2358_v7  ;;  %v12669_v19 = vrot.slane %v9788_v3, 6 }
 0x2ab   :  { %v711_v12 = vadd.f32 %v595_v34, %v12662_v61  ;;  %v875_v43 = vsel %vm834_vm1, %v12665_v0, %v12663_v55  ;;  %v12670_v33 = vrot.slane %v12522_v21, 7  ;;  %v12672_v45 = vrot.slane %v12671_v2, 7  ;;  %v12673_v61 = vld [vmem:[#allocation107_spill] sm:$0xff] }
 0x2ac   :  { %v1160_v28 = vsel %vm1119_vm2, %v12668_v40, %v12666_v15  ;;  %v2361_v32 = vsel %vm1119_vm2, %v2358_v7, %v12669_v19  ;;  %v1615_v8 = vmul.f32 %v7201_v10, %v12673_v61  ;;  %v3118_v55 = vpack.c.bf16 %v3076_v47, %v3075_v9  ;;  %v12675_v40 = vld [vmem:[#allocation142_spill] sm:$0xff]  ;;  %v12678_v21 = vld [vmem:[#allocation143_spill] sm:$0xff] }
 0x2ad   :  { %v1447_v34 = vsel %vm1406_vm3, %v12672_v45, %v12670_v33  ;;  %v2490_v17 = vadd.f32 %v2359_v46, %v2211_v60  ;;  %v2491_v0 = vadd.f32 %v2361_v32, %v2212_v29  ;;  %v991_v15 = vadd.f32 %v875_v43, %v711_v12  ;;  %v12681_v29 = vld [vmem:[#allocation116_spill] sm:$0xff]  ;;  %v12687_v45 = vld [vmem:[#allocation75_spill] sm:$0xff] }
 0x2ae   :  { %v12674_v48 = vrot.slane %v9883_v37, 4  ;;  %v12676_v54 = vrot.slane %v12675_v40, 4  ;;  %v12677_v7 = vrot.slane %v9889_v41, 5  ;;  %v12679_v19 = vrot.slane %v12678_v21, 5  ;;  %v12683_v37 = vld [vmem:[#allocation70_spill] sm:$0xff]  ;;  %6115 = vmatpush3.bf16.msra.mxu1 %v3118_v55  ;;  %v12691_v55 = vld [vmem:[#allocation71_spill] sm:$0xff] }
 0x2af   :  { %v12680_v33 = vrot.slane %v10009_v58, 6  ;;  %v12682_v47 = vrot.slane %v12681_v29, 1  ;;  %v12684_v9 = vrot.slane %v12683_v37, 1  ;;  %v2540_v41 = vadd.f32 %v12049_v4, %v2490_v17  ;;  %6116 = vmatprep.subr.bf16.mxu1 %v12619_v63 }
 0x2b0   :  { %v1830_v3 = vsel %vm1789_vm4, %v12676_v54, %v12674_v48  ;;  %v2110_v2 = vsel %vm2069_vm5, %v12679_v19, %v12677_v7  ;;  %v2541_v54 = vadd.f32 %v12049_v4, %v2491_v0  ;;  %v1276_v43 = vadd.f32 %v1160_v28, %v991_v15  ;;  %v12688_v48 = vld [vmem:[#allocation124_spill] sm:$0xff]  ;;  %v12689_v7 = vld [vmem:[#allocation117_spill] sm:$0xff] }
 0x2b1   :  { %v10400_v60 = vsel %vm1119_vm2, %v2941_v36, %v12680_v33  ;;  %v629_v12 = vsel %vm554_vm0, %v12684_v9, %v12682_v47  ;;  %v12685_v46 = vrot.slane %v12594_v13, 1  ;;  %v12686_v58 = vmov %v12682_v47  ;;  %v12695_v47 = vld [vmem:[#allocation122_spill] sm:$0xff] }
 0x2b2   :  { %v728_v61 = vadd.f32 %v629_v12, %v12687_v45  ;;  %v12690_v21 = vrot.slane %v12689_v7, 2  ;;  %v12692_v19 = vrot.slane %v12691_v55, 2  ;;  %v12693_v28 = vrot.slane %v12603_v14, 2  ;;  %v12697_v12 = vld [vmem:[#allocation118_spill] sm:$0xff] }
 0x2b3   :  { %v631_v32 = vsel %vm554_vm0, %v12686_v58, %v12685_v46  ;;  %v2586_v15 = vmax.f32 %v2540_v41, 0.0  ;;  %v2587_v33 = vmax.f32 %v2541_v54, 0.0  ;;  %v1565_v29 = vadd.f32 %v1447_v34, %v1276_v43  ;;  %v12701_v7 = vld [vmem:[#allocation126_spill] sm:$0xff] }
 0x2b4   :  { %v729_v40 = vadd.f32 %v631_v32, %v12688_v48  ;;  %v909_v17 = vsel %vm834_vm1, %v12692_v19, %v12690_v21  ;;  %v12694_v13 = vmov %v12690_v21  ;;  %v12696_v9 = vrot.slane %v12695_v47, 6 }
 0x2b5   :  { %v911_v0 = vsel %vm834_vm1, %v12694_v13, %v12693_v28  ;;  %v12698_v46 = vrot.slane %v12697_v12, 6  ;;  %v1008_v32 = vadd.f32 %v909_v17, %v728_v61  ;;  %v12699_v48 = vrot.slane %v12609_v39, 6  ;;  %v12703_v28 = vld [vmem:[#allocation119_spill] sm:$0xff] }
 0x2b6   :  { %v1009_v45 = vadd.f32 %v911_v0, %v729_v40  ;;  %v12700_v21 = vmov %v12696_v9  ;;  %v12702_v19 = vrot.slane %v12701_v7, 7  ;;  %v12704_v41 = vrot.slane %v12703_v28, 7  ;;  %v12707_v0 = vld [vmem:[#allocation94_spill] sm:$0xff] }
 0x2b7   :  { %v1194_v58 = vsel %vm1119_vm2, %v12698_v46, %v12696_v9  ;;  %v1196_v14 = vsel %vm1119_vm2, %v12700_v21, %v12699_v48  ;;  %v10442_v54 = vrot.slane %v2586_v15, 1  ;;  %v2681_v43 = vrot.slane %v2587_v33, 1  ;;  %v12708_v46 = vld [vmem:[#allocation52_spill] sm:$0xff] }
 0x2b8   :  { %v1481_v34 = vsel %vm1406_vm3, %v12704_v41, %v12702_v19  ;;  %v1661_v13 = vadd.f32 %v1615_v8, %v1565_v29  ;;  %v12705_v9 = vrot.slane %v12615_v30, 7  ;;  %v12706_v61 = vmov %v12702_v19 }
 0x2b9   :  { %v1293_v40 = vadd.f32 %v1194_v58, %v1008_v32  ;;  %v1294_v17 = vadd.f32 %v1196_v14, %v1009_v45  ;;  %v1632_v47 = vmul.f32 %v7201_v10, %v12707_v0  ;;  %v1633_v48 = vmul.f32 %v7201_v10, %v12708_v46 }
 0x2ba   :  { %v1483_v39 = vsel %vm1406_vm3, %v12706_v61, %v12705_v9  ;;  %v2682_v21 = vsel %vm554_vm0, %v10442_v54, %v2681_v43  ;;  %v2684_v8 = vsel %vm554_vm0, %v2681_v43, %v9893_v42  ;;  %v1946_v29 = vadd.f32 %v1830_v3, %v1661_v13  ;;  %v12710_v43 = vld [vmem:[#allocation145_spill] sm:$0xff] }
 0x2bb   :  { %v10459_v30 = vmul.f32 %v7205_v11, %v12708_v46  ;;  %v10461_v7 = vmax.f32 %v2586_v15, %v2682_v21  ;;  %v10463_v58 = vmax.f32 %v2587_v33, %v2684_v8  ;;  %v1582_v32 = vadd.f32 %v1481_v34, %v1293_v40 }
 0x2bc   :  { %v1583_v45 = vadd.f32 %v1483_v39, %v1294_v17  ;;  %v2226_v14 = vadd.f32 %v2110_v2, %v1946_v29  ;;  %v1734_v19 = vmul.f32 %v7205_v11, %v12620_v52  ;;  %v10470_v42 = vmul.f32 %v7219_v16, %v12708_v46 }
 0x2bd   :  { %v1861_v41 = vrot.slane %v10459_v30, 4  ;;  %v2911_v3 = vrot.slane %v10463_v58, 6  ;;  %v3042_v15 = vmax.f32 %v10463_v58, %v10347_v6  ;;  %v12709_v33 = vrot.slane %v9903_v35, 6 }
 0x2be   :  { %v12711_v34 = vrot.slane %v12710_v43, 6  ;;  %v1678_v13 = vadd.f32 %v1632_v47, %v1582_v32  ;;  %v1679_v61 = vadd.f32 %v1633_v48, %v1583_v45  ;;  %v1863_v39 = vrot.slane %v1734_v19, 4 }
 0x2bf   :  { %v2014_v40 = vmul.f32 %v7219_v16, %v12620_v52  ;;  %v12712_v17 = vrot.slane %v9917_v44, 6  ;;  %v2141_v6 = vrot.slane %v10470_v42, 5  ;;  %v10490_v35 = vmul.f32 %v9784_v22, %v12708_v46 }
 0x2c0   :  { %v2389_v2 = vsel %vm1119_vm2, %v12711_v34, %v12709_v33  ;;  %v2294_v47 = vmul.f32 %v9784_v22, %v12620_v52  ;;  %v1864_v44 = vsel %vm1789_vm4, %v1861_v41, %v1863_v39  ;;  %v1866_v8 = vsel %vm1789_vm4, %v1863_v39, %v1865_v59 }
 0x2c1   :  { %v2505_v9 = vadd.f32 %v2389_v2, %v2226_v14  ;;  %v2914_v0 = vsel %vm1119_vm2, %v2911_v3, %v12712_v17  ;;  %v1963_v29 = vadd.f32 %v1864_v44, %v1678_v13  ;;  %v1964_v32 = vadd.f32 %v1866_v8, %v1679_v61  ;;  %v12713_v14 = vld [vmem:[#allocation31_spill] sm:$0xff] }
 0x2c2   :  { %v3041_v48 = vmax.f32 %v10461_v7, %v2914_v0  ;;  %v2143_v45 = vrot.slane %v2014_v40, 5  ;;  %v2420_v46 = vrot.slane %v10490_v35, 6  ;;  %v10505_v52 = vadd.f32 %v12713_v14, %v9954_v1  ;;  %v12719_v0 = vld [vmem:[#allocation57_spill] sm:$0xff]  ;;  %v12722_v44 = vld [vmem:[#allocation27_spill] sm:$0xff] }
 0x2c3   :  { %v2555_v21 = vadd.f32 %v12049_v4, %v2505_v9  ;;  %v2422_v43 = vrot.slane %v2294_v47, 6  ;;  %v2977_v34 = vrot.slane %v10327_v49, 6  ;;  %v12714_v59 = vrot.slane %v10193_v20, 5  ;;  %v12716_v9 = vld [vmem:[#allocation58_spill] sm:$0xff]  ;;  %v12724_v14 = vld [vmem:[#allocation103_spill] sm:$0xff]  ;;  %v12740_v49 = vld [vmem:[#allocation104_spill] sm:$0xff] }
 0x2c4   :  { %v3101_v19 = vpack.c.bf16 %v3042_v15, %v3041_v48  ;;  %v2144_v38 = vsel %vm2069_vm5, %v2141_v6, %v2143_v45  ;;  %v12715_v13 = vrot.slane %v12637_v31, 2  ;;  %v12717_v61 = vrot.slane %v12716_v9, 2 }
 0x2c5   :  { %v2601_v33 = vmax.f32 %v2555_v21, 0.0  ;;  %v2146_v2 = vsel %vm2069_vm5, %v2143_v45, %v12714_v59  ;;  %v2243_v39 = vadd.f32 %v2144_v38, %v1963_v29  ;;  %v12718_v17 = vrot.slane %v12643_v26, 6  ;;  %v12723_v45 = vld [vmem:[#allocation24_spill] sm:$0xff] }
 0x2c6   :  { %v843_v1 = vsel %vm834_vm1, %v12717_v61, %v12715_v13  ;;  %5890 = vmatpush3.bf16.msra.mxu0 %v3101_v19  ;;  %v2244_v40 = vadd.f32 %v2146_v2, %v1964_v32  ;;  %v12720_v47 = vrot.slane %v12719_v0, 6  ;;  %v2423_v20 = vsel %vm1119_vm2, %v2420_v46, %v2422_v43  ;;  %v12725_v32 = vld [vmem:[#allocation64_spill] sm:$0xff]  ;;  %v12726_v19 = vld [vmem:[#allocation95_spill] sm:$0xff]  ;;  %v12727_v61 = vld [vmem:[#allocation86_spill] sm:$0xff] }
 0x2c7   :  { %v2709_v15 = vrot.slane %v2601_v33, 1  ;;  %v12721_v31 = vrot.slane %v10224_v62, 6  ;;  %v975_v8 = vadd.f32 %v843_v1, %v12722_v44  ;;  %v1259_v29 = vadd.f32 %v12724_v14, %v12723_v45 }
 0x2c8   :  { %v1128_v48 = vsel %vm1119_vm2, %v12720_v47, %v12718_v17  ;;  %v2522_v59 = vadd.f32 %v2423_v20, %v2243_v39  ;;  %v12728_v62 = vrot.slane %v12727_v61, 7  ;;  %v12729_v17 = vld [vmem:[#allocation60_spill] sm:$0xff]  ;;  %v12731_v0 = vrot.slane %v12649_v51, 7 }
 0x2c9   :  { %v2425_v21 = vsel %vm1119_vm2, %v2422_v43, %v12721_v31  ;;  %v2710_v26 = vsel %vm554_vm0, %v12725_v32, %v2709_v15  ;;  %v2712_v38 = vsel %vm554_vm0, %v2709_v15, %v12726_v19  ;;  %v1260_v9 = vadd.f32 %v1128_v48, %v975_v8  ;;  %v12734_v48 = vld [vmem:[#allocation33_spill] sm:$0xff]  ;;  %v12736_v19 = vld [vmem:[#allocation139_spill] sm:$0xff] }
 0x2ca   :  { %v2523_v2 = vadd.f32 %v2425_v21, %v2244_v40  ;;  %v10537_v13 = vmax.f32 %v2601_v33, %v2712_v38  ;;  %v12730_v43 = vrot.slane %v12729_v17, 7  ;;  %v12732_v47 = vmov %v12728_v62  ;;  %v12733_v33 = vld [vmem:[#allocation156_spill] sm:$0xff] }
 0x2cb   :  { %v1415_v31 = vsel %vm1406_vm3, %v12732_v47, %v12731_v0  ;;  %v2572_v44 = vadd.f32 %v12049_v4, %v2522_v59  ;;  %v1598_v40 = vmul.f32 %v7201_v10, %v12733_v33  ;;  %v12735_v20 = vmax.f32 %v12734_v48, 0.0 }
 0x2cc   :  { %v1413_v1 = vsel %vm1406_vm3, %v12730_v43, %v12728_v62  ;;  %v2573_v15 = vadd.f32 %v12049_v4, %v2523_v2  ;;  %v2939_v8 = vrot.slane %v10537_v13, 6  ;;  %v3056_v51 = vmax.f32 %v10537_v13, %v10400_v60 }
 0x2cd   :  { %v1548_v39 = vadd.f32 %v1413_v1, %v1259_v29  ;;  %v10555_v21 = vmax.f32 %v12735_v20, %v2710_v26  ;;  %v1549_v45 = vadd.f32 %v1415_v31, %v1260_v9  ;;  %v2618_v14 = vmax.f32 %v2572_v44, 0.0 }
 0x2ce   :  { %v2619_v32 = vmax.f32 %v2573_v15, 0.0  ;;  %v1599_v38 = vmul.f32 %v7201_v10, %v12736_v19  ;;  %v2942_v29 = vsel %vm1119_vm2, %v2939_v8, %v2941_v36  ;;  %v10567_v26 = vmul.f32 %v7205_v11, %v12736_v19 }
 0x2cf   :  { %v1644_v59 = vadd.f32 %v1598_v40, %v1548_v39  ;;  %v1700_v2 = vmul.f32 %v7205_v11, %v12653_v27  ;;  %v10573_v60 = vmul.f32 %v7219_v16, %v12736_v19  ;;  %v3055_v13 = vmax.f32 %v10555_v21, %v2942_v29  ;;  %v12737_v29 = vld [vmem:[#allocation23_spill] sm:$0xff] }
 0x2d0   :  { %v10576_v9 = vrot.slane %v2618_v14, 1  ;;  %v2745_v61 = vrot.slane %v2619_v32, 1  ;;  %v1645_v62 = vadd.f32 %v1599_v38, %v1549_v45  ;;  %v1793_v56 = vrot.slane %v10567_v26, 4  ;;  %v12738_v26 = vld [vmem:[#allocation20_spill] sm:$0xff] }
 0x2d1   :  { %v1795_v36 = vrot.slane %v1700_v2, 4  ;;  %v1980_v17 = vmul.f32 %v7219_v16, %v12653_v27  ;;  %v2073_v43 = vrot.slane %v10573_v60, 5  ;;  %v3108_v1 = vpack.c.bf16 %v3056_v51, %v3055_v13 }
 0x2d2   :  { %v2746_v11 = vsel %vm554_vm0, %v10576_v9, %v2745_v61  ;;  %v2748_v0 = vsel %vm554_vm0, %v2745_v61, %v10304_v24  ;;  %v10588_v47 = vmul.f32 %v9784_v22, %v12736_v19  ;;  %v2980_v44 = vsel %vm1119_vm2, %v2977_v34, %v2979_v18  ;;  %v12741_v61 = vld [vmem:[#allocation28_spill] sm:$0xff] }
 0x2d3   :  { %v10590_v31 = vmax.f32 %v2619_v32, %v2748_v0  ;;  %v1796_v15 = vsel %vm1789_vm4, %v1793_v56, %v1795_v36  ;;  %v1798_v39 = vsel %vm1789_vm4, %v1795_v36, %v1797_v25  ;;  %5891 = vmatprep.subr.bf16.mxu0 %v3108_v1  ;;  %v2075_v48 = vrot.slane %v1980_v17, 5  ;;  %v12742_v36 = vld [vmem:[#allocation108_spill] sm:$0xff]  ;;  %v12744_v17 = vld [vmem:[#allocation151_spill] sm:$0xff] }
 0x2d4   :  { %v1929_v24 = vadd.f32 %v1796_v15, %v1644_v59  ;;  %v1930_v40 = vadd.f32 %v1798_v39, %v1645_v62  ;;  %v2260_v20 = vmul.f32 %v9784_v22, %v12653_v27  ;;  %v2909_v51 = vrot.slane %v10461_v7, 6  ;;  %v12768_v7 = vld [vmem:[#allocation135_spill] sm:$0xff] }
 0x2d5   :  { %v10604_v53 = vmax.f32 %v2618_v14, %v2746_v11  ;;  %v2975_v45 = vrot.slane %v10590_v31, 6  ;;  %v2352_v18 = vrot.slane %v10588_v47, 6  ;;  %v3074_v32 = vmax.f32 %v10590_v31, %v2980_v44 }
 0x2d6   :  { %v2076_v50 = vsel %vm2069_vm5, %v2073_v43, %v2075_v48  ;;  %v2078_v25 = vsel %vm2069_vm5, %v2075_v48, %v2077_v5  ;;  %v2354_v19 = vrot.slane %v2260_v20, 6  ;;  %v2937_v27 = vrot.slane %v10555_v21, 6 }
 0x2d7   :  { %v2978_v14 = vsel %vm1119_vm2, %v2975_v45, %v2977_v34  ;;  %v2209_v38 = vadd.f32 %v2076_v50, %v1929_v24  ;;  %v2210_v59 = vadd.f32 %v2078_v25, %v1930_v40  ;;  %v447_v2 = vmul.f32 %v12738_v26, %v12737_v29  ;;  %v12747_v40 = vld [vmem:[#allocation25_spill] sm:$0xff] }
 0x2d8   :  { %v3073_v13 = vmax.f32 %v10604_v53, %v2978_v14  ;;  %v2355_v57 = vsel %vm1119_vm2, %v2352_v18, %v2354_v19  ;;  %v12739_v5 = vrot.slane %v10316_v23, 6  ;;  %v1643_v62 = vadd.f32 %v12741_v61, %v12740_v49  ;;  %v12755_v26 = vld [vmem:[#allocation69_spill] sm:$0xff] }
 0x2d9   :  { %v12743_v34 = vrot.slane %v12742_v36, 4  ;;  %v12745_v1 = vrot.slane %v12744_v17, 4  ;;  %v2488_v0 = vadd.f32 %v2355_v57, %v2209_v38  ;;  %v2912_v23 = vsel %vm1119_vm2, %v2909_v51, %v2911_v3  ;;  %v12752_v38 = vld [vmem:[#allocation26_spill] sm:$0xff] }
 0x2da   :  { %v2357_v21 = vsel %vm1119_vm2, %v2354_v19, %v12739_v5  ;;  %v3117_v39 = vpack.c.bf16 %v3074_v32, %v3073_v13  ;;  %v12746_v24 = vrot.slane %v12683_v37, 1  ;;  %v12748_v48 = vrot.slane %v12747_v40, 1  ;;  %v12749_v19 = vld [vmem:[#allocation32_spill] sm:$0xff] }
 0x2db   :  { %v1792_v11 = vsel %vm1789_vm4, %v12745_v1, %v12743_v34  ;;  %v2489_v44 = vadd.f32 %v2357_v21, %v2210_v59  ;;  %v2538_v50 = vadd.f32 %v12049_v4, %v2488_v0  ;;  %v12750_v14 = vrot.slane %v12749_v19, 6  ;;  %v12758_v21 = vld [vmem:[#allocation72_spill] sm:$0xff]  ;;  %v12764_v0 = vld [vmem:[#allocation90_spill] sm:$0xff] }
 0x2dc   :  { %v1927_v15 = vadd.f32 %v1792_v11, %v10505_v52  ;;  %v627_v20 = vsel %vm554_vm0, %v12748_v48, %v12746_v24  ;;  %6117 = vmatpush3.bf16.msra.mxu1 %v3117_v39  ;;  %v2940_v58 = vsel %vm1119_vm2, %v2937_v27, %v2939_v8  ;;  %v12751_v3 = vrot.slane %v12691_v55, 2 }
 0x2dd   :  { %v2539_v25 = vadd.f32 %v12049_v4, %v2489_v44  ;;  %v2938_v52 = vsel %vm1119_vm2, %v12750_v14, %v2937_v27  ;;  %v727_v32 = vadd.f32 %v627_v20, %v447_v2  ;;  %v12753_v37 = vrot.slane %v12752_v38, 2  ;;  %6118 = vmatprep.subr.bf16.mxu1 %v12619_v63  ;;  %v12760_v27 = vld [vmem:[#allocation93_spill] sm:$0xff] }
 0x2de   :  { %v12754_v29 = vrot.slane %v12697_v12, 6  ;;  %v12756_v13 = vrot.slane %v12755_v26, 6  ;;  %v12757_v5 = vrot.slane %v12703_v28, 7  ;;  %v12759_v49 = vrot.slane %v12758_v21, 7  ;;  %v12761_v12 = vld [vmem:[#allocation127_spill] sm:$0xff]  ;;  %v12765_v26 = vld [vmem:[#allocation50_spill] sm:$0xff] }
 0x2df   :  { %v907_v59 = vsel %vm834_vm1, %v12753_v37, %v12751_v3  ;;  %v2584_v61 = vmax.f32 %v2538_v50, 0.0  ;;  %v2585_v8 = vmax.f32 %v2539_v25, 0.0  ;;  %v1631_v34 = vmul.f32 %v7201_v10, %v12760_v27 }
 0x2e0   :  { %v1192_v57 = vsel %vm1119_vm2, %v12756_v13, %v12754_v29  ;;  %v1479_v2 = vsel %vm1406_vm3, %v12759_v49, %v12757_v5  ;;  %v1007_v55 = vadd.f32 %v907_v59, %v727_v32  ;;  %v12762_v17 = vrot.slane %v12761_v12, 4 }
 0x2e1   :  { %v12763_v28 = vrot.slane %v12742_v36, 4  ;;  %v1977_v44 = vmul.f32 %v7219_v16, %v12764_v0  ;;  %v1978_v39 = vmul.f32 %v7219_v16, %v12733_v33  ;;  %v2675_v24 = vrot.slane %v2584_v61, 1 }
 0x2e2   :  { %v1862_v1 = vsel %vm1789_vm4, %v12762_v17, %v1861_v41  ;;  %v2677_v40 = vrot.slane %v2585_v8, 1  ;;  %v1292_v48 = vadd.f32 %v1192_v57, %v1007_v55  ;;  %v2257_v50 = vmul.f32 %v9784_v22, %v12764_v0  ;;  %v6734_v41 = vld [vmem:[#allocation2 + $0x8] ss:$0 sm:$0xff] }
 0x2e3   :  { %v1794_v11 = vsel %vm1789_vm4, %v12763_v28, %v1793_v56  ;;  %v2070_v20 = vrot.slane %v1977_v44, 5  ;;  %v2071_v30 = vrot.slane %v1978_v39, 5  ;;  %v2258_v36 = vmul.f32 %v6734_v41, %v12733_v33 }
 0x2e4   :  { %v1928_v10 = vadd.f32 %v1794_v11, %v1643_v62  ;;  %v2678_v56 = vsel %vm554_vm0, %v2675_v24, %v2677_v40  ;;  %v2680_v25 = vsel %vm554_vm0, %v2677_v40, %v10442_v54  ;;  %v1581_v14 = vadd.f32 %v1479_v2, %v1292_v48  ;;  %v12770_v40 = vld [vmem:[#allocation212_spill] sm:$0xff] }
 0x2e5   :  { %v2805_v32 = vmax.f32 %v2584_v61, %v2678_v56  ;;  %v2806_v16 = vmax.f32 %v2585_v8, %v2680_v25  ;;  %v2072_v3 = vsel %vm2069_vm5, %v2070_v20, %v2071_v30  ;;  %v2074_v62 = vsel %vm2069_vm5, %v2071_v30, %v2073_v43  ;;  %v12766_v43 = vld [vmem:[#allocation128_spill] sm:$0xff]  ;;  %v12771_v20 = vld [vmem:[#allocation207_spill] sm:$0xff] }
 0x2e6   :  { %v1677_v22 = vadd.f32 %v1631_v34, %v1581_v14  ;;  %v2207_v33 = vadd.f32 %v2072_v3, %v1927_v15  ;;  %v2208_v38 = vadd.f32 %v2074_v62, %v1928_v10  ;;  %v2349_v37 = vrot.slane %v2257_v50, 6 }
 0x2e7   :  { %v2907_v59 = vrot.slane %v2806_v16, 6  ;;  %v2350_v29 = vrot.slane %v2258_v36, 6  ;;  %v3040_v54 = vmax.f32 %v2806_v16, %v2912_v23  ;;  %v3053_v13 = vmax.f32 %v12765_v26, %v2938_v52  ;;  %v6593_v26 = vld [vmem:[%s11351_s9 + $0x1c] ss:$12 sps:$4 sm:$0xff]  }
 0x2e8   :  { %v3054_v57 = vmax.f32 %v12749_v19, %v2940_v58  ;;  %v1962_v5 = vadd.f32 %v1862_v1, %v1677_v22  ;;  %v12767_v21 = vrot.slane %v12766_v43, 5  ;;  %v2905_v12 = vrot.slane %v2805_v32, 6  ;;  %v6612_v43 = vld [vmem:[%s11344_s2 + $0x78] sm:$0xff]  }
 0x2e9   :  { %v2910_v60 = vsel %vm1119_vm2, %v2907_v59, %v2909_v51  ;;  %v2351_v49 = vsel %vm1119_vm2, %v2349_v37, %v2350_v29  ;;  %v2353_v23 = vsel %vm1119_vm2, %v2350_v29, %v2352_v18  ;;  %v12769_v51 = vrot.slane %v12768_v7, 6  ;;  %v6613_v7 = vld [vmem:[%s11344_s2 + $0x18] sm:$0xff]  }
 0x2ea   :  { %v2142_v15 = vsel %vm2069_vm5, %v12767_v21, %v2141_v6  ;;  %v3039_v52 = vmax.f32 %v2805_v32, %v2910_v60  ;;  %v2486_v19 = vadd.f32 %v2351_v49, %v2207_v33  ;;  %v2487_v58 = vadd.f32 %v2353_v23, %v2208_v38  ;;  %v6592_v60 = vld [vmem:[%s11351_s9 + $0x8] ss:$12 sps:$4 sm:$0xff]   ;;  %v6595_v21 = vld [vmem:[%s11351_s9 + $0x18] ss:$12 sps:$4 sm:$0xff]  }
 0x2eb   :  { %v2242_v2 = vadd.f32 %v2142_v15, %v1962_v5  ;;  %v2421_v42 = vsel %vm1119_vm2, %v12769_v51, %v2420_v46  ;;  %v3107_v27 = vpack.c.bf16 %v3054_v57, %v3053_v13  ;;  %v2973_v0 = vrot.slane %v10604_v53, 6  ;;  %v6608_v13 = vld [vmem:[%s11344_s2 + $0x38] sm:$0xff]   ;;  %v6609_v5 = vld [vmem:[%s11344_s2 + $0x30] sm:$0xff]   ;;  %v6610_v49 = vld [vmem:[%s11344_s2 + $0x28] sm:$0xff]  }
 0x2ec   :  { %v3100_v61 = vpack.c.bf16 %v3040_v54, %v3039_v52  ;;  %v2536_v6 = vadd.f32 %v12049_v4, %v2486_v19  ;;  %v2537_v55 = vadd.f32 %v12049_v4, %v2487_v58  ;;  %v2908_v39 = vsel %vm1119_vm2, %v2905_v12, %v2907_v59  ;;  %v12775_v59 = vld [vmem:[#allocation215_spill] sm:$0xff]  ;;  %v6611_v52 = vld [vmem:[%s11344_s2 + $0x20] sm:$0xff]  }
 0x2ed   :  { %v2521_v8 = vadd.f32 %v2421_v42, %v2242_v2  ;;  %v12772_v30 = vmax.f32 %v12771_v20, 0.0  ;;  %v6597_v15 = vld [vmem:[%s11351_s9 + $0x34] ss:$12 sps:$4 sm:$0xff]   ;;  %v6599_v19 = vld [vmem:[%s11351_s9 + $0x30] ss:$12 sps:$4 sm:$0xff]  }
 0x2ee   :  { %5892 = vmatpush3.bf16.msra.mxu0 %v3100_v61  ;;  %v2582_v18 = vmax.f32 %v2536_v6, 0.0  ;;  %v2583_v34 = vmax.f32 %v2537_v55, 0.0  ;;  %v6614_v23 = vld [vmem:[%s11344_s2 + $0x70] sm:$0xff]   ;;  %v6596_v2 = vld [vmem:[%s11351_s9 + $0x20] ss:$12 sps:$4 sm:$0xff]  }
 0x2ef   :  { %v2571_v47 = vadd.f32 %v12049_v4, %v2521_v8  ;;  %5893 = vmatprep.subr.bf16.mxu0 %v3107_v27  ;;  %v6601_v58 = vld [vmem:[%s11351_s9 + $0x4c] ss:$12 sps:$4 sm:$0xff]   ;;  %v3097_v42 = vld [vmem:[%s11351_s9 + $0x60] sm:$0xff]  ;;  %v6603_v61 = vld [vmem:[%s11351_s9 + $0x48] ss:$12 sps:$4 sm:$0xff]  }
 0x2f0   :  { %v2672_v35 = vrot.slane %v2582_v18, 1  ;;  %v2673_v1 = vrot.slane %v2583_v34, 1  ;;  %v6600_v51 = vld [vmem:[%s11351_s9 + $0x38] ss:$12 sps:$4 sm:$0xff]   ;;  %v5694_v8 = vcombine.high %v3097_v42, %v3097_v42  ;;  %v6604_v6 = vld [vmem:[%s11351_s9 + $0x50] ss:$12 sps:$4 sm:$0xff]   ;;  %v5693_v55 = vcombine.low %v3097_v42, %v3097_v42 }
 0x2f1   :  { %v2617_v17 = vmax.f32 %v2571_v47, 0.0  ;;  %v6607_v27 = vld [vmem:[%s11351_s9 + $0x68] ss:$0 sps:$4 sm:$0xff]   ;;  %v6615_v47 = vld [vmem:[%s11344_s2 + $0x10] sm:$0xff]  }
 0x2f2   :  { %v2674_v46 = vsel %vm554_vm0, %v2672_v35, %v2673_v1  ;;  %v2676_v11 = vsel %vm554_vm0, %v2673_v1, %v2675_v24  ;;  %v2976_v24 = vsel %vm1119_vm2, %v2973_v0, %v2975_v45  ;;  %v6589_v45 = vld [vmem:[%s11351_s9] ss:$12 sps:$4 sm:$0xff]   ;;  %v6620_v35 = vld [vmem:[%s11344_s2 + $0x58] sm:$0xff]   ;;  %v6621_v1 = vld [vmem:[%s11344_s2 + $0x50] sm:$0xff]  }
 0x2f3   :  { %v2741_v28 = vrot.slane %v2617_v17, 1  ;;  %v2804_v44 = vmax.f32 %v2583_v34, %v2676_v11  ;;  %v2803_v10 = vmax.f32 %v2582_v18, %v2674_v46  ;;  %v6616_v18 = vld [vmem:[%s11344_s2 + $0x68] sm:$0xff]   ;;  %v6624_v46 = vld [vmem:[%s11344_s2 + $0x40] sm:$0xff]  }
 0x2f4   :  { %v6617_v34 = vld [vmem:[%s11344_s2 + $0x8] sm:$0xff]  }
 0x2f5   :  { %v2742_v4 = vsel %vm554_vm0, %v12770_v40, %v2741_v28  ;;  %v2744_v48 = vsel %vm554_vm0, %v2741_v28, %v10576_v9  ;;  %v2904_v36 = vrot.slane %v2804_v44, 6  ;;  %v3038_v53 = vmax.f32 %v2804_v44, %v2908_v39  ;;  %v12773_v9 = vld [vmem:[#allocation216_spill] sm:$0xff]  ;;  %v6622_v28 = vld [vmem:[%s11344_s2 + $0x48] sm:$0xff]  }
 0x2f6   :  { %v2837_v50 = vmax.f32 %v12772_v30, %v2742_v4  ;;  %v2838_v41 = vmax.f32 %v2617_v17, %v2744_v48  ;;  %v12774_v62 = vrot.slane %v12773_v9, 6  ;;  %v6619_v17 = vld [vmem:[%s11344_s2] sm:$0xff]  }
 0x2f7   :  { %v2906_v14 = vsel %vm1119_vm2, %v2904_v36, %v2905_v12  ;;  %v6618_v12 = vld [vmem:[%s11344_s2 + $0x60] sm:$0xff]  }
 0x2f8   :  { %v2969_v56 = vrot.slane %v2837_v50, 6  ;;  %v2971_v25 = vrot.slane %v2838_v41, 6  ;;  %v3072_v32 = vmax.f32 %v2838_v41, %v2976_v24  ;;  %v3037_v16 = vmax.f32 %v2803_v10, %v2906_v14 }
 0x2fa   :  { %v2974_v3 = vsel %vm1119_vm2, %v2971_v25, %v2973_v0  ;;  %v2970_v22 = vsel %vm1119_vm2, %v12774_v62, %v2969_v56  ;;  %v2972_v33 = vsel %vm1119_vm2, %v2969_v56, %v2971_v25  ;;  %v3099_v31 = vpack.c.bf16 %v3038_v53, %v3037_v16  ;;  %v6623_v56 = vld [vmem:[%s11344_s2 + $0xf8] sm:$0xff]  }
 0x2fb   :  { %v3071_v38 = vmax.f32 %v2837_v50, %v2974_v3  ;;  %v3069_v29 = vmax.f32 %v12775_v59, %v2970_v22  ;;  %v3070_v54 = vmax.f32 %v12773_v9, %v2972_v33  ;;  %v6625_v22 = vld [vmem:[%s11344_s2 + $0xf0] sm:$0xff]  }
 0x2fc   :  { %5894 = vmatpush3.bf16.msra.mxu0 %v3099_v31 }
 0x2fd   :  { %v3116_v37 = vpack.c.bf16 %v3072_v32, %v3071_v38  ;;  %6178 = vmatprep.subr.bf16.mxu0 %v12619_v63  ;;  %v3115_v57 = vpack.c.bf16 %v3070_v54, %v3069_v29  ;;  %v6626_v54 = vld [vmem:[%s11344_s2 + $0xe8] sm:$0xff]  }
 0x2ff   :  { %6119 = vmatpush3.bf16.msra.mxu1 %v3116_v37  ;;  %3246 = vmatmul.mubr.bf16.vlgmr.msra.gmra.mxu0 %v6589_v45 }
 0x300   :  { %6120 = vmatprep.subr.bf16.mxu1 %v12619_v63  ;;  %3253 = vmatprep.mubr.bf16.mxu0 %v6593_v26 }
 0x301   :  { %6179 = vmatpush3.bf16.msra.mxu0 %v6608_v13 }
 0x302   :  { %6180 = vmatprep.subr.bf16.mxu0 %v12619_v63 }
 0x303   :  { %6121 = vmatpush3.bf16.msra.mxu1 %v3115_v57 }
 0x304   :  { %6142 = vmatprep.subr.bf16.mxu1 %v12619_v63 }
 0x305   :  { %6181 = vmatpush3.bf16.msra.mxu0 %v6609_v5 }
 0x306   :  { %6123 = vmatmul.mubr.msk.bf16.vlgmr.msra.gmra.mxu1 %vm3191_vm8, %v6592_v60  ;;  %6182 = vmatprep.subr.bf16.mxu0 %v12619_v63 }
 0x307   :  { %6126 = vmatprep.mubr.msk.bf16.mxu1 %vm6900_vm7, %v12619_v63  ;;  %6143 = vmatpush3.bf16.msra.mxu1 %v6612_v43 }
 0x308   :  { %3254 = vmatmul.mubr.bf16.gmra.mxu0 %v6595_v21  ;;  %6144 = vmatprep.subr.bf16.mxu1 %v12619_v63 }
 0x309   :  { %3261 = vmatprep.mubr.bf16.mxu0 %v6597_v15  ;;  %6183 = vmatpush3.bf16.msra.mxu0 %v6610_v49 }
 0x30a   :  { %6184 = vmatprep.subr.bf16.mxu0 %v12619_v63 }
 0x30b   :  { %6145 = vmatpush3.bf16.msra.mxu1 %v6614_v23 }
 0x30c   :  { %6146 = vmatprep.subr.bf16.mxu1 %v12619_v63 }
 0x30d   :  { %6185 = vmatpush3.bf16.msra.mxu0 %v6611_v52  ;;  %v6627_v52 = vld [vmem:[%s11344_s2 + $0xe0] sm:$0xff]  }
 0x30e   :  { %6127 = vmatmul.mubr.msk.bf16.gmra.mxu1 %vm3191_vm8, %v6596_v2  ;;  %6186 = vmatprep.subr.bf16.mxu0 %v12619_v63 }
 0x30f   :  { %6130 = vmatprep.mubr.msk.bf16.mxu1 %vm6900_vm7, %v12619_v63  ;;  %6147 = vmatpush3.bf16.msra.mxu1 %v6616_v18  ;;  %v6630_v18 = vld [vmem:[%s11344_s2 + $0xb0] sm:$0xff]  }
 0x310   :  { %3262 = vmatmul.mubr.bf16.gmra.mxu0 %v6599_v19  ;;  %6148 = vmatprep.subr.bf16.mxu1 %v12619_v63 }
 0x311   :  { %3269 = vmatprep.mubr.bf16.mxu0 %v6601_v58  ;;  %6187 = vmatpush3.bf16.msra.mxu0 %v6613_v7  ;;  %v6628_v58 = vld [vmem:[%s11344_s2 + $0xb8] sm:$0xff]  }
 0x312   :  { %6188 = vmatprep.subr.bf16.mxu0 %v12619_v63 }
 0x313   :  { %6149 = vmatpush3.bf16.msra.mxu1 %v6618_v12 }
 0x314   :  { %6150 = vmatprep.subr.bf16.mxu1 %v12619_v63 }
 0x315   :  { %6189 = vmatpush3.bf16.msra.mxu0 %v6615_v47 }
 0x316   :  { %6131 = vmatmul.mubr.msk.bf16.gmra.mxu1 %vm3191_vm8, %v6600_v51  ;;  %6190 = vmatprep.subr.bf16.mxu0 %v12619_v63 }
 0x317   :  { %6134 = vmatprep.mubr.msk.bf16.mxu1 %vm6900_vm7, %v12619_v63  ;;  %6151 = vmatpush3.bf16.msra.mxu1 %v6620_v35 }
 0x318   :  { %3270 = vmatmul.mubr.bf16.gmra.mxu0 %v6603_v61  ;;  %6152 = vmatprep.subr.bf16.mxu1 %v12619_v63 }
 0x319   :  { %3277 = vmatprep.mubr.bf16.mxu0 %v5694_v8  ;;  %6191 = vmatpush3.bf16.msra.mxu0 %v6617_v34 }
 0x31a   :  { %6192 = vmatprep.subr.bf16.mxu0 %v12619_v63 }
 0x31b   :  { %6153 = vmatpush3.bf16.msra.mxu1 %v6621_v1 }
 0x31c   :  { %6154 = vmatprep.subr.bf16.mxu1 %v12619_v63 }
 0x31d   :  { %6193 = vmatpush3.bf16.msra.mxu0 %v6619_v17 }
 0x31e   :  { %6135 = vmatmul.mubr.msk.bf16.gmra.mxu1 %vm3191_vm8, %v6604_v6  ;;  %6250 = vmatprep.subr.bf16.mxu0 %v12619_v63 }
 0x31f   :  { %6138 = vmatprep.mubr.msk.bf16.mxu1 %vm6900_vm7, %v12619_v63  ;;  %6155 = vmatpush3.bf16.msra.mxu1 %v6622_v28 }
 0x320   :  { %3278 = vmatmul.mubr.bf16.gmra.mxu0 %v5693_v55  ;;  %6156 = vmatprep.subr.bf16.mxu1 %v12619_v63 }
 0x321   :  { %6194 = vmatprep.mubr.msk.bf16.mxu0 %vm6900_vm7, %v12619_v63 }
 0x323   :  { %6157 = vmatpush3.bf16.msra.mxu1 %v6624_v46 }
 0x324   :  { %6214 = vmatprep.subr.bf16.mxu1 %v12619_v63 }
 0x326   :  { %6139 = vmatmul.mubr.msk.bf16.gmra.mxu1 %vm3191_vm8, %v6607_v27  ;;  %v6629_v27 = vld [vmem:[%s11344_s2 + $0xd8] sm:$0xff]  }
 0x327   :  { %6158 = vmatprep.mubr.msk.bf16.mxu1 %vm6900_vm7, %v12619_v63 }
 0x3bf   :  { %v5895_v11 = vpop.f32.mrf.mxu0 }
 0x3c1   :  { %v5896_v0 = vpop.f32.mrf.mxu0 }
 0x3c2   :  { %v5897_v4 = vadd.f32 %v5896_v0, %v5895_v11  ;;  %v6631_v0 = vld [vmem:[%s11344_s2 + $0xd0] sm:$0xff]  }
 0x3c3   :  { %v5898_v44 = vpop.f32.mrf.mxu0 }
 0x3c5   :  { %v5899_v40 = vpop.f32.mrf.mxu0 }
 0x3c6   :  { %v3319_v39 = vpop.f32.mrf.mxu1  ;;  %v5900_v48 = vadd.f32 %v5899_v40, %v5898_v44  ;;  %v6632_v40 = vld [vmem:[%s11344_s2 + $0xa8] sm:$0xff]  }
 0x3c7   :  { %v3320_v41 = vadd.f32 %v5897_v4, %v3319_v39 }
 0x3c8   :  { %v6124_v10 = vpop.f32.mrf.mxu1  ;;  %v5901_v20 = vpop.f32.mrf.mxu0 }
 0x3ca   :  { %v3322_v30 = vpop.f32.mrf.mxu1  ;;  %v5902_v50 = vpop.f32.mrf.mxu0 }
 0x3cb   :  { %v3323_v24 = vadd.f32 %v5900_v48, %v3322_v30  ;;  %v5903_v16 = vadd.f32 %v5902_v50, %v5901_v20 }
 0x3cc   :  { %v6125_v36 = vpop.f32.mrf.mxu1  ;;  %v5904_v53 = vpop.f32.mrf.mxu0 }
 0x3cd   :  { %v10865_v25 = vpack.c.bf16 %v3323_v24, %v3320_v41  ;;  %v6633_v36 = vld [vmem:[%s11344_s2 + $0xc8] sm:$0xff]  }
 0x3ce   :  { %v3327_v14 = vpop.f32.mrf.mxu1  ;;  %v5905_v32 = vpop.f32.mrf.mxu0 }
 0x3cf   :  { %6195 = vmatmul.mubr.bf16.vlgmr.msra.gmra.mxu0 %v10865_v25  ;;  %v5906_v3 = vadd.f32 %v5905_v32, %v5904_v53  ;;  %v3399_v33 = vshll.u32 %v10865_v25, 16  ;;  %v3328_v45 = vadd.f32 %v5903_v16, %v3327_v14  ;;  %v3397_v60 = vshrl.u32 %v10865_v25, 16 }
 0x3d0   :  { %v6128_v9 = vpop.f32.mrf.mxu1  ;;  %v5907_v62 = vpop.f32.mrf.mxu0  ;;  %6198 = vmatprep.mubr.msk.bf16.mxu0 %vm6900_vm7, %v12619_v63  ;;  %6251 = vmatpush3.bf16.msra.mxu0 %v6623_v56  ;;  %v6634_v56 = vld [vmem:[%s11344_s2 + $0xa0] sm:$0xff]  }
 0x3d1   :  { %6252 = vmatprep.subr.bf16.mxu0 %v12619_v63  ;;  %v3401_v13 = vrot.slane %v3399_v33, 1 }
 0x3d2   :  { %v3330_v38 = vpop.f32.mrf.mxu1  ;;  %v5908_v31 = vpop.f32.mrf.mxu0 }
 0x3d3   :  { %v3331_v37 = vadd.f32 %v5906_v3, %v3330_v38  ;;  %v5909_v21 = vadd.f32 %v5908_v31, %v5907_v62  ;;  %v3402_v2 = vor.u32 %v3401_v13, %v3397_v60 }
 0x3d4   :  { %v6129_v59 = vpop.f32.mrf.mxu1  ;;  %v5910_v29 = vpop.f32.mrf.mxu0  ;;  %6253 = vmatpush3.bf16.msra.mxu0 %v6625_v22  ;;  %v6635_v22 = vld [vmem:[%s11344_s2 + $0xc0] sm:$0xff]  }
 0x3d5   :  { %v10878_v26 = vpack.c.bf16 %v3331_v37, %v3328_v45  ;;  %6254 = vmatprep.subr.bf16.mxu0 %v12619_v63  ;;  %v6636_v37 = vld [vmem:[%s11344_s2 + $0x98] sm:$0xff]  }
 0x3d6   :  { %v3335_v57 = vpop.f32.mrf.mxu1  ;;  %v5911_v5 = vpop.f32.mrf.mxu0 }
 0x3d7   :  { %v3404_v43 = vshll.u32 %v10878_v26, 16  ;;  %6199 = vmatmul.mubr.bf16.gmra.mxu0 %v10878_v26  ;;  %v5912_v15 = vadd.f32 %v5911_v5, %v5910_v29  ;;  %v3336_v42 = vadd.f32 %v5909_v21, %v3335_v57  ;;  %v3408_v1 = vshrl.u32 %v10878_v26, 16  ;;  %v6637_v57 = vld [vmem:[%s11344_s2 + $0x90] sm:$0xff]  }
 0x3d8   :  { %v6132_v49 = vpop.f32.mrf.mxu1  ;;  %v5913_v23 = vpop.f32.mrf.mxu0  ;;  %6202 = vmatprep.mubr.msk.bf16.mxu0 %vm6900_vm7, %v12619_v63  ;;  %6255 = vmatpush3.bf16.msra.mxu0 %v6626_v54 }
 0x3d9   :  { %v3406_v19 = vrot.slane %v3404_v43, 1  ;;  %6256 = vmatprep.subr.bf16.mxu0 %v12619_v63  ;;  %v3866_v5 = vrot.slane %v3408_v1, 3  ;;  %v3867_v21 = vrot.slane %v3404_v43, 4  ;;  %v6638_v43 = vld [vmem:[%s11344_s2 + $0x88] sm:$0xff]  }
 0x3da   :  { %v3338_v7 = vpop.f32.mrf.mxu1  ;;  %v5914_v51 = vpop.f32.mrf.mxu0 }
 0x3db   :  { %v3339_v61 = vadd.f32 %v5912_v15, %v3338_v7  ;;  %v3407_v8 = vsel %vm3395_vm9, %v3402_v2, %v3406_v19  ;;  %v5915_v17 = vadd.f32 %v5914_v51, %v5913_v23  ;;  %v3410_v44 = vor.u32 %v3408_v1, %v3406_v19 }
 0x3dc   :  { %v6133_v6 = vpop.f32.mrf.mxu1  ;;  %6159 = vmatmul.mubr.bf16.vlgmr.msra.gmra.mxu1 %v3407_v8  ;;  %v5916_v55 = vpop.f32.mrf.mxu0  ;;  %6257 = vmatpush3.bf16.msra.mxu0 %v6627_v52  ;;  %v3863_v23 = vrot.slane %v3397_v60, 3  ;;  %v3864_v52 = vrot.slane %v3399_v33, 4  ;;  %v3868_v19 = vor.u32 %v3867_v21, %v3866_v5  ;;  %v6639_v33 = vld [vmem:[%s11344_s2 + $0x80] sm:$0xff]  }
 0x3dd   :  { %v10903_v47 = vpack.c.bf16 %v3339_v61, %v3336_v42  ;;  %6162 = vmatprep.mubr.msk.bf16.mxu1 %vm6900_vm7, %v12619_v63  ;;  %6215 = vmatpush3.bf16.msra.mxu1 %v6628_v58 }
 0x3de   :  { %v3343_v34 = vpop.f32.mrf.mxu1  ;;  %v5917_v12 = vpop.f32.mrf.mxu0  ;;  %6258 = vmatprep.subr.bf16.mxu0 %v12619_v63  ;;  %6216 = vmatprep.subr.bf16.mxu1 %v12619_v63  ;;  %v3865_v7 = vor.u32 %v3864_v52, %v3863_v23 }
 0x3df   :  { %6203 = vmatmul.mubr.bf16.gmra.mxu0 %v10903_v47  ;;  %v5918_v35 = vadd.f32 %v5917_v12, %v5916_v55  ;;  %v3412_v28 = vshll.u32 %v10903_v47, 16  ;;  %v3344_v10 = vadd.f32 %v5915_v17, %v3343_v34  ;;  %v3416_v3 = vshrl.u32 %v10903_v47, 16 }
 0x3e0   :  { %v6136_v46 = vpop.f32.mrf.mxu1  ;;  %v5919_v11 = vpop.f32.mrf.mxu0  ;;  %6206 = vmatprep.mubr.msk.bf16.mxu0 %vm6900_vm7, %v12619_v63  ;;  %6259 = vmatpush3.bf16.msra.mxu0 %v6629_v27  ;;  %v3869_v60 = vsel %vm3862_vm10, %v3865_v7, %v3868_v19  ;;  %v3702_v34 = vrot.slane %v10865_v25, 3 }
 0x3e1   :  { %v3414_v39 = vrot.slane %v3412_v28, 1  ;;  %6217 = vmatpush3.bf16.msra.mxu1 %v6630_v18  ;;  %6260 = vmatprep.subr.bf16.mxu0 %v12619_v63  ;;  %v3870_v51 = vrot.slane %v3416_v3, 3  ;;  %v3871_v42 = vrot.slane %v3412_v28, 4  ;;  %v3703_v18 = vrot.slane %v10878_v26, 3 }
 0x3e2   :  { %v3346_v4 = vpop.f32.mrf.mxu1  ;;  %v5920_v48 = vpop.f32.mrf.mxu0  ;;  %6218 = vmatprep.subr.bf16.mxu1 %v12619_v63  ;;  %v3705_v46 = vrot.slane %v10903_v47, 3 }
 0x3e3   :  { %v3347_v20 = vadd.f32 %v5918_v35, %v3346_v4  ;;  %v5921_v30 = vadd.f32 %v5920_v48, %v5919_v11  ;;  %v3415_v50 = vsel %vm3395_vm9, %v3410_v44, %v3414_v39  ;;  %v3418_v31 = vor.u32 %v3416_v3, %v3414_v39  ;;  %v6646_v4 = vld [vmem:[#allocation5 + $0x78] sm:$0xff]  }
 0x3e4   :  { %v6137_v41 = vpop.f32.mrf.mxu1  ;;  %6163 = vmatmul.mubr.bf16.gmra.mxu1 %v3415_v50  ;;  %v5922_v24 = vpop.f32.mrf.mxu0  ;;  %6261 = vmatpush3.bf16.msra.mxu0 %v6631_v0  ;;  %v3872_v8 = vor.u32 %v3871_v42, %v3870_v51  ;;  %v3704_v17 = vsel %vm3207_vm6, %v3702_v34, %v3703_v18  ;;  %v3706_v25 = vsel %vm3207_vm6, %v3703_v18, %v3705_v46  ;;  %v6650_v50 = vld [vmem:[#allocation5 + $0x68] sm:$0xff]  }
 0x3e5   :  { %v10931_v53 = vpack.c.bf16 %v3347_v20, %v3344_v10  ;;  %6166 = vmatprep.mubr.msk.bf16.mxu1 %vm6900_vm7, %v12619_v63  ;;  %6219 = vmatpush3.bf16.msra.mxu1 %v6632_v40  ;;  %v6640_v40 = vld [vmem:[#allocation11] sm:$0xff]   ;;  %v6648_v10 = vld [vmem:[#allocation5 + $0x70] sm:$0xff]  }
 0x3e6   :  { %v3351_v14 = vpop.f32.mrf.mxu1  ;;  %v5923_v32 = vpop.f32.mrf.mxu0  ;;  %6262 = vmatprep.subr.bf16.mxu0 %v12619_v63  ;;  %6220 = vmatprep.subr.bf16.mxu1 %v12619_v63  ;;  %v3873_v6 = vsel %vm3862_vm10, %v3868_v19, %v3872_v8 }
 0x3e7   :  { %v3352_v16 = vadd.f32 %v5921_v30, %v3351_v14  ;;  %6207 = vmatmul.mubr.bf16.gmra.mxu0 %v10931_v53  ;;  %v3420_v9 = vshll.u32 %v10931_v53, 16  ;;  %v3424_v15 = vshrl.u32 %v10931_v53, 16  ;;  %v3707_v0 = vrot.slane %v10931_v53, 3 }
 0x3e8   :  { %v6140_v62 = vpop.f32.mrf.mxu1  ;;  %6210 = vmatprep.mubr.msk.bf16.mxu0 %vm6900_vm7, %v12619_v63  ;;  %6263 = vmatpush3.bf16.msra.mxu0 %v6633_v36  ;;  %v6652_v36 = vld [vmem:[#allocation5 + $0x60] sm:$0xff]  }
 0x3e9   :  { %v10948_v38 = vpack.c.bf16 %v3352_v16, %v3352_v16  ;;  %v3422_v45 = vrot.slane %v3420_v9, 1  ;;  %6221 = vmatpush3.bf16.msra.mxu1 %v6634_v56  ;;  %6264 = vmatprep.subr.bf16.mxu0 %v12619_v63  ;;  %v3874_v55 = vrot.slane %v3424_v15, 3  ;;  %v3875_v27 = vrot.slane %v3420_v9, 4 }
 0x3ea   :  { %v3354_v59 = vpop.f32.mrf.mxu1  ;;  %6222 = vmatprep.subr.bf16.mxu1 %v12619_v63  ;;  %v3708_v47 = vsel %vm3207_vm6, %v3705_v46, %v3707_v0 }
 0x3eb   :  { %v3423_v29 = vsel %vm3395_vm9, %v3418_v31, %v3422_v45  ;;  %v3428_v54 = vshll.u32 %v10948_v38, 16  ;;  %v3426_v2 = vor.u32 %v3424_v15, %v3422_v45  ;;  %v3432_v61 = vshrl.u32 %v10948_v38, 16 }
 0x3ec   :  { %v6141_v13 = vpop.f32.mrf.mxu1  ;;  %6167 = vmatmul.mubr.bf16.gmra.mxu1 %v3423_v29  ;;  %6265 = vmatpush3.bf16.msra.mxu0 %v6635_v22  ;;  %v3876_v12 = vor.u32 %v3875_v27, %v3874_v55  ;;  %v3709_v44 = vrot.slane %v10948_v38, 3 }
 0x3ed   :  { %6170 = vmatprep.mubr.msk.bf16.mxu1 %vm6900_vm7, %v12619_v63  ;;  %6223 = vmatpush3.bf16.msra.mxu1 %v6636_v37  ;;  %v3430_v49 = vrot.slane %v3428_v54, 1  ;;  %v3878_v35 = vrot.slane %v3432_v61, 3  ;;  %v3879_v28 = vrot.slane %v3428_v54, 4 }
 0x3ee   :  { %6224 = vmatprep.subr.bf16.mxu1 %v12619_v63  ;;  %6304 = vmatprep.subr.bf16.mxu0 %v12619_v63  ;;  %v3877_v1 = vsel %vm3862_vm10, %v3872_v8, %v3876_v12  ;;  %v3710_v39 = vsel %vm3207_vm6, %v3707_v0, %v3709_v44 }
 0x3ef   :  { %6211 = vmatmul.mubr.bf16.gmra.mxu0 %v10948_v38  ;;  %v3431_v58 = vsel %vm3395_vm9, %v3426_v2, %v3430_v49  ;;  %v3880_v26 = vor.u32 %v3879_v28, %v3878_v35 }
 0x3f0   :  { %6266 = vmatprep.mubr.msk.bf16.mxu0 %vm6900_vm7, %v12619_v63 }
 0x3f1   :  { %6225 = vmatpush3.bf16.msra.mxu1 %v6637_v57  ;;  %v3881_v11 = vsel %vm3862_vm10, %v3876_v12, %v3880_v26 }
 0x3f2   :  { %6226 = vmatprep.subr.bf16.mxu1 %v12619_v63 }
 0x3f4   :  { %6171 = vmatmul.mubr.bf16.gmra.mxu1 %v3431_v58 }
 0x3f5   :  { %6174 = vmatprep.mubr.msk.bf16.mxu1 %vm6900_vm7, %v12619_v63  ;;  %6227 = vmatpush3.bf16.msra.mxu1 %v6638_v43 }
 0x3f6   :  { %6228 = vmatprep.subr.bf16.mxu1 %v12619_v63 }
 0x3f7   :  { %6267 = vmatmul.mubr.bf16.vlgmr.msra.gmra.mxu0 %v3869_v60 }
 0x3f8   :  { %6270 = vmatprep.mubr.msk.bf16.mxu0 %vm6900_vm7, %v12619_v63  ;;  %6305 = vmatpush3.bf16.msra.mxu0 %v6646_v4 }
 0x3f9   :  { %6229 = vmatpush3.bf16.msra.mxu1 %v6639_v33  ;;  %6306 = vmatprep.subr.bf16.mxu0 %v12619_v63 }
 0x3fc   :  { %6175 = vmatmul.mubr.bf16.gmra.mxu1 %v3432_v61  ;;  %6307 = vmatpush3.bf16.msra.mxu0 %v6648_v10 }
 0x3fd   :  { %6230 = vmatprep.mubr.msk.bf16.mxu1 %vm6900_vm7, %v12619_v63  ;;  %6308 = vmatprep.subr.bf16.mxu0 %v12619_v63 }
 0x3ff   :  { %6271 = vmatmul.mubr.bf16.gmra.mxu0 %v3873_v6 }
 0x400   :  { %6274 = vmatprep.mubr.msk.bf16.mxu0 %vm6900_vm7, %v12619_v63  ;;  %6309 = vmatpush3.bf16.msra.mxu0 %v6650_v50 }
 0x401   :  { %6310 = vmatprep.subr.bf16.mxu0 %v12619_v63 }
 0x404   :  { %6231 = vmatmul.mubr.bf16.vlgmr.msra.gmra.mxu1 %v3704_v17  ;;  %6311 = vmatpush3.bf16.msra.mxu0 %v6652_v36 }
 0x405   :  { %6234 = vmatprep.mubr.msk.bf16.mxu1 %vm6900_vm7, %v12619_v63  ;;  %6312 = vmatprep.subr.bf16.mxu0 %v12619_v63 }
 0x407   :  { %6275 = vmatmul.mubr.bf16.gmra.mxu0 %v3877_v1 }
 0x408   :  { %6278 = vmatprep.mubr.msk.bf16.mxu0 %vm6900_vm7, %v12619_v63 }
 0x40c   :  { %6235 = vmatmul.mubr.bf16.gmra.mxu1 %v3706_v25 }
 0x40d   :  { %6238 = vmatprep.mubr.msk.bf16.mxu1 %vm6900_vm7, %v12619_v63 }
 0x40f   :  { %6279 = vmatmul.mubr.bf16.gmra.mxu0 %v3881_v11 }
 0x410   :  { %6282 = vmatprep.mubr.msk.bf16.mxu0 %vm6900_vm7, %v12619_v63 }
 0x414   :  { %6239 = vmatmul.mubr.bf16.gmra.mxu1 %v3708_v47 }
 0x415   :  { %6242 = vmatprep.mubr.msk.bf16.mxu1 %vm6900_vm7, %v12619_v63 }
 0x417   :  { %6283 = vmatmul.mubr.bf16.gmra.mxu0 %v3878_v35 }
 0x418   :  { %6320 = vmatprep.mubr.msk.bf16.mxu0 %vm6900_vm7, %v12619_v63 }
 0x41c   :  { %6243 = vmatmul.mubr.bf16.gmra.mxu1 %v3710_v39  ;;  %v12776_v39 = vld [vmem:[#allocation19_spill] sm:$0xff] }
 0x41d   :  { %6246 = vmatprep.mubr.msk.bf16.mxu1 %vm6900_vm7, %v12619_v63 }
 0x424   :  { %6247 = vmatmul.mubr.bf16.gmra.mxu1 %v3709_v44  ;;  %v11042_v44 = vld [vmem:[#allocation10] sm:$0xff] }
 0x425   :  { %6296 = vmatprep.mubr.msk.bf16.mxu1 %vm4068_vm11, %v6640_v40  ;;  %v12777_v40 = vsub.s32 1, %v12776_v39 }
 0x427   :  { %v11047_v4 = vrot.slane %v11042_v44, %v12777_v40 }
 0x48f   :  { %v3641_v48 = vpop.f32.mrf.mxu0 }
 0x491   :  { %v6196_v20 = vpop.f32.mrf.mxu0 }
 0x493   :  { %v3644_v30 = vpop.f32.mrf.mxu0 }
 0x495   :  { %v6197_v41 = vpop.f32.mrf.mxu0 }
 0x497   :  { %v3649_v24 = vpop.f32.mrf.mxu0 }
 0x499   :  { %v6200_v53 = vpop.f32.mrf.mxu0 }
 0x49b   :  { %v3652_v56 = vpop.f32.mrf.mxu0 }
 0x49c   :  { %v3521_v14 = vpop.f32.mrf.mxu1 }
 0x49d   :  { %v3642_v32 = vadd.f32 %v3641_v48, %v3521_v14  ;;  %v6201_v16 = vpop.f32.mrf.mxu0 }
 0x49e   :  { %v6160_v3 = vpop.f32.mrf.mxu1 }
 0x49f   :  { %v11026_v9 = vpop.f32.mrf.mxu0 }
 0x4a0   :  { %v3524_v62 = vpop.f32.mrf.mxu1 }
 0x4a1   :  { %v3645_v22 = vadd.f32 %v3644_v30, %v3524_v62  ;;  %v6204_v38 = vpop.f32.mrf.mxu0 }
 0x4a2   :  { %v6161_v31 = vpop.f32.mrf.mxu1 }
 0x4a3   :  { %v11028_v45 = vpop.f32.mrf.mxu0 }
 0x4a4   :  { %v3529_v37 = vpop.f32.mrf.mxu1 }
 0x4a5   :  { %v3650_v59 = vadd.f32 %v3649_v24, %v3529_v37  ;;  %v6205_v29 = vpop.f32.mrf.mxu0 }
 0x4a6   :  { %v6164_v54 = vpop.f32.mrf.mxu1 }
 0x4a7   :  { %v11030_v13 = vpop.f32.mrf.mxu0 }
 0x4a8   :  { %v3532_v57 = vpop.f32.mrf.mxu1 }
 0x4a9   :  { %v3653_v5 = vadd.f32 %v3652_v56, %v3532_v57  ;;  %v6208_v21 = vpop.f32.mrf.mxu0 }
 0x4aa   :  { %v6165_v15 = vpop.f32.mrf.mxu1 }
 0x4ab   :  { %v11032_v49 = vpop.f32.mrf.mxu0 }
 0x4ac   :  { %v3537_v23 = vpop.f32.mrf.mxu1 }
 0x4ad   :  { %v6209_v52 = vpop.f32.mrf.mxu0  ;;  %v3658_v21 = vadd.f32 %v11026_v9, %v3537_v23 }
 0x4ae   :  { %v6168_v2 = vpop.f32.mrf.mxu1 }
 0x4af   :  { %v11034_v43 = vpop.f32.mrf.mxu0 }
 0x4b0   :  { %v3540_v19 = vpop.f32.mrf.mxu1 }
 0x4b1   :  { %v6212_v58 = vpop.f32.mrf.mxu0 }
 0x4b2   :  { %v6169_v7 = vpop.f32.mrf.mxu1 }
 0x4b3   :  { %v3676_v33 = vpop.f32.mrf.mxu0 }
 0x4b4   :  { %v11036_v60 = vpop.f32.mrf.mxu1 }
 0x4b5   :  { %v6213_v51 = vpop.f32.mrf.mxu0 }
 0x4b6   :  { %v6172_v42 = vpop.f32.mrf.mxu1 }
 0x4b7   :  { %v3969_v61 = vpop.f32.mrf.mxu0  ;;  %v3661_v42 = vadd.f32 %v11028_v45, %v3540_v19 }
 0x4b8   :  { %v11038_v8 = vpop.f32.mrf.mxu1 }
 0x4b9   :  { %v6268_v6 = vpop.f32.mrf.mxu0  ;;  %v3669_v45 = vadd.f32 %v11032_v49, %v11038_v8 }
 0x4ba   :  { %v6173_v55 = vpop.f32.mrf.mxu1 }
 0x4bb   :  { %v3972_v27 = vpop.f32.mrf.mxu0 }
 0x4bc   :  { %v11040_v18 = vpop.f32.mrf.mxu1 }
 0x4bd   :  { %v6269_v34 = vpop.f32.mrf.mxu0 }
 0x4be   :  { %v6176_v12 = vpop.f32.mrf.mxu1 }
 0x4bf   :  { %v3977_v17 = vpop.f32.mrf.mxu0 }
 0x4c0   :  { %v3556_v35 = vpop.f32.mrf.mxu1 }
 0x4c1   :  { %v6272_v1 = vpop.f32.mrf.mxu0 }
 0x4c2   :  { %v6177_v28 = vpop.f32.mrf.mxu1 }
 0x4c3   :  { %v3980_v46 = vpop.f32.mrf.mxu0 }
 0x4c4   :  { %v3798_v26 = vpop.f32.mrf.mxu1 }
 0x4c5   :  { %v3836_v25 = vadd.f32 %v3798_v26, %v3642_v32  ;;  %v6273_v11 = vpop.f32.mrf.mxu0 }
 0x4c6   :  { %v6232_v0 = vpop.f32.mrf.mxu1 }
 0x4c7   :  { %v4007_v47 = vadd.f32 %v3969_v61, %v3836_v25  ;;  %v3985_v48 = vpop.f32.mrf.mxu0 }
 0x4c8   :  { %v3801_v10 = vpop.f32.mrf.mxu1 }
 0x4c9   :  { %v3837_v20 = vadd.f32 %v3801_v10, %v3645_v22  ;;  %v6276_v30 = vpop.f32.mrf.mxu0  ;;  %v4020_v41 = vadd.f32 %v11047_v4, %v4007_v47  ;;  %v3666_v47 = vadd.f32 %v11030_v13, %v11036_v60 }
 0x4ca   :  { %v6233_v50 = vpop.f32.mrf.mxu1 }
 0x4cb   :  { %v4008_v24 = vadd.f32 %v3972_v27, %v3837_v20  ;;  %v3988_v36 = vpop.f32.mrf.mxu0  ;;  %v4029_v3 = vmax.f32 %v4020_v41, 0.0  ;;  %v3674_v20 = vadd.f32 %v11034_v43, %v11040_v18 }
 0x4cc   :  { %v3806_v53 = vpop.f32.mrf.mxu1 }
 0x4cd   :  { %v4021_v56 = vadd.f32 %v11047_v4, %v4008_v24  ;;  %v3838_v14 = vadd.f32 %v3806_v53, %v3650_v59  ;;  %v6277_v32 = vpop.f32.mrf.mxu0 }
 0x4ce   :  { %v6236_v16 = vpop.f32.mrf.mxu1 }
 0x4cf   :  { %v4030_v62 = vmax.f32 %v4021_v56, 0.0  ;;  %v4009_v38 = vadd.f32 %v3977_v17, %v3838_v14  ;;  %v3993_v31 = vpop.f32.mrf.mxu0  ;;  %v12778_v16 = vmov 0  }
 0x4d0   :  { %v3809_v37 = vpop.f32.mrf.mxu1 }
 0x4d1   :  { %v3839_v29 = vadd.f32 %v3809_v37, %v3653_v5  ;;  %v6280_v54 = vpop.f32.mrf.mxu0  ;;  %v11051_v22 = vpack.c.bf16 %v4030_v62, %v4029_v3  ;;  %v4022_v15 = vadd.f32 %v11047_v4, %v4009_v38  ;;  %v4082_v3 = vsel %vm1406_vm3, 65535, %v12778_v16 }
 0x4d2   :  { %v6237_v57 = vpop.f32.mrf.mxu1  ;;  %v6645_v54 = vld [vmem:[#allocation5 + $0x30] sm:$0xff]  }
 0x4d3   :  { %v4010_v52 = vadd.f32 %v3980_v46, %v3839_v29  ;;  %v3996_v2 = vpop.f32.mrf.mxu0  ;;  %v4031_v61 = vmax.f32 %v4022_v15, 0.0  ;;  %v6644_v29 = vld [vmem:[#allocation5 + $0x38] sm:$0xff]   ;;  %v6643_v57 = vld [vmem:[#allocation11 + $0x18] ss:$0 sps:$4 sm:$0x11]  }
 0x4d4   :  { %v3814_v58 = vpop.f32.mrf.mxu1  ;;  %v6651_v15 = vld [vmem:[#allocation5 + $0x18] sm:$0xff]  }
 0x4d5   :  { %v4023_v59 = vadd.f32 %v11047_v4, %v4010_v52  ;;  %v3840_v7 = vadd.f32 %v3814_v58, %v3658_v21  ;;  %v6281_v33 = vpop.f32.mrf.mxu0  ;;  %v6647_v21 = vld [vmem:[#allocation5 + $0x28] sm:$0xff]   ;;  %v6653_v52 = vld [vmem:[#allocation5 + $0x10] sm:$0xff]  }
 0x4d6   :  { %v6240_v51 = vpop.f32.mrf.mxu1  ;;  %v6655_v58 = vld [vmem:[#allocation5 + $0x8] sm:$0xff]  }
 0x4d7   :  { %v4032_v5 = vmax.f32 %v4023_v59, 0.0  ;;  %v4011_v6 = vadd.f32 %v3985_v48, %v3840_v7  ;;  %v4001_v55 = vpop.f32.mrf.mxu0  ;;  %v6656_v59 = vld [vmem:[#allocation5 + $0x50] sm:$0xff]   ;;  %v6657_v7 = vld [vmem:[#allocation5] sm:$0xff]   ;;  %v6658_v33 = vld [vmem:[#allocation5 + $0x48] sm:$0xff]  }
 0x4d8   :  { %v3817_v27 = vpop.f32.mrf.mxu1  ;;  %v6660_v51 = vld [vmem:[#allocation5 + $0x40] sm:$0xff]  }
 0x4d9   :  { %v3841_v34 = vadd.f32 %v3817_v27, %v3661_v42  ;;  %v6284_v12 = vpop.f32.mrf.mxu0  ;;  %v4046_v9 = vpack.c.bf16 %v4032_v5, %v4031_v61  ;;  %v4024_v17 = vadd.f32 %v11047_v4, %v4011_v6  ;;  %v6659_v27 = vld [vmem:[#allocation5 + $0xf8] sm:$0xff]  }
 0x4da   :  { %v6241_v23 = vpop.f32.mrf.mxu1 }
 0x4db   :  { %v4012_v35 = vadd.f32 %v3988_v36, %v3841_v34  ;;  %v4004_v1 = vpop.f32.mrf.mxu0  ;;  %v4033_v19 = vmax.f32 %v4024_v17, 0.0 }
 0x4dc   :  { %v3822_v28 = vpop.f32.mrf.mxu1 }
 0x4dd   :  { %v4025_v46 = vadd.f32 %v11047_v4, %v4012_v35  ;;  %v6285_v26 = vpop.f32.mrf.mxu0  ;;  %v3842_v30 = vadd.f32 %v3822_v28, %v3666_v47  ;;  %v6661_v35 = vld [vmem:[#allocation5 + $0xf0] sm:$0xff]  }
 0x4de   :  { %v6244_v25 = vpop.f32.mrf.mxu1 }
 0x4df   :  { %v4034_v11 = vmax.f32 %v4025_v46, 0.0  ;;  %v4013_v53 = vadd.f32 %v3993_v31, %v3842_v30  ;;  %v6642_v31 = vld [vmem:[#allocation11 + $0x10] sm:$0xff]  }
 0x4e0   :  { %v3825_v0 = vpop.f32.mrf.mxu1 }
 0x4e1   :  { %v3843_v40 = vadd.f32 %v3825_v0, %v3669_v45  ;;  %v4047_v48 = vpack.c.bf16 %v4034_v11, %v4033_v19  ;;  %v4026_v13 = vadd.f32 %v11047_v4, %v4013_v53  ;;  %v6662_v45 = vld [vmem:[#allocation5 + $0xb8] sm:$0xff]   ;;  %v6663_v11 = vld [vmem:[#allocation5 + $0xe8] sm:$0xff]   ;;  %v6668_v53 = vld [vmem:[#allocation5 + $0xa0] sm:$0xff]  }
 0x4e2   :  { %v6245_v10 = vpop.f32.mrf.mxu1 }
 0x4e3   :  { %v4014_v41 = vadd.f32 %v3996_v2, %v3843_v40  ;;  %v4035_v62 = vmax.f32 %v4026_v13, 0.0  ;;  %v6654_v2 = vld [vmem:[#allocation5 + $0x58] sm:$0xff]   ;;  %v6664_v40 = vld [vmem:[#allocation5 + $0xb0] sm:$0xff]   ;;  %v6665_v10 = vld [vmem:[#allocation5 + $0xe0] sm:$0xff]  }
 0x4e4   :  { %v3830_v50 = vpop.f32.mrf.mxu1  ;;  %6313 = vmatpush3.bf16.msra.mxu0 %v6654_v2  ;;  %v6672_v13 = vld [vmem:[#allocation5 + $0x90] sm:$0xff]  }
 0x4e5   :  { %v3844_v24 = vadd.f32 %v3830_v50, %v3674_v20  ;;  %v4027_v8 = vadd.f32 %v11047_v4, %v4014_v41  ;;  %6314 = vmatprep.subr.bf16.mxu0 %v12619_v63  ;;  %v6666_v41 = vld [vmem:[#allocation5 + $0xa8] sm:$0xff]  }
 0x4e6   :  { %v6248_v36 = vpop.f32.mrf.mxu1 }
 0x4e7   :  { %v4015_v56 = vadd.f32 %v4001_v55, %v3844_v24  ;;  %v4036_v43 = vmax.f32 %v4027_v8, 0.0  ;;  %v6667_v24 = vld [vmem:[#allocation5 + $0xd8] sm:$0xff]  }
 0x4e8   :  { %v3833_v49 = vpop.f32.mrf.mxu1  ;;  %6315 = vmatpush3.bf16.msra.mxu0 %v6656_v59  ;;  %v6670_v8 = vld [vmem:[#allocation5 + $0x98] sm:$0xff]  }
 0x4e9   :  { %v4028_v14 = vadd.f32 %v11047_v4, %v4015_v56  ;;  %v4048_v37 = vpack.c.bf16 %v4036_v43, %v4035_v62  ;;  %v6641_v4 = vld [vmem:[#allocation11 + $0x8] sm:$0xff]   ;;  %6316 = vmatprep.subr.bf16.mxu0 %v12619_v63 }
 0x4ea   :  { %v6249_v32 = vpop.f32.mrf.mxu1  ;;  %v6669_v56 = vld [vmem:[#allocation5 + $0xd0] sm:$0xff]  }
 0x4eb   :  { %v4037_v60 = vmax.f32 %v4028_v14, 0.0  ;;  %v6671_v32 = vld [vmem:[#allocation5 + $0xc8] sm:$0xff]  }
 0x4ec   :  { %6317 = vmatpush3.bf16.msra.mxu0 %v6658_v33 }
 0x4ed   :  { %v4049_v18 = vpack.c.bf16 %v4037_v60, %v4037_v60  ;;  %6318 = vmatprep.subr.bf16.mxu0 %v12619_v63  ;;  %v6673_v60 = vld [vmem:[#allocation5 + $0xc0] sm:$0xff]  }
 0x4ef   :  { %v4084_v38 = vand.u32 %v4082_v3, %v4049_v18  ;;  %v6674_v3 = vld [vmem:[#allocation5 + $0x88] sm:$0xff]  }
 0x4f0   :  { %6319 = vmatpush3.bf16.msra.mxu0 %v6660_v51 }
 0x4f1   :  { %6286 = vmatprep.subr.bf16.mxu1 %v4084_v38  ;;  %6360 = vmatprep.subr.bf16.mxu0 %v12619_v63 }
 0x4f2   :  { %6287 = vmatpush3.bf16.msra.mxu1 %v4084_v38 }
 0x4f3   :  { %6288 = vmatprep.subr.bf16.mxu1 %v4048_v37 }
 0x4f6   :  { %6289 = vmatpush3.bf16.msra.mxu1 %v4048_v37 }
 0x4f7   :  { %6290 = vmatprep.subr.bf16.mxu1 %v4047_v48 }
 0x4fa   :  { %6291 = vmatpush3.bf16.msra.mxu1 %v4047_v48 }
 0x4fb   :  { %6292 = vmatprep.subr.bf16.mxu1 %v4046_v9 }
 0x4fe   :  { %6293 = vmatpush3.bf16.msra.mxu1 %v4046_v9 }
 0x4ff   :  { %6294 = vmatprep.subr.bf16.mxu1 %v11051_v22 }
 0x502   :  { %6295 = vmatpush3.bf16.msra.mxu1 %v11051_v22  ;;  %v6649_v22 = vld [vmem:[#allocation5 + $0x20] sm:$0xff]  }
 0x503   :  { %6332 = vmatprep.subr.bf16.mxu1 %v12619_v63 }
 0x505   :  { %6297 = vmatmul.mubr.msk.bf16.vlgmr.msra.gmra.mxu1 %vm4068_vm11, %v6641_v4 }
 0x506   :  { %6300 = vmatprep.mubr.msk.bf16.mxu1 %vm4068_vm11, %v6642_v31  ;;  %6333 = vmatpush3.bf16.msra.mxu1 %v6644_v29  ;;  %v6675_v31 = vld [vmem:[#allocation5 + $0x80] sm:$0xff]  }
 0x507   :  { %6334 = vmatprep.subr.bf16.mxu1 %v12619_v63 }
 0x50a   :  { %6335 = vmatpush3.bf16.msra.mxu1 %v6645_v54 }
 0x50b   :  { %6336 = vmatprep.subr.bf16.mxu1 %v12619_v63 }
 0x50d   :  { %6301 = vmatmul.mubr.msk.bf16.gmra.mxu1 %vm4068_vm11, %v6643_v57 }
 0x50e   :  { %6337 = vmatpush3.bf16.msra.mxu1 %v6647_v21  ;;  %6348 = vmatprep.mubr.msk.bf16.mxu1 %vm6900_vm7, %v12619_v63 }
 0x50f   :  { %6338 = vmatprep.subr.bf16.mxu1 %v12619_v63 }
 0x512   :  { %6339 = vmatpush3.bf16.msra.mxu1 %v6649_v22 }
 0x513   :  { %6340 = vmatprep.subr.bf16.mxu1 %v12619_v63 }
 0x516   :  { %6341 = vmatpush3.bf16.msra.mxu1 %v6651_v15 }
 0x517   :  { %6342 = vmatprep.subr.bf16.mxu1 %v12619_v63 }
 0x51a   :  { %6343 = vmatpush3.bf16.msra.mxu1 %v6653_v52 }
 0x51b   :  { %6344 = vmatprep.subr.bf16.mxu1 %v12619_v63 }
 0x51e   :  { %6345 = vmatpush3.bf16.msra.mxu1 %v6655_v58 }
 0x51f   :  { %6346 = vmatprep.subr.bf16.mxu1 %v12619_v63 }
 0x522   :  { %6347 = vmatpush3.bf16.msra.mxu1 %v6657_v7 }
 0x523   :  { %6388 = vmatprep.subr.bf16.mxu1 %v12619_v63 }
 0x5c5   :  { %v6298_v42 = vpop.f32.mrf.mxu1 }
 0x5c7   :  { %v4120_v61 = vpop.f32.mrf.mxu1 }
 0x5c9   :  { %v6299_v5 = vpop.f32.mrf.mxu1 }
 0x5ca   :  { %v11090_v6 = vpack.c.bf16 %v6299_v5, %v6298_v42  ;;  %v6676_v5 = vld [vmem:[#allocation7 + $0x38] sm:$0xff]  }
 0x5cb   :  { %v4123_v55 = vpop.f32.mrf.mxu1 }
 0x5cc   :  { %v11092_v34 = vpack.c.bf16 %v4123_v55, %v4120_v61  ;;  %v4194_v9 = vshll.u32 %v11090_v6, 16  ;;  %v4198_v20 = vshrl.u32 %v11090_v6, 16  ;;  %v4593_v43 = vrot.slane %v11090_v6, 3  ;;  %v6679_v55 = vld [vmem:[#allocation7 + $0x28] sm:$0xff]  }
 0x5cd   :  { %v11094_v12 = vpop.f32.mrf.mxu1 }
 0x5ce   :  { %v4189_v23 = vshll.u32 %v11092_v34, 16  ;;  %6349 = vmatmul.mubr.bf16.vlgmr.msra.gmra.mxu1 %v11092_v34  ;;  %v4187_v1 = vshrl.u32 %v11092_v34, 16  ;;  %v4196_v25 = vrot.slane %v4194_v9, 1  ;;  %v4592_v16 = vrot.slane %v11092_v34, 3  ;;  %v6683_v34 = vld [vmem:[#allocation7 + $0x18] sm:$0xff]  }
 0x5cf   :  { %6389 = vmatpush3.bf16.msra.mxu1 %v6659_v27  ;;  %v4136_v17 = vpop.f32.mrf.mxu1  ;;  %6352 = vmatprep.mubr.msk.bf16.mxu1 %vm6900_vm7, %v12619_v63  ;;  %v4445_v37 = vrot.slane %v4194_v9, 3  ;;  %v4444_v4 = vrot.slane %v4198_v20, 2  ;;  %v4422_v52 = vpack.c.bf16 %v11094_v12, %v11094_v12  ;;  %v6681_v27 = vld [vmem:[#allocation7 + $0x20] sm:$0xff]   ;;  %v6685_v12 = vld [vmem:[#allocation7 + $0x10] sm:$0xff]   ;;  %v6687_v9 = vld [vmem:[#allocation7 + $0x8] sm:$0xff]  }
 0x5d0   :  { %v4191_v28 = vrot.slane %v4189_v23, 1  ;;  %6390 = vmatprep.subr.bf16.mxu1 %v12619_v63  ;;  %v4200_v50 = vor.u32 %v4198_v20, %v4196_v25  ;;  %v4441_v18 = vrot.slane %v4187_v1, 2  ;;  %v4442_v62 = vrot.slane %v4189_v23, 3  ;;  %v6689_v23 = vld [vmem:[#allocation7] sm:$0xff]  }
 0x5d1   :  { %v6303_v46 = vpop.f32.mrf.mxu1  ;;  %v4594_v38 = vsel %vm3207_vm6, %v4592_v16, %v4593_v43  ;;  %v4446_v57 = vor.u32 %v4445_v37, %v4444_v4  ;;  %v4597_v59 = vrot.slane %v4422_v52, 3  ;;  %v4453_v7 = vshll.u32 %v4422_v52, 16 }
 0x5d2   :  { %v4192_v26 = vor.u32 %v4191_v28, %v4187_v1  ;;  %v4443_v29 = vor.u32 %v4442_v62, %v4441_v18 }
 0x5d3   :  { %6391 = vmatpush3.bf16.msra.mxu1 %v6661_v35  ;;  %v4139_v19 = vpop.f32.mrf.mxu1  ;;  %v4455_v42 = vrot.slane %v4453_v7, 3 }
 0x5d4   :  { %v11109_v0 = vpack.c.bf16 %v4139_v19, %v4136_v17  ;;  %v4197_v47 = vsel %vm3395_vm9, %v4192_v26, %v4196_v25  ;;  %6392 = vmatprep.subr.bf16.mxu1 %v12619_v63  ;;  %v4447_v22 = vsel %vm4440_vm12, %v4443_v29, %v4446_v57 }
 0x5d5   :  { %6321 = vmatmul.mubr.bf16.vlgmr.msra.gmra.mxu0 %v4197_v47 }
 0x5d6   :  { %6361 = vmatpush3.bf16.msra.mxu0 %v6662_v45  ;;  %6353 = vmatmul.mubr.bf16.gmra.mxu1 %v11090_v6  ;;  %v4202_v48 = vshll.u32 %v11109_v0, 16  ;;  %v4206_v49 = vshrl.u32 %v11109_v0, 16  ;;  %v4595_v54 = vrot.slane %v11109_v0, 3  ;;  %v6677_v6 = vld [vmem:[#allocation7 + $0x30] sm:$0xff]  }
 0x5d7   :  { %6393 = vmatpush3.bf16.msra.mxu1 %v6663_v11  ;;  %6362 = vmatprep.subr.bf16.mxu0 %v12619_v63 }
 0x5d8   :  { %6394 = vmatprep.subr.bf16.mxu1 %v12619_v63  ;;  %6324 = vmatprep.mubr.msk.bf16.mxu0 %vm6900_vm7, %v12619_v63  ;;  %v4204_v30 = vrot.slane %v4202_v48, 1  ;;  %v4448_v21 = vrot.slane %v4206_v49, 2  ;;  %v4449_v15 = vrot.slane %v4202_v48, 3  ;;  %v4596_v2 = vsel %vm3207_vm6, %v4593_v43, %v4595_v54 }
 0x5d9   :  { %6356 = vmatprep.mubr.msk.bf16.mxu1 %vm6900_vm7, %v12619_v63  ;;  %v4598_v51 = vsel %vm3207_vm6, %v4595_v54, %v4597_v59 }
 0x5da   :  { %6363 = vmatpush3.bf16.msra.mxu0 %v6664_v40  ;;  %v4205_v36 = vsel %vm3395_vm9, %v4200_v50, %v4204_v30  ;;  %v4208_v14 = vor.u32 %v4206_v49, %v4204_v30  ;;  %v4450_v58 = vor.u32 %v4449_v15, %v4448_v21 }
 0x5db   :  { %6395 = vmatpush3.bf16.msra.mxu1 %v6665_v10  ;;  %6364 = vmatprep.subr.bf16.mxu0 %v12619_v63 }
 0x5dc   :  { %6396 = vmatprep.subr.bf16.mxu1 %v12619_v63  ;;  %v4451_v33 = vsel %vm4440_vm12, %v4446_v57, %v4450_v58  ;;  %v4456_v61 = vsel %vm4440_vm12, %v4450_v58, %v4455_v42 }
 0x5dd   :  { %6325 = vmatmul.mubr.bf16.gmra.mxu0 %v4205_v36 }
 0x5de   :  { %6365 = vmatpush3.bf16.msra.mxu0 %v6666_v41  ;;  %6357 = vmatmul.mubr.bf16.gmra.mxu1 %v11109_v0 }
 0x5df   :  { %6397 = vmatpush3.bf16.msra.mxu1 %v6667_v24  ;;  %6366 = vmatprep.subr.bf16.mxu0 %v12619_v63 }
 0x5e0   :  { %6398 = vmatprep.subr.bf16.mxu1 %v12619_v63  ;;  %6328 = vmatprep.mubr.msk.bf16.mxu0 %vm6900_vm7, %v12619_v63 }
 0x5e1   :  { %6404 = vmatprep.mubr.msk.bf16.mxu1 %vm6900_vm7, %v12619_v63 }
 0x5e2   :  { %6367 = vmatpush3.bf16.msra.mxu0 %v6668_v53 }
 0x5e3   :  { %6399 = vmatpush3.bf16.msra.mxu1 %v6669_v56  ;;  %6368 = vmatprep.subr.bf16.mxu0 %v12619_v63 }
 0x5e4   :  { %6400 = vmatprep.subr.bf16.mxu1 %v12619_v63 }
 0x5e5   :  { %6329 = vmatmul.mubr.bf16.gmra.mxu0 %v4208_v14 }
 0x5e6   :  { %6369 = vmatpush3.bf16.msra.mxu0 %v6670_v8  ;;  %6376 = vmatprep.mubr.msk.bf16.mxu0 %vm6900_vm7, %v12619_v63 }
 0x5e7   :  { %6401 = vmatpush3.bf16.msra.mxu1 %v6671_v32  ;;  %6370 = vmatprep.subr.bf16.mxu0 %v12619_v63 }
 0x5e8   :  { %6402 = vmatprep.subr.bf16.mxu1 %v12619_v63 }
 0x5ea   :  { %6371 = vmatpush3.bf16.msra.mxu0 %v6672_v13 }
 0x5eb   :  { %6403 = vmatpush3.bf16.msra.mxu1 %v6673_v60  ;;  %6372 = vmatprep.subr.bf16.mxu0 %v12619_v63 }
 0x5ec   :  { %6446 = vmatprep.subr.bf16.mxu1 %v12619_v63 }
 0x5ee   :  { %6373 = vmatpush3.bf16.msra.mxu0 %v6674_v3  ;;  %6405 = vmatmul.mubr.bf16.vlgmr.msra.gmra.mxu1 %v4594_v38 }
 0x5ef   :  { %6374 = vmatprep.subr.bf16.mxu0 %v12619_v63  ;;  %6408 = vmatprep.mubr.msk.bf16.mxu1 %vm6900_vm7, %v12619_v63 }
 0x5f0   :  { %6447 = vmatpush3.bf16.msra.mxu1 %v6676_v5 }
 0x5f1   :  { %6448 = vmatprep.subr.bf16.mxu1 %v12619_v63 }
 0x5f2   :  { %6375 = vmatpush3.bf16.msra.mxu0 %v6675_v31 }
 0x5f3   :  { %6416 = vmatprep.subr.bf16.mxu0 %v12619_v63 }
 0x5f4   :  { %6449 = vmatpush3.bf16.msra.mxu1 %v6677_v6  ;;  %v12779_v6 = vsub.s32 2, %v12776_v39 }
 0x5f5   :  { %6377 = vmatmul.mubr.bf16.vlgmr.msra.gmra.mxu0 %v4447_v22  ;;  %6450 = vmatprep.subr.bf16.mxu1 %v12619_v63 }
 0x5f6   :  { %6409 = vmatmul.mubr.bf16.gmra.mxu1 %v4596_v2  ;;  %6380 = vmatprep.mubr.msk.bf16.mxu0 %vm6900_vm7, %v12619_v63 }
 0x5f7   :  { %6412 = vmatprep.mubr.msk.bf16.mxu1 %vm6900_vm7, %v12619_v63 }
 0x5f8   :  { %6451 = vmatpush3.bf16.msra.mxu1 %v6679_v55  ;;  %v4716_v55 = vrot.slane %v11042_v44, %v12779_v6 }
 0x5f9   :  { %6452 = vmatprep.subr.bf16.mxu1 %v12619_v63 }
 0x5fc   :  { %6453 = vmatpush3.bf16.msra.mxu1 %v6681_v27 }
 0x5fd   :  { %6381 = vmatmul.mubr.bf16.gmra.mxu0 %v4451_v33  ;;  %6454 = vmatprep.subr.bf16.mxu1 %v12619_v63 }
 0x5fe   :  { %6413 = vmatmul.mubr.bf16.gmra.mxu1 %v4598_v51  ;;  %6384 = vmatprep.mubr.msk.bf16.mxu0 %vm6900_vm7, %v12619_v63 }
 0x5ff   :  { %6462 = vmatprep.mubr.msk.bf16.mxu1 %vm6900_vm7, %v12619_v63 }
 0x600   :  { %6455 = vmatpush3.bf16.msra.mxu1 %v6683_v34 }
 0x601   :  { %6456 = vmatprep.subr.bf16.mxu1 %v12619_v63 }
 0x604   :  { %6457 = vmatpush3.bf16.msra.mxu1 %v6685_v12 }
 0x605   :  { %6385 = vmatmul.mubr.bf16.gmra.mxu0 %v4456_v61  ;;  %6458 = vmatprep.subr.bf16.mxu1 %v12619_v63 }
 0x606   :  { %6422 = vmatprep.mubr.msk.bf16.mxu0 %vm6900_vm7, %v12619_v63 }
 0x608   :  { %6459 = vmatpush3.bf16.msra.mxu1 %v6687_v9 }
 0x609   :  { %6460 = vmatprep.subr.bf16.mxu1 %v12619_v63 }
 0x60c   :  { %6461 = vmatpush3.bf16.msra.mxu1 %v6689_v23 }
 0x60d   :  { %6486 = vmatprep.subr.bf16.mxu1 %v12619_v63 }
 0x68e   :  { %v4399_v17 = vpop.f32.mrf.mxu1 }
 0x690   :  { %v6350_v35 = vpop.f32.mrf.mxu1 }
 0x692   :  { %v4402_v1 = vpop.f32.mrf.mxu1 }
 0x694   :  { %v6351_v28 = vpop.f32.mrf.mxu1 }
 0x695   :  { %v4294_v46 = vpop.f32.mrf.mxu0 }
 0x696   :  { %v4407_v26 = vpop.f32.mrf.mxu1  ;;  %v4400_v59 = vadd.f32 %v4399_v17, %v4294_v46 }
 0x697   :  { %v6322_v25 = vpop.f32.mrf.mxu0 }
 0x698   :  { %v6354_v45 = vpop.f32.mrf.mxu1 }
 0x699   :  { %v4297_v19 = vpop.f32.mrf.mxu0 }
 0x69a   :  { %v4410_v11 = vpop.f32.mrf.mxu1  ;;  %v4403_v22 = vadd.f32 %v4402_v1, %v4297_v19 }
 0x69b   :  { %v6323_v0 = vpop.f32.mrf.mxu0 }
 0x69c   :  { %v6355_v47 = vpop.f32.mrf.mxu1 }
 0x69d   :  { %v4302_v40 = vpop.f32.mrf.mxu0 }
 0x69e   :  { %v4415_v48 = vpop.f32.mrf.mxu1  ;;  %v4408_v29 = vadd.f32 %v4407_v26, %v4302_v40 }
 0x69f   :  { %v6326_v10 = vpop.f32.mrf.mxu0 }
 0x6a0   :  { %v6358_v20 = vpop.f32.mrf.mxu1 }
 0x6a1   :  { %v4305_v30 = vpop.f32.mrf.mxu0 }
 0x6a2   :  { %v4418_v50 = vpop.f32.mrf.mxu1  ;;  %v4411_v57 = vadd.f32 %v4410_v11, %v4305_v30 }
 0x6a3   :  { %v6327_v41 = vpop.f32.mrf.mxu0 }
 0x6a4   :  { %v6359_v24 = vpop.f32.mrf.mxu1 }
 0x6a5   :  { %v4310_v36 = vpop.f32.mrf.mxu0 }
 0x6a6   :  { %v4416_v51 = vadd.f32 %v4415_v48, %v4310_v36 }
 0x6a7   :  { %v6330_v53 = vpop.f32.mrf.mxu0 }
 0x6a9   :  { %v4313_v56 = vpop.f32.mrf.mxu0 }
 0x6aa   :  { %v4419_v1 = vadd.f32 %v4418_v50, %v4313_v56 }
 0x6ab   :  { %v6331_v49 = vpop.f32.mrf.mxu0 }
 0x6ae   :  { %v4684_v8 = vpop.f32.mrf.mxu1 }
 0x6b0   :  { %v6406_v14 = vpop.f32.mrf.mxu1 }
 0x6b2   :  { %v4687_v32 = vpop.f32.mrf.mxu1 }
 0x6b4   :  { %v6407_v13 = vpop.f32.mrf.mxu1 }
 0x6b5   :  { %v4542_v60 = vpop.f32.mrf.mxu0 }
 0x6b6   :  { %v4692_v16 = vpop.f32.mrf.mxu1  ;;  %v4565_v5 = vadd.f32 %v4542_v60, %v4400_v59 }
 0x6b7   :  { %v6378_v3 = vpop.f32.mrf.mxu0 }
 0x6b8   :  { %v6410_v43 = vpop.f32.mrf.mxu1  ;;  %v4707_v26 = vadd.f32 %v4684_v8, %v4565_v5 }
 0x6b9   :  { %v4545_v18 = vpop.f32.mrf.mxu0 }
 0x6ba   :  { %v4695_v62 = vpop.f32.mrf.mxu1  ;;  %v4566_v7 = vadd.f32 %v4545_v18, %v4403_v22  ;;  %v4717_v48 = vadd.f32 %v4716_v55, %v4707_v26  ;;  %v6692_v26 = vld [vmem:[#allocation7 + $0x40] sm:$0xff]  }
 0x6bb   :  { %v6379_v38 = vpop.f32.mrf.mxu0 }
 0x6bc   :  { %v6411_v37 = vpop.f32.mrf.mxu1  ;;  %v4708_v9 = vadd.f32 %v4687_v32, %v4566_v7  ;;  %v4723_v36 = vmax.f32 %v4717_v48, 0.0  ;;  %v6694_v48 = vld [vmem:[#allocation7 + $0xb8] sm:$0xff]  }
 0x6bd   :  { %v4550_v4 = vpop.f32.mrf.mxu0 }
 0x6be   :  { %v4700_v31 = vpop.f32.mrf.mxu1  ;;  %v4567_v15 = vadd.f32 %v4550_v4, %v4408_v29  ;;  %v4718_v19 = vadd.f32 %v4716_v55, %v4708_v9  ;;  %v4734_v60 = vrot.slane %v4723_v36, 1  ;;  %v6682_v9 = vld [vmem:[#allocation7 + $0x68] sm:$0xff]  }
 0x6bf   :  { %v6382_v54 = vpop.f32.mrf.mxu0 }
 0x6c0   :  { %v6414_v21 = vpop.f32.mrf.mxu1  ;;  %v4709_v27 = vadd.f32 %v4692_v16, %v4567_v15  ;;  %v4724_v30 = vmax.f32 %v4718_v19, 0.0 }
 0x6c1   :  { %v4553_v52 = vpop.f32.mrf.mxu0 }
 0x6c2   :  { %v4568_v2 = vadd.f32 %v4553_v52, %v4411_v57  ;;  %v4703_v58 = vpop.f32.mrf.mxu1  ;;  %v4719_v17 = vadd.f32 %v4716_v55, %v4709_v27  ;;  %v4735_v49 = vrot.slane %v4724_v30, 1  ;;  %v4787_v27 = vld [vmem:[%s11353_s11] sm:$0xf] }
 0x6c3   :  { %v6383_v33 = vpop.f32.mrf.mxu0 }
 0x6c4   :  { %v4710_v42 = vadd.f32 %v4695_v62, %v4568_v2  ;;  %v6415_v61 = vpop.f32.mrf.mxu1  ;;  %v4725_v44 = vmax.f32 %v4719_v17, 0.0  ;;  %v4736_v62 = vsel %vm554_vm0, %v4734_v60, %v4735_v49  ;;  %v6706_v60 = vld [vmem:[#allocation7 + $0x88] sm:$0xff]  }
 0x6c5   :  { %v4558_v34 = vpop.f32.mrf.mxu0  ;;  %v4748_v22 = vmax.f32 %v4723_v36, %v4736_v62  ;;  %v6699_v36 = vld [vmem:[#allocation7 + $0xd8] sm:$0xff]   ;;  %v6709_v62 = vld [vmem:[%s11347_s5 + $0x30] sm:$0xff]  }
 0x6c6   :  { %v4569_v12 = vadd.f32 %v4558_v34, %v4416_v51  ;;  %v4720_v23 = vadd.f32 %v4716_v55, %v4710_v42  ;;  %v4737_v50 = vrot.slane %v4725_v44, 1  ;;  %v6678_v34 = vld [vmem:[#allocation7 + $0x78] sm:$0xff]  }
 0x6c7   :  { %v6386_v35 = vpop.f32.mrf.mxu0  ;;  %v4766_v7 = vrot.slane %v4748_v22, 5 }
 0x6c8   :  { %v4711_v28 = vadd.f32 %v4700_v31, %v4569_v12  ;;  %v4726_v11 = vmax.f32 %v4720_v23, 0.0  ;;  %v4738_v16 = vsel %vm554_vm0, %v4735_v49, %v4737_v50  ;;  %v6680_v12 = vld [vmem:[#allocation7 + $0x70] sm:$0xff]   ;;  %v6684_v23 = vld [vmem:[#allocation7 + $0x60] sm:$0xff]   ;;  %v6686_v35 = vld [vmem:[#allocation7 + $0x58] sm:$0xff]  }
 0x6c9   :  { %v4561_v46 = vpop.f32.mrf.mxu0  ;;  %v4749_v31 = vmax.f32 %v4724_v30, %v4738_v16  ;;  %v6696_v30 = vld [vmem:[#allocation7 + $0xb0] sm:$0xff]   ;;  %v6703_v49 = vld [vmem:[#allocation7 + $0xc8] sm:$0xff]  }
 0x6ca   :  { %v4721_v25 = vadd.f32 %v4716_v55, %v4711_v28  ;;  %v4570_v45 = vadd.f32 %v4561_v46, %v4419_v1  ;;  %v4739_v41 = vrot.slane %v4726_v11, 1  ;;  %v6688_v1 = vld [vmem:[#allocation7 + $0x50] sm:$0xff]   ;;  %v6690_v28 = vld [vmem:[#allocation7 + $0x48] sm:$0xff]   ;;  %v6691_v46 = vld [vmem:[#allocation7 + $0xf8] sm:$0xff]  }
 0x6cb   :  { %v6387_v0 = vpop.f32.mrf.mxu0  ;;  %v4767_v2 = vrot.slane %v4749_v31, 5 }
 0x6cc   :  { %v4727_v47 = vmax.f32 %v4721_v25, 0.0  ;;  %v4712_v40 = vadd.f32 %v4703_v58, %v4570_v45  ;;  %v4740_v8 = vsel %vm554_vm0, %v4737_v50, %v4739_v41  ;;  %v6700_v50 = vld [vmem:[#allocation7 + $0xa0] sm:$0xff]  }
 0x6cd   :  { %v4750_v18 = vmax.f32 %v4725_v44, %v4740_v8  ;;  %v4768_v42 = vsel %vm2069_vm5, %v4766_v7, %v4767_v2  ;;  %v6704_v8 = vld [vmem:[#allocation7 + $0x90] sm:$0xff]  }
 0x6ce   :  { %v4741_v10 = vrot.slane %v4727_v47, 1  ;;  %v4722_v20 = vadd.f32 %v4716_v55, %v4712_v40  ;;  %v4782_v6 = vmax.f32 %v4748_v22, %v4768_v42 }
 0x6cf   :  { %v4769_v57 = vrot.slane %v4750_v18, 5 }
 0x6d0   :  { %v4728_v24 = vmax.f32 %v4722_v20, 0.0  ;;  %v4742_v53 = vsel %vm554_vm0, %v4739_v41, %v4741_v10  ;;  %v4752_v37 = vmax.f32 %v4727_v47, %v4741_v10  ;;  %v6695_v20 = vld [vmem:[#allocation7 + $0xe8] sm:$0xff]   ;;  %v6697_v41 = vld [vmem:[#allocation7 + $0xe0] sm:$0xff]  }
 0x6d1   :  { %v4751_v13 = vmax.f32 %v4726_v11, %v4742_v53  ;;  %v4770_v33 = vsel %vm2069_vm5, %v4767_v2, %v4769_v57  ;;  %v6693_v11 = vld [vmem:[#allocation7 + $0xf0] sm:$0xff]  }
 0x6d2   :  { %v4754_v56 = vrot.slane %v4728_v24, 1  ;;  %v4783_v5 = vmax.f32 %v4749_v31, %v4770_v33  ;;  %v6701_v53 = vld [vmem:[#allocation7 + $0xd0] sm:$0xff]   ;;  %v6713_v31 = vld [vmem:[%s11347_s5 + $0x10] sm:$0xff]  }
 0x6d3   :  { %v4771_v4 = vrot.slane %v4751_v13, 5 }
 0x6d4   :  { %v4755_v14 = vsel %vm554_vm0, %v4741_v10, %v4754_v56  ;;  %v4759_v32 = vmax.f32 %v4728_v24, %v4754_v56  ;;  %v4788_v55 = vpack.c.bf16 %v4783_v5, %v4782_v6  ;;  %v6698_v24 = vld [vmem:[#allocation7 + $0xa8] sm:$0xff]   ;;  %v6702_v56 = vld [vmem:[#allocation7 + $0x98] sm:$0xff]   ;;  %v11272_v6 = vld [vmem:[#allocation10] sm:$0xff] }
 0x6d5   :  { %v4758_v3 = vmax.f32 %v4727_v47, %v4755_v14  ;;  %v4772_v52 = vsel %vm2069_vm5, %v4769_v57, %v4771_v4  ;;  %v6705_v14 = vld [vmem:[#allocation7 + $0xc0] sm:$0xff]  }
 0x6d6   :  { %v4775_v43 = vrot.slane %v4759_v32, 5  ;;  %v4784_v51 = vmax.f32 %v4750_v18, %v4772_v52  ;;  %v6708_v18 = vld [vmem:[%s11347_s5 + $0x38] sm:$0xff]  }
 0x6d7   :  { %v4773_v38 = vrot.slane %v4758_v3, 5  ;;  %v6707_v3 = vld [vmem:[#allocation7 + $0x80] sm:$0xff]  }
 0x6d9   :  { %v4776_v29 = vsel %vm2069_vm5, %v4773_v38, %v4775_v43  ;;  %v4774_v21 = vsel %vm2069_vm5, %v4771_v4, %v4773_v38  ;;  %v6710_v38 = vld [vmem:[%s11347_s5 + $0x28] sm:$0xff]   ;;  %v6712_v4 = vld [vmem:[%s11347_s5 + $0x18] sm:$0xff]  }
 0x6da   :  { %v4786_v54 = vmax.f32 %v4752_v37, %v4776_v29  ;;  %v4785_v58 = vmax.f32 %v4751_v13, %v4774_v21  ;;  %v6711_v37 = vld [vmem:[%s11347_s5 + $0x20] sm:$0xff]   ;;  %v6714_v29 = vld [vmem:[%s11347_s5 + $0x8] sm:$0xff]  }
 0x6dc   :  { %v4790_v15 = vpack.c.bf16 %v4786_v54, %v4786_v54  ;;  %v4789_v61 = vpack.c.bf16 %v4785_v58, %v4784_v51 }
 0x6de   :  { %v4796_v59 = vsel %vm2069_vm5, %v4790_v15, 0 }
 0x6df   :  { %6417 = vmatpush3.bf16.msra.mxu0 %v4796_v59 }
 0x6e0   :  { %6418 = vmatprep.subr.bf16.mxu0 %v12619_v63 }
 0x6e3   :  { %6419 = vmatpush3.bf16.msra.mxu0 %v4789_v61 }
 0x6e4   :  { %6420 = vmatprep.subr.bf16.mxu0 %v12619_v63 }
 0x6e7   :  { %6421 = vmatpush3.bf16.msra.mxu0 %v4788_v55  ;;  %v12780_v55 = vsub.s32 3, %v12776_v39 }
 0x6e8   :  { %6426 = vmatprep.subr.bf16.mxu0 %v12619_v63 }
 0x6ea   :  { %6423 = vmatmul.mubr.msk.bf16.vlgmr.msra.gmra.mxu0 %vm4791_vm13, %v4787_v27  ;;  %v5278_v27 = vrot.slane %v11272_v6, %v12780_v55 }
 0x6eb   :  { %6427 = vmatpush3.bf16.msra.mxu0 %v6678_v34  ;;  %6442 = vmatprep.mubr.msk.bf16.mxu0 %vm6900_vm7, %v12619_v63 }
 0x6ec   :  { %6428 = vmatprep.subr.bf16.mxu0 %v12619_v63 }
 0x6ef   :  { %6429 = vmatpush3.bf16.msra.mxu0 %v6680_v12 }
 0x6f0   :  { %6430 = vmatprep.subr.bf16.mxu0 %v12619_v63 }
 0x6f3   :  { %6431 = vmatpush3.bf16.msra.mxu0 %v6682_v9 }
 0x6f4   :  { %6432 = vmatprep.subr.bf16.mxu0 %v12619_v63 }
 0x6f7   :  { %6433 = vmatpush3.bf16.msra.mxu0 %v6684_v23  ;;  %v12781_v23 = vmov 65535  }
 0x6f8   :  { %6434 = vmatprep.subr.bf16.mxu0 %v12619_v63 }
 0x6fb   :  { %6435 = vmatpush3.bf16.msra.mxu0 %v6686_v35  ;;  %v5287_v35 = vsel %vm1119_vm2, 4294967295, %v12781_v23 }
 0x6fc   :  { %6436 = vmatprep.subr.bf16.mxu0 %v12619_v63 }
 0x6ff   :  { %6437 = vmatpush3.bf16.msra.mxu0 %v6688_v1 }
 0x700   :  { %6438 = vmatprep.subr.bf16.mxu0 %v12619_v63 }
 0x703   :  { %6439 = vmatpush3.bf16.msra.mxu0 %v6690_v28 }
 0x704   :  { %6440 = vmatprep.subr.bf16.mxu0 %v12619_v63 }
 0x707   :  { %6441 = vmatpush3.bf16.msra.mxu0 %v6692_v26 }
 0x708   :  { %6466 = vmatprep.subr.bf16.mxu0 %v12619_v63 }
 0x7aa   :  { %v4832_v17 = vpop.f32.mrf.mxu0 }
 0x7ab   :  { %v11214_v25 = vpack.c.bf16 %v4832_v17, %v4832_v17  ;;  %v5288_v17 = vsel %vm2069_vm5, %v5287_v35, 0 }
 0x7ac   :  { %v6424_v45 = vpop.f32.mrf.mxu0 }
 0x7ad   :  { %v4875_v19 = vshll.u32 %v11214_v25, 16  ;;  %6463 = vmatmul.mubr.bf16.vlgmr.msra.gmra.mxu1 %v11214_v25  ;;  %v4873_v47 = vshrl.u32 %v11214_v25, 16  ;;  %v5074_v43 = vrot.slane %v11214_v25, 1  ;;  %v5281_v45 = vld [vmem:[%s11354_s12] sm:$0x1] }
 0x7ae   :  { %6487 = vmatpush3.bf16.msra.mxu1 %v6691_v46  ;;  %v4835_v0 = vpop.f32.mrf.mxu0  ;;  %6502 = vmatprep.mubr.msk.bf16.mxu1 %vm6900_vm7, %v12619_v63 }
 0x7af   :  { %6488 = vmatprep.subr.bf16.mxu1 %v12619_v63  ;;  %v4877_v40 = vrot.slane %v4875_v19, 1  ;;  %v5182_v32 = vrot.slane %v4873_v47, 1  ;;  %v5183_v13 = vrot.slane %v4875_v19, 2  ;;  %v6715_v19 = vld [vmem:[%s11347_s5] sm:$0xff]   ;;  %v6717_v0 = vld [vmem:[%s11348_s6 + $0x30] sm:$0xff]  }
 0x7b0   :  { %v6425_v44 = vpop.f32.mrf.mxu0 }
 0x7b1   :  { %v4878_v10 = vor.u32 %v4877_v40, %v4873_v47  ;;  %v5184_v16 = vor.u32 %v5183_v13, %v5182_v32  ;;  %v6718_v47 = vld [vmem:[%s11348_s6 + $0x28] sm:$0xff]   ;;  %v6719_v40 = vld [vmem:[%s11348_s6 + $0x20] sm:$0xff]   ;;  %v6721_v44 = vld [vmem:[%s11348_s6 + $0x10] sm:$0xff]   ;;  %v12782_v13 = vsub.s32 4, %v12776_v39 }
 0x7b2   :  { %6489 = vmatpush3.bf16.msra.mxu1 %v6693_v11  ;;  %v6716_v11 = vld [vmem:[%s11348_s6 + $0x38] sm:$0xff]   ;;  %v6729_v32 = vld [vmem:[#allocation8 + $0x10] sm:$0xff]  }
 0x7b3   :  { %6443 = vmatmul.mubr.bf16.vlgmr.msra.gmra.mxu0 %v4878_v10  ;;  %6490 = vmatprep.subr.bf16.mxu1 %v12619_v63 }
 0x7b4   :  { %6467 = vmatpush3.bf16.msra.mxu0 %v6694_v48  ;;  %6482 = vmatprep.mubr.msk.bf16.mxu0 %vm6900_vm7, %v12619_v63  ;;  %v6720_v48 = vld [vmem:[%s11348_s6 + $0x18] sm:$0xff]  }
 0x7b5   :  { %6468 = vmatprep.subr.bf16.mxu0 %v12619_v63 }
 0x7b6   :  { %6491 = vmatpush3.bf16.msra.mxu1 %v6695_v20 }
 0x7b7   :  { %6492 = vmatprep.subr.bf16.mxu1 %v12619_v63 }
 0x7b8   :  { %6469 = vmatpush3.bf16.msra.mxu0 %v6696_v30 }
 0x7b9   :  { %6470 = vmatprep.subr.bf16.mxu0 %v12619_v63 }
 0x7ba   :  { %6493 = vmatpush3.bf16.msra.mxu1 %v6697_v41 }
 0x7bb   :  { %6494 = vmatprep.subr.bf16.mxu1 %v12619_v63 }
 0x7bc   :  { %6471 = vmatpush3.bf16.msra.mxu0 %v6698_v24 }
 0x7bd   :  { %6472 = vmatprep.subr.bf16.mxu0 %v12619_v63 }
 0x7be   :  { %6495 = vmatpush3.bf16.msra.mxu1 %v6699_v36  ;;  %v6722_v36 = vld [vmem:[%s11348_s6 + $0x8] sm:$0xff]  }
 0x7bf   :  { %6496 = vmatprep.subr.bf16.mxu1 %v12619_v63 }
 0x7c0   :  { %6473 = vmatpush3.bf16.msra.mxu0 %v6700_v50  ;;  %v6723_v50 = vld [vmem:[%s11348_s6] sm:$0xff]   ;;  %s6901_s6 = smov [#allocation13]  }
 0x7c1   :  { %6474 = vmatprep.subr.bf16.mxu0 %v12619_v63  ;;  %s5668_s28 = sshll.u32 %s6901_s6, 4  ;;  %s5669_s28 = int_to_ptr.vmem [resolvable:$true] %s5668_s28 }
 0x7c2   :  { %6497 = vmatpush3.bf16.msra.mxu1 %v6701_v53  ;;  %v6724_v53 = vld [vmem:[#allocation8 + $0x38] sm:$0xff]   ;;  %s6857_s9 = scalar_lea.vmem %s5669_s28, 32  ;;  %p6862_p3 = scmp.lt.s32.totalorder %s5669_s28, %s5669_s28 }
 0x7c3   :  { %6498 = vmatprep.subr.bf16.mxu1 %v12619_v63  ;;  %p6858_p2 = scmp.ne.s32.totalorder %s5669_s28, %s6857_s9  ;;  %p6863_p4 = scmp.lt.s32.totalorder %s6857_s9, %s6857_s9 }
 0x7c4   :  { %6475 = vmatpush3.bf16.msra.mxu0 %v6702_v56  ;;  %v6725_v56 = vld [vmem:[#allocation8 + $0x30] sm:$0xff]  }
 0x7c5   :  { %6476 = vmatprep.subr.bf16.mxu0 %v12619_v63  ;;  %p6864_p5 = por %p6863_p4, %p6862_p3 }
 0x7c6   :  { %6499 = vmatpush3.bf16.msra.mxu1 %v6703_v49  ;;  %v6726_v49 = vld [vmem:[#allocation8 + $0x28] sm:$0xff]  }
 0x7c7   :  { %6500 = vmatprep.subr.bf16.mxu1 %v12619_v63  ;;  %p6865_p6 = pnand %p6864_p5, %p6858_p2 }
 0x7c8   :  { %6477 = vmatpush3.bf16.msra.mxu0 %v6704_v8  ;;  %v6727_v8 = vld [vmem:[#allocation8 + $0x20] sm:$0xff]  }
 0x7c9   :  { %6478 = vmatprep.subr.bf16.mxu0 %v12619_v63 }
 0x7ca   :  { %6501 = vmatpush3.bf16.msra.mxu1 %v6705_v14  ;;  %v6728_v14 = vld [vmem:[#allocation8 + $0x18] sm:$0xff]  }
 0x7cb   :  { %6512 = vmatprep.subr.bf16.mxu1 %v12619_v63 }
 0x7cc   :  { %6479 = vmatpush3.bf16.msra.mxu0 %v6706_v60  ;;  %v5352_v60 = vrot.slane %v11272_v6, %v12782_v13 }
 0x7cd   :  { %6503 = vmatmul.mubr.bf16.vlgmr.msra.gmra.mxu1 %v5184_v16  ;;  %6480 = vmatprep.subr.bf16.mxu0 %v12619_v63 }
 0x7ce   :  { %6528 = vmatprep.mubr.msk.bf16.mxu1 %vm6900_vm7, %v12619_v63  ;;  %6513 = vmatpush3.bf16.msra.mxu1 %v6708_v18 }
 0x7cf   :  { %6514 = vmatprep.subr.bf16.mxu1 %v12619_v63 }
 0x7d0   :  { %6481 = vmatpush3.bf16.msra.mxu0 %v6707_v3 }
 0x7d1   :  { %6506 = vmatprep.subr.bf16.mxu0 %v12619_v63 }
 0x7d2   :  { %6515 = vmatpush3.bf16.msra.mxu1 %v6709_v62 }
 0x7d3   :  { %6483 = vmatmul.mubr.bf16.vlgmr.msra.gmra.mxu0 %v5074_v43  ;;  %6516 = vmatprep.subr.bf16.mxu1 %v12619_v63 }
 0x7d4   :  { %6508 = vmatprep.mubr.msk.bf16.mxu0 %vm6900_vm7, %v12619_v63 }
 0x7d6   :  { %6517 = vmatpush3.bf16.msra.mxu1 %v6710_v38 }
 0x7d7   :  { %6518 = vmatprep.subr.bf16.mxu1 %v12619_v63 }
 0x7da   :  { %6519 = vmatpush3.bf16.msra.mxu1 %v6711_v37 }
 0x7db   :  { %6520 = vmatprep.subr.bf16.mxu1 %v12619_v63 }
 0x7de   :  { %6521 = vmatpush3.bf16.msra.mxu1 %v6712_v4  ;;  %v6730_v4 = vld [vmem:[#allocation8 + $0x8] sm:$0xff]  }
 0x7df   :  { %6522 = vmatprep.subr.bf16.mxu1 %v12619_v63 }
 0x7e2   :  { %6523 = vmatpush3.bf16.msra.mxu1 %v6713_v31  ;;  %v6731_v31 = vld [vmem:[#allocation8] sm:$0xff]  }
 0x7e3   :  { %6524 = vmatprep.subr.bf16.mxu1 %v12619_v63 }
 0x7e6   :  { %6525 = vmatpush3.bf16.msra.mxu1 %v6714_v29  ;;  %v12783_v29 = vsub.s32 5, %v12776_v39 }
 0x7e7   :  { %6526 = vmatprep.subr.bf16.mxu1 %v12619_v63 }
 0x7ea   :  { %6527 = vmatpush3.bf16.msra.mxu1 %v6715_v19 }
 0x7eb   :  { %6552 = vmatprep.subr.bf16.mxu1 %v12619_v63 }
 0x86d   :  { %v5050_v54 = vpop.f32.mrf.mxu1 }
 0x86f   :  { %v6464_v57 = vpop.f32.mrf.mxu1 }
 0x871   :  { %v5053_v21 = vpop.f32.mrf.mxu1 }
 0x873   :  { %v4962_v22 = vpop.f32.mrf.mxu0  ;;  %v6465_v15 = vpop.f32.mrf.mxu1 }
 0x874   :  { %v5051_v51 = vadd.f32 %v5050_v54, %v4962_v22  ;;  %v5462_v54 = vrot.slane %v11272_v6, %v12783_v29 }
 0x875   :  { %v6444_v52 = vpop.f32.mrf.mxu0 }
 0x877   :  { %v4965_v2 = vpop.f32.mrf.mxu0 }
 0x879   :  { %v6445_v58 = vpop.f32.mrf.mxu0 }
 0x88d   :  { %v5268_v59 = vpop.f32.mrf.mxu1 }
 0x88f   :  { %v6504_v7 = vpop.f32.mrf.mxu1 }
 0x891   :  { %v5271_v33 = vpop.f32.mrf.mxu1 }
 0x893   :  { %v5158_v42 = vpop.f32.mrf.mxu0  ;;  %v6505_v61 = vpop.f32.mrf.mxu1 }
 0x894   :  { %v5164_v5 = vadd.f32 %v5158_v42, %v5051_v51 }
 0x895   :  { %v6484_v34 = vpop.f32.mrf.mxu0 }
 0x896   :  { %v5274_v12 = vadd.f32 %v5268_v59, %v5164_v5  ;;  %v12784_v59 = vsub.s32 6, %v12776_v39 }
 0x897   :  { %v5161_v9 = vpop.f32.mrf.mxu0 }
 0x898   :  { %v5279_v1 = vadd.f32 %v5278_v27, %v5274_v12  ;;  %v5572_v7 = vrot.slane %v11272_v6, %v12784_v59 }
 0x899   :  { %v6485_v28 = vpop.f32.mrf.mxu0 }
 0x89a   :  { %v5280_v26 = vmax.f32 %v5279_v1, 0.0 }
 0x89c   :  { %v5282_v46 = vpack.c.bf16 %v5280_v26, %v5280_v26 }
 0x89e   :  { %v5290_v25 = vand.u32 %v5288_v17, %v5282_v46 }
 0x8a0   :  { %6507 = vmatpush3.bf16.msra.mxu0 %v5290_v25 }
 0x8a1   :  { %6532 = vmatprep.subr.bf16.mxu0 %v12619_v63 }
 0x8a3   :  { %6509 = vmatmul.mubr.msk.bf16.vlgmr.msra.gmra.mxu0 %vm5283_vm14, %v5281_v45 }
 0x8a4   :  { %6548 = vmatprep.mubr.msk.bf16.mxu0 %vm6900_vm7, %v12619_v63  ;;  %6533 = vmatpush3.bf16.msra.mxu0 %v6716_v11 }
 0x8a5   :  { %6534 = vmatprep.subr.bf16.mxu0 %v12619_v63 }
 0x8a8   :  { %6535 = vmatpush3.bf16.msra.mxu0 %v6717_v0 }
 0x8a9   :  { %6536 = vmatprep.subr.bf16.mxu0 %v12619_v63 }
 0x8ac   :  { %6537 = vmatpush3.bf16.msra.mxu0 %v6718_v47 }
 0x8ad   :  { %6538 = vmatprep.subr.bf16.mxu0 %v12619_v63 }
 0x8b0   :  { %6539 = vmatpush3.bf16.msra.mxu0 %v6719_v40 }
 0x8b1   :  { %6540 = vmatprep.subr.bf16.mxu0 %v12619_v63 }
 0x8b4   :  { %6541 = vmatpush3.bf16.msra.mxu0 %v6720_v48 }
 0x8b5   :  { %6542 = vmatprep.subr.bf16.mxu0 %v12619_v63 }
 0x8b8   :  { %6543 = vmatpush3.bf16.msra.mxu0 %v6721_v44 }
 0x8b9   :  { %6544 = vmatprep.subr.bf16.mxu0 %v12619_v63 }
 0x8bc   :  { %6545 = vmatpush3.bf16.msra.mxu0 %v6722_v36 }
 0x8bd   :  { %6546 = vmatprep.subr.bf16.mxu0 %v12619_v63 }
 0x8c0   :  { %6547 = vmatpush3.bf16.msra.mxu0 %v6723_v50 }
 0x963   :  { %v5326_v10 = vpop.f32.mrf.mxu0 }
 0x964   :  { %v5332_v20 = vpack.c.bf16 %v5326_v10, %v5326_v10 }
 0x965   :  { %v6510_v30 = vpop.f32.mrf.mxu0 }
 0x966   :  { %6529 = vmatmul.mubr.bf16.vlgmr.msra.gmra.mxu1 %v5332_v20 }
 0x967   :  { %v5329_v41 = vpop.f32.mrf.mxu0  ;;  %6568 = vmatprep.mubr.msk.bf16.mxu1 %vm6900_vm7, %v12619_v63  ;;  %6553 = vmatpush3.bf16.msra.mxu1 %v6724_v53 }
 0x968   :  { %6554 = vmatprep.subr.bf16.mxu1 %v12619_v63 }
 0x969   :  { %v6511_v24 = vpop.f32.mrf.mxu0 }
 0x96b   :  { %6555 = vmatpush3.bf16.msra.mxu1 %v6725_v56 }
 0x96c   :  { %6556 = vmatprep.subr.bf16.mxu1 %v12619_v63 }
 0x96f   :  { %6557 = vmatpush3.bf16.msra.mxu1 %v6726_v49 }
 0x970   :  { %6558 = vmatprep.subr.bf16.mxu1 %v12619_v63 }
 0x973   :  { %6559 = vmatpush3.bf16.msra.mxu1 %v6727_v8 }
 0x974   :  { %6560 = vmatprep.subr.bf16.mxu1 %v12619_v63 }
 0x977   :  { %6561 = vmatpush3.bf16.msra.mxu1 %v6728_v14 }
 0x978   :  { %6562 = vmatprep.subr.bf16.mxu1 %v12619_v63 }
 0x97b   :  { %6563 = vmatpush3.bf16.msra.mxu1 %v6729_v32 }
 0x97c   :  { %6564 = vmatprep.subr.bf16.mxu1 %v12619_v63 }
 0x97f   :  { %6565 = vmatpush3.bf16.msra.mxu1 %v6730_v4 }
 0x980   :  { %6566 = vmatprep.subr.bf16.mxu1 %v12619_v63 }
 0x983   :  { %6567 = vmatpush3.bf16.msra.mxu1 %v6731_v31 }
 0xa26   :  { %v5435_v16 = vpop.f32.mrf.mxu1 }
 0xa27   :  { %v5436_v3 = vadd.f32 %v5435_v16, %v5352_v60 }
 0xa28   :  { %v6530_v43 = vpop.f32.mrf.mxu1 }
 0xa29   :  { %v5441_v18 = vmax.f32 %v5436_v3, 0.0 }
 0xa2a   :  { %v5438_v62 = vpop.f32.mrf.mxu1 }
 0xa2b   :  { %v5442_v38 = vpack.c.bf16 %v5441_v18, %v5441_v18 }
 0xa2c   :  { %v6531_v37 = vpop.f32.mrf.mxu1 }
 0xa2d   :  { %6549 = vmatmul.mubr.bf16.vlgmr.msra.gmra.mxu0 %v5442_v38 }
 0xaed   :  { %v5545_v57 = vpop.f32.mrf.mxu0 }
 0xaee   :  { %v5546_v21 = vadd.f32 %v5545_v57, %v5462_v54 }
 0xaef   :  { %v6550_v22 = vpop.f32.mrf.mxu0 }
 0xaf0   :  { %v5551_v15 = vmax.f32 %v5546_v21, 0.0 }
 0xaf1   :  { %v5548_v52 = vpop.f32.mrf.mxu0 }
 0xaf2   :  { %v5552_v2 = vpack.c.bf16 %v5551_v15, %v5551_v15 }
 0xaf3   :  { %v6551_v58 = vpop.f32.mrf.mxu0 }
 0xaf4   :  { %6569 = vmatmul.mubr.bf16.vlgmr.msra.gmra.mxu1 %v5552_v2 }
 0xbb4   :  { %v5655_v63 = vpop.f32.mrf.mxu1 }
 0xbb5   :  { %v5656_v33 = vadd.f32 %v5655_v63, %v5572_v7 }
 0xbb6   :  { %v6570_v51 = vpop.f32.mrf.mxu1 }
 0xbb7   :  { %5661 = vst [vmem:[#allocation13] sm:$0x3] %v5656_v33 }
 0xbb8   :  { %v5658_v42 = vpop.f32.mrf.mxu1 }
 0xbb9   :  { %6868 = shalt.err (!%p6865_p6)
}
 0xbba   :  { %5671 = dma.vmem_to_hbm [thread:$0]  %s5669_s28, 32, %s11355_s13, [#allocation4]   ;;  %v6571_v39 = vpop.f32.mrf.mxu1 }
 0xbbb   :  { %6885 = dma.done.wait [#allocation4], 32  }
 0xbbc   :  { %6886 = vsyncadd [#allocation4], 4294967264 }
 0xbbd   :  { %5675 = vsyncpa [#allocation3], 1 }
 0xbbe   :  { %5676 = vsyncpa [#allocation6], 1 }
 0xbbf   :  { %5677 = vsyncpa [#allocation9], 1 }
 0xbc0   :  { %5678 = vsyncpa [#allocation12], 1 }
 0xbc1   :  { %5679 = vsyncpa [#allocation4], 1 }

</bundles_post_ra>
